<compile_context>
chip_gen: v7x
topology: tpu7x:2x2x1
jax: 0.10.0
libtpu: 0.0.40
codegen_flags: <defaults>
</compile_context>

<pallas_src>
import functools

import jax
import jax.numpy as jnp
import numpy as np
from jax.experimental import pallas as pl
from jax.experimental.pallas import tpu as pltpu

EPS = 1e-5


# ----------------------------------------------------------------------------
# Fused forward kernel (single grid point, everything resident in VMEM)
# ----------------------------------------------------------------------------
def fused_forward_kernel(x_ref, biases_ref, bd1_ref, bd2_ref,
                         w3_ref, s3e_ref, s3o_ref,
                         w4_ref, s4e_ref, s4o_ref,
                         wf1_ref, wf2_ref, wf3_ref,
                         o_ref, *, N, S, C):
    f32 = jnp.float32
    Ch = C // 2
    C2 = 2 * C
    D = H = W = S
    Do = Ho = Wo = S - 2          # after first 3x3x3 VALID conv
    Dp = Hp = Wp = Do // 2        # after first MaxPool3d(2)
    D2 = H2 = W2 = Dp - 2         # after second 3x3x3 VALID conv
    D3 = H3 = W3 = D2 // 2        # after second MaxPool3d(2)

    def mm(a, b):
        return jnp.dot(a, b, preferred_element_type=f32)

    # --- Stage 1: BN0 + Conv1(1x1) + BN1 + ReLU + Conv2(1x1) + BN2 + ReLU ----
    # x: (N*D*H, W*C) lane-dense; BN folded into block-diagonal bd1 / bd2.
    x = x_ref[...]
    b1 = biases_ref[0:1, :W * Ch]
    b2 = biases_ref[1:2, :W * Ch]
    h = jnp.maximum(mm(x, bd1_ref[...]) + b1, 0.0)        # (N*D*H, W*Ch)
    h = jnp.maximum(mm(h, bd2_ref[...]) + b2, 0.0)        # (N*D*H, W*Ch)
    h = h.reshape(N, D, H, W * Ch)

    # --- Stage 2: Conv3d(k=3) + BN3 + MaxPool(2) + ReLU ----------------------
    b3 = biases_ref[2:3, :Wo * C]
    acc = jnp.zeros((N * Do * Ho, Wo * C), f32) + b3
    for kd in range(3):
        for kh in range(3):
            slab = h[:, kd:kd + Do, kh:kh + Ho, :]        # (N, Do, Ho, W*Ch)
            slab = slab.reshape(N * Do * Ho, W * Ch)
            acc = acc + mm(slab, w3_ref[kd * 3 + kh])     # (N*Do*Ho, Wo*C)
    # MaxPool along W (lane axis) via 0/1 selection matmuls.
    pw = jnp.maximum(mm(acc, s3e_ref[...]), mm(acc, s3o_ref[...]))  # (.., Wp*C)
    # MaxPool along H: adjacent row pairs.
    ph = pw.reshape(N * Do * Hp, 2, Wp * C)
    ph = jnp.maximum(ph[:, 0, :], ph[:, 1, :])            # (N*Do*Hp, Wp*C)
    # MaxPool along D: adjacent blocks of Hp rows.
    pd = ph.reshape(N * Dp, 2, Hp, Wp * C)
    pd = jnp.maximum(pd[:, 0, :, :], pd[:, 1, :, :])      # (N*Dp, Hp, Wp*C)
    y = jnp.maximum(pd, 0.0)                              # ReLU
    y = y.reshape(N, Dp, Hp, Wp * C)

    # --- Stage 3: Conv3d(k=3) + BN4 + MaxPool(2) + ReLU ----------------------
    b4 = biases_ref[3:4, :W2 * C2]
    acc2 = jnp.zeros((N * D2 * H2, W2 * C2), f32) + b4
    for kd in range(3):
        for kh in range(3):
            slab = y[:, kd:kd + D2, kh:kh + H2, :]        # (N, D2, H2, Wp*C)
            slab = slab.reshape(N * D2 * H2, Wp * C)
            acc2 = acc2 + mm(slab, w4_ref[kd * 3 + kh])   # (N*D2*H2, W2*C2)
    pw2 = jnp.maximum(mm(acc2, s4e_ref[...]), mm(acc2, s4o_ref[...]))
    ph2 = pw2.reshape(N * D2 * H3, 2, W3 * C2)
    ph2 = jnp.maximum(ph2[:, 0, :], ph2[:, 1, :])         # (N*D2*H3, W3*C2)
    pd2 = ph2.reshape(N * D3, 2, H3, W3 * C2)
    pd2 = jnp.maximum(pd2[:, 0, :, :], pd2[:, 1, :, :])   # (N*D3, H3, W3*C2)
    z = jnp.maximum(pd2, 0.0)
    z = z.reshape(N, D3 * H3, W3 * C2)                    # (N, 4, 32)

    # --- FC head: BNf + Linear(F,128) + ReLU + Linear(128,128) + ReLU
    #              + Linear(128,1) + Sigmoid   (Dropout = identity) -----------
    bf1 = biases_ref[4:5, :]
    bf2 = biases_ref[5:6, :]
    bf3 = biases_ref[6:7, :1]
    hid = jnp.zeros((N, 128), f32) + bf1
    for g in range(D3 * H3):                              # fc1, grouped rows
        hid = hid + mm(z[:, g, :], wf1_ref[g])
    hid = jnp.maximum(hid, 0.0)
    hid = jnp.maximum(mm(hid, wf2_ref[...]) + bf2, 0.0)
    logit = mm(hid, wf3_ref[...]) + bf3                   # (N, 1)
    o_ref[...] = 1.0 / (1.0 + jnp.exp(-logit))


# ----------------------------------------------------------------------------
# Host-side parameter folding / operand preparation
# ----------------------------------------------------------------------------
def _prepare_operands(p, C, S):
    Ch = C // 2
    C2 = 2 * C
    W = S
    Wo = S - 2
    Wp = Wo // 2
    W2 = Wp - 2
    W3 = W2 // 2
    assert Wo % 2 == 0 and W2 % 2 == 0 and W3 >= 1

    def fold(d):
        s = d["g"] / jnp.sqrt(d["v"] + EPS)
        return s, d["b"] - d["m"] * s

    s0, t0 = fold(p["bn0"])
    s1, t1 = fold(p["bn1"])
    s2, t2 = fold(p["bn2"])
    s3, t3 = fold(p["bn3"])
    s4, t4 = fold(p["bn4"])
    sF, tF = fold(p["bnf"])

    # 1x1x1 convs with BN folded on both sides -> block-diagonal over W.
    w1f = (s0[:, None] * p["conv1"]["w"]) * s1[None, :]
    b1f = (t0 @ p["conv1"]["w"] + p["conv1"]["b"]) * s1 + t1
    w2f = p["conv2"]["w"] * s2[None, :]
    b2f = p["conv2"]["b"] * s2 + t2
    eye = jnp.eye(W, dtype=jnp.float32)
    bd1 = jnp.kron(eye, w1f)                 # (W*C,  W*Ch)
    bd2 = jnp.kron(eye, w2f)                 # (W*Ch, W*Ch)

    # 3x3x3 convs with output BN folded -> banded (Toeplitz-over-W) matrices,
    # one per (kd, kh) tap pair; the kw taps live inside the band.
    w3f = np.asarray(p["conv3"]["w"] * s3[None, None, :])    # (27, Ch, C)
    b3f = p["conv3"]["b"] * s3 + t3
    w4f = np.asarray(p["conv4"]["w"] * s4[None, None, :])    # (27, C, C2)
    b4f = p["conv4"]["b"] * s4 + t4

    def banded(wt, cin, cout, win, wout):
        m = np.zeros((9, win * cin, wout * cout), np.float32)
        for kd in range(3):
            for kh in range(3):
                for kw in range(3):
                    blk = wt[kd * 9 + kh * 3 + kw]
                    for wo in range(wout):
                        wi = wo + kw
                        m[kd * 3 + kh,
                          wi * cin:(wi + 1) * cin,
                          wo * cout:(wo + 1) * cout] = blk
        return jnp.asarray(m)

    w3t = banded(w3f, Ch, C, W, Wo)          # (9, W*Ch, Wo*C)
    w4t = banded(w4f, C, C2, Wp, W2)         # (9, Wp*C, W2*C2)

    # 0/1 lane-selection matrices implementing MaxPool along the W lane axis.
    def pool_sel(wout, cc):
        half = wout // 2
        se = np.zeros((wout * cc, half * cc), np.float32)
        so = np.zeros_like(se)
        for wp in range(half):
            for c in range(cc):
                se[(2 * wp) * cc + c, wp * cc + c] = 1.0
                so[(2 * wp + 1) * cc + c, wp * cc + c] = 1.0
        return jnp.asarray(se), jnp.asarray(so)

    s3e, s3o = pool_sel(Wo, C)
    s4e, s4o = pool_sel(W2, C2)

    # fc1 with BN1d folded; rows permuted from torch's NCDHW flatten order to
    # the kernel's channels-last (d, h | w, c) order, grouped by (d, h).
    wf1f = np.asarray(sF[:, None] * p["fc1"]["w"])           # (F, 128)
    bf1f = p["fc1"]["b"] + tF @ p["fc1"]["w"]
    D3 = H3 = W3
    wf1g = np.zeros((D3 * H3, W3 * C2, 128), np.float32)
    for d in range(D3):
        for hh in range(H3):
            for w in range(W3):
                for c in range(C2):
                    f = ((c * D3 + d) * H3 + hh) * W3 + w
                    wf1g[d * H3 + hh, w * C2 + c, :] = wf1f[f, :]
    wf1g = jnp.asarray(wf1g)

    widths = (W * Ch, W * Ch, Wo * C, W2 * C2, 128, 128, 1)
    assert max(widths) <= 128
    biases = np.zeros((7, 128), np.float32)
    biases[0, :W * Ch] = np.tile(np.asarray(b1f), W)
    biases[1, :W * Ch] = np.tile(np.asarray(b2f), W)
    biases[2, :Wo * C] = np.tile(np.asarray(b3f), Wo)
    biases[3, :W2 * C2] = np.tile(np.asarray(b4f), W2)
    biases[4, :] = np.asarray(bf1f)
    biases[5, :] = np.asarray(p["fc2"]["b"])
    biases[6, :1] = np.asarray(p["fc3"]["b"])

    return dict(biases=jnp.asarray(biases), bd1=bd1, bd2=bd2,
                w3=w3t, s3e=s3e, s3o=s3o, w4=w4t, s4e=s4e, s4o=s4o,
                wf1=wf1g, wf2=p["fc2"]["w"], wf3=p["fc3"]["w"])


# ----------------------------------------------------------------------------
# Forward pass using the fused Pallas kernel
# ----------------------------------------------------------------------------
def forward_pallas(x_in, p):
    # x_in: (N, C0, S, S, S); xyz coordinate channels are appended (module's
    # torch.cat([x, xyz], 1)) before entering the trunk.
    N, C0, S = x_in.shape[0], x_in.shape[1], x_in.shape[2]
    C = C0 + 3
    ops = _prepare_operands(p, C, S)

    xyz = p["xyz"]
    x = jnp.concatenate(
        [x_in, jnp.broadcast_to(xyz[None], (N,) + xyz.shape)], axis=1)
    # NCDHW -> channels-last, then merge (W, C) into one lane-dense minor dim.
    x = jnp.transpose(x, (0, 2, 3, 4, 1)).reshape(N * S * S, S * C)

    args = (x, ops["biases"], ops["bd1"], ops["bd2"],
            ops["w3"], ops["s3e"], ops["s3o"],
            ops["w4"], ops["s4e"], ops["s4o"],
            ops["wf1"], ops["wf2"], ops["wf3"])
    kernel = functools.partial(fused_forward_kernel, N=N, S=S, C=C)
    return pl.pallas_call(
        kernel,
        out_shape=jax.ShapeDtypeStruct((N, 1), jnp.float32),
        in_specs=[pl.BlockSpec(memory_space=pltpu.MemorySpace.VMEM)] * len(args),
        out_specs=pl.BlockSpec(memory_space=pltpu.MemorySpace.VMEM),
    )(*args)


# ----------------------------------------------------------------------------
# Parameter init (deterministic, synthetic, "torch-like" raw parameters)
# ----------------------------------------------------------------------------
def init_params(key, C, F, S):
    keys = iter(jax.random.split(key, 48))

    def nrm(shape, scale=0.1):
        return (scale * jax.random.normal(next(keys), shape)).astype(jnp.float32)

    def bn(c):
        return dict(g=1.0 + nrm((c,), 0.05), b=nrm((c,), 0.05),
                    m=nrm((c,), 0.2),
                    v=0.5 + jax.random.uniform(next(keys), (c,), jnp.float32))

    Ch = C // 2
    p = {}
    p["bn0"] = bn(C)
    p["conv1"] = dict(w=nrm((C, Ch)), b=nrm((Ch,)))           # 1x1x1 conv
    p["bn1"] = bn(Ch)
    p["conv2"] = dict(w=nrm((Ch, Ch)), b=nrm((Ch,)))          # 1x1x1 conv
    p["bn2"] = bn(Ch)
    p["conv3"] = dict(w=nrm((27, Ch, C)), b=nrm((C,)))        # 3x3x3 conv
    p["bn3"] = bn(C)
    p["conv4"] = dict(w=nrm((27, C, 2 * C)), b=nrm((2 * C,)))  # 3x3x3 conv
    p["bn4"] = bn(2 * C)
    p["bnf"] = bn(F)
    p["fc1"] = dict(w=nrm((F, 128)), b=nrm((128,)))
    p["fc2"] = dict(w=nrm((128, 128)), b=nrm((128,)))
    p["fc3"] = dict(w=nrm((128, 1)), b=nrm((1,)))
    # xyz coordinate channels (as in the torch module, at this spatial size).
    coords = jnp.arange(S, dtype=jnp.float32) / S
    xg = jnp.broadcast_to(coords[:, None, None], (S, S, S))
    yg = jnp.broadcast_to(coords[None, :, None], (S, S, S))
    zg = jnp.broadcast_to(coords[None, None, :], (S, S, S))
    p["xyz"] = jnp.stack([xg, yg, zg], axis=0)
    return p


# ----------------------------------------------------------------------------
# Pure-JAX reference (XLA conv / reduce_window) for validation
# ----------------------------------------------------------------------------
def forward_ref(x_in, p):
    HI = jax.lax.Precision.HIGHEST
    N = x_in.shape[0]
    xyz = p["xyz"]
    x = jnp.concatenate(
        [x_in, jnp.broadcast_to(xyz[None], (N,) + xyz.shape)], axis=1)

    def bn(h, d):
        s = (1, -1) + (1,) * (h.ndim - 2)
        return ((h - d["m"].reshape(s)) * jax.lax.rsqrt(d["v"].reshape(s) + EPS)
                * d["g"].reshape(s) + d["b"].reshape(s))

    def conv(h, w_oidhw, b):
        y = jax.lax.conv_general_dilated(
            h, w_oidhw, (1, 1, 1), "VALID",
            dimension_numbers=("NCDHW", "OIDHW", "NCDHW"), precision=HI)
        return y + b.reshape(1, -1, 1, 1, 1)

    def pool(h):
        return jax.lax.reduce_window(h, -jnp.inf, jax.lax.max,
                                     (1, 1, 2, 2, 2), (1, 1, 2, 2, 2), "VALID")

    C = x.shape[1]
    Ch = C // 2
    h = bn(x, p["bn0"])
    w1 = p["conv1"]["w"].T.reshape(Ch, C, 1, 1, 1)
    h = jax.nn.relu(bn(conv(h, w1, p["conv1"]["b"]), p["bn1"]))
    w2 = p["conv2"]["w"].T.reshape(Ch, Ch, 1, 1, 1)
    h = jax.nn.relu(bn(conv(h, w2, p["conv2"]["b"]), p["bn2"]))
    w3 = jnp.transpose(p["conv3"]["w"].reshape(3, 3, 3, Ch, C), (4, 3, 0, 1, 2))
    h = jax.nn.relu(pool(bn(conv(h, w3, p["conv3"]["b"]), p["bn3"])))
    w4 = jnp.transpose(p["conv4"]["w"].reshape(3, 3, 3, C, 2 * C), (4, 3, 0, 1, 2))
    h = jax.nn.relu(pool(bn(conv(h, w4, p["conv4"]["b"]), p["bn4"])))
    z = h.reshape(h.shape[0], -1)
    z = bn(z, p["bnf"])
    z = jax.nn.relu(jnp.dot(z, p["fc1"]["w"], precision=HI) + p["fc1"]["b"])
    z = jax.nn.relu(jnp.dot(z, p["fc2"]["w"], precision=HI) + p["fc2"]["b"])
    z = jnp.dot(z, p["fc3"]["w"], precision=HI) + p["fc3"]["b"]
    return jax.nn.sigmoid(z)


if __name__ == "__main__":
    key = jax.random.PRNGKey(0)
    kx, kp = jax.random.split(key)

    # Small shapes consistent with the module: batch=2, 5 raw feature channels
    # + 3 xyz channels -> C=8, 14^3 grid -> trunk output 16 x 2^3 -> F = 128.
    N, C0, S = 2, 5, 14
    C = C0 + 3
    F = 2 * C * (((S - 2) // 2 - 2) // 2) ** 3
    assert F == 128

    x = jax.random.normal(kx, (N, C0, S, S, S), dtype=jnp.float32)
    params = init_params(kp, C, F, S)

    out = jax.block_until_ready(forward_pallas(x, params))
    ref = jax.block_until_ready(forward_ref(x, params))

    assert out.shape == (N, 1), out.shape
    np.testing.assert_allclose(np.asarray(out), np.asarray(ref),
                               rtol=1e-3, atol=1e-3)
    print("KERNEL_OK")
</pallas_src>

<mosaic_0001>
module attributes {stable_mosaic.version = 11 : i64} {
  func.func @fused_forward_kernel(%arg0: memref<392x112xf32, #tpu.memory_space<vmem>>, %arg1: memref<7x128xf32, #tpu.memory_space<vmem>>, %arg2: memref<112x56xf32, #tpu.memory_space<vmem>>, %arg3: memref<56x56xf32, #tpu.memory_space<vmem>>, %arg4: memref<9x56x96xf32, #tpu.memory_space<vmem>>, %arg5: memref<96x48xf32, #tpu.memory_space<vmem>>, %arg6: memref<96x48xf32, #tpu.memory_space<vmem>>, %arg7: memref<9x48x64xf32, #tpu.memory_space<vmem>>, %arg8: memref<64x32xf32, #tpu.memory_space<vmem>>, %arg9: memref<64x32xf32, #tpu.memory_space<vmem>>, %arg10: memref<4x32x128xf32, #tpu.memory_space<vmem>>, %arg11: memref<128x128xf32, #tpu.memory_space<vmem>>, %arg12: memref<128x1xf32, #tpu.memory_space<vmem>>, %arg13: memref<2x1xf32, #tpu.memory_space<vmem>>) attributes {dimension_semantics = [], scalar_prefetch = 0 : i64, scratch_operands = 0 : i64, tpu.core_type = #tpu.core_type<tc>} {
    %c0 = arith.constant 0 : index
    %c0_0 = arith.constant 0 : index
    %0 = vector.load %arg0[%c0, %c0_0] : memref<392x112xf32, #tpu.memory_space<vmem>>, vector<392x112xf32>
    %c0_1 = arith.constant 0 : index
    %c0_2 = arith.constant 0 : index
    %1 = vector.load %arg1[%c0_1, %c0_2] : memref<7x128xf32, #tpu.memory_space<vmem>>, vector<1x56xf32>
    %c1 = arith.constant 1 : index
    %c0_3 = arith.constant 0 : index
    %2 = vector.load %arg1[%c1, %c0_3] : memref<7x128xf32, #tpu.memory_space<vmem>>, vector<1x56xf32>
    %c0_4 = arith.constant 0 : index
    %c0_5 = arith.constant 0 : index
    %3 = vector.load %arg2[%c0_4, %c0_5] : memref<112x56xf32, #tpu.memory_space<vmem>>, vector<112x56xf32>
    %cst = arith.constant dense<0.000000e+00> : vector<392x56xf32>
    %4 = tpu.matmul %0, %3, %cst {dimension_numbers = #tpu.dot_dimension_numbers<[1], [0], [0], [1], [0, 0, 1, 1], [], []>} : vector<392x112xf32>, vector<112x56xf32>, vector<392x56xf32> -> vector<392x56xf32>
    %5 = vector.broadcast %1 : vector<1x56xf32> to vector<392x56xf32>
    %6 = arith.addf %4, %5 : vector<392x56xf32>
    %cst_6 = arith.constant 0.000000e+00 : f32
    %7 = vector.broadcast %cst_6 : f32 to vector<392x56xf32>
    %8 = arith.maximumf %6, %7 : vector<392x56xf32>
    %c0_7 = arith.constant 0 : index
    %c0_8 = arith.constant 0 : index
    %9 = vector.load %arg3[%c0_7, %c0_8] : memref<56x56xf32, #tpu.memory_space<vmem>>, vector<56x56xf32>
    %cst_9 = arith.constant dense<0.000000e+00> : vector<392x56xf32>
    %10 = tpu.matmul %8, %9, %cst_9 {dimension_numbers = #tpu.dot_dimension_numbers<[1], [0], [0], [1], [0, 0, 1, 1], [], []>} : vector<392x56xf32>, vector<56x56xf32>, vector<392x56xf32> -> vector<392x56xf32>
    %11 = vector.broadcast %2 : vector<1x56xf32> to vector<392x56xf32>
    %12 = arith.addf %10, %11 : vector<392x56xf32>
    %cst_10 = arith.constant 0.000000e+00 : f32
    %13 = vector.broadcast %cst_10 : f32 to vector<392x56xf32>
    %14 = arith.maximumf %12, %13 : vector<392x56xf32>
    %15 = vector.shape_cast %14 : vector<392x56xf32> to vector<2x14x14x56xf32>
    %c2 = arith.constant 2 : index
    %c0_11 = arith.constant 0 : index
    %16 = vector.load %arg1[%c2, %c0_11] : memref<7x128xf32, #tpu.memory_space<vmem>>, vector<1x96xf32>
    %cst_12 = arith.constant 0.000000e+00 : f32
    %17 = vector.broadcast %cst_12 : f32 to vector<288x96xf32>
    %18 = vector.broadcast %16 : vector<1x96xf32> to vector<288x96xf32>
    %19 = arith.addf %17, %18 : vector<288x96xf32>
    %20 = vector.extract_strided_slice %15 {offsets = [0, 0, 0, 0], sizes = [2, 12, 12, 56], strides = [1, 1, 1, 1]} : vector<2x14x14x56xf32> to vector<2x12x12x56xf32>
    %21 = vector.shape_cast %20 : vector<2x12x12x56xf32> to vector<288x56xf32>
    %c0_13 = arith.constant 0 : index
    %c0_14 = arith.constant 0 : index
    %c0_15 = arith.constant 0 : index
    %22 = vector.load %arg4[%c0_13, %c0_14, %c0_15] : memref<9x56x96xf32, #tpu.memory_space<vmem>>, vector<1x56x96xf32>
    %23 = vector.shape_cast %22 : vector<1x56x96xf32> to vector<56x96xf32>
    %cst_16 = arith.constant dense<0.000000e+00> : vector<288x96xf32>
    %24 = tpu.matmul %21, %23, %cst_16 {dimension_numbers = #tpu.dot_dimension_numbers<[1], [0], [0], [1], [0, 0, 1, 1], [], []>} : vector<288x56xf32>, vector<56x96xf32>, vector<288x96xf32> -> vector<288x96xf32>
    %25 = arith.addf %19, %24 : vector<288x96xf32>
    %26 = vector.extract_strided_slice %15 {offsets = [0, 0, 1, 0], sizes = [2, 12, 12, 56], strides = [1, 1, 1, 1]} : vector<2x14x14x56xf32> to vector<2x12x12x56xf32>
    %27 = vector.shape_cast %26 : vector<2x12x12x56xf32> to vector<288x56xf32>
    %c1_17 = arith.constant 1 : index
    %c0_18 = arith.constant 0 : index
    %c0_19 = arith.constant 0 : index
    %28 = vector.load %arg4[%c1_17, %c0_18, %c0_19] : memref<9x56x96xf32, #tpu.memory_space<vmem>>, vector<1x56x96xf32>
    %29 = vector.shape_cast %28 : vector<1x56x96xf32> to vector<56x96xf32>
    %cst_20 = arith.constant dense<0.000000e+00> : vector<288x96xf32>
    %30 = tpu.matmul %27, %29, %cst_20 {dimension_numbers = #tpu.dot_dimension_numbers<[1], [0], [0], [1], [0, 0, 1, 1], [], []>} : vector<288x56xf32>, vector<56x96xf32>, vector<288x96xf32> -> vector<288x96xf32>
    %31 = arith.addf %25, %30 : vector<288x96xf32>
    %32 = vector.extract_strided_slice %15 {offsets = [0, 0, 2, 0], sizes = [2, 12, 12, 56], strides = [1, 1, 1, 1]} : vector<2x14x14x56xf32> to vector<2x12x12x56xf32>
    %33 = vector.shape_cast %32 : vector<2x12x12x56xf32> to vector<288x56xf32>
    %c2_21 = arith.constant 2 : index
    %c0_22 = arith.constant 0 : index
    %c0_23 = arith.constant 0 : index
    %34 = vector.load %arg4[%c2_21, %c0_22, %c0_23] : memref<9x56x96xf32, #tpu.memory_space<vmem>>, vector<1x56x96xf32>
    %35 = vector.shape_cast %34 : vector<1x56x96xf32> to vector<56x96xf32>
    %cst_24 = arith.constant dense<0.000000e+00> : vector<288x96xf32>
    %36 = tpu.matmul %33, %35, %cst_24 {dimension_numbers = #tpu.dot_dimension_numbers<[1], [0], [0], [1], [0, 0, 1, 1], [], []>} : vector<288x56xf32>, vector<56x96xf32>, vector<288x96xf32> -> vector<288x96xf32>
    %37 = arith.addf %31, %36 : vector<288x96xf32>
    %38 = vector.extract_strided_slice %15 {offsets = [0, 1, 0, 0], sizes = [2, 12, 12, 56], strides = [1, 1, 1, 1]} : vector<2x14x14x56xf32> to vector<2x12x12x56xf32>
    %39 = vector.shape_cast %38 : vector<2x12x12x56xf32> to vector<288x56xf32>
    %c3 = arith.constant 3 : index
    %c0_25 = arith.constant 0 : index
    %c0_26 = arith.constant 0 : index
    %40 = vector.load %arg4[%c3, %c0_25, %c0_26] : memref<9x56x96xf32, #tpu.memory_space<vmem>>, vector<1x56x96xf32>
    %41 = vector.shape_cast %40 : vector<1x56x96xf32> to vector<56x96xf32>
    %cst_27 = arith.constant dense<0.000000e+00> : vector<288x96xf32>
    %42 = tpu.matmul %39, %41, %cst_27 {dimension_numbers = #tpu.dot_dimension_numbers<[1], [0], [0], [1], [0, 0, 1, 1], [], []>} : vector<288x56xf32>, vector<56x96xf32>, vector<288x96xf32> -> vector<288x96xf32>
    %43 = arith.addf %37, %42 : vector<288x96xf32>
    %44 = vector.extract_strided_slice %15 {offsets = [0, 1, 1, 0], sizes = [2, 12, 12, 56], strides = [1, 1, 1, 1]} : vector<2x14x14x56xf32> to vector<2x12x12x56xf32>
    %45 = vector.shape_cast %44 : vector<2x12x12x56xf32> to vector<288x56xf32>
    %c4 = arith.constant 4 : index
    %c0_28 = arith.constant 0 : index
    %c0_29 = arith.constant 0 : index
    %46 = vector.load %arg4[%c4, %c0_28, %c0_29] : memref<9x56x96xf32, #tpu.memory_space<vmem>>, vector<1x56x96xf32>
    %47 = vector.shape_cast %46 : vector<1x56x96xf32> to vector<56x96xf32>
    %cst_30 = arith.constant dense<0.000000e+00> : vector<288x96xf32>
    %48 = tpu.matmul %45, %47, %cst_30 {dimension_numbers = #tpu.dot_dimension_numbers<[1], [0], [0], [1], [0, 0, 1, 1], [], []>} : vector<288x56xf32>, vector<56x96xf32>, vector<288x96xf32> -> vector<288x96xf32>
    %49 = arith.addf %43, %48 : vector<288x96xf32>
    %50 = vector.extract_strided_slice %15 {offsets = [0, 1, 2, 0], sizes = [2, 12, 12, 56], strides = [1, 1, 1, 1]} : vector<2x14x14x56xf32> to vector<2x12x12x56xf32>
    %51 = vector.shape_cast %50 : vector<2x12x12x56xf32> to vector<288x56xf32>
    %c5 = arith.constant 5 : index
    %c0_31 = arith.constant 0 : index
    %c0_32 = arith.constant 0 : index
    %52 = vector.load %arg4[%c5, %c0_31, %c0_32] : memref<9x56x96xf32, #tpu.memory_space<vmem>>, vector<1x56x96xf32>
    %53 = vector.shape_cast %52 : vector<1x56x96xf32> to vector<56x96xf32>
    %cst_33 = arith.constant dense<0.000000e+00> : vector<288x96xf32>
    %54 = tpu.matmul %51, %53, %cst_33 {dimension_numbers = #tpu.dot_dimension_numbers<[1], [0], [0], [1], [0, 0, 1, 1], [], []>} : vector<288x56xf32>, vector<56x96xf32>, vector<288x96xf32> -> vector<288x96xf32>
    %55 = arith.addf %49, %54 : vector<288x96xf32>
    %56 = vector.extract_strided_slice %15 {offsets = [0, 2, 0, 0], sizes = [2, 12, 12, 56], strides = [1, 1, 1, 1]} : vector<2x14x14x56xf32> to vector<2x12x12x56xf32>
    %57 = vector.shape_cast %56 : vector<2x12x12x56xf32> to vector<288x56xf32>
    %c6 = arith.constant 6 : index
    %c0_34 = arith.constant 0 : index
    %c0_35 = arith.constant 0 : index
    %58 = vector.load %arg4[%c6, %c0_34, %c0_35] : memref<9x56x96xf32, #tpu.memory_space<vmem>>, vector<1x56x96xf32>
    %59 = vector.shape_cast %58 : vector<1x56x96xf32> to vector<56x96xf32>
    %cst_36 = arith.constant dense<0.000000e+00> : vector<288x96xf32>
    %60 = tpu.matmul %57, %59, %cst_36 {dimension_numbers = #tpu.dot_dimension_numbers<[1], [0], [0], [1], [0, 0, 1, 1], [], []>} : vector<288x56xf32>, vector<56x96xf32>, vector<288x96xf32> -> vector<288x96xf32>
    %61 = arith.addf %55, %60 : vector<288x96xf32>
    %62 = vector.extract_strided_slice %15 {offsets = [0, 2, 1, 0], sizes = [2, 12, 12, 56], strides = [1, 1, 1, 1]} : vector<2x14x14x56xf32> to vector<2x12x12x56xf32>
    %63 = vector.shape_cast %62 : vector<2x12x12x56xf32> to vector<288x56xf32>
    %c7 = arith.constant 7 : index
    %c0_37 = arith.constant 0 : index
    %c0_38 = arith.constant 0 : index
    %64 = vector.load %arg4[%c7, %c0_37, %c0_38] : memref<9x56x96xf32, #tpu.memory_space<vmem>>, vector<1x56x96xf32>
    %65 = vector.shape_cast %64 : vector<1x56x96xf32> to vector<56x96xf32>
    %cst_39 = arith.constant dense<0.000000e+00> : vector<288x96xf32>
    %66 = tpu.matmul %63, %65, %cst_39 {dimension_numbers = #tpu.dot_dimension_numbers<[1], [0], [0], [1], [0, 0, 1, 1], [], []>} : vector<288x56xf32>, vector<56x96xf32>, vector<288x96xf32> -> vector<288x96xf32>
    %67 = arith.addf %61, %66 : vector<288x96xf32>
    %68 = vector.extract_strided_slice %15 {offsets = [0, 2, 2, 0], sizes = [2, 12, 12, 56], strides = [1, 1, 1, 1]} : vector<2x14x14x56xf32> to vector<2x12x12x56xf32>
    %69 = vector.shape_cast %68 : vector<2x12x12x56xf32> to vector<288x56xf32>
    %c8 = arith.constant 8 : index
    %c0_40 = arith.constant 0 : index
    %c0_41 = arith.constant 0 : index
    %70 = vector.load %arg4[%c8, %c0_40, %c0_41] : memref<9x56x96xf32, #tpu.memory_space<vmem>>, vector<1x56x96xf32>
    %71 = vector.shape_cast %70 : vector<1x56x96xf32> to vector<56x96xf32>
    %cst_42 = arith.constant dense<0.000000e+00> : vector<288x96xf32>
    %72 = tpu.matmul %69, %71, %cst_42 {dimension_numbers = #tpu.dot_dimension_numbers<[1], [0], [0], [1], [0, 0, 1, 1], [], []>} : vector<288x56xf32>, vector<56x96xf32>, vector<288x96xf32> -> vector<288x96xf32>
    %73 = arith.addf %67, %72 : vector<288x96xf32>
    %c0_43 = arith.constant 0 : index
    %c0_44 = arith.constant 0 : index
    %74 = vector.load %arg5[%c0_43, %c0_44] : memref<96x48xf32, #tpu.memory_space<vmem>>, vector<96x48xf32>
    %cst_45 = arith.constant dense<0.000000e+00> : vector<288x48xf32>
    %75 = tpu.matmul %73, %74, %cst_45 {dimension_numbers = #tpu.dot_dimension_numbers<[1], [0], [0], [1], [0, 0, 1, 1], [], []>} : vector<288x96xf32>, vector<96x48xf32>, vector<288x48xf32> -> vector<288x48xf32>
    %c0_46 = arith.constant 0 : index
    %c0_47 = arith.constant 0 : index
    %76 = vector.load %arg6[%c0_46, %c0_47] : memref<96x48xf32, #tpu.memory_space<vmem>>, vector<96x48xf32>
    %cst_48 = arith.constant dense<0.000000e+00> : vector<288x48xf32>
    %77 = tpu.matmul %73, %76, %cst_48 {dimension_numbers = #tpu.dot_dimension_numbers<[1], [0], [0], [1], [0, 0, 1, 1], [], []>} : vector<288x96xf32>, vector<96x48xf32>, vector<288x48xf32> -> vector<288x48xf32>
    %78 = arith.maximumf %75, %77 : vector<288x48xf32>
    %79 = vector.shape_cast %78 : vector<288x48xf32> to vector<144x2x48xf32>
    %80 = vector.extract_strided_slice %79 {offsets = [0, 0, 0], sizes = [144, 1, 48], strides = [1, 1, 1]} : vector<144x2x48xf32> to vector<144x1x48xf32>
    %81 = vector.shape_cast %80 : vector<144x1x48xf32> to vector<144x48xf32>
    %82 = vector.extract_strided_slice %79 {offsets = [0, 1, 0], sizes = [144, 1, 48], strides = [1, 1, 1]} : vector<144x2x48xf32> to vector<144x1x48xf32>
    %83 = vector.shape_cast %82 : vector<144x1x48xf32> to vector<144x48xf32>
    %84 = arith.maximumf %81, %83 : vector<144x48xf32>
    %85 = vector.shape_cast %84 : vector<144x48xf32> to vector<12x2x6x48xf32>
    %86 = vector.extract_strided_slice %85 {offsets = [0, 0, 0, 0], sizes = [12, 1, 6, 48], strides = [1, 1, 1, 1]} : vector<12x2x6x48xf32> to vector<12x1x6x48xf32>
    %87 = vector.shape_cast %86 : vector<12x1x6x48xf32> to vector<12x6x48xf32>
    %88 = vector.extract_strided_slice %85 {offsets = [0, 1, 0, 0], sizes = [12, 1, 6, 48], strides = [1, 1, 1, 1]} : vector<12x2x6x48xf32> to vector<12x1x6x48xf32>
    %89 = vector.shape_cast %88 : vector<12x1x6x48xf32> to vector<12x6x48xf32>
    %90 = arith.maximumf %87, %89 : vector<12x6x48xf32>
    %cst_49 = arith.constant 0.000000e+00 : f32
    %91 = vector.broadcast %cst_49 : f32 to vector<12x6x48xf32>
    %92 = arith.maximumf %90, %91 : vector<12x6x48xf32>
    %93 = vector.shape_cast %92 : vector<12x6x48xf32> to vector<2x6x6x48xf32>
    %c3_50 = arith.constant 3 : index
    %c0_51 = arith.constant 0 : index
    %94 = vector.load %arg1[%c3_50, %c0_51] : memref<7x128xf32, #tpu.memory_space<vmem>>, vector<1x64xf32>
    %cst_52 = arith.constant 0.000000e+00 : f32
    %95 = vector.broadcast %cst_52 : f32 to vector<32x64xf32>
    %96 = vector.broadcast %94 : vector<1x64xf32> to vector<32x64xf32>
    %97 = arith.addf %95, %96 : vector<32x64xf32>
    %98 = vector.extract_strided_slice %93 {offsets = [0, 0, 0, 0], sizes = [2, 4, 4, 48], strides = [1, 1, 1, 1]} : vector<2x6x6x48xf32> to vector<2x4x4x48xf32>
    %99 = vector.shape_cast %98 : vector<2x4x4x48xf32> to vector<32x48xf32>
    %c0_53 = arith.constant 0 : index
    %c0_54 = arith.constant 0 : index
    %c0_55 = arith.constant 0 : index
    %100 = vector.load %arg7[%c0_53, %c0_54, %c0_55] : memref<9x48x64xf32, #tpu.memory_space<vmem>>, vector<1x48x64xf32>
    %101 = vector.shape_cast %100 : vector<1x48x64xf32> to vector<48x64xf32>
    %cst_56 = arith.constant dense<0.000000e+00> : vector<32x64xf32>
    %102 = tpu.matmul %99, %101, %cst_56 {dimension_numbers = #tpu.dot_dimension_numbers<[1], [0], [0], [1], [0, 0, 1, 1], [], []>} : vector<32x48xf32>, vector<48x64xf32>, vector<32x64xf32> -> vector<32x64xf32>
    %103 = arith.addf %97, %102 : vector<32x64xf32>
    %104 = vector.extract_strided_slice %93 {offsets = [0, 0, 1, 0], sizes = [2, 4, 4, 48], strides = [1, 1, 1, 1]} : vector<2x6x6x48xf32> to vector<2x4x4x48xf32>
    %105 = vector.shape_cast %104 : vector<2x4x4x48xf32> to vector<32x48xf32>
    %c1_57 = arith.constant 1 : index
    %c0_58 = arith.constant 0 : index
    %c0_59 = arith.constant 0 : index
    %106 = vector.load %arg7[%c1_57, %c0_58, %c0_59] : memref<9x48x64xf32, #tpu.memory_space<vmem>>, vector<1x48x64xf32>
    %107 = vector.shape_cast %106 : vector<1x48x64xf32> to vector<48x64xf32>
    %cst_60 = arith.constant dense<0.000000e+00> : vector<32x64xf32>
    %108 = tpu.matmul %105, %107, %cst_60 {dimension_numbers = #tpu.dot_dimension_numbers<[1], [0], [0], [1], [0, 0, 1, 1], [], []>} : vector<32x48xf32>, vector<48x64xf32>, vector<32x64xf32> -> vector<32x64xf32>
    %109 = arith.addf %103, %108 : vector<32x64xf32>
    %110 = vector.extract_strided_slice %93 {offsets = [0, 0, 2, 0], sizes = [2, 4, 4, 48], strides = [1, 1, 1, 1]} : vector<2x6x6x48xf32> to vector<2x4x4x48xf32>
    %111 = vector.shape_cast %110 : vector<2x4x4x48xf32> to vector<32x48xf32>
    %c2_61 = arith.constant 2 : index
    %c0_62 = arith.constant 0 : index
    %c0_63 = arith.constant 0 : index
    %112 = vector.load %arg7[%c2_61, %c0_62, %c0_63] : memref<9x48x64xf32, #tpu.memory_space<vmem>>, vector<1x48x64xf32>
    %113 = vector.shape_cast %112 : vector<1x48x64xf32> to vector<48x64xf32>
    %cst_64 = arith.constant dense<0.000000e+00> : vector<32x64xf32>
    %114 = tpu.matmul %111, %113, %cst_64 {dimension_numbers = #tpu.dot_dimension_numbers<[1], [0], [0], [1], [0, 0, 1, 1], [], []>} : vector<32x48xf32>, vector<48x64xf32>, vector<32x64xf32> -> vector<32x64xf32>
    %115 = arith.addf %109, %114 : vector<32x64xf32>
    %116 = vector.extract_strided_slice %93 {offsets = [0, 1, 0, 0], sizes = [2, 4, 4, 48], strides = [1, 1, 1, 1]} : vector<2x6x6x48xf32> to vector<2x4x4x48xf32>
    %117 = vector.shape_cast %116 : vector<2x4x4x48xf32> to vector<32x48xf32>
    %c3_65 = arith.constant 3 : index
    %c0_66 = arith.constant 0 : index
    %c0_67 = arith.constant 0 : index
    %118 = vector.load %arg7[%c3_65, %c0_66, %c0_67] : memref<9x48x64xf32, #tpu.memory_space<vmem>>, vector<1x48x64xf32>
    %119 = vector.shape_cast %118 : vector<1x48x64xf32> to vector<48x64xf32>
    %cst_68 = arith.constant dense<0.000000e+00> : vector<32x64xf32>
    %120 = tpu.matmul %117, %119, %cst_68 {dimension_numbers = #tpu.dot_dimension_numbers<[1], [0], [0], [1], [0, 0, 1, 1], [], []>} : vector<32x48xf32>, vector<48x64xf32>, vector<32x64xf32> -> vector<32x64xf32>
    %121 = arith.addf %115, %120 : vector<32x64xf32>
    %122 = vector.extract_strided_slice %93 {offsets = [0, 1, 1, 0], sizes = [2, 4, 4, 48], strides = [1, 1, 1, 1]} : vector<2x6x6x48xf32> to vector<2x4x4x48xf32>
    %123 = vector.shape_cast %122 : vector<2x4x4x48xf32> to vector<32x48xf32>
    %c4_69 = arith.constant 4 : index
    %c0_70 = arith.constant 0 : index
    %c0_71 = arith.constant 0 : index
    %124 = vector.load %arg7[%c4_69, %c0_70, %c0_71] : memref<9x48x64xf32, #tpu.memory_space<vmem>>, vector<1x48x64xf32>
    %125 = vector.shape_cast %124 : vector<1x48x64xf32> to vector<48x64xf32>
    %cst_72 = arith.constant dense<0.000000e+00> : vector<32x64xf32>
    %126 = tpu.matmul %123, %125, %cst_72 {dimension_numbers = #tpu.dot_dimension_numbers<[1], [0], [0], [1], [0, 0, 1, 1], [], []>} : vector<32x48xf32>, vector<48x64xf32>, vector<32x64xf32> -> vector<32x64xf32>
    %127 = arith.addf %121, %126 : vector<32x64xf32>
    %128 = vector.extract_strided_slice %93 {offsets = [0, 1, 2, 0], sizes = [2, 4, 4, 48], strides = [1, 1, 1, 1]} : vector<2x6x6x48xf32> to vector<2x4x4x48xf32>
    %129 = vector.shape_cast %128 : vector<2x4x4x48xf32> to vector<32x48xf32>
    %c5_73 = arith.constant 5 : index
    %c0_74 = arith.constant 0 : index
    %c0_75 = arith.constant 0 : index
    %130 = vector.load %arg7[%c5_73, %c0_74, %c0_75] : memref<9x48x64xf32, #tpu.memory_space<vmem>>, vector<1x48x64xf32>
    %131 = vector.shape_cast %130 : vector<1x48x64xf32> to vector<48x64xf32>
    %cst_76 = arith.constant dense<0.000000e+00> : vector<32x64xf32>
    %132 = tpu.matmul %129, %131, %cst_76 {dimension_numbers = #tpu.dot_dimension_numbers<[1], [0], [0], [1], [0, 0, 1, 1], [], []>} : vector<32x48xf32>, vector<48x64xf32>, vector<32x64xf32> -> vector<32x64xf32>
    %133 = arith.addf %127, %132 : vector<32x64xf32>
    %134 = vector.extract_strided_slice %93 {offsets = [0, 2, 0, 0], sizes = [2, 4, 4, 48], strides = [1, 1, 1, 1]} : vector<2x6x6x48xf32> to vector<2x4x4x48xf32>
    %135 = vector.shape_cast %134 : vector<2x4x4x48xf32> to vector<32x48xf32>
    %c6_77 = arith.constant 6 : index
    %c0_78 = arith.constant 0 : index
    %c0_79 = arith.constant 0 : index
    %136 = vector.load %arg7[%c6_77, %c0_78, %c0_79] : memref<9x48x64xf32, #tpu.memory_space<vmem>>, vector<1x48x64xf32>
    %137 = vector.shape_cast %136 : vector<1x48x64xf32> to vector<48x64xf32>
    %cst_80 = arith.constant dense<0.000000e+00> : vector<32x64xf32>
    %138 = tpu.matmul %135, %137, %cst_80 {dimension_numbers = #tpu.dot_dimension_numbers<[1], [0], [0], [1], [0, 0, 1, 1], [], []>} : vector<32x48xf32>, vector<48x64xf32>, vector<32x64xf32> -> vector<32x64xf32>
    %139 = arith.addf %133, %138 : vector<32x64xf32>
    %140 = vector.extract_strided_slice %93 {offsets = [0, 2, 1, 0], sizes = [2, 4, 4, 48], strides = [1, 1, 1, 1]} : vector<2x6x6x48xf32> to vector<2x4x4x48xf32>
    %141 = vector.shape_cast %140 : vector<2x4x4x48xf32> to vector<32x48xf32>
    %c7_81 = arith.constant 7 : index
    %c0_82 = arith.constant 0 : index
    %c0_83 = arith.constant 0 : index
    %142 = vector.load %arg7[%c7_81, %c0_82, %c0_83] : memref<9x48x64xf32, #tpu.memory_space<vmem>>, vector<1x48x64xf32>
    %143 = vector.shape_cast %142 : vector<1x48x64xf32> to vector<48x64xf32>
    %cst_84 = arith.constant dense<0.000000e+00> : vector<32x64xf32>
    %144 = tpu.matmul %141, %143, %cst_84 {dimension_numbers = #tpu.dot_dimension_numbers<[1], [0], [0], [1], [0, 0, 1, 1], [], []>} : vector<32x48xf32>, vector<48x64xf32>, vector<32x64xf32> -> vector<32x64xf32>
    %145 = arith.addf %139, %144 : vector<32x64xf32>
    %146 = vector.extract_strided_slice %93 {offsets = [0, 2, 2, 0], sizes = [2, 4, 4, 48], strides = [1, 1, 1, 1]} : vector<2x6x6x48xf32> to vector<2x4x4x48xf32>
    %147 = vector.shape_cast %146 : vector<2x4x4x48xf32> to vector<32x48xf32>
    %c8_85 = arith.constant 8 : index
    %c0_86 = arith.constant 0 : index
    %c0_87 = arith.constant 0 : index
    %148 = vector.load %arg7[%c8_85, %c0_86, %c0_87] : memref<9x48x64xf32, #tpu.memory_space<vmem>>, vector<1x48x64xf32>
    %149 = vector.shape_cast %148 : vector<1x48x64xf32> to vector<48x64xf32>
    %cst_88 = arith.constant dense<0.000000e+00> : vector<32x64xf32>
    %150 = tpu.matmul %147, %149, %cst_88 {dimension_numbers = #tpu.dot_dimension_numbers<[1], [0], [0], [1], [0, 0, 1, 1], [], []>} : vector<32x48xf32>, vector<48x64xf32>, vector<32x64xf32> -> vector<32x64xf32>
    %151 = arith.addf %145, %150 : vector<32x64xf32>
    %c0_89 = arith.constant 0 : index
    %c0_90 = arith.constant 0 : index
    %152 = vector.load %arg8[%c0_89, %c0_90] : memref<64x32xf32, #tpu.memory_space<vmem>>, vector<64x32xf32>
    %cst_91 = arith.constant dense<0.000000e+00> : vector<32x32xf32>
    %153 = tpu.matmul %151, %152, %cst_91 {dimension_numbers = #tpu.dot_dimension_numbers<[1], [0], [0], [1], [0, 0, 1, 1], [], []>} : vector<32x64xf32>, vector<64x32xf32>, vector<32x32xf32> -> vector<32x32xf32>
    %c0_92 = arith.constant 0 : index
    %c0_93 = arith.constant 0 : index
    %154 = vector.load %arg9[%c0_92, %c0_93] : memref<64x32xf32, #tpu.memory_space<vmem>>, vector<64x32xf32>
    %cst_94 = arith.constant dense<0.000000e+00> : vector<32x32xf32>
    %155 = tpu.matmul %151, %154, %cst_94 {dimension_numbers = #tpu.dot_dimension_numbers<[1], [0], [0], [1], [0, 0, 1, 1], [], []>} : vector<32x64xf32>, vector<64x32xf32>, vector<32x32xf32> -> vector<32x32xf32>
    %156 = arith.maximumf %153, %155 : vector<32x32xf32>
    %157 = vector.shape_cast %156 : vector<32x32xf32> to vector<16x2x32xf32>
    %158 = vector.extract_strided_slice %157 {offsets = [0, 0, 0], sizes = [16, 1, 32], strides = [1, 1, 1]} : vector<16x2x32xf32> to vector<16x1x32xf32>
    %159 = vector.shape_cast %158 : vector<16x1x32xf32> to vector<16x32xf32>
    %160 = vector.extract_strided_slice %157 {offsets = [0, 1, 0], sizes = [16, 1, 32], strides = [1, 1, 1]} : vector<16x2x32xf32> to vector<16x1x32xf32>
    %161 = vector.shape_cast %160 : vector<16x1x32xf32> to vector<16x32xf32>
    %162 = arith.maximumf %159, %161 : vector<16x32xf32>
    %163 = vector.shape_cast %162 : vector<16x32xf32> to vector<4x2x2x32xf32>
    %164 = vector.extract_strided_slice %163 {offsets = [0, 0, 0, 0], sizes = [4, 1, 2, 32], strides = [1, 1, 1, 1]} : vector<4x2x2x32xf32> to vector<4x1x2x32xf32>
    %165 = vector.shape_cast %164 : vector<4x1x2x32xf32> to vector<4x2x32xf32>
    %166 = vector.extract_strided_slice %163 {offsets = [0, 1, 0, 0], sizes = [4, 1, 2, 32], strides = [1, 1, 1, 1]} : vector<4x2x2x32xf32> to vector<4x1x2x32xf32>
    %167 = vector.shape_cast %166 : vector<4x1x2x32xf32> to vector<4x2x32xf32>
    %168 = arith.maximumf %165, %167 : vector<4x2x32xf32>
    %cst_95 = arith.constant 0.000000e+00 : f32
    %169 = vector.broadcast %cst_95 : f32 to vector<4x2x32xf32>
    %170 = arith.maximumf %168, %169 : vector<4x2x32xf32>
    %171 = vector.shape_cast %170 : vector<4x2x32xf32> to vector<2x4x32xf32>
    %c4_96 = arith.constant 4 : index
    %c0_97 = arith.constant 0 : index
    %172 = vector.load %arg1[%c4_96, %c0_97] : memref<7x128xf32, #tpu.memory_space<vmem>>, vector<1x128xf32>
    %c5_98 = arith.constant 5 : index
    %c0_99 = arith.constant 0 : index
    %173 = vector.load %arg1[%c5_98, %c0_99] : memref<7x128xf32, #tpu.memory_space<vmem>>, vector<1x128xf32>
    %c6_100 = arith.constant 6 : index
    %c0_101 = arith.constant 0 : index
    %174 = vector.load %arg1[%c6_100, %c0_101] : memref<7x128xf32, #tpu.memory_space<vmem>>, vector<1x1xf32>
    %cst_102 = arith.constant 0.000000e+00 : f32
    %175 = vector.broadcast %cst_102 : f32 to vector<2x128xf32>
    %176 = vector.broadcast %172 : vector<1x128xf32> to vector<2x128xf32>
    %177 = arith.addf %175, %176 : vector<2x128xf32>
    %178 = vector.extract_strided_slice %171 {offsets = [0, 0, 0], sizes = [2, 1, 32], strides = [1, 1, 1]} : vector<2x4x32xf32> to vector<2x1x32xf32>
    %179 = vector.shape_cast %178 : vector<2x1x32xf32> to vector<2x32xf32>
    %c0_103 = arith.constant 0 : index
    %c0_104 = arith.constant 0 : index
    %c0_105 = arith.constant 0 : index
    %180 = vector.load %arg10[%c0_103, %c0_104, %c0_105] : memref<4x32x128xf32, #tpu.memory_space<vmem>>, vector<1x32x128xf32>
    %181 = vector.shape_cast %180 : vector<1x32x128xf32> to vector<32x128xf32>
    %cst_106 = arith.constant dense<0.000000e+00> : vector<2x128xf32>
    %182 = tpu.matmul %179, %181, %cst_106 {dimension_numbers = #tpu.dot_dimension_numbers<[1], [0], [0], [1], [0, 0, 1, 1], [], []>} : vector<2x32xf32>, vector<32x128xf32>, vector<2x128xf32> -> vector<2x128xf32>
    %183 = arith.addf %177, %182 : vector<2x128xf32>
    %184 = vector.extract_strided_slice %171 {offsets = [0, 1, 0], sizes = [2, 1, 32], strides = [1, 1, 1]} : vector<2x4x32xf32> to vector<2x1x32xf32>
    %185 = vector.shape_cast %184 : vector<2x1x32xf32> to vector<2x32xf32>
    %c1_107 = arith.constant 1 : index
    %c0_108 = arith.constant 0 : index
    %c0_109 = arith.constant 0 : index
    %186 = vector.load %arg10[%c1_107, %c0_108, %c0_109] : memref<4x32x128xf32, #tpu.memory_space<vmem>>, vector<1x32x128xf32>
    %187 = vector.shape_cast %186 : vector<1x32x128xf32> to vector<32x128xf32>
    %cst_110 = arith.constant dense<0.000000e+00> : vector<2x128xf32>
    %188 = tpu.matmul %185, %187, %cst_110 {dimension_numbers = #tpu.dot_dimension_numbers<[1], [0], [0], [1], [0, 0, 1, 1], [], []>} : vector<2x32xf32>, vector<32x128xf32>, vector<2x128xf32> -> vector<2x128xf32>
    %189 = arith.addf %183, %188 : vector<2x128xf32>
    %190 = vector.extract_strided_slice %171 {offsets = [0, 2, 0], sizes = [2, 1, 32], strides = [1, 1, 1]} : vector<2x4x32xf32> to vector<2x1x32xf32>
    %191 = vector.shape_cast %190 : vector<2x1x32xf32> to vector<2x32xf32>
    %c2_111 = arith.constant 2 : index
    %c0_112 = arith.constant 0 : index
    %c0_113 = arith.constant 0 : index
    %192 = vector.load %arg10[%c2_111, %c0_112, %c0_113] : memref<4x32x128xf32, #tpu.memory_space<vmem>>, vector<1x32x128xf32>
    %193 = vector.shape_cast %192 : vector<1x32x128xf32> to vector<32x128xf32>
    %cst_114 = arith.constant dense<0.000000e+00> : vector<2x128xf32>
    %194 = tpu.matmul %191, %193, %cst_114 {dimension_numbers = #tpu.dot_dimension_numbers<[1], [0], [0], [1], [0, 0, 1, 1], [], []>} : vector<2x32xf32>, vector<32x128xf32>, vector<2x128xf32> -> vector<2x128xf32>
    %195 = arith.addf %189, %194 : vector<2x128xf32>
    %196 = vector.extract_strided_slice %171 {offsets = [0, 3, 0], sizes = [2, 1, 32], strides = [1, 1, 1]} : vector<2x4x32xf32> to vector<2x1x32xf32>
    %197 = vector.shape_cast %196 : vector<2x1x32xf32> to vector<2x32xf32>
    %c3_115 = arith.constant 3 : index
    %c0_116 = arith.constant 0 : index
    %c0_117 = arith.constant 0 : index
    %198 = vector.load %arg10[%c3_115, %c0_116, %c0_117] : memref<4x32x128xf32, #tpu.memory_space<vmem>>, vector<1x32x128xf32>
    %199 = vector.shape_cast %198 : vector<1x32x128xf32> to vector<32x128xf32>
    %cst_118 = arith.constant dense<0.000000e+00> : vector<2x128xf32>
    %200 = tpu.matmul %197, %199, %cst_118 {dimension_numbers = #tpu.dot_dimension_numbers<[1], [0], [0], [1], [0, 0, 1, 1], [], []>} : vector<2x32xf32>, vector<32x128xf32>, vector<2x128xf32> -> vector<2x128xf32>
    %201 = arith.addf %195, %200 : vector<2x128xf32>
    %cst_119 = arith.constant 0.000000e+00 : f32
    %202 = vector.broadcast %cst_119 : f32 to vector<2x128xf32>
    %203 = arith.maximumf %201, %202 : vector<2x128xf32>
    %c0_120 = arith.constant 0 : index
    %c0_121 = arith.constant 0 : index
    %204 = vector.load %arg11[%c0_120, %c0_121] : memref<128x128xf32, #tpu.memory_space<vmem>>, vector<128x128xf32>
    %cst_122 = arith.constant dense<0.000000e+00> : vector<2x128xf32>
    %205 = tpu.matmul %203, %204, %cst_122 {dimension_numbers = #tpu.dot_dimension_numbers<[1], [0], [0], [1], [0, 0, 1, 1], [], []>} : vector<2x128xf32>, vector<128x128xf32>, vector<2x128xf32> -> vector<2x128xf32>
    %206 = vector.broadcast %173 : vector<1x128xf32> to vector<2x128xf32>
    %207 = arith.addf %205, %206 : vector<2x128xf32>
    %cst_123 = arith.constant 0.000000e+00 : f32
    %208 = vector.broadcast %cst_123 : f32 to vector<2x128xf32>
    %209 = arith.maximumf %207, %208 : vector<2x128xf32>
    %c0_124 = arith.constant 0 : index
    %c0_125 = arith.constant 0 : index
    %210 = vector.load %arg12[%c0_124, %c0_125] : memref<128x1xf32, #tpu.memory_space<vmem>>, vector<128x1xf32>
    %cst_126 = arith.constant dense<0.000000e+00> : vector<2x1xf32>
    %211 = tpu.matmul %209, %210, %cst_126 {dimension_numbers = #tpu.dot_dimension_numbers<[1], [0], [0], [1], [0, 0, 1, 1], [], []>} : vector<2x128xf32>, vector<128x1xf32>, vector<2x1xf32> -> vector<2x1xf32>
    %212 = vector.broadcast %174 : vector<1x1xf32> to vector<2x1xf32>
    %213 = arith.addf %211, %212 : vector<2x1xf32>
    %cst_127 = arith.constant 0.000000e+00 : f32
    %214 = vector.broadcast %cst_127 : f32 to vector<2x1xf32>
    %215 = arith.subf %214, %213 : vector<2x1xf32>
    %216 = math.exp %215 : vector<2x1xf32>
    %cst_128 = arith.constant 1.000000e+00 : f32
    %217 = vector.broadcast %cst_128 : f32 to vector<2x1xf32>
    %218 = arith.addf %217, %216 : vector<2x1xf32>
    %cst_129 = arith.constant 1.000000e+00 : f32
    %219 = vector.broadcast %cst_129 : f32 to vector<2x1xf32>
    %220 = arith.divf %219, %218 : vector<2x1xf32>
    %c0_130 = arith.constant 0 : index
    %c0_131 = arith.constant 0 : index
    %221 = vector.load %arg13[%c0_130, %c0_131] : memref<2x1xf32, #tpu.memory_space<vmem>>, vector<2x1xf32>
    tpu.vector_store %arg13[%c0_130, %c0_131], %220 {strides = array<i32>} : memref<2x1xf32, #tpu.memory_space<vmem>>, vector<2x1xf32>,
    return
  }
}

</mosaic_0001>

<bundles_post_ra>
// kernel: tpu_custom_call.1
= control target key start
LH: loop header
LB: loop body
LE: loop exit
PB: predicated region body
PF: predicated region fallthrough
CT: control target
= control target key end

     0   :  { %18 = vsyncpa [#allocation3], 0  ;;  %s23502_s0 = inlined_call_operand.hbm [shape: f32[392,112], index: 0, kind: input, shape index: {}]   ;;  %s23503_s1 = inlined_call_operand.hbm [shape: f32[7,128], index: 1, kind: input, shape index: {}]   ;;  %s23504_s2 = inlined_call_operand.vmem [shape: f32[112,56], index: 2, kind: input, shape index: {}]   ;;  %s23505_s3 = inlined_call_operand.hbm [shape: f32[56,56], index: 3, kind: input, shape index: {}]   ;;  %s23506_s4 = inlined_call_operand.vmem [shape: f32[9,56,96], index: 4, kind: input, shape index: {}]   ;;  %s23507_s5 = inlined_call_operand.vmem [shape: f32[96,48], index: 5, kind: input, shape index: {}]   ;;  %s23508_s6 = inlined_call_operand.vmem [shape: f32[96,48], index: 6, kind: input, shape index: {}]   ;;  %s23509_s7 = inlined_call_operand.hbm [shape: f32[9,48,64], index: 7, kind: input, shape index: {}]   ;;  %s23510_s8 = inlined_call_operand.vmem [shape: f32[64,32], index: 8, kind: input, shape index: {}]   ;;  %s23511_s9 = inlined_call_operand.vmem [shape: f32[64,32], index: 9, kind: input, shape index: {}]   ;;  %s23512_s10 = inlined_call_operand.vmem [shape: f32[4,32,128], index: 10, kind: input, shape index: {}]   ;;  %s23513_s11 = inlined_call_operand.vmem [shape: f32[128,128], index: 11, kind: input, shape index: {}]   ;;  %s23514_s12 = inlined_call_operand.vmem [shape: f32[128,1], index: 12, kind: input, shape index: {}]   ;;  %s23515_s13 = inlined_call_operand.vmem [shape: f32[2,1], index: 13, kind: output, shape index: {}]  }
   0x1   :  { %19 = vsyncpa [#allocation5], 0 }
   0x2   :  { %20 = vsyncpa [#allocation8], 0  ;;  %s16426_s25 = smov [#allocation4]   ;;  %s16427_s27 = smov [#allocation2]  }
   0x3   :  { %s39_s26 = sshll.u32 %s16426_s25, 4  ;;  %s26_s28 = sshll.u32 %s16427_s27, 4  ;;  %s40_s26 = int_to_ptr.vmem [resolvable:$true] %s39_s26  ;;  %s16506_s28 = int_to_ptr.vmem [resolvable:$true] %s26_s28 }
   0x4   :  { %s16332_s14 = scalar_lea.hbm %s23503_s1, 128 }
   0x5   :  { %p16333_p0 = scmp.ne.s32.totalorder %s23503_s1, %s16332_s14  ;;  %p16336_p1 = scmp.lt.u32.totalorder %s16332_s14, %s23503_s1 }
   0x7   :  { %p16338_p2 = pnand %p16336_p1, %p16333_p0 }
   0x9   :  { %16341 = shalt.err (!%p16338_p2)
}
   0xa   :  { %s16342_s19 = scalar_lea.vmem %s40_s26, 128  ;;  %p16347_p4 = scmp.lt.s32.totalorder %s40_s26, %s40_s26 }
   0xb   :  { %p16343_p3 = scmp.ne.s32.totalorder %s40_s26, %s16342_s19  ;;  %p16348_p5 = scmp.lt.s32.totalorder %s16342_s19, %s16342_s19 }
   0xd   :  { %p16349_p6 = por %p16348_p5, %p16347_p4 }
   0xf   :  { %p16350_p7 = pnand %p16349_p6, %p16343_p3 }
  0x11   :  { %16353 = shalt.err (!%p16350_p7)
}
  0x12   :  { %42 = dma.hbm_to_vmem [thread:$0]  %s23503_s1, 128, %s40_s26, [#allocation5]  }
  0x13   :  { %s16354_s24 = scalar_lea.hbm %s23502_s0, 6272 }
  0x14   :  { %p16355_p8 = scmp.ne.s32.totalorder %s23502_s0, %s16354_s24  ;;  %p16358_p9 = scmp.lt.u32.totalorder %s16354_s24, %s23502_s0 }
  0x16   :  { %p16360_p10 = pnand %p16358_p9, %p16355_p8 }
  0x18   :  { %16363 = shalt.err (!%p16360_p10)
}
  0x19   :  { %s16364_s14 = scalar_lea.vmem %s16506_s28, 6272  ;;  %p16369_p12 = scmp.lt.s32.totalorder %s16506_s28, %s16506_s28 }
  0x1a   :  { %p16365_p11 = scmp.ne.s32.totalorder %s16506_s28, %s16364_s14  ;;  %p16370_p13 = scmp.lt.s32.totalorder %s16364_s14, %s16364_s14 }
  0x1c   :  { %p16371_p0 = por %p16370_p13, %p16369_p12 }
  0x1e   :  { %p16372_p1 = pnand %p16371_p0, %p16365_p11 }
  0x20   :  { %16375 = shalt.err (!%p16372_p1)
}
  0x21   :  { %s16428_s1 = smov 128   ;;  %s16429_s26 = smov 8  }
  0x22   :  { %32 = dma.hbm_to_vmem [thread:$0]  %s23502_s0, 6272, %s16506_s28, [#allocation3], %s16428_s1, %s16428_s1, %s16429_s26  }
  0x23   :  { %s16430_s17 = smov [#allocation6]   ;;  %s16431_s19 = smov [#allocation7]  }
  0x24   :  { %s50_s18 = sshll.u32 %s16430_s17, 4  ;;  %s68_s20 = sshll.u32 %s16431_s19, 4  ;;  %s51_s18 = int_to_ptr.vmem [resolvable:$true] %s50_s18  ;;  %s16540_s20 = int_to_ptr.vmem [resolvable:$true] %s68_s20 }
  0x25   :  { %s16376_s23 = scalar_lea.hbm %s23505_s3, 896 }
  0x26   :  { %p16377_p2 = scmp.ne.s32.totalorder %s23505_s3, %s16376_s23  ;;  %p16380_p3 = scmp.lt.u32.totalorder %s16376_s23, %s23505_s3 }
  0x28   :  { %p16382_p4 = pnand %p16380_p3, %p16377_p2 }
  0x2a   :  { %16385 = shalt.err (!%p16382_p4)
}
  0x2b   :  { %s16386_s0 = scalar_lea.vmem %s51_s18, 896  ;;  %p16391_p6 = scmp.lt.s32.totalorder %s51_s18, %s51_s18 }
  0x2c   :  { %p16387_p5 = scmp.ne.s32.totalorder %s51_s18, %s16386_s0  ;;  %p16392_p7 = scmp.lt.s32.totalorder %s16386_s0, %s16386_s0 }
  0x2e   :  { %p16393_p8 = por %p16392_p7, %p16391_p6 }
  0x30   :  { %p16394_p9 = pnand %p16393_p8, %p16387_p5 }
  0x32   :  { %16397 = shalt.err (!%p16394_p9)
}
  0x33   :  { %56 = dma.hbm_to_vmem [thread:$0]  %s23505_s3, 896, %s51_s18, [#allocation5], %s16428_s1, %s16428_s1, %s16429_s26  }
  0x34   :  { %s16398_s16 = scalar_lea.hbm %s23509_s7, 6912 }
  0x35   :  { %p16399_p10 = scmp.ne.s32.totalorder %s23509_s7, %s16398_s16  ;;  %p16402_p11 = scmp.lt.u32.totalorder %s16398_s16, %s23509_s7 }
  0x37   :  { %p16404_p12 = pnand %p16402_p11, %p16399_p10 }
  0x39   :  { %16407 = shalt.err (!%p16404_p12)
}
  0x3a   :  { %s16408_s23 = scalar_lea.vmem %s16540_s20, 6912  ;;  %p16413_p0 = scmp.lt.s32.totalorder %s16540_s20, %s16540_s20 }
  0x3b   :  { %p16409_p13 = scmp.ne.s32.totalorder %s16540_s20, %s16408_s23  ;;  %p16414_p1 = scmp.lt.s32.totalorder %s16408_s23, %s16408_s23 }
  0x3d   :  { %p16415_p2 = por %p16414_p1, %p16413_p0 }
  0x3f   :  { %p16416_p3 = pnand %p16415_p2, %p16409_p13 }
  0x41   :  { %16419 = shalt.err (!%p16416_p3)
}
  0x42   :  { %74 = dma.hbm_to_vmem [thread:$0]  %s23509_s7, 6912, %s16540_s20, [#allocation8], %s16428_s1, %s16428_s1, %s16429_s26  }
  0x43   :  { %16420 = dma.done.wait [#allocation3], 6272  }
  0x44   :  { %16421 = vsyncadd [#allocation3], 4294961024 }
  0x45   :  { %16422 = dma.done.wait [#allocation5], 1024  }
  0x46   :  { %16423 = vsyncadd [#allocation5], 4294966272 }
  0x47   :  { %16424 = dma.done.wait [#allocation8], 6912  }
  0x48   :  { %16425 = vsyncadd [#allocation8], 4294960384  ;;  %v23518_v0 = vmov 0.0|0.0   ;;  %vm16433_vm0 = vmmov 0   ;;  %v23516_v1 = vmov 0.0   ;;  %v148_v2 = vld [vmem:[%s23504_s2] sm:$0xff] }
  0x49   :  { %15542 = vmatprep.subr.bf16.mxu0 %v23518_v0  ;;  %14146 = vmatprep.mubr.msk.f32.mxu0 %vm16433_vm0, %v23516_v1  ;;  %v149_v3 = vld [vmem:[%s23504_s2 + $0x8] sm:$0xff]  ;;  %v150_v4 = vld [vmem:[%s23504_s2 + $0x10] sm:$0xff]  ;;  %v151_v6 = vld [vmem:[%s23504_s2 + $0x18] sm:$0xff]  ;;  %vm166_vm1 = vcmask 916480   ;;  %vm684_vm2 = vcmask 457728   ;;  %vm3051_vm3 = vcmask 1040384  }
  0x4a   :  { %15940 = vmatprep.subr.bf16.mxu1 %v23518_v0  ;;  %14403 = vmatprep.mubr.msk.f32.mxu1 %vm16433_vm0, %v23516_v1  ;;  %v15543_v5 = vpack.c.bf16 %v149_v3, %v148_v2  ;;  %v15546_v7 = vpack.c.bf16 %v151_v6, %v150_v4  ;;  %v152_v8 = vld [vmem:[%s23504_s2 + $0x20] sm:$0xff]  ;;  %v153_v9 = vld [vmem:[%s23504_s2 + $0x28] sm:$0xff]  ;;  %v154_v11 = vld [vmem:[%s23504_s2 + $0x30] sm:$0xff]  ;;  %vm3052_vm4 = vcmask 1042434   ;;  %vm3054_vm6 = vcmask 1044484  }
  0x4b   :  { %v15549_v10 = vpack.c.bf16 %v153_v9, %v152_v8  ;;  %v155_v12 = vld [vmem:[%s23504_s2 + $0x38] sm:$0xff]  ;;  %v673_v13 = vld [vmem:[#allocation6] sm:$0xff]  ;;  %v156_v17 = vld [vmem:[%s23504_s2 + $0x40] sm:$0xff]  ;;  %vm3056_vm8 = vcmask 1046534   ;;  %vm7948_vm10 = vcmask 785408   ;;  %vm10279_vm11 = vcmask 1041409  }
  0x4c   :  { %15544 = vmatpush3.bf16.msra.mxu0 %v15543_v5  ;;  %v674_v14 = vld [vmem:[#allocation6 + $0x8] sm:$0xff]  ;;  %v15552_v16 = vpack.c.bf16 %v155_v12, %v154_v11  ;;  %v157_v18 = vld [vmem:[%s23504_s2 + $0x48] sm:$0xff]  ;;  %v675_v19 = vld [vmem:[#allocation6 + $0x10] sm:$0xff]  ;;  %vm10282_vm12 = vcmask 1043459   ;;  %vm10285_vm13 = vcmask 1045509   ;;  %vm10311_vm14 = vcmask 392192  }
  0x4d   :  { %15545 = vmatprep.subr.bf16.mxu0 %v23518_v0  ;;  %v15564_v15 = vpack.c.bf16 %v674_v14, %v673_v13  ;;  %v676_v20 = vld [vmem:[#allocation6 + $0x18] sm:$0xff]  ;;  %v15555_v21 = vpack.c.bf16 %v157_v18, %v156_v17  ;;  %v158_v23 = vld [vmem:[%s23504_s2 + $0x50] sm:$0xff]  ;;  %v159_v24 = vld [vmem:[%s23504_s2 + $0x58] sm:$0xff]  ;;  %vm10288_vm15 = vcmask 1047559  }
  0x4e   :  { %v15567_v22 = vpack.c.bf16 %v676_v20, %v675_v19  ;;  %v15558_v25 = vpack.c.bf16 %v159_v24, %v158_v23  ;;  %v160_v26 = vld [vmem:[%s23504_s2 + $0x60] sm:$0xff]  ;;  %v161_v27 = vld [vmem:[%s23504_s2 + $0x68] sm:$0xff]  ;;  %v99_v31 = vld [vmem:[#allocation2 + $0x10] sm:$0xff] }
  0x4f   :  { %15944 = vmatpush3.bf16.msra.mxu1 %v15564_v15  ;;  %v15561_v28 = vpack.c.bf16 %v161_v27, %v160_v26  ;;  %v97_v29 = vld [vmem:[#allocation2] sm:$0xff]  ;;  %v98_v30 = vld [vmem:[#allocation2 + $0x8] sm:$0xff]  ;;  %v100_v32 = vld [vmem:[#allocation2 + $0x18] sm:$0xff] }
  0x50   :  { %15547 = vmatpush3.bf16.msra.mxu0 %v15546_v7  ;;  %15941 = vmatprep.subr.bf16.mxu1 %v23518_v0  ;;  %v101_v33 = vld [vmem:[#allocation2 + $0x20] sm:$0xff]  ;;  %v102_v34 = vld [vmem:[#allocation2 + $0x28] sm:$0xff]  ;;  %v677_v35 = vld [vmem:[#allocation6 + $0x20] sm:$0xff] }
  0x51   :  { %15548 = vmatprep.subr.bf16.mxu0 %v23518_v0  ;;  %v678_v36 = vld [vmem:[#allocation6 + $0x28] sm:$0xff]  ;;  %v103_v37 = vld [vmem:[#allocation2 + $0x30] sm:$0xff]  ;;  %v105_v40 = vld [vmem:[#allocation2 + $0x40] sm:$0xff] }
  0x52   :  { %v15570_v38 = vpack.c.bf16 %v678_v36, %v677_v35  ;;  %v104_v39 = vld [vmem:[#allocation2 + $0x38] sm:$0xff]  ;;  %v106_v41 = vld [vmem:[#allocation2 + $0x48] sm:$0xff]  ;;  %v107_v42 = vld [vmem:[#allocation2 + $0x50] sm:$0xff] }
  0x53   :  { %15945 = vmatpush3.bf16.msra.mxu1 %v15567_v22  ;;  %v108_v43 = vld [vmem:[#allocation2 + $0x58] sm:$0xff]  ;;  %v109_v44 = vld [vmem:[#allocation2 + $0x60] sm:$0xff]  ;;  %v110_v45 = vld [vmem:[#allocation2 + $0x68] sm:$0xff] }
  0x54   :  { %15550 = vmatpush3.bf16.msra.mxu0 %v15549_v10  ;;  %15942 = vmatprep.subr.bf16.mxu1 %v23518_v0  ;;  %v111_v46 = vld [vmem:[#allocation2 + $0x70] sm:$0xff]  ;;  %v679_v47 = vld [vmem:[#allocation6 + $0x30] sm:$0xff]  ;;  %v112_v48 = vld [vmem:[#allocation2 + $0x78] sm:$0xff] }
  0x55   :  { %15551 = vmatprep.subr.bf16.mxu0 %v23518_v0  ;;  %v113_v49 = vld [vmem:[#allocation2 + $0x80] sm:$0xff]  ;;  %v114_v50 = vld [vmem:[#allocation2 + $0x88] sm:$0xff]  ;;  %v115_v51 = vld [vmem:[#allocation2 + $0x90] sm:$0xff] }
  0x56   :  { %v116_v52 = vld [vmem:[#allocation2 + $0x98] sm:$0xff]  ;;  %v117_v53 = vld [vmem:[#allocation2 + $0xa0] sm:$0xff]  ;;  %v118_v54 = vld [vmem:[#allocation2 + $0xa8] sm:$0xff] }
  0x57   :  { %15946 = vmatpush3.bf16.msra.mxu1 %v15570_v38  ;;  %v119_v55 = vld [vmem:[#allocation2 + $0xb0] sm:$0xff]  ;;  %v120_v56 = vld [vmem:[#allocation2 + $0xb8] sm:$0xff]  ;;  %v121_v57 = vld [vmem:[#allocation2 + $0xc0] sm:$0xff] }
  0x58   :  { %15553 = vmatpush3.bf16.msra.mxu0 %v15552_v16  ;;  %15943 = vmatprep.subr.mxu1 %v23516_v1  ;;  %v122_v58 = vld [vmem:[#allocation2 + $0xc8] sm:$0xff]  ;;  %v123_v59 = vld [vmem:[#allocation2 + $0xd0] sm:$0xff]  ;;  %v124_v60 = vld [vmem:[#allocation2 + $0xd8] sm:$0xff] }
  0x59   :  { %15554 = vmatprep.subr.bf16.mxu0 %v23518_v0  ;;  %v125_v61 = vld [vmem:[#allocation2 + $0xe0] sm:$0xff]  ;;  %v126_v62 = vld [vmem:[#allocation2 + $0xe8] sm:$0xff]  ;;  %v127_v63 = vld [vmem:[#allocation2 + $0xf0] sm:$0xff] }
  0x5a   :  { %v128_v2 = vld [vmem:[#allocation2 + $0xf8] sm:$0xff]  ;;  %v129_v3 = vld [vmem:[#allocation2 + $0x100] sm:$0xff]  ;;  %v130_v4 = vld [vmem:[#allocation2 + $0x108] sm:$0xff] }
  0x5b   :  { %15947 = vmatpush3.msra.mxu1 %v679_v47  ;;  %v131_v5 = vld [vmem:[#allocation2 + $0x110] sm:$0xff]  ;;  %v132_v6 = vld [vmem:[#allocation2 + $0x118] sm:$0xff]  ;;  %v133_v7 = vld [vmem:[#allocation2 + $0x120] sm:$0xff] }
  0x5c   :  { %15556 = vmatpush3.bf16.msra.mxu0 %v15555_v21  ;;  %v134_v8 = vld [vmem:[#allocation2 + $0x128] sm:$0xff]  ;;  %v135_v9 = vld [vmem:[#allocation2 + $0x130] sm:$0xff]  ;;  %v136_v10 = vld [vmem:[#allocation2 + $0x138] sm:$0xff] }
  0x5d   :  { %15557 = vmatprep.subr.bf16.mxu0 %v23518_v0  ;;  %v137_v11 = vld [vmem:[#allocation2 + $0x140] sm:$0xff]  ;;  %v138_v12 = vld [vmem:[#allocation2 + $0x148] sm:$0xff]  ;;  %v139_v13 = vld [vmem:[#allocation2 + $0x150] sm:$0xff] }
  0x5e   :  { %v140_v14 = vld [vmem:[#allocation2 + $0x158] sm:$0xff]  ;;  %v142_v16 = vld [vmem:[#allocation2 + $0x168] sm:$0xff]  ;;  %v143_v17 = vld [vmem:[#allocation2 + $0x170] sm:$0xff] }
  0x5f   :  { %v144_v18 = vld [vmem:[#allocation2 + $0x178] sm:$0xff]  ;;  %v145_v19 = vld [vmem:[#allocation2 + $0x180] sm:$0xff]  ;;  %v16785_v20 = vld [vmem:[#allocation4] ss:$0 sm:$0xff] }
  0x60   :  { %15559 = vmatpush3.bf16.msra.mxu0 %v15558_v25  ;;  %vm3053_vm5 = vmor %vm3051_vm3, %vm3052_vm4 }
  0x61   :  { %15560 = vmatprep.subr.bf16.mxu0 %v23518_v0  ;;  %vm3055_vm7 = vmor %vm3053_vm5, %vm3054_vm6 }
  0x62   :  { %vm17044_vm9 = vmor %vm3055_vm7, %vm3056_vm8 }
  0x64   :  { %15562 = vmatpush3.bf16.msra.mxu0 %v15561_v28 }
  0x65   :  { %15563 = vmatprep.subr.bf16.mxu0 %v23518_v0 }
  0x67   :  { %14147 = vmatmul.mubr.msk.f32.vlgmr.msra.gmra.mrb[0].mxu0 %vm166_vm1, %v97_v29 }
  0x68   :  { %14149 = vmatprep.mubr.msk.f32.mxu0 %vm16433_vm0, %v23516_v1  ;;  %15565 = vmatpush3.bf16.msra.mxu0 %v15564_v15  ;;  %v141_v15 = vld [vmem:[#allocation2 + $0x160] sm:$0xff] }
  0x69   :  { %15566 = vmatprep.subr.bf16.mxu0 %v23518_v0 }
  0x6b   :  { %14150 = vmatmul.mubr.msk.f32.gmra.mrb[2].mxu0 %vm166_vm1, %v98_v30 }
  0x6c   :  { %14152 = vmatprep.mubr.msk.f32.mxu0 %vm16433_vm0, %v23516_v1  ;;  %15568 = vmatpush3.bf16.msra.mxu0 %v15567_v22 }
  0x6d   :  { %15569 = vmatprep.subr.bf16.mxu0 %v23518_v0 }
  0x6f   :  { %14153 = vmatmul.mubr.msk.f32.gmra.mrb[4].mxu0 %vm166_vm1, %v99_v31 }
  0x70   :  { %14155 = vmatprep.mubr.msk.f32.mxu0 %vm16433_vm0, %v23516_v1  ;;  %15571 = vmatpush3.bf16.msra.mxu0 %v15570_v38 }
  0x71   :  { %14305 = vmatprep.subr.mxu0 %v23516_v1 }
  0x73   :  { %14156 = vmatmul.mubr.msk.f32.gmra.mrb[6].mxu0 %vm166_vm1, %v100_v32 }
  0x74   :  { %14158 = vmatprep.mubr.msk.f32.mxu0 %vm16433_vm0, %v23516_v1  ;;  %14306 = vmatpush3.msra.mxu0 %v679_v47 }
  0x77   :  { %14159 = vmatmul.mubr.msk.f32.gmra.mrb[8].mxu0 %vm166_vm1, %v101_v33 }
  0x78   :  { %14161 = vmatprep.mubr.msk.f32.mxu0 %vm16433_vm0, %v23516_v1 }
  0x7b   :  { %14162 = vmatmul.mubr.msk.f32.gmra.mrb[10].mxu0 %vm166_vm1, %v102_v34 }
  0x7c   :  { %14164 = vmatprep.mubr.msk.f32.mxu0 %vm16433_vm0, %v23516_v1 }
  0x7f   :  { %14165 = vmatmul.mubr.msk.f32.gmra.mrb[12].mxu0 %vm166_vm1, %v103_v37 }
  0x80   :  { %14167 = vmatprep.mubr.msk.f32.mxu0 %vm16433_vm0, %v23516_v1 }
  0x83   :  { %14168 = vmatmul.mubr.msk.f32.gmra.mrb[14].mxu0 %vm166_vm1, %v104_v39 }
  0x84   :  { %14170 = vmatprep.mubr.msk.f32.mxu0 %vm16433_vm0, %v23516_v1 }
  0x87   :  { %14171 = vmatmul.mubr.msk.f32.gmra.mrb[16].mxu0 %vm166_vm1, %v105_v40 }
  0x88   :  { %14173 = vmatprep.mubr.msk.f32.mxu0 %vm16433_vm0, %v23516_v1 }
  0x8b   :  { %14174 = vmatmul.mubr.msk.f32.gmra.mrb[18].mxu0 %vm166_vm1, %v106_v41 }
  0x8c   :  { %14176 = vmatprep.mubr.msk.f32.mxu0 %vm16433_vm0, %v23516_v1 }
  0x8f   :  { %14177 = vmatmul.mubr.msk.f32.gmra.mrb[20].mxu0 %vm166_vm1, %v107_v42 }
  0x90   :  { %14179 = vmatprep.mubr.msk.f32.mxu0 %vm16433_vm0, %v23516_v1 }
  0x93   :  { %14180 = vmatmul.mubr.msk.f32.gmra.mrb[22].mxu0 %vm166_vm1, %v108_v43 }
  0x94   :  { %14182 = vmatprep.mubr.msk.f32.mxu0 %vm16433_vm0, %v23516_v1 }
  0x97   :  { %14183 = vmatmul.mubr.msk.f32.gmra.mrb[24].mxu0 %vm166_vm1, %v109_v44 }
  0x98   :  { %14185 = vmatprep.mubr.msk.f32.mxu0 %vm16433_vm0, %v23516_v1 }
  0x9b   :  { %14186 = vmatmul.mubr.msk.f32.gmra.mrb[26].mxu0 %vm166_vm1, %v110_v45 }
  0x9c   :  { %14188 = vmatprep.mubr.msk.f32.mxu0 %vm16433_vm0, %v23516_v1 }
  0x9f   :  { %14189 = vmatmul.mubr.msk.f32.gmra.mrb[28].mxu0 %vm166_vm1, %v111_v46 }
  0xa0   :  { %14191 = vmatprep.mubr.msk.f32.mxu0 %vm16433_vm0, %v23516_v1 }
  0xa3   :  { %14192 = vmatmul.mubr.msk.f32.gmra.mrb[30].mxu0 %vm166_vm1, %v112_v48 }
  0xa4   :  { %14194 = vmatprep.mubr.msk.f32.mxu0 %vm16433_vm0, %v23516_v1 }
  0xa7   :  { %14195 = vmatmul.mubr.msk.f32.gmra.mrb[32].mxu0 %vm166_vm1, %v113_v49 }
  0xa8   :  { %14197 = vmatprep.mubr.msk.f32.mxu0 %vm16433_vm0, %v23516_v1 }
  0xab   :  { %14198 = vmatmul.mubr.msk.f32.gmra.mrb[34].mxu0 %vm166_vm1, %v114_v50 }
  0xac   :  { %14200 = vmatprep.mubr.msk.f32.mxu0 %vm16433_vm0, %v23516_v1 }
  0xaf   :  { %14201 = vmatmul.mubr.msk.f32.gmra.mrb[36].mxu0 %vm166_vm1, %v115_v51 }
  0xb0   :  { %14203 = vmatprep.mubr.msk.f32.mxu0 %vm16433_vm0, %v23516_v1 }
  0xb3   :  { %14204 = vmatmul.mubr.msk.f32.gmra.mrb[38].mxu0 %vm166_vm1, %v116_v52 }
  0xb4   :  { %14206 = vmatprep.mubr.msk.f32.mxu0 %vm16433_vm0, %v23516_v1 }
  0xb7   :  { %14207 = vmatmul.mubr.msk.f32.gmra.mrb[40].mxu0 %vm166_vm1, %v117_v53 }
  0xb8   :  { %14209 = vmatprep.mubr.msk.f32.mxu0 %vm16433_vm0, %v23516_v1 }
  0xbb   :  { %14210 = vmatmul.mubr.msk.f32.gmra.mrb[42].mxu0 %vm166_vm1, %v118_v54 }
  0xbc   :  { %14212 = vmatprep.mubr.msk.f32.mxu0 %vm16433_vm0, %v23516_v1 }
  0xbf   :  { %14213 = vmatmul.mubr.msk.f32.gmra.mrb[44].mxu0 %vm166_vm1, %v119_v55 }
  0xc0   :  { %14215 = vmatprep.mubr.msk.f32.mxu0 %vm16433_vm0, %v23516_v1 }
  0xc3   :  { %14216 = vmatmul.mubr.msk.f32.gmra.mrb[46].mxu0 %vm166_vm1, %v120_v56 }
  0xc4   :  { %14218 = vmatprep.mubr.msk.f32.mxu0 %vm16433_vm0, %v23516_v1 }
  0xc7   :  { %14219 = vmatmul.mubr.msk.f32.gmra.mrb[48].mxu0 %vm166_vm1, %v121_v57 }
  0xc8   :  { %14221 = vmatprep.mubr.msk.f32.mxu0 %vm16433_vm0, %v23516_v1 }
  0xcb   :  { %14222 = vmatmul.mubr.msk.f32.gmra.mrb[50].mxu0 %vm166_vm1, %v122_v58 }
  0xcc   :  { %14224 = vmatprep.mubr.msk.f32.mxu0 %vm16433_vm0, %v23516_v1 }
  0xcf   :  { %14225 = vmatmul.mubr.msk.f32.gmra.mrb[52].mxu0 %vm166_vm1, %v123_v59 }
  0xd0   :  { %14227 = vmatprep.mubr.msk.f32.mxu0 %vm16433_vm0, %v23516_v1 }
  0xd3   :  { %14228 = vmatmul.mubr.msk.f32.gmra.mrb[54].mxu0 %vm166_vm1, %v124_v60 }
  0xd4   :  { %14230 = vmatprep.mubr.msk.f32.mxu0 %vm16433_vm0, %v23516_v1 }
  0xd7   :  { %14231 = vmatmul.mubr.msk.f32.gmra.mrb[56].mxu0 %vm166_vm1, %v125_v61 }
  0xd8   :  { %14233 = vmatprep.mubr.msk.f32.mxu0 %vm16433_vm0, %v23516_v1 }
  0xdb   :  { %14234 = vmatmul.mubr.msk.f32.gmra.mrb[58].mxu0 %vm166_vm1, %v126_v62 }
  0xdc   :  { %14236 = vmatprep.mubr.msk.f32.mxu0 %vm16433_vm0, %v23516_v1 }
  0xdf   :  { %14237 = vmatmul.mubr.msk.f32.gmra.mrb[60].mxu0 %vm166_vm1, %v127_v63 }
  0xe0   :  { %14239 = vmatprep.mubr.msk.f32.mxu0 %vm16433_vm0, %v23516_v1 }
  0xe3   :  { %14240 = vmatmul.mubr.msk.f32.gmra.mrb[62].mxu0 %vm166_vm1, %v128_v2 }
  0xe4   :  { %14242 = vmatprep.mubr.msk.f32.mxu0 %vm16433_vm0, %v23516_v1 }
  0xe7   :  { %14243 = vmatmul.mubr.msk.f32.gmra.mrb[64].mxu0 %vm166_vm1, %v129_v3 }
  0xe8   :  { %14245 = vmatprep.mubr.msk.f32.mxu0 %vm16433_vm0, %v23516_v1 }
  0xeb   :  { %14246 = vmatmul.mubr.msk.f32.gmra.mrb[66].mxu0 %vm166_vm1, %v130_v4 }
  0xec   :  { %14248 = vmatprep.mubr.msk.f32.mxu0 %vm16433_vm0, %v23516_v1 }
  0xef   :  { %14249 = vmatmul.mubr.msk.f32.gmra.mrb[68].mxu0 %vm166_vm1, %v131_v5 }
  0xf0   :  { %14251 = vmatprep.mubr.msk.f32.mxu0 %vm16433_vm0, %v23516_v1 }
  0xf3   :  { %14252 = vmatmul.mubr.msk.f32.gmra.mrb[70].mxu0 %vm166_vm1, %v132_v6 }
  0xf4   :  { %14254 = vmatprep.mubr.msk.f32.mxu0 %vm16433_vm0, %v23516_v1 }
  0xf7   :  { %14255 = vmatmul.mubr.msk.f32.gmra.mrb[72].mxu0 %vm166_vm1, %v133_v7 }
  0xf8   :  { %14257 = vmatprep.mubr.msk.f32.mxu0 %vm16433_vm0, %v23516_v1 }
  0xfb   :  { %14258 = vmatmul.mubr.msk.f32.gmra.mrb[74].mxu0 %vm166_vm1, %v134_v8 }
  0xfc   :  { %14260 = vmatprep.mubr.msk.f32.mxu0 %vm16433_vm0, %v23516_v1 }
  0xff   :  { %14261 = vmatmul.mubr.msk.f32.gmra.mrb[76].mxu0 %vm166_vm1, %v135_v9 }
 0x100   :  { %14263 = vmatprep.mubr.msk.f32.mxu0 %vm16433_vm0, %v23516_v1 }
 0x103   :  { %14264 = vmatmul.mubr.msk.f32.gmra.mrb[78].mxu0 %vm166_vm1, %v136_v10 }
 0x104   :  { %14266 = vmatprep.mubr.msk.f32.mxu0 %vm16433_vm0, %v23516_v1 }
 0x107   :  { %14267 = vmatmul.mubr.msk.f32.gmra.mrb[80].mxu0 %vm166_vm1, %v137_v11 }
 0x108   :  { %14269 = vmatprep.mubr.msk.f32.mxu0 %vm16433_vm0, %v23516_v1 }
 0x10b   :  { %14270 = vmatmul.mubr.msk.f32.gmra.mrb[82].mxu0 %vm166_vm1, %v138_v12 }
 0x10c   :  { %14272 = vmatprep.mubr.msk.f32.mxu0 %vm16433_vm0, %v23516_v1 }
 0x10f   :  { %14273 = vmatmul.mubr.msk.f32.gmra.mrb[84].mxu0 %vm166_vm1, %v139_v13 }
 0x110   :  { %14275 = vmatprep.mubr.msk.f32.mxu0 %vm16433_vm0, %v23516_v1 }
 0x113   :  { %14276 = vmatmul.mubr.msk.f32.gmra.mrb[86].mxu0 %vm166_vm1, %v140_v14 }
 0x114   :  { %14278 = vmatprep.mubr.msk.f32.mxu0 %vm16433_vm0, %v23516_v1 }
 0x117   :  { %14279 = vmatmul.mubr.msk.f32.gmra.mrb[88].mxu0 %vm166_vm1, %v141_v15 }
 0x118   :  { %14281 = vmatprep.mubr.msk.f32.mxu0 %vm16433_vm0, %v23516_v1 }
 0x11b   :  { %14282 = vmatmul.mubr.msk.f32.gmra.mrb[90].mxu0 %vm166_vm1, %v142_v16 }
 0x11c   :  { %14284 = vmatprep.mubr.msk.f32.mxu0 %vm16433_vm0, %v23516_v1 }
 0x11f   :  { %14285 = vmatmul.mubr.msk.f32.gmra.mrb[92].mxu0 %vm166_vm1, %v143_v17 }
 0x120   :  { %14287 = vmatprep.mubr.msk.f32.mxu0 %vm16433_vm0, %v23516_v1 }
 0x123   :  { %14288 = vmatmul.mubr.msk.f32.gmra.mrb[94].mxu0 %vm166_vm1, %v144_v18 }
 0x124   :  { %14290 = vmatprep.mubr.msk.f32.mxu0 %vm16433_vm0, %v23516_v1 }
 0x127   :  { %14291 = vmatmul.mubr.msk.f32.gmra.mrb[96].mxu0 %vm166_vm1, %v145_v19  ;;  %vm11619_vm1 = vcmask 523264  }
 0x128   :  { %14307 = vmatprep.mubr.msk.f32.mxu0 %vm16433_vm0, %v23516_v1 }
 0x13a   :  { %v380_v21 = vpop.f32.mrb[0].mxu0 }
 0x13b   :  { %v381_v22 = vadd.f32 %v16785_v20, %v380_v21  ;;  %v14148_v23 = vpop.f32.mrb[1].mxu0 }
 0x13d   :  { %v624_v24 = vmax.f32 %v381_v22, 0.0 }
 0x13e   :  { %v385_v25 = vpop.f32.mrb[2].mxu0 }
 0x13f   :  { %v386_v26 = vadd.f32 %v16785_v20, %v385_v25  ;;  %v14151_v27 = vpop.f32.mrb[3].mxu0  ;;  %14308 = vmatmul.mubr.msk.f32.vlgmr.msra.gmra.mrb[98].mxu0 %vm684_vm2, %v624_v24 }
 0x140   :  { %14310 = vmatprep.mubr.msk.f32.mxu0 %vm16433_vm0, %v23516_v1 }
 0x141   :  { %v625_v28 = vmax.f32 %v386_v26, 0.0 }
 0x142   :  { %v390_v29 = vpop.f32.mrb[4].mxu0 }
 0x143   :  { %v391_v30 = vadd.f32 %v16785_v20, %v390_v29  ;;  %v14154_v31 = vpop.f32.mrb[5].mxu0  ;;  %14311 = vmatmul.mubr.msk.f32.gmra.mrb[100].mxu0 %vm684_vm2, %v625_v28 }
 0x144   :  { %14313 = vmatprep.mubr.msk.f32.mxu0 %vm16433_vm0, %v23516_v1 }
 0x145   :  { %v626_v32 = vmax.f32 %v391_v30, 0.0 }
 0x146   :  { %v395_v33 = vpop.f32.mrb[6].mxu0 }
 0x147   :  { %v396_v34 = vadd.f32 %v16785_v20, %v395_v33  ;;  %v14157_v35 = vpop.f32.mrb[7].mxu0  ;;  %14314 = vmatmul.mubr.msk.f32.gmra.mrb[102].mxu0 %vm684_vm2, %v626_v32 }
 0x148   :  { %14316 = vmatprep.mubr.msk.f32.mxu0 %vm16433_vm0, %v23516_v1 }
 0x149   :  { %v627_v36 = vmax.f32 %v396_v34, 0.0 }
 0x14a   :  { %v400_v37 = vpop.f32.mrb[8].mxu0 }
 0x14b   :  { %v401_v38 = vadd.f32 %v16785_v20, %v400_v37  ;;  %v14160_v39 = vpop.f32.mrb[9].mxu0  ;;  %14317 = vmatmul.mubr.msk.f32.gmra.mrb[104].mxu0 %vm684_vm2, %v627_v36 }
 0x14c   :  { %14319 = vmatprep.mubr.msk.f32.mxu0 %vm16433_vm0, %v23516_v1 }
 0x14d   :  { %v628_v40 = vmax.f32 %v401_v38, 0.0 }
 0x14e   :  { %v405_v41 = vpop.f32.mrb[10].mxu0 }
 0x14f   :  { %v406_v42 = vadd.f32 %v16785_v20, %v405_v41  ;;  %v14163_v43 = vpop.f32.mrb[11].mxu0  ;;  %14320 = vmatmul.mubr.msk.f32.gmra.mrb[106].mxu0 %vm684_vm2, %v628_v40 }
 0x150   :  { %14322 = vmatprep.mubr.msk.f32.mxu0 %vm16433_vm0, %v23516_v1 }
 0x151   :  { %v629_v44 = vmax.f32 %v406_v42, 0.0 }
 0x152   :  { %v410_v45 = vpop.f32.mrb[12].mxu0 }
 0x153   :  { %v411_v46 = vadd.f32 %v16785_v20, %v410_v45  ;;  %v14166_v47 = vpop.f32.mrb[13].mxu0  ;;  %14323 = vmatmul.mubr.msk.f32.gmra.mrb[108].mxu0 %vm684_vm2, %v629_v44 }
 0x154   :  { %14325 = vmatprep.mubr.msk.f32.mxu0 %vm16433_vm0, %v23516_v1 }
 0x155   :  { %v630_v48 = vmax.f32 %v411_v46, 0.0 }
 0x156   :  { %v415_v49 = vpop.f32.mrb[14].mxu0 }
 0x157   :  { %v416_v50 = vadd.f32 %v16785_v20, %v415_v49  ;;  %v14169_v51 = vpop.f32.mrb[15].mxu0  ;;  %14326 = vmatmul.mubr.msk.f32.gmra.mrb[110].mxu0 %vm684_vm2, %v630_v48 }
 0x158   :  { %14328 = vmatprep.mubr.msk.f32.mxu0 %vm16433_vm0, %v23516_v1 }
 0x159   :  { %v631_v52 = vmax.f32 %v416_v50, 0.0 }
 0x15a   :  { %v420_v53 = vpop.f32.mrb[16].mxu0 }
 0x15b   :  { %v421_v54 = vadd.f32 %v16785_v20, %v420_v53  ;;  %v14172_v55 = vpop.f32.mrb[17].mxu0  ;;  %14329 = vmatmul.mubr.msk.f32.gmra.mrb[112].mxu0 %vm684_vm2, %v631_v52 }
 0x15c   :  { %14331 = vmatprep.mubr.msk.f32.mxu0 %vm16433_vm0, %v23516_v1  ;;  %v2079_v55 = vld [vmem:[%s23506_s4] sm:$0xff] }
 0x15d   :  { %v632_v56 = vmax.f32 %v421_v54, 0.0 }
 0x15e   :  { %v425_v57 = vpop.f32.mrb[18].mxu0 }
 0x15f   :  { %v426_v58 = vadd.f32 %v16785_v20, %v425_v57  ;;  %v14175_v59 = vpop.f32.mrb[19].mxu0  ;;  %14332 = vmatmul.mubr.msk.f32.gmra.mrb[114].mxu0 %vm684_vm2, %v632_v56  ;;  %v2080_v56 = vld [vmem:[%s23506_s4 + $0x8] sm:$0xff] }
 0x160   :  { %14334 = vmatprep.mubr.msk.f32.mxu0 %vm16433_vm0, %v23516_v1 }
 0x161   :  { %v633_v60 = vmax.f32 %v426_v58, 0.0  ;;  %v16886_v58 = vpack.c.bf16 %v2080_v56, %v2079_v55 }
 0x162   :  { %v430_v61 = vpop.f32.mrb[20].mxu0 }
 0x163   :  { %v431_v62 = vadd.f32 %v16785_v20, %v430_v61  ;;  %v14178_v63 = vpop.f32.mrb[21].mxu0  ;;  %14335 = vmatmul.mubr.msk.f32.gmra.mrb[116].mxu0 %vm684_vm2, %v633_v60  ;;  %15573 = vmatprep.subr.bf16.mxu1 %v16886_v58 }
 0x164   :  { %14337 = vmatprep.mubr.msk.f32.mxu0 %vm16433_vm0, %v23516_v1 }
 0x165   :  { %v634_v2 = vmax.f32 %v431_v62, 0.0 }
 0x166   :  { %v435_v3 = vpop.f32.mrb[22].mxu0 }
 0x167   :  { %v436_v4 = vadd.f32 %v16785_v20, %v435_v3  ;;  %v14181_v5 = vpop.f32.mrb[23].mxu0  ;;  %14338 = vmatmul.mubr.msk.f32.gmra.mrb[118].mxu0 %vm684_vm2, %v634_v2 }
 0x168   :  { %14340 = vmatprep.mubr.msk.f32.mxu0 %vm16433_vm0, %v23516_v1 }
 0x169   :  { %v635_v6 = vmax.f32 %v436_v4, 0.0 }
 0x16a   :  { %v440_v7 = vpop.f32.mrb[24].mxu0 }
 0x16b   :  { %v441_v8 = vadd.f32 %v16785_v20, %v440_v7  ;;  %v14184_v9 = vpop.f32.mrb[25].mxu0  ;;  %14341 = vmatmul.mubr.msk.f32.gmra.mrb[120].mxu0 %vm684_vm2, %v635_v6 }
 0x16c   :  { %14343 = vmatprep.mubr.msk.f32.mxu0 %vm16433_vm0, %v23516_v1 }
 0x16d   :  { %v636_v10 = vmax.f32 %v441_v8, 0.0 }
 0x16e   :  { %v445_v11 = vpop.f32.mrb[26].mxu0 }
 0x16f   :  { %v446_v12 = vadd.f32 %v16785_v20, %v445_v11  ;;  %v14187_v13 = vpop.f32.mrb[27].mxu0  ;;  %14344 = vmatmul.mubr.msk.f32.gmra.mrb[122].mxu0 %vm684_vm2, %v636_v10 }
 0x170   :  { %14346 = vmatprep.mubr.msk.f32.mxu0 %vm16433_vm0, %v23516_v1 }
 0x171   :  { %v637_v14 = vmax.f32 %v446_v12, 0.0 }
 0x172   :  { %v450_v15 = vpop.f32.mrb[28].mxu0 }
 0x173   :  { %v451_v16 = vadd.f32 %v16785_v20, %v450_v15  ;;  %v14190_v17 = vpop.f32.mrb[29].mxu0  ;;  %14347 = vmatmul.mubr.msk.f32.gmra.mrb[124].mxu0 %vm684_vm2, %v637_v14 }
 0x174   :  { %14349 = vmatprep.mubr.msk.f32.mxu0 %vm16433_vm0, %v23516_v1 }
 0x175   :  { %v638_v18 = vmax.f32 %v451_v16, 0.0 }
 0x176   :  { %v455_v19 = vpop.f32.mrb[30].mxu0 }
 0x177   :  { %v456_v21 = vadd.f32 %v16785_v20, %v455_v19  ;;  %v14193_v22 = vpop.f32.mrb[31].mxu0  ;;  %14350 = vmatmul.mubr.msk.f32.gmra.mrb[126].mxu0 %vm684_vm2, %v638_v18 }
 0x178   :  { %14352 = vmatprep.mubr.msk.f32.mxu0 %vm16433_vm0, %v23516_v1 }
 0x179   :  { %v639_v23 = vmax.f32 %v456_v21, 0.0 }
 0x17a   :  { %v460_v24 = vpop.f32.mrb[32].mxu0 }
 0x17b   :  { %v461_v25 = vadd.f32 %v16785_v20, %v460_v24  ;;  %v14196_v26 = vpop.f32.mrb[33].mxu0  ;;  %14353 = vmatmul.mubr.msk.f32.gmra.mrb[128].mxu0 %vm684_vm2, %v639_v23 }
 0x17c   :  { %14355 = vmatprep.mubr.msk.f32.mxu0 %vm16433_vm0, %v23516_v1 }
 0x17d   :  { %v640_v27 = vmax.f32 %v461_v25, 0.0 }
 0x17e   :  { %v465_v28 = vpop.f32.mrb[34].mxu0 }
 0x17f   :  { %v466_v29 = vadd.f32 %v16785_v20, %v465_v28  ;;  %v14199_v30 = vpop.f32.mrb[35].mxu0  ;;  %14356 = vmatmul.mubr.msk.f32.gmra.mrb[130].mxu0 %vm684_vm2, %v640_v27 }
 0x180   :  { %14358 = vmatprep.mubr.msk.f32.mxu0 %vm16433_vm0, %v23516_v1 }
 0x181   :  { %v641_v31 = vmax.f32 %v466_v29, 0.0 }
 0x182   :  { %v470_v32 = vpop.f32.mrb[36].mxu0 }
 0x183   :  { %v471_v33 = vadd.f32 %v16785_v20, %v470_v32  ;;  %v14202_v34 = vpop.f32.mrb[37].mxu0  ;;  %14359 = vmatmul.mubr.msk.f32.gmra.mrb[132].mxu0 %vm684_vm2, %v641_v31  ;;  %v2081_v31 = vld [vmem:[%s23506_s4 + $0x10] sm:$0xff]  ;;  %v2082_v32 = vld [vmem:[%s23506_s4 + $0x18] sm:$0xff] }
 0x184   :  { %14361 = vmatprep.mubr.msk.f32.mxu0 %vm16433_vm0, %v23516_v1 }
 0x185   :  { %v642_v35 = vmax.f32 %v471_v33, 0.0 }
 0x186   :  { %v475_v36 = vpop.f32.mrb[38].mxu0 }
 0x187   :  { %v476_v37 = vadd.f32 %v16785_v20, %v475_v36  ;;  %v14205_v38 = vpop.f32.mrb[39].mxu0  ;;  %14362 = vmatmul.mubr.msk.f32.gmra.mrb[134].mxu0 %vm684_vm2, %v642_v35  ;;  %v15576_v36 = vpack.c.bf16 %v2082_v32, %v2081_v31 }
 0x188   :  { %14364 = vmatprep.mubr.msk.f32.mxu0 %vm16433_vm0, %v23516_v1  ;;  %v2083_v38 = vld [vmem:[%s23506_s4 + $0x20] sm:$0xff] }
 0x189   :  { %v643_v39 = vmax.f32 %v476_v37, 0.0 }
 0x18a   :  { %v480_v40 = vpop.f32.mrb[40].mxu0 }
 0x18b   :  { %v481_v41 = vadd.f32 %v16785_v20, %v480_v40  ;;  %v14208_v42 = vpop.f32.mrb[41].mxu0  ;;  %14365 = vmatmul.mubr.msk.f32.gmra.mrb[136].mxu0 %vm684_vm2, %v643_v39  ;;  %v2084_v39 = vld [vmem:[%s23506_s4 + $0x28] sm:$0xff] }
 0x18c   :  { %14367 = vmatprep.mubr.msk.f32.mxu0 %vm16433_vm0, %v23516_v1 }
 0x18d   :  { %v644_v43 = vmax.f32 %v481_v41, 0.0 }
 0x18e   :  { %v485_v44 = vpop.f32.mrb[42].mxu0 }
 0x18f   :  { %v486_v45 = vadd.f32 %v16785_v20, %v485_v44  ;;  %v14211_v46 = vpop.f32.mrb[43].mxu0  ;;  %14368 = vmatmul.mubr.msk.f32.gmra.mrb[138].mxu0 %vm684_vm2, %v644_v43  ;;  %v15580_v43 = vpack.c.bf16 %v2084_v39, %v2083_v38 }
 0x190   :  { %14370 = vmatprep.mubr.msk.f32.mxu0 %vm16433_vm0, %v23516_v1 }
 0x191   :  { %v645_v47 = vmax.f32 %v486_v45, 0.0 }
 0x192   :  { %v490_v48 = vpop.f32.mrb[44].mxu0 }
 0x193   :  { %v491_v49 = vadd.f32 %v16785_v20, %v490_v48  ;;  %v14214_v50 = vpop.f32.mrb[45].mxu0  ;;  %14371 = vmatmul.mubr.msk.f32.gmra.mrb[140].mxu0 %vm684_vm2, %v645_v47 }
 0x194   :  { %14373 = vmatprep.mubr.msk.f32.mxu0 %vm16433_vm0, %v23516_v1 }
 0x195   :  { %v646_v51 = vmax.f32 %v491_v49, 0.0  ;;  %v2085_v49 = vld [vmem:[%s23506_s4 + $0x30] sm:$0xff] }
 0x196   :  { %v495_v52 = vpop.f32.mrb[46].mxu0 }
 0x197   :  { %v496_v53 = vadd.f32 %v16785_v20, %v495_v52  ;;  %v14217_v54 = vpop.f32.mrb[47].mxu0  ;;  %14374 = vmatmul.mubr.msk.f32.gmra.mrb[142].mxu0 %vm684_vm2, %v646_v51 }
 0x198   :  { %14376 = vmatprep.mubr.msk.f32.mxu0 %vm16433_vm0, %v23516_v1 }
 0x199   :  { %v647_v57 = vmax.f32 %v496_v53, 0.0 }
 0x19a   :  { %v500_v59 = vpop.f32.mrb[48].mxu0 }
 0x19b   :  { %v501_v60 = vadd.f32 %v16785_v20, %v500_v59  ;;  %v14220_v61 = vpop.f32.mrb[49].mxu0  ;;  %14377 = vmatmul.mubr.msk.f32.gmra.mrb[144].mxu0 %vm684_vm2, %v647_v57 }
 0x19c   :  { %14379 = vmatprep.mubr.msk.f32.mxu0 %vm16433_vm0, %v23516_v1 }
 0x19d   :  { %v648_v62 = vmax.f32 %v501_v60, 0.0 }
 0x19e   :  { %v505_v63 = vpop.f32.mrb[50].mxu0 }
 0x19f   :  { %v506_v2 = vadd.f32 %v16785_v20, %v505_v63  ;;  %v14223_v3 = vpop.f32.mrb[51].mxu0  ;;  %14380 = vmatmul.mubr.msk.f32.gmra.mrb[146].mxu0 %vm684_vm2, %v648_v62 }
 0x1a0   :  { %14382 = vmatprep.mubr.msk.f32.mxu0 %vm16433_vm0, %v23516_v1 }
 0x1a1   :  { %v649_v4 = vmax.f32 %v506_v2, 0.0 }
 0x1a2   :  { %v510_v5 = vpop.f32.mrb[52].mxu0 }
 0x1a3   :  { %v511_v6 = vadd.f32 %v16785_v20, %v510_v5  ;;  %v14226_v7 = vpop.f32.mrb[53].mxu0  ;;  %14383 = vmatmul.mubr.msk.f32.gmra.mrb[148].mxu0 %vm684_vm2, %v649_v4 }
 0x1a4   :  { %14385 = vmatprep.mubr.msk.f32.mxu0 %vm16433_vm0, %v23516_v1 }
 0x1a5   :  { %v650_v8 = vmax.f32 %v511_v6, 0.0 }
 0x1a6   :  { %v515_v9 = vpop.f32.mrb[54].mxu0 }
 0x1a7   :  { %v516_v10 = vadd.f32 %v16785_v20, %v515_v9  ;;  %v14229_v11 = vpop.f32.mrb[55].mxu0  ;;  %14386 = vmatmul.mubr.msk.f32.gmra.mrb[150].mxu0 %vm684_vm2, %v650_v8 }
 0x1a8   :  { %14388 = vmatprep.mubr.msk.f32.mxu0 %vm16433_vm0, %v23516_v1 }
 0x1a9   :  { %v651_v12 = vmax.f32 %v516_v10, 0.0 }
 0x1aa   :  { %v520_v13 = vpop.f32.mrb[56].mxu0 }
 0x1ab   :  { %v521_v14 = vadd.f32 %v16785_v20, %v520_v13  ;;  %v14232_v15 = vpop.f32.mrb[57].mxu0  ;;  %14389 = vmatmul.mubr.msk.f32.gmra.mrb[152].mxu0 %vm684_vm2, %v651_v12 }
 0x1ac   :  { %14391 = vmatprep.mubr.msk.f32.mxu0 %vm16433_vm0, %v23516_v1 }
 0x1ad   :  { %v652_v16 = vmax.f32 %v521_v14, 0.0 }
 0x1ae   :  { %v525_v17 = vpop.f32.mrb[58].mxu0 }
 0x1af   :  { %v526_v18 = vadd.f32 %v16785_v20, %v525_v17  ;;  %v14235_v19 = vpop.f32.mrb[59].mxu0  ;;  %14392 = vmatmul.mubr.msk.f32.gmra.mrb[154].mxu0 %vm684_vm2, %v652_v16 }
 0x1b0   :  { %14394 = vmatprep.mubr.msk.f32.mxu0 %vm16433_vm0, %v23516_v1 }
 0x1b1   :  { %v653_v21 = vmax.f32 %v526_v18, 0.0 }
 0x1b2   :  { %v530_v22 = vpop.f32.mrb[60].mxu0 }
 0x1b3   :  { %v531_v23 = vadd.f32 %v16785_v20, %v530_v22  ;;  %v14238_v24 = vpop.f32.mrb[61].mxu0  ;;  %14395 = vmatmul.mubr.msk.f32.gmra.mrb[156].mxu0 %vm684_vm2, %v653_v21 }
 0x1b4   :  { %14397 = vmatprep.mubr.msk.f32.mxu0 %vm16433_vm0, %v23516_v1 }
 0x1b5   :  { %v654_v25 = vmax.f32 %v531_v23, 0.0 }
 0x1b6   :  { %v535_v26 = vpop.f32.mrb[62].mxu0 }
 0x1b7   :  { %v536_v27 = vadd.f32 %v16785_v20, %v535_v26  ;;  %v14241_v28 = vpop.f32.mrb[63].mxu0  ;;  %14398 = vmatmul.mubr.msk.f32.gmra.mrb[158].mxu0 %vm684_vm2, %v654_v25 }
 0x1b8   :  { %14400 = vmatprep.mubr.msk.f32.mxu0 %vm16433_vm0, %v23516_v1 }
 0x1b9   :  { %v655_v29 = vmax.f32 %v536_v27, 0.0 }
 0x1ba   :  { %v540_v30 = vpop.f32.mrb[64].mxu0 }
 0x1bb   :  { %v541_v33 = vadd.f32 %v16785_v20, %v540_v30  ;;  %v14244_v34 = vpop.f32.mrb[65].mxu0  ;;  %14401 = vmatmul.mubr.msk.f32.gmra.mrb[160].mxu0 %vm684_vm2, %v655_v29 }
 0x1bd   :  { %v656_v35 = vmax.f32 %v541_v33, 0.0 }
 0x1be   :  { %v545_v37 = vpop.f32.mrb[66].mxu0 }
 0x1bf   :  { %v546_v40 = vadd.f32 %v16785_v20, %v545_v37  ;;  %v14247_v41 = vpop.f32.mrb[67].mxu0  ;;  %14404 = vmatmul.mubr.msk.f32.vlgmr.msra.gmra.mrb[0].mxu1 %vm684_vm2, %v656_v35 }
 0x1c0   :  { %14406 = vmatprep.mubr.msk.f32.mxu1 %vm16433_vm0, %v23516_v1  ;;  %15575 = vmatpush3.bf16.msra.mxu1 %v16886_v58 }
 0x1c1   :  { %v657_v42 = vmax.f32 %v546_v40, 0.0  ;;  %15577 = vmatprep.subr.bf16.mxu1 %v15576_v36 }
 0x1c2   :  { %v550_v44 = vpop.f32.mrb[68].mxu0 }
 0x1c3   :  { %v551_v45 = vadd.f32 %v16785_v20, %v550_v44  ;;  %v14250_v46 = vpop.f32.mrb[69].mxu0  ;;  %14407 = vmatmul.mubr.msk.f32.gmra.mrb[2].mxu1 %vm684_vm2, %v657_v42  ;;  %v17004_v44 = vld [vmem:[#allocation4 + $0x1] ss:$0 sm:$0xff] }
 0x1c4   :  { %14409 = vmatprep.mubr.msk.f32.mxu1 %vm16433_vm0, %v23516_v1  ;;  %15579 = vmatpush3.bf16.msra.mxu1 %v15576_v36  ;;  %v16435_v46 = vmov 1983009808  }
 0x1c5   :  { %v658_v47 = vmax.f32 %v551_v45, 0.0  ;;  %15581 = vmatprep.subr.bf16.mxu1 %v15580_v43 }
 0x1c6   :  { %v555_v48 = vpop.f32.mrb[70].mxu0 }
 0x1c7   :  { %v556_v50 = vadd.f32 %v16785_v20, %v555_v48  ;;  %v14253_v51 = vpop.f32.mrb[71].mxu0  ;;  %14410 = vmatmul.mubr.msk.f32.gmra.mrb[4].mxu1 %vm684_vm2, %v658_v47  ;;  %v1242_v47 = vunpack.c.l.s4 %v16435_v46  ;;  %v1244_v48 = vlaneseq }
 0x1c8   :  { %14412 = vmatprep.mubr.msk.f32.mxu1 %vm16433_vm0, %v23516_v1  ;;  %15583 = vmatpush3.bf16.msra.mxu1 %v15580_v43 }
 0x1c9   :  { %v659_v52 = vmax.f32 %v556_v50, 0.0  ;;  %14466 = vmatprep.subr.mxu1 %v2085_v49 }
 0x1ca   :  { %v560_v53 = vpop.f32.mrb[72].mxu0 }
 0x1cb   :  { %v561_v54 = vadd.f32 %v16785_v20, %v560_v53  ;;  %v14256_v55 = vpop.f32.mrb[73].mxu0  ;;  %14413 = vmatmul.mubr.msk.f32.gmra.mrb[6].mxu1 %vm684_vm2, %v659_v52  ;;  %v17007_v52 = vshrl.u32 %v1244_v48, 7 }
 0x1cc   :  { %14415 = vmatprep.mubr.msk.f32.mxu1 %vm16433_vm0, %v23516_v1  ;;  %14467 = vmatpush3.msra.mxu1 %v2085_v49 }
 0x1cd   :  { %v660_v56 = vmax.f32 %v561_v54, 0.0  ;;  %24170 = vst [vmem:[#allocation12_spill] sm:$0xff] %v17007_v52 }
 0x1ce   :  { %v565_v57 = vpop.f32.mrb[74].mxu0 }
 0x1cf   :  { %v566_v58 = vadd.f32 %v16785_v20, %v565_v57  ;;  %v14259_v59 = vpop.f32.mrb[75].mxu0  ;;  %14416 = vmatmul.mubr.msk.f32.gmra.mrb[8].mxu1 %vm684_vm2, %v660_v56 }
 0x1d0   :  { %14418 = vmatprep.mubr.msk.f32.mxu1 %vm16433_vm0, %v23516_v1 }
 0x1d1   :  { %v661_v60 = vmax.f32 %v566_v58, 0.0 }
 0x1d2   :  { %v570_v61 = vpop.f32.mrb[76].mxu0 }
 0x1d3   :  { %v571_v62 = vadd.f32 %v16785_v20, %v570_v61  ;;  %v14262_v63 = vpop.f32.mrb[77].mxu0  ;;  %14419 = vmatmul.mubr.msk.f32.gmra.mrb[10].mxu1 %vm684_vm2, %v661_v60 }
 0x1d4   :  { %14421 = vmatprep.mubr.msk.f32.mxu1 %vm16433_vm0, %v23516_v1 }
 0x1d5   :  { %v662_v2 = vmax.f32 %v571_v62, 0.0 }
 0x1d6   :  { %v575_v3 = vpop.f32.mrb[78].mxu0 }
 0x1d7   :  { %v576_v4 = vadd.f32 %v16785_v20, %v575_v3  ;;  %v14265_v5 = vpop.f32.mrb[79].mxu0  ;;  %14422 = vmatmul.mubr.msk.f32.gmra.mrb[12].mxu1 %vm684_vm2, %v662_v2 }
 0x1d8   :  { %14424 = vmatprep.mubr.msk.f32.mxu1 %vm16433_vm0, %v23516_v1 }
 0x1d9   :  { %v663_v6 = vmax.f32 %v576_v4, 0.0 }
 0x1da   :  { %v580_v7 = vpop.f32.mrb[80].mxu0 }
 0x1db   :  { %v581_v8 = vadd.f32 %v16785_v20, %v580_v7  ;;  %v14268_v9 = vpop.f32.mrb[81].mxu0  ;;  %14425 = vmatmul.mubr.msk.f32.gmra.mrb[14].mxu1 %vm684_vm2, %v663_v6 }
 0x1dc   :  { %14427 = vmatprep.mubr.msk.f32.mxu1 %vm16433_vm0, %v23516_v1 }
 0x1dd   :  { %v664_v10 = vmax.f32 %v581_v8, 0.0 }
 0x1de   :  { %v585_v11 = vpop.f32.mrb[82].mxu0 }
 0x1df   :  { %v586_v12 = vadd.f32 %v16785_v20, %v585_v11  ;;  %v14271_v13 = vpop.f32.mrb[83].mxu0  ;;  %14428 = vmatmul.mubr.msk.f32.gmra.mrb[16].mxu1 %vm684_vm2, %v664_v10 }
 0x1e0   :  { %14430 = vmatprep.mubr.msk.f32.mxu1 %vm16433_vm0, %v23516_v1 }
 0x1e1   :  { %v665_v14 = vmax.f32 %v586_v12, 0.0 }
 0x1e2   :  { %v590_v15 = vpop.f32.mrb[84].mxu0 }
 0x1e3   :  { %v591_v16 = vadd.f32 %v16785_v20, %v590_v15  ;;  %v14274_v17 = vpop.f32.mrb[85].mxu0  ;;  %14431 = vmatmul.mubr.msk.f32.gmra.mrb[18].mxu1 %vm684_vm2, %v665_v14  ;;  %v24177_v15 = vmov 0 }
 0x1e4   :  { %14433 = vmatprep.mubr.msk.f32.mxu1 %vm16433_vm0, %v23516_v1  ;;  %v24178_v15 = vsel %vm17044_vm9, 4294967295, %v24177_v15 }
 0x1e5   :  { %v666_v18 = vmax.f32 %v591_v16, 0.0  ;;  %24179 = vst [vmem:[#allocation19_spill] sm:$0xff] %v24178_v15 }
 0x1e6   :  { %v595_v19 = vpop.f32.mrb[86].mxu0 }
 0x1e7   :  { %v596_v21 = vadd.f32 %v16785_v20, %v595_v19  ;;  %v14277_v22 = vpop.f32.mrb[87].mxu0  ;;  %14434 = vmatmul.mubr.msk.f32.gmra.mrb[20].mxu1 %vm684_vm2, %v666_v18 }
 0x1e8   :  { %14436 = vmatprep.mubr.msk.f32.mxu1 %vm16433_vm0, %v23516_v1 }
 0x1e9   :  { %v667_v23 = vmax.f32 %v596_v21, 0.0 }
 0x1ea   :  { %v600_v24 = vpop.f32.mrb[88].mxu0 }
 0x1eb   :  { %v601_v25 = vadd.f32 %v16785_v20, %v600_v24  ;;  %v14280_v26 = vpop.f32.mrb[89].mxu0  ;;  %14437 = vmatmul.mubr.msk.f32.gmra.mrb[22].mxu1 %vm684_vm2, %v667_v23 }
 0x1ec   :  { %14439 = vmatprep.mubr.msk.f32.mxu1 %vm16433_vm0, %v23516_v1 }
 0x1ed   :  { %v668_v27 = vmax.f32 %v601_v25, 0.0 }
 0x1ee   :  { %v605_v28 = vpop.f32.mrb[90].mxu0 }
 0x1ef   :  { %v606_v29 = vadd.f32 %v16785_v20, %v605_v28  ;;  %v14283_v30 = vpop.f32.mrb[91].mxu0  ;;  %14440 = vmatmul.mubr.msk.f32.gmra.mrb[24].mxu1 %vm684_vm2, %v668_v27 }
 0x1f0   :  { %14442 = vmatprep.mubr.msk.f32.mxu1 %vm16433_vm0, %v23516_v1 }
 0x1f1   :  { %v669_v31 = vmax.f32 %v606_v29, 0.0 }
 0x1f2   :  { %v610_v32 = vpop.f32.mrb[92].mxu0 }
 0x1f3   :  { %v611_v33 = vadd.f32 %v16785_v20, %v610_v32  ;;  %14443 = vmatmul.mubr.msk.f32.gmra.mrb[26].mxu1 %vm684_vm2, %v669_v31  ;;  %v14286_v34 = vpop.f32.mrb[93].mxu0 }
 0x1f4   :  { %14445 = vmatprep.mubr.msk.f32.mxu1 %vm16433_vm0, %v23516_v1 }
 0x1f5   :  { %v670_v35 = vmax.f32 %v611_v33, 0.0 }
 0x1f6   :  { %v615_v36 = vpop.f32.mrb[94].mxu0 }
 0x1f7   :  { %14446 = vmatmul.mubr.msk.f32.gmra.mrb[28].mxu1 %vm684_vm2, %v670_v35  ;;  %v616_v37 = vadd.f32 %v16785_v20, %v615_v36  ;;  %v14289_v38 = vpop.f32.mrb[95].mxu0 }
 0x1f8   :  { %14448 = vmatprep.mubr.msk.f32.mxu1 %vm16433_vm0, %v23516_v1 }
 0x1f9   :  { %v671_v39 = vmax.f32 %v616_v37, 0.0 }
 0x1fa   :  { %v620_v40 = vpop.f32.mrb[96].mxu0 }
 0x1fb   :  { %v621_v41 = vadd.f32 %v16785_v20, %v620_v40  ;;  %v14292_v42 = vpop.f32.mrb[97].mxu0  ;;  %14449 = vmatmul.mubr.msk.f32.gmra.mrb[30].mxu1 %vm684_vm2, %v671_v39  ;;  %v1243_v20 = vunpack.c.0.s8 %v1242_v47 }
 0x1fc   :  { %14451 = vmatprep.mubr.msk.f32.mxu1 %vm16433_vm0, %v23516_v1 }
 0x1fd   :  { %v672_v43 = vmax.f32 %v621_v41, 0.0  ;;  %v17011_v58 = vsub.s32 %v1243_v20, %v17007_v52 }
 0x1ff   :  { %14452 = vmatmul.mubr.msk.f32.gmra.mrb[32].mxu1 %vm684_vm2, %v672_v43  ;;  %24171 = vst [vmem:[#allocation13_spill] sm:$0xff] %v17011_v58 }
 0x212   :  { %v898_v45 = vpop.f32.mrb[98].mxu0 }
 0x213   :  { %v899_v49 = vadd.f32 %v17004_v44, %v898_v45  ;;  %v14309_v50 = vpop.f32.mrb[99].mxu0 }
 0x215   :  { %v1142_v51 = vmax.f32 %v899_v49, 0.0 }
 0x216   :  { %v903_v53 = vpop.f32.mrb[100].mxu0 }
 0x217   :  { %v904_v54 = vadd.f32 %v17004_v44, %v903_v53  ;;  %v14312_v55 = vpop.f32.mrb[101].mxu0  ;;  %v1240_v56 = vcombine.high %v1142_v51, %v1142_v51  ;;  %v17031_v7 = vrot.slane %v1142_v51, %v17011_v58 }
 0x219   :  { %v1143_v57 = vmax.f32 %v904_v54, 0.0  ;;  %v17019_v2 = vrot.slane %v1240_v56, %v17011_v58  ;;  %v17060_v25 = vcombine.high %v17031_v7, %v17031_v7 }
 0x21a   :  { %v908_v59 = vpop.f32.mrb[102].mxu0 }
 0x21b   :  { %v14315_v60 = vpop.f32.mrb[103].mxu0  ;;  %v1257_v61 = vcombine.high %v1143_v57, %v1143_v57  ;;  %v17015_v62 = vrot.slane %v1143_v57, %v17011_v58  ;;  %v909_v63 = vadd.f32 %v17004_v44, %v908_v59  ;;  %24173 = vst [vmem:[#allocation15_spill] sm:$0xff] %v17019_v2  ;;  %v17041_v14 = vcombine.high %v17019_v2, %v17019_v2 }
 0x21c   :  { %24181 = vst [vmem:[#allocation21_spill] sm:$0xff] %v17060_v25  ;;  %v2086_v41 = vcombine.low %v17031_v7, %v17060_v25 }
 0x21d   :  { %24172 = vst [vmem:[#allocation14_spill] sm:$0xff] %v17015_v62  ;;  %v17023_v3 = vrot.slane %v1257_v61, %v17011_v58  ;;  %v17027_v4 = vcombine.high %v17015_v62, %v17015_v62  ;;  %v23522_v5 = vrot.slane %v17015_v62, 7  ;;  %v1144_v8 = vmax.f32 %v909_v63, 0.0  ;;  %24176 = vst [vmem:[#allocation18_spill] sm:$0xff] %v17041_v14 }
 0x21e   :  { %v913_v6 = vpop.f32.mrb[104].mxu0  ;;  %v2087_v39 = vcombine.low %v17019_v2, %v17041_v14  ;;  %v2094_v61 = vrot.slane %v2086_v41, %v17011_v58 }
 0x21f   :  { %24174 = vst [vmem:[#allocation16_spill] sm:$0xff] %v17023_v3  ;;  %24175 = vst [vmem:[#allocation17_spill] sm:$0xff] %v17027_v4  ;;  %v14318_v9 = vpop.f32.mrb[105].mxu0  ;;  %v1273_v10 = vcombine.high %v17023_v3, %v17023_v3  ;;  %v3071_v11 = vrot.slane %v23522_v5, 2  ;;  %v3072_v12 = vrot.slane %v17027_v4, 7  ;;  %v914_v13 = vadd.f32 %v17004_v44, %v913_v6 }
 0x220   :  { %v1274_v17 = vcombine.high %v1144_v8, %v1144_v8  ;;  %v17051_v18 = vrot.slane %v1144_v8, %v17011_v58  ;;  %v3075_v22 = vrot.slane %v17023_v3, 7  ;;  %v2103_v42 = vcombine.low %v17015_v62, %v17027_v4 }
 0x221   :  { %v17055_v19 = vsel %vm17044_vm9, %v3071_v11, %v3072_v12  ;;  %v3074_v21 = vrot.slane %v3072_v12, 2  ;;  %v12681_v23 = vrot.slane %v1273_v10, 9  ;;  %v1145_v32 = vmax.f32 %v914_v13, 0.0 }
 0x222   :  { %24180 = vst [vmem:[#allocation20_spill] sm:$0xff] %v17051_v18  ;;  %v918_v24 = vpop.f32.mrb[106].mxu0  ;;  %v17063_v26 = vrot.slane %v1274_v17, %v17011_v58  ;;  %v17067_v27 = vcombine.high %v17051_v18, %v17051_v18  ;;  %v2104_v28 = vcombine.low %v1273_v10, %v17051_v18  ;;  %v3079_v31 = vrot.slane %v17051_v18, 7 }
 0x223   :  { %v14321_v29 = vpop.f32.mrb[107].mxu0  ;;  %v17072_v30 = vsel %vm17044_vm9, %v3074_v21, %v3075_v22  ;;  %v919_v33 = vadd.f32 %v17004_v44, %v918_v24  ;;  %v1291_v43 = vcombine.high %v1145_v32, %v1145_v32  ;;  %v17092_v45 = vrot.slane %v1145_v32, %v17011_v58 }
 0x224   :  { %24182 = vst [vmem:[#allocation22_spill] sm:$0xff] %v17063_v26  ;;  %24183 = vst [vmem:[#allocation23_spill] sm:$0xff] %v17067_v27  ;;  %v23521_v35 = vrot.slane %v17067_v27, 7  ;;  %v17081_v36 = vsel %vm17044_vm9, %v12681_v23, %v3079_v31  ;;  %v3081_v37 = vrot.slane %v3079_v31, 2  ;;  %v17096_v47 = vcombine.high %v17063_v26, %v17063_v26 }
 0x225   :  { %24184 = vst [vmem:[#allocation24_spill] sm:$0xff] %v17092_v45  ;;  %v1146_v49 = vmax.f32 %v919_v33, 0.0  ;;  %v17105_v50 = vrot.slane %v2104_v28, %v17011_v58  ;;  %v17110_v20 = vrot.slane %v1291_v43, %v17011_v58  ;;  %v17114_v53 = vcombine.high %v17092_v45, %v17092_v45 }
 0x226   :  { %v923_v40 = vpop.f32.mrb[108].mxu0  ;;  %24185 = vst [vmem:[#allocation25_spill] sm:$0xff] %v17096_v47  ;;  %v17102_v48 = vsel %vm17044_vm9, %v3081_v37, %v23521_v35  ;;  %v2101_v56 = vrot.slane %v2087_v39, %v17011_v58  ;;  %v2111_v59 = vrot.slane %v2103_v42, %v17011_v58  ;;  %v2121_v6 = vcombine.low %v17096_v47, %v17092_v45 }
 0x227   :  { %v14324_v46 = vpop.f32.mrb[109].mxu0  ;;  %24186 = vst [vmem:[#allocation26_spill] sm:$0xff] %v17105_v50  ;;  %24187 = vst [vmem:[#allocation27_spill] sm:$0xff] %v17110_v20  ;;  %v1308_v54 = vcombine.high %v1146_v49, %v1146_v49  ;;  %v17117_v55 = vrot.slane %v1146_v49, %v17011_v58  ;;  %v17123_v60 = vcombine.high %v17110_v20, %v17110_v20 }
 0x228   :  { %24188 = vst [vmem:[#allocation28_spill] sm:$0xff] %v17114_v53  ;;  %v2119_v11 = vcombine.low %v2111_v59, %v17105_v50  ;;  %v2102_v21 = vcombine.low %v2094_v61, %v2101_v56  ;;  %v924_v23 = vadd.f32 %v17004_v44, %v923_v40  ;;  %v2120_v31 = vcombine.low %v17067_v27, %v17063_v26 }
 0x229   :  { %24189 = vst [vmem:[#allocation29_spill] sm:$0xff] %v17117_v55  ;;  %24190 = vst [vmem:[#allocation30_spill] sm:$0xff] %v17123_v60  ;;  %v17131_v9 = vrot.slane %v1308_v54, %v17011_v58  ;;  %v17135_v10 = vcombine.high %v17117_v55, %v17117_v55  ;;  %v2137_v13 = vcombine.low %v17110_v20, %v17123_v60 }
 0x22a   :  { %v928_v57 = vpop.f32.mrb[110].mxu0  ;;  %14468 = vmatprep.mubr.msk.f32.mxu1 %vm684_vm2, %v2102_v21  ;;  %v17154_v32 = vrot.slane %v2121_v6, %v17011_v58  ;;  %v1147_v33 = vmax.f32 %v924_v23, 0.0  ;;  %v17159_v40 = vrot.slane %v2120_v31, %v17011_v58 }
 0x22b   :  { %v14327_v63 = vpop.f32.mrb[111].mxu0  ;;  %24191 = vst [vmem:[#allocation31_spill] sm:$0xff] %v17131_v9  ;;  %24192 = vst [vmem:[#allocation32_spill] sm:$0xff] %v17135_v10  ;;  %v2138_v17 = vcombine.low %v17117_v55, %v17135_v10  ;;  %v17147_v24 = vcombine.high %v17131_v9, %v17131_v9  ;;  %v929_v29 = vadd.f32 %v17004_v44, %v928_v57  ;;  %14469 = vmatmul.mubr.msk.f32.vlgmr.msra.gmra.mrb[34].mxu1 %vm684_vm2, %v2119_v11 }
 0x22c   :  { %24194 = vst [vmem:[#allocation34_spill] sm:$0xff] %v17154_v32  ;;  %24195 = vst [vmem:[#allocation35_spill] sm:$0xff] %v17159_v40  ;;  %v17162_v41 = vrot.slane %v2137_v13, %v17011_v58  ;;  %v1325_v46 = vcombine.high %v1147_v33, %v1147_v33  ;;  %v17168_v49 = vrot.slane %v1147_v33, %v17011_v58 }
 0x22d   :  { %24193 = vst [vmem:[#allocation33_spill] sm:$0xff] %v17147_v24  ;;  %v23520_v37 = vrot.slane %v17147_v24, 7  ;;  %v1148_v39 = vmax.f32 %v929_v29, 0.0  ;;  %v17165_v42 = vrot.slane %v2138_v17, %v17011_v58  ;;  %v2136_v61 = vcombine.low %v17159_v40, %v17154_v32 }
 0x22e   :  { %v933_v22 = vpop.f32.mrb[112].mxu0  ;;  %24196 = vst [vmem:[#allocation36_spill] sm:$0xff] %v17162_v41  ;;  %24198 = vst [vmem:[#allocation38_spill] sm:$0xff] %v17168_v49  ;;  %v17183_v6 = vrot.slane %v1325_v46, %v17011_v58  ;;  %v17187_v11 = vcombine.high %v17168_v49, %v17168_v49  ;;  %v3113_v13 = vrot.slane %v17168_v49, 7  ;;  %v2154_v46 = vcombine.low %v17131_v9, %v17147_v24 }
 0x22f   :  { %v14330_v28 = vpop.f32.mrb[113].mxu0  ;;  %24197 = vst [vmem:[#allocation37_spill] sm:$0xff] %v17165_v42  ;;  %v3112_v54 = vrot.slane %v23520_v37, 2  ;;  %v934_v56 = vadd.f32 %v17004_v44, %v933_v22  ;;  %v17174_v59 = vrot.slane %v1148_v39, %v17011_v58  ;;  %v17180_v63 = vcombine.low %v17162_v41, %v17165_v42  ;;  %14471 = vmatprep.mubr.msk.f32.mxu1 %vm684_vm2, %v2136_v61 }
 0x230   :  { %24201 = vst [vmem:[#allocation41_spill] sm:$0xff] %v17183_v6  ;;  %24202 = vst [vmem:[#allocation42_spill] sm:$0xff] %v17187_v11  ;;  %v1342_v21 = vcombine.high %v1148_v39, %v1148_v39  ;;  %v17205_v33 = vcombine.high %v17183_v6, %v17183_v6  ;;  %v2155_v39 = vcombine.low %v17187_v11, %v17183_v6 }
 0x231   :  { %24199 = vst [vmem:[#allocation39_spill] sm:$0xff] %v17174_v59  ;;  %24200 = vst [vmem:[#allocation40_spill] sm:$0xff] %v17180_v63  ;;  %v17194_v22 = vcombine.high %v17174_v59, %v17174_v59  ;;  %v17199_v28 = vsel %vm17044_vm9, %v3112_v54, %v3113_v13  ;;  %v1149_v29 = vmax.f32 %v934_v56, 0.0  ;;  %14472 = vmatmul.mubr.msk.f32.gmra.mrb[36].mxu1 %vm684_vm2, %v17180_v63 }
 0x232   :  { %v938_v43 = vpop.f32.mrb[114].mxu0  ;;  %24204 = vst [vmem:[#allocation44_spill] sm:$0xff] %v17199_v28  ;;  %24205 = vst [vmem:[#allocation45_spill] sm:$0xff] %v17205_v33  ;;  %v17214_v54 = vrot.slane %v1342_v21, %v17011_v58  ;;  %v2171_v0 = vcombine.low %v17205_v33, %v17174_v59  ;;  %v17222_v17 = vrot.slane %v2154_v46, %v17011_v58 }
 0x233   :  { %v14333_v57 = vpop.f32.mrb[115].mxu0  ;;  %24203 = vst [vmem:[#allocation43_spill] sm:$0xff] %v17194_v22  ;;  %v1359_v13 = vcombine.high %v1149_v29, %v1149_v29  ;;  %v17225_v16 = vrot.slane %v2155_v39, %v17011_v58  ;;  %v17229_v38 = vrot.slane %v1149_v29, %v17011_v58 }
 0x234   :  { %24206 = vst [vmem:[#allocation46_spill] sm:$0xff] %v17214_v54  ;;  %24207 = vst [vmem:[#allocation47_spill] sm:$0xff] %v17222_v17  ;;  %v17246_v29 = vrot.slane %v2171_v0, %v17011_v58 }
 0x235   :  { %24208 = vst [vmem:[#allocation48_spill] sm:$0xff] %v17225_v16  ;;  %v17233_v56 = vcombine.low %v17222_v17, %v17225_v16  ;;  %v17238_v46 = vrot.slane %v1359_v13, %v17011_v58  ;;  %v12684_v11 = vrot.slane %v17229_v38, 9 }
 0x236   :  { %v943_v23 = vpop.f32.mrb[116].mxu0  ;;  %24212 = vst [vmem:[#allocation52_spill] sm:$0xff] %v17246_v29 }
 0x237   :  { %v14336_v31 = vpop.f32.mrb[117].mxu0  ;;  %v944_v21 = vadd.f32 %v17004_v44, %v943_v23  ;;  %24209 = vst [vmem:[#allocation49_spill] sm:$0xff] %v17233_v56  ;;  %24210 = vst [vmem:[#allocation50_spill] sm:$0xff] %v17238_v46  ;;  %14474 = vmatprep.mubr.msk.f32.mxu1 %vm684_vm2, %v17233_v56  ;;  %v17277_v34 = vcombine.high %v17238_v46, %v17238_v46 }
 0x238   :  { %v939_v31 = vadd.f32 %v17004_v44, %v938_v43 }
 0x239   :  { %v1151_v23 = vmax.f32 %v944_v21, 0.0  ;;  %24220 = vst [vmem:[#allocation60_spill] sm:$0xff] %v17277_v34  ;;  %v2189_v41 = vcombine.low %v17238_v46, %v17277_v34 }
 0x23a   :  { %v948_v61 = vpop.f32.mrb[118].mxu0  ;;  %v1150_v57 = vmax.f32 %v939_v31, 0.0 }
 0x23b   :  { %v14339_v1 = vpop.f32.mrb[119].mxu0  ;;  %v949_v37 = vadd.f32 %v17004_v44, %v948_v61  ;;  %v17264_v21 = vrot.slane %v1151_v23, %v17011_v58  ;;  %v1393_v35 = vcombine.high %v1151_v23, %v1151_v23 }
 0x23c   :  { %v2172_v1 = vcombine.low %v17194_v22, %v17214_v54  ;;  %v1376_v12 = vcombine.high %v1150_v57, %v1150_v57  ;;  %v17241_v39 = vrot.slane %v1150_v57, %v17011_v58 }
 0x23d   :  { %24217 = vst [vmem:[#allocation57_spill] sm:$0xff] %v17264_v21  ;;  %v17283_v56 = vcombine.high %v17264_v21, %v17264_v21  ;;  %v17294_v52 = vrot.slane %v1393_v35, %v17011_v58 }
 0x23e   :  { %v953_v43 = vpop.f32.mrb[120].mxu0  ;;  %24211 = vst [vmem:[#allocation51_spill] sm:$0xff] %v17241_v39  ;;  %v17249_v8 = vrot.slane %v2172_v1, %v17011_v58  ;;  %v17253_v13 = vrot.slane %v1376_v12, %v17011_v58  ;;  %v17257_v57 = vcombine.high %v17241_v39, %v17241_v39  ;;  %v1152_v1 = vmax.f32 %v949_v37, 0.0 }
 0x23f   :  { %v14342_v31 = vpop.f32.mrb[121].mxu0  ;;  %v954_v5 = vadd.f32 %v17004_v44, %v953_v43  ;;  %24221 = vst [vmem:[#allocation61_spill] sm:$0xff] %v17283_v56  ;;  %24222 = vst [vmem:[#allocation62_spill] sm:$0xff] %v17294_v52 }
 0x240   :  { %24213 = vst [vmem:[#allocation53_spill] sm:$0xff] %v17249_v8  ;;  %24214 = vst [vmem:[#allocation54_spill] sm:$0xff] %v17253_v13  ;;  %v17261_v31 = vcombine.high %v17229_v38, %v17229_v38  ;;  %v17268_v0 = vcombine.low %v17246_v29, %v17249_v8  ;;  %v17272_v12 = vcombine.high %v17253_v13, %v17253_v13 }
 0x241   :  { %24215 = vst [vmem:[#allocation55_spill] sm:$0xff] %v17257_v57  ;;  %v1410_v23 = vcombine.high %v1152_v1, %v1152_v1  ;;  %v17297_v8 = vrot.slane %v1152_v1, %v17011_v58  ;;  %v2205_v40 = vcombine.low %v17241_v39, %v17257_v57 }
 0x242   :  { %24216 = vst [vmem:[#allocation56_spill] sm:$0xff] %v17261_v31  ;;  %24218 = vst [vmem:[#allocation58_spill] sm:$0xff] %v17268_v0  ;;  %v958_v61 = vpop.f32.mrb[122].mxu0  ;;  %14475 = vmatmul.mubr.msk.f32.gmra.mrb[38].mxu1 %vm684_vm2, %v17268_v0  ;;  %v2206_v37 = vcombine.low %v17272_v12, %v17264_v21  ;;  %v1153_v0 = vmax.f32 %v954_v5, 0.0  ;;  %v17317_v5 = vrot.slane %v2189_v41, %v17011_v58 }
 0x243   :  { %24219 = vst [vmem:[#allocation59_spill] sm:$0xff] %v17272_v12  ;;  %v14345_v51 = vpop.f32.mrb[123].mxu0  ;;  %24223 = vst [vmem:[#allocation63_spill] sm:$0xff] %v17297_v8  ;;  %v17300_v16 = vrot.slane %v1410_v23, %v17011_v58  ;;  %v17306_v32 = vcombine.high %v17297_v8, %v17297_v8  ;;  %v959_v35 = vadd.f32 %v17004_v44, %v958_v61 }
 0x244   :  { %v2188_v51 = vcombine.low %v17229_v38, %v17261_v31  ;;  %v1427_v1 = vcombine.high %v1153_v0, %v1153_v0  ;;  %v17314_v42 = vrot.slane %v1153_v0, %v17011_v58  ;;  %24228 = vst [vmem:[#allocation68_spill] sm:$0xff] %v17317_v5  ;;  %v17321_v23 = vcombine.high %v17294_v52, %v17294_v52 }
 0x245   :  { %24224 = vst [vmem:[#allocation64_spill] sm:$0xff] %v17300_v16  ;;  %24225 = vst [vmem:[#allocation65_spill] sm:$0xff] %v17306_v32  ;;  %v17310_v43 = vcombine.high %v17300_v16, %v17300_v16 }
 0x246   :  { %v963_v63 = vpop.f32.mrb[124].mxu0  ;;  %24227 = vst [vmem:[#allocation67_spill] sm:$0xff] %v17314_v42  ;;  %24229 = vst [vmem:[#allocation69_spill] sm:$0xff] %v17321_v23  ;;  %v17324_v17 = vrot.slane %v2188_v51, %v17011_v58  ;;  %v17331_v0 = vrot.slane %v1427_v1, %v17011_v58  ;;  %v17335_v41 = vcombine.high %v17314_v42, %v17314_v42 }
 0x247   :  { %v14348_v29 = vpop.f32.mrb[125].mxu0  ;;  %24226 = vst [vmem:[#allocation66_spill] sm:$0xff] %v17310_v43  ;;  %v2223_v4 = vcombine.low %v17321_v23, %v17297_v8  ;;  %v2239_v23 = vcombine.low %v17300_v16, %v17310_v43 }
 0x248   :  { %24230 = vst [vmem:[#allocation70_spill] sm:$0xff] %v17324_v17  ;;  %24231 = vst [vmem:[#allocation71_spill] sm:$0xff] %v17331_v0  ;;  %v17341_v51 = vcombine.low %v17324_v17, %v17317_v5  ;;  %v17349_v1 = vcombine.high %v17331_v0, %v17331_v0  ;;  %v17355_v5 = vrot.slane %v2205_v40, %v17011_v58 }
 0x249   :  { %24232 = vst [vmem:[#allocation72_spill] sm:$0xff] %v17335_v41  ;;  %v964_v17 = vadd.f32 %v17004_v44, %v963_v63  ;;  %v2240_v34 = vcombine.low %v17314_v42, %v17335_v41 }
 0x24a   :  { %v968_v29 = vpop.f32.mrb[126].mxu0  ;;  %24233 = vst [vmem:[#allocation73_spill] sm:$0xff] %v17341_v51  ;;  %14477 = vmatprep.mubr.msk.f32.mxu1 %vm684_vm2, %v17341_v51  ;;  %24234 = vst [vmem:[#allocation74_spill] sm:$0xff] %v17349_v1  ;;  %v2222_v51 = vcombine.low %v17283_v56, %v17294_v52  ;;  %v23558_v40 = vrot.slane %v17349_v1, 7 }
 0x24b   :  { %v14351_v50 = vpop.f32.mrb[127].mxu0  ;;  %24236 = vst [vmem:[#allocation76_spill] sm:$0xff] %v17355_v5  ;;  %v1155_v28 = vmax.f32 %v964_v17, 0.0 }
 0x24c   :  { %v1154_v50 = vmax.f32 %v959_v35, 0.0  ;;  %v17358_v35 = vrot.slane %v2206_v37, %v17011_v58  ;;  %v3188_v24 = vrot.slane %v23558_v40, 2  ;;  %v17390_v63 = vrot.slane %v2222_v51, %v17011_v58 }
 0x24d   :  { %v1461_v27 = vcombine.high %v1155_v28, %v1155_v28  ;;  %v17387_v62 = vrot.slane %v1155_v28, %v17011_v58  ;;  %v969_v40 = vadd.f32 %v17004_v44, %v968_v29 }
 0x24e   :  { %v973_v3 = vpop.f32.mrb[128].mxu0  ;;  %v1444_v61 = vcombine.high %v1154_v50, %v1154_v50  ;;  %v17352_v18 = vrot.slane %v1154_v50, %v17011_v58  ;;  %24237 = vst [vmem:[#allocation77_spill] sm:$0xff] %v17358_v35  ;;  %v17379_v37 = vcombine.low %v17355_v5, %v17358_v35  ;;  %24242 = vst [vmem:[#allocation82_spill] sm:$0xff] %v17390_v63 }
 0x24f   :  { %v14354_v49 = vpop.f32.mrb[129].mxu0  ;;  %24241 = vst [vmem:[#allocation81_spill] sm:$0xff] %v17387_v62  ;;  %v17393_v35 = vrot.slane %v2223_v4, %v17011_v58  ;;  %v17410_v51 = vcombine.high %v17387_v62, %v17387_v62  ;;  %v17425_v5 = vrot.slane %v1461_v27, %v17011_v58 }
 0x250   :  { %24235 = vst [vmem:[#allocation75_spill] sm:$0xff] %v17352_v18  ;;  %v17368_v50 = vrot.slane %v1444_v61, %v17011_v58  ;;  %v17373_v49 = vcombine.high %v17352_v18, %v17352_v18  ;;  %24240 = vst [vmem:[#allocation80_spill] sm:$0xff] %v17379_v37  ;;  %v3189_v61 = vrot.slane %v17352_v18, 7  ;;  %14478 = vmatmul.mubr.msk.f32.gmra.mrb[40].mxu1 %vm684_vm2, %v17379_v37 }
 0x251   :  { %24243 = vst [vmem:[#allocation83_spill] sm:$0xff] %v17393_v35  ;;  %v17404_v37 = vrot.slane %v2240_v34, %v17011_v58  ;;  %24247 = vst [vmem:[#allocation87_spill] sm:$0xff] %v17410_v51  ;;  %v17418_v29 = vcombine.low %v17390_v63, %v17393_v35 }
 0x252   :  { %24238 = vst [vmem:[#allocation78_spill] sm:$0xff] %v17368_v50  ;;  %24239 = vst [vmem:[#allocation79_spill] sm:$0xff] %v17373_v49  ;;  %v978_v33 = vpop.f32.mrb[130].mxu0  ;;  %v17397_v17 = vsel %vm17044_vm9, %v3188_v24, %v3189_v61  ;;  %v2257_v28 = vcombine.low %v17373_v49, %v17368_v50  ;;  %v17414_v24 = vcombine.high %v17368_v50, %v17368_v50  ;;  %v3060_v49 = vrot.slane %v17060_v25, 7 }
 0x253   :  { %v14357_v47 = vpop.f32.mrb[131].mxu0  ;;  %24244 = vst [vmem:[#allocation84_spill] sm:$0xff] %v17397_v17  ;;  %24246 = vst [vmem:[#allocation86_spill] sm:$0xff] %v17404_v37  ;;  %14480 = vmatprep.mubr.msk.f32.mxu1 %vm684_vm2, %v17418_v29  ;;  %v974_v17 = vadd.f32 %v17004_v44, %v973_v3  ;;  %v979_v3 = vadd.f32 %v17004_v44, %v978_v33 }
 0x254   :  { %v17401_v47 = vrot.slane %v2239_v23, %v17011_v58  ;;  %24248 = vst [vmem:[#allocation88_spill] sm:$0xff] %v17414_v24  ;;  %24249 = vst [vmem:[#allocation89_spill] sm:$0xff] %v17418_v29  ;;  %v1156_v23 = vmax.f32 %v969_v40, 0.0  ;;  %v2256_v40 = vcombine.low %v17331_v0, %v17349_v1  ;;  %v2273_v27 = vcombine.low %v17414_v24, %v17387_v62 }
 0x255   :  { %24251 = vst [vmem:[#allocation91_spill] sm:$0xff] %v17425_v5  ;;  %v1157_v18 = vmax.f32 %v974_v17, 0.0  ;;  %v1158_v17 = vmax.f32 %v979_v3, 0.0 }
 0x256   :  { %24245 = vst [vmem:[#allocation85_spill] sm:$0xff] %v17401_v47  ;;  %v983_v4 = vpop.f32.mrb[132].mxu0  ;;  %v17422_v34 = vcombine.low %v17401_v47, %v17404_v37  ;;  %v17437_v37 = vrot.slane %v2257_v28, %v17011_v58  ;;  %v1478_v35 = vcombine.high %v1156_v23, %v1156_v23  ;;  %v17442_v29 = vrot.slane %v2256_v40, %v17011_v58 }
 0x257   :  { %v14360_v61 = vpop.f32.mrb[133].mxu0  ;;  %v17448_v63 = vrot.slane %v1156_v23, %v17011_v58  ;;  %v1495_v28 = vcombine.high %v1157_v18, %v1157_v18  ;;  %v17451_v1 = vrot.slane %v1157_v18, %v17011_v58  ;;  %v17461_v33 = vrot.slane %v2273_v27, %v17011_v58 }
 0x258   :  { %24250 = vst [vmem:[#allocation90_spill] sm:$0xff] %v17422_v34  ;;  %14481 = vmatmul.mubr.msk.f32.gmra.mrb[42].mxu1 %vm684_vm2, %v17422_v34  ;;  %24252 = vst [vmem:[#allocation92_spill] sm:$0xff] %v17437_v37  ;;  %v2274_v34 = vcombine.low %v17410_v51, %v17425_v5  ;;  %v17455_v24 = vcombine.low %v17442_v29, %v17437_v37  ;;  %v17458_v40 = vrot.slane %v1478_v35, %v17011_v58 }
 0x259   :  { %24253 = vst [vmem:[#allocation93_spill] sm:$0xff] %v17442_v29  ;;  %24254 = vst [vmem:[#allocation94_spill] sm:$0xff] %v17448_v63  ;;  %v17467_v51 = vrot.slane %v1495_v28, %v17011_v58  ;;  %v17471_v18 = vcombine.high %v17451_v1, %v17451_v1  ;;  %v17477_v35 = vcombine.high %v17448_v63, %v17448_v63 }
 0x25a   :  { %v988_v61 = vpop.f32.mrb[134].mxu0  ;;  %24255 = vst [vmem:[#allocation95_spill] sm:$0xff] %v17451_v1  ;;  %24256 = vst [vmem:[#allocation96_spill] sm:$0xff] %v17455_v24  ;;  %v17464_v14 = vrot.slane %v2274_v34, %v17011_v58  ;;  %14483 = vmatprep.mubr.msk.f32.mxu1 %vm684_vm2, %v17455_v24  ;;  %v17480_v27 = vrot.slane %v1158_v17, %v17011_v58  ;;  %v984_v3 = vadd.f32 %v17004_v44, %v983_v4 }
 0x25b   :  { %v14363_v47 = vpop.f32.mrb[135].mxu0  ;;  %24257 = vst [vmem:[#allocation97_spill] sm:$0xff] %v17458_v40  ;;  %24258 = vst [vmem:[#allocation98_spill] sm:$0xff] %v17461_v33  ;;  %v17489_v28 = vcombine.high %v17467_v51, %v17467_v51  ;;  %v17495_v24 = vcombine.high %v17458_v40, %v17458_v40  ;;  %v2290_v5 = vcombine.low %v17448_v63, %v17477_v35 }
 0x25c   :  { %24259 = vst [vmem:[#allocation99_spill] sm:$0xff] %v17464_v14  ;;  %24260 = vst [vmem:[#allocation100_spill] sm:$0xff] %v17467_v51  ;;  %v17484_v34 = vcombine.low %v17461_v33, %v17464_v14  ;;  %v17501_v14 = vcombine.high %v17480_v27, %v17480_v27  ;;  %v1159_v33 = vmax.f32 %v984_v3, 0.0  ;;  %v12680_v3 = vrot.slane %v17031_v7, 9 }
 0x25d   :  { %24261 = vst [vmem:[#allocation101_spill] sm:$0xff] %v17471_v18  ;;  %24262 = vst [vmem:[#allocation102_spill] sm:$0xff] %v17477_v35  ;;  %v2291_v25 = vcombine.low %v17458_v40, %v17495_v24  ;;  %v24280_v40 = vrot.slane %v17019_v2, 7 }
 0x25e   :  { %v993_v47 = vpop.f32.mrb[136].mxu0  ;;  %24263 = vst [vmem:[#allocation103_spill] sm:$0xff] %v17480_v27  ;;  %24264 = vst [vmem:[#allocation104_spill] sm:$0xff] %v17484_v34  ;;  %14484 = vmatmul.mubr.msk.f32.gmra.mrb[44].mxu1 %vm684_vm2, %v17484_v34  ;;  %v1529_v62 = vcombine.high %v1159_v33, %v1159_v33  ;;  %v17516_v41 = vrot.slane %v1159_v33, %v17011_v58  ;;  %v17536_v7 = vsel %vm17044_vm9, %v12680_v3, %v3060_v49 }
 0x25f   :  { %v14366_v23 = vpop.f32.mrb[137].mxu0  ;;  %24265 = vst [vmem:[#allocation105_spill] sm:$0xff] %v17489_v28  ;;  %24266 = vst [vmem:[#allocation106_spill] sm:$0xff] %v17495_v24  ;;  %v17566_v63 = vrot.slane %v24280_v40, 2 }
 0x260   :  { %v1512_v23 = vcombine.high %v1158_v17, %v1158_v17  ;;  %24267 = vst [vmem:[#allocation107_spill] sm:$0xff] %v17501_v14  ;;  %v2308_v17 = vcombine.low %v17489_v28, %v17480_v27  ;;  %24269 = vst [vmem:[#allocation109_spill] sm:$0xff] %v17516_v41  ;;  %v994_v28 = vadd.f32 %v17004_v44, %v993_v47 }
 0x261   :  { %v17528_v27 = vrot.slane %v1529_v62, %v17011_v58  ;;  %24273 = vst [vmem:[#allocation113_spill] sm:$0xff] %v17536_v7  ;;  %v17542_v47 = vrot.slane %v2291_v25, %v17011_v58  ;;  %v17562_v7 = vrot.slane %v3060_v49, 2  ;;  %24281 = vst [vmem:[#allocation120_spill] sm:$0xff] %v17566_v63 }
 0x262   :  { %v17491_v37 = vpop.f32.mrb[138].mxu0  ;;  %v17513_v51 = vrot.slane %v1512_v23, %v17011_v58  ;;  %v1161_v29 = vmax.f32 %v994_v28, 0.0  ;;  %v24282_v28 = vcombine.low %v17055_v19, %v17072_v30  ;;  %v24288_v19 = vcombine.low %v17081_v36, %v17102_v48 }
 0x263   :  { %v14369_v4 = vpop.f32.mrb[139].mxu0  ;;  %24271 = vst [vmem:[#allocation111_spill] sm:$0xff] %v17528_v27  ;;  %24275 = vst [vmem:[#allocation115_spill] sm:$0xff] %v17542_v47  ;;  %v17551_v23 = vcombine.high %v17528_v27, %v17528_v27  ;;  %v17625_v36 = vrot.slane %v2308_v17, %v17011_v58 }
 0x264   :  { %24268 = vst [vmem:[#allocation108_spill] sm:$0xff] %v17513_v51  ;;  %v989_v4 = vadd.f32 %v17004_v44, %v988_v61  ;;  %v17532_v61 = vcombine.high %v17516_v41, %v17516_v41  ;;  %v17547_v62 = vcombine.high %v17513_v51, %v17513_v51  ;;  %v17595_v30 = vrot.slane %v24288_v19, %v17011_v58  ;;  %v24377_v32 = vld [vmem:[#allocation102_spill] sm:$0xff] }
 0x265   :  { %24277 = vst [vmem:[#allocation117_spill] sm:$0xff] %v17551_v23  ;;  %24295 = vst [vmem:[#allocation130_spill] sm:$0xff] %v17625_v36  ;;  %v2324_v20 = vcombine.low %v17501_v14, %v17513_v51 }
 0x266   :  { %v17519_v34 = vpop.f32.mrb[140].mxu0  ;;  %24272 = vst [vmem:[#allocation112_spill] sm:$0xff] %v17532_v61  ;;  %v1160_v33 = vmax.f32 %v989_v4, 0.0  ;;  %24276 = vst [vmem:[#allocation116_spill] sm:$0xff] %v17547_v62  ;;  %v17572_v4 = vrot.slane %v24282_v28, %v17011_v58 }
 0x267   :  { %24270 = vst [vmem:[#allocation110_spill] sm:$0xff] %v17519_v34  ;;  %v14372_v35 = vpop.f32.mrb[141].mxu0  ;;  %v17539_v34 = vrot.slane %v2290_v5, %v17011_v58  ;;  %24289 = vst [vmem:[#allocation125_spill] sm:$0xff] %v17595_v30  ;;  %v17648_v30 = vrot.slane %v2324_v20, %v17011_v58 }
 0x268   :  { %v1546_v5 = vcombine.high %v1160_v33, %v1160_v33  ;;  %v17556_v24 = vrot.slane %v1160_v33, %v17011_v58  ;;  %24283 = vst [vmem:[#allocation121_spill] sm:$0xff] %v17572_v4  ;;  %v24284_v33 = vrot.slane %v17063_v26, 7 }
 0x269   :  { %24274 = vst [vmem:[#allocation114_spill] sm:$0xff] %v17539_v34  ;;  %v17560_v25 = vcombine.low %v17539_v34, %v17542_v47  ;;  %v2307_v47 = vcombine.low %v17451_v1, %v17471_v18  ;;  %24299 = vst [vmem:[#allocation133_spill] sm:$0xff] %v17648_v30 }
 0x26a   :  { %v1008_v3 = vpop.f32.mrb[142].mxu0  ;;  %24278 = vst [vmem:[#allocation118_spill] sm:$0xff] %v17556_v24  ;;  %v17576_v61 = vrot.slane %v24284_v33, 2  ;;  %v17581_v49 = vrot.slane %v1546_v5, %v17011_v58  ;;  %v17585_v40 = vcombine.high %v17556_v24, %v17556_v24  ;;  %v2325_v5 = vcombine.low %v17547_v62, %v17516_v41 }
 0x26b   :  { %24279 = vst [vmem:[#allocation119_spill] sm:$0xff] %v17560_v25  ;;  %v14375_v35 = vpop.f32.mrb[143].mxu0  ;;  %14486 = vmatprep.mubr.msk.f32.mxu1 %vm684_vm2, %v17560_v25  ;;  %v17601_v33 = vrot.slane %v1161_v29, %v17011_v58  ;;  %v2341_v62 = vcombine.low %v17528_v27, %v17551_v23  ;;  %v17622_v25 = vrot.slane %v2307_v47, %v17011_v58 }
 0x26c   :  { %24285 = vst [vmem:[#allocation122_spill] sm:$0xff] %v17576_v61  ;;  %24286 = vst [vmem:[#allocation123_spill] sm:$0xff] %v17581_v49  ;;  %v24291_v35 = vrot.slane %v17092_v45, 7  ;;  %v2342_v26 = vcombine.low %v17556_v24, %v17585_v40  ;;  %v17619_v45 = vcombine.high %v17581_v49, %v17581_v49  ;;  %v1009_v20 = vadd.f32 %v17004_v44, %v1008_v3 }
 0x26d   :  { %24287 = vst [vmem:[#allocation124_spill] sm:$0xff] %v17585_v40  ;;  %24290 = vst [vmem:[#allocation126_spill] sm:$0xff] %v17601_v33  ;;  %v3265_v17 = vrot.slane %v17601_v33, 7  ;;  %v24309_v3 = vrot.slane %v17117_v55, 7 }
 0x26e   :  { %v17603_v34 = vpop.f32.mrb[144].mxu0  ;;  %v17607_v61 = vrot.slane %v24291_v35, 2  ;;  %24293 = vst [vmem:[#allocation128_spill] sm:$0xff] %v17619_v45  ;;  %v1563_v35 = vcombine.high %v1161_v29, %v1161_v29  ;;  %24294 = vst [vmem:[#allocation129_spill] sm:$0xff] %v17622_v25  ;;  %v24298_v48 = vrot.slane %v17619_v45, 7  ;;  %v17654_v63 = vrot.slane %v2342_v26, %v17011_v58 }
 0x26f   :  { %v14378_v19 = vpop.f32.mrb[145].mxu0 }
 0x270   :  { %24292 = vst [vmem:[#allocation127_spill] sm:$0xff] %v17607_v61  ;;  %v999_v19 = vadd.f32 %v17004_v44, %v17491_v37  ;;  %v17635_v61 = vrot.slane %v2325_v5, %v17011_v58  ;;  %v17643_v37 = vcombine.low %v17622_v25, %v17625_v36  ;;  %v3264_v4 = vrot.slane %v24298_v48, 2  ;;  %24301 = vst [vmem:[#allocation135_spill] sm:$0xff] %v17654_v63 }
 0x271   :  { %v17651_v5 = vrot.slane %v2341_v62, %v17011_v58  ;;  %v17657_v47 = vrot.slane %v1563_v35, %v17011_v58  ;;  %v17661_v36 = vcombine.high %v17601_v33, %v17601_v33  ;;  %v17688_v62 = vrot.slane %v24309_v3, 2 }
 0x272   :  { %24296 = vst [vmem:[#allocation131_spill] sm:$0xff] %v17635_v61  ;;  %v17637_v29 = vpop.f32.mrb[146].mxu0  ;;  %24297 = vst [vmem:[#allocation132_spill] sm:$0xff] %v17643_v37  ;;  %v1162_v28 = vmax.f32 %v999_v19, 0.0  ;;  %14487 = vmatmul.mubr.msk.f32.gmra.mrb[46].mxu1 %vm684_vm2, %v17643_v37  ;;  %v17672_v26 = vsel %vm17044_vm9, %v3264_v4, %v3265_v17  ;;  %v17676_v48 = vcombine.low %v17648_v30, %v17635_v61  ;;  %v24308_v37 = vrot.slane %v17123_v60, 7 }
 0x273   :  { %v14381_v53 = vpop.f32.mrb[147].mxu0  ;;  %24300 = vst [vmem:[#allocation134_spill] sm:$0xff] %v17651_v5  ;;  %24302 = vst [vmem:[#allocation136_spill] sm:$0xff] %v17657_v47  ;;  %v17680_v35 = vcombine.low %v17651_v5, %v17654_v63  ;;  %v24310_v4 = vrot.slane %v17131_v9, 7  ;;  %v1164_v3 = vmax.f32 %v1009_v20, 0.0  ;;  %v3136_v5 = vrot.slane %v17261_v31, 7 }
 0x274   :  { %24303 = vst [vmem:[#allocation137_spill] sm:$0xff] %v17661_v36  ;;  %v17666_v53 = vrot.slane %v1162_v28, %v17011_v58  ;;  %24305 = vst [vmem:[#allocation139_spill] sm:$0xff] %v17672_v26  ;;  %v17684_v25 = vrot.slane %v24308_v37, 2  ;;  %v17702_v37 = vcombine.high %v17214_v54, %v17214_v54  ;;  %14489 = vmatprep.mubr.msk.f32.mxu1 %vm684_vm2, %v17676_v48  ;;  %v24318_v9 = vrot.slane %v17183_v6, 7 }
 0x275   :  { %24306 = vst [vmem:[#allocation140_spill] sm:$0xff] %v17676_v48  ;;  %24307 = vst [vmem:[#allocation141_spill] sm:$0xff] %v17680_v35  ;;  %v17692_v17 = vrot.slane %v24310_v4, 2  ;;  %v24314_v4 = vrot.slane %v17174_v59, 7  ;;  %v1580_v63 = vcombine.high %v1162_v28, %v1162_v28  ;;  %v17724_v59 = vcombine.high %v17657_v47, %v17657_v47 }
 0x276   :  { %24304 = vst [vmem:[#allocation138_spill] sm:$0xff] %v17666_v53  ;;  %v1023_v19 = vpop.f32.mrb[148].mxu0  ;;  %v17696_v61 = vcombine.high %v17666_v53, %v17666_v53  ;;  %24313 = vst [vmem:[#allocation144_spill] sm:$0xff] %v17702_v37  ;;  %14490 = vmatmul.mubr.msk.f32.gmra.mrb[48].mxu1 %vm684_vm2, %v17680_v35  ;;  %v1614_v28 = vcombine.high %v1164_v3, %v1164_v3  ;;  %v17727_v35 = vrot.slane %v1164_v3, %v17011_v58 }
 0x277   :  { %24311 = vst [vmem:[#allocation142_spill] sm:$0xff] %v17692_v17  ;;  %v14384_v30 = vpop.f32.mrb[149].mxu0  ;;  %v17708_v33 = vrot.slane %v24314_v4, 2  ;;  %v2358_v4 = vcombine.low %v17581_v49, %v17619_v45  ;;  %24316 = vst [vmem:[#allocation146_spill] sm:$0xff] %v17724_v59  ;;  %v17737_v26 = vrot.slane %v1580_v63, %v17011_v58  ;;  %v17755_v38 = vsel %vm17044_vm9, %v12684_v11, %v3136_v5 }
 0x278   :  { %24312 = vst [vmem:[#allocation143_spill] sm:$0xff] %v17696_v61  ;;  %v2359_v30 = vcombine.low %v17661_v36, %v17657_v47  ;;  %24317 = vst [vmem:[#allocation147_spill] sm:$0xff] %v17727_v35  ;;  %v17740_v17 = vrot.slane %v1614_v28, %v17011_v58  ;;  %v17744_v3 = vcombine.high %v17727_v35, %v17727_v35  ;;  %v24327_v63 = vrot.slane %v17238_v46, 7 }
 0x279   :  { %24315 = vst [vmem:[#allocation145_spill] sm:$0xff] %v17708_v33  ;;  %v17731_v33 = vrot.slane %v24318_v9, 2  ;;  %24320 = vst [vmem:[#allocation149_spill] sm:$0xff] %v17737_v26  ;;  %v24324_v9 = vrot.slane %v17214_v54, 7  ;;  %v17762_v28 = vrot.slane %v2358_v4, %v17011_v58  ;;  %v17764_v37 = vrot.slane %v3136_v5, 2 }
 0x27a   :  { %v1028_v48 = vpop.f32.mrb[150].mxu0  ;;  %24321 = vst [vmem:[#allocation150_spill] sm:$0xff] %v17740_v17  ;;  %24322 = vst [vmem:[#allocation151_spill] sm:$0xff] %v17744_v3  ;;  %v17759_v45 = vrot.slane %v24327_v63, 2  ;;  %v2375_v11 = vcombine.low %v17724_v59, %v17666_v53  ;;  %v1014_v5 = vadd.f32 %v17004_v44, %v17603_v34  ;;  %v2376_v63 = vcombine.low %v17696_v61, %v17737_v26  ;;  %v12706_v61 = vld [vmem:[%s23506_s4 + $0x48] sm:$0xff] }
 0x27b   :  { %v14387_v31 = vpop.f32.mrb[151].mxu0  ;;  %24319 = vst [vmem:[#allocation148_spill] sm:$0xff] %v17731_v33  ;;  %v17751_v20 = vrot.slane %v24324_v9, 2  ;;  %24326 = vst [vmem:[#allocation154_spill] sm:$0xff] %v17755_v38  ;;  %v1024_v46 = vadd.f32 %v17004_v44, %v1023_v19  ;;  %v24341_v19 = vrot.slane %v17264_v21, 7 }
 0x27c   :  { %v17747_v31 = vrot.slane %v2359_v30, %v17011_v58  ;;  %24328 = vst [vmem:[#allocation155_spill] sm:$0xff] %v17759_v45  ;;  %24329 = vst [vmem:[#allocation156_spill] sm:$0xff] %v17762_v28  ;;  %v24331_v30 = vrot.slane %v17241_v39, 7  ;;  %v17801_v3 = vmax.f32 %v1014_v5, 0.0  ;;  %v17805_v59 = vrot.slane %v2375_v11, %v17011_v58 }
 0x27d   :  { %24325 = vst [vmem:[#allocation153_spill] sm:$0xff] %v17751_v20  ;;  %24330 = vst [vmem:[#allocation157_spill] sm:$0xff] %v17764_v37  ;;  %v17808_v39 = vrot.slane %v2376_v63, %v17011_v58  ;;  %v1167_v5 = vmax.f32 %v1024_v46, 0.0 }
 0x27e   :  { %24323 = vst [vmem:[#allocation152_spill] sm:$0xff] %v17747_v31  ;;  %v1033_v35 = vpop.f32.mrb[152].mxu0  ;;  %v17768_v22 = vrot.slane %v24331_v30, 2  ;;  %v17778_v4 = vcombine.low %v17762_v28, %v17747_v31  ;;  %v12704_v30 = vld [vmem:[%s23506_s4 + $0x38] sm:$0xff]  ;;  %v1019_v31 = vadd.f32 %v17004_v44, %v17637_v29  ;;  %v17797_v28 = vcombine.high %v17740_v17, %v17740_v17  ;;  %24335 = vst [vmem:[#allocation161_spill] sm:$0xff] %v17801_v3 }
 0x27f   :  { %v14390_v38 = vpop.f32.mrb[153].mxu0  ;;  %24336 = vst [vmem:[#allocation162_spill] sm:$0xff] %v17805_v59  ;;  %24337 = vst [vmem:[#allocation163_spill] sm:$0xff] %v17808_v39  ;;  %v17813_v45 = vrot.slane %v17801_v3, %v17011_v58  ;;  %v17819_v11 = vcombine.low %v17805_v59, %v17808_v39  ;;  %v17833_v17 = vrot.slane %v24341_v19, 2  ;;  %v1665_v46 = vcombine.high %v1167_v5, %v1167_v5 }
 0x280   :  { %24332 = vst [vmem:[#allocation158_spill] sm:$0xff] %v17768_v22  ;;  %24333 = vst [vmem:[#allocation159_spill] sm:$0xff] %v17778_v4  ;;  %v12705_v38 = vld [vmem:[%s23506_s4 + $0x40] sm:$0xff]  ;;  %14492 = vmatprep.mubr.msk.f32.mxu1 %vm684_vm2, %v17778_v4  ;;  %v1166_v29 = vmax.f32 %v1019_v31, 0.0  ;;  %v1029_v4 = vadd.f32 %v17004_v44, %v1028_v48  ;;  %v1034_v48 = vadd.f32 %v17004_v44, %v1033_v35  ;;  %v24345_v35 = vrot.slane %v17294_v52, 7  ;;  %v24376_v52 = vld [vmem:[#allocation94_spill] sm:$0xff] }
 0x281   :  { %24334 = vst [vmem:[#allocation160_spill] sm:$0xff] %v17797_v28  ;;  %v15584_v13 = vpack.c.bf16 %v12705_v38, %v12704_v30  ;;  %24338 = vst [vmem:[#allocation164_spill] sm:$0xff] %v17813_v45  ;;  %14493 = vmatmul.mubr.msk.f32.gmra.mrb[50].mxu1 %vm684_vm2, %v17819_v11  ;;  %v24349_v28 = vrot.slane %v17310_v43, 7  ;;  %v24360_v43 = vld [vmem:[#allocation91_spill] sm:$0xff] }
 0x282   :  { %v1038_v9 = vpop.f32.mrb[154].mxu0  ;;  %24339 = vst [vmem:[#allocation165_spill] sm:$0xff] %v17819_v11  ;;  %v1648_v63 = vcombine.high %v1166_v29, %v1166_v29  ;;  %v17822_v31 = vrot.slane %v1166_v29, %v17011_v58  ;;  %24342 = vst [vmem:[#allocation167_spill] sm:$0xff] %v17833_v17  ;;  %v17846_v3 = vrot.slane %v24345_v35, 2  ;;  %v1168_v39 = vmax.f32 %v1029_v4, 0.0 }
 0x283   :  { %v14393_v34 = vpop.f32.mrb[155].mxu0  ;;  %15585 = vmatprep.subr.bf16.mxu1 %v15584_v13  ;;  %v24347_v11 = vrot.slane %v17297_v8, 7  ;;  %v17857_v45 = vrot.slane %v24349_v28, 2  ;;  %v24351_v35 = vrot.slane %v17314_v42, 7  ;;  %v24355_v28 = vld [vmem:[#allocation81_spill] sm:$0xff]  ;;  %v24358_v42 = vrot.slane %v17331_v0, 7 }
 0x284   :  { %24340 = vst [vmem:[#allocation166_spill] sm:$0xff] %v17822_v31  ;;  %15587 = vmatpush3.bf16.msra.mxu1 %v15584_v13  ;;  %v17838_v29 = vrot.slane %v1648_v63, %v17011_v58  ;;  %v17842_v30 = vcombine.high %v17822_v31, %v17822_v31  ;;  %24346 = vst [vmem:[#allocation170_spill] sm:$0xff] %v17846_v3 }
 0x285   :  { %v17852_v59 = vrot.slane %v24347_v11, 2  ;;  %24350 = vst [vmem:[#allocation172_spill] sm:$0xff] %v17857_v45  ;;  %v17862_v3 = vrot.slane %v24351_v35, 2  ;;  %v1169_v11 = vmax.f32 %v1034_v48, 0.0  ;;  %v17878_v35 = vrot.slane %v1665_v46, %v17011_v58 }
 0x286   :  { %v17829_v34 = vpop.f32.mrb[156].mxu0  ;;  %24343 = vst [vmem:[#allocation168_spill] sm:$0xff] %v17838_v29  ;;  %24344 = vst [vmem:[#allocation169_spill] sm:$0xff] %v17842_v30  ;;  %v17866_v13 = vcombine.high %v17838_v29, %v17838_v29  ;;  %v17882_v16 = vrot.slane %v24358_v42, 2  ;;  %v1682_v48 = vcombine.high %v1168_v39, %v1168_v39  ;;  %v17886_v30 = vrot.slane %v1168_v39, %v17011_v58 }
 0x287   :  { %v14396_v38 = vpop.f32.mrb[157].mxu0  ;;  %24348 = vst [vmem:[#allocation171_spill] sm:$0xff] %v17852_v59  ;;  %24352 = vst [vmem:[#allocation173_spill] sm:$0xff] %v17862_v3  ;;  %v24363_v45 = vrot.slane %v17368_v50, 7  ;;  %v17895_v46 = vcombine.high %v24360_v43, %v24360_v43  ;;  %v17906_v31 = vcombine.high %v17878_v35, %v17878_v35  ;;  %v1039_v39 = vadd.f32 %v17004_v44, %v1038_v9 }
 0x288   :  { %24353 = vst [vmem:[#allocation174_spill] sm:$0xff] %v17866_v13  ;;  %v17875_v38 = vrot.slane %v1167_v5, %v17011_v58  ;;  %24357 = vst [vmem:[#allocation176_spill] sm:$0xff] %v17878_v35  ;;  %v17918_v0 = vrot.slane %v1682_v48, %v17011_v58  ;;  %v12688_v59 = vrot.slane %v24376_v52, 9  ;;  %v2392_v56 = vcombine.low %v17838_v29, %v17866_v13 }
 0x289   :  { %24359 = vst [vmem:[#allocation177_spill] sm:$0xff] %v17882_v16  ;;  %24361 = vst [vmem:[#allocation178_spill] sm:$0xff] %v17886_v30  ;;  %v17891_v5 = vrot.slane %v24363_v45, 2  ;;  %v17909_v45 = vrot.slane %v1169_v11, %v17011_v58  ;;  %v24374_v16 = vrot.slane %v24360_v43, 7  ;;  %v1699_v44 = vcombine.high %v1169_v11, %v1169_v11 }
 0x28a   :  { %v17870_v19 = vpop.f32.mrb[158].mxu0  ;;  %24356 = vst [vmem:[#allocation175_spill] sm:$0xff] %v17875_v38  ;;  %24365 = vst [vmem:[#allocation180_spill] sm:$0xff] %v17895_v46  ;;  %v17900_v42 = vcombine.high %v17875_v38, %v17875_v38  ;;  %v1170_v43 = vmax.f32 %v1039_v39, 0.0  ;;  %v24385_v11 = vrot.slane %v17451_v1, 7  ;;  %v2400_v39 = vrot.slane %v2392_v56, %v17011_v58  ;;  %v24388_v1 = vld [vmem:[#allocation103_spill] sm:$0xff] }
 0x28b   :  { %v14399_v3 = vpop.f32.mrb[159].mxu0  ;;  %24364 = vst [vmem:[#allocation179_spill] sm:$0xff] %v17891_v5  ;;  %24368 = vst [vmem:[#allocation182_spill] sm:$0xff] %v17906_v31  ;;  %v24370_v5 = vrot.slane %v24355_v28, 7  ;;  %v17927_v63 = vrot.slane %v24374_v16, 2  ;;  %v3212_v28 = vrot.slane %v24377_v32, 7  ;;  %v17945_v9 = vcombine.high %v17909_v45, %v17909_v45 }
 0x28c   :  { %24367 = vst [vmem:[#allocation181_spill] sm:$0xff] %v17900_v42  ;;  %24369 = vst [vmem:[#allocation183_spill] sm:$0xff] %v17909_v45  ;;  %v17922_v3 = vcombine.high %v17886_v30, %v17886_v30  ;;  %v2393_v16 = vcombine.low %v17875_v38, %v17900_v42  ;;  %v24450_v33 = vrot.slane %v17875_v38, 7 }
 0x28d   :  { %v17915_v8 = vrot.slane %v24370_v5, 2  ;;  %24372 = vst [vmem:[#allocation185_spill] sm:$0xff] %v17918_v0  ;;  %24375 = vst [vmem:[#allocation187_spill] sm:$0xff] %v17927_v63  ;;  %v23690_v5 = vrot.slane %v17906_v31, 7  ;;  %v17954_v12 = vsel %vm17044_vm9, %v12688_v59, %v3212_v28  ;;  %v17974_v59 = vcombine.high %v17918_v0, %v17918_v0 }
 0x28e   :  { %v17911_v4 = vpop.f32.mrb[160].mxu0  ;;  %24373 = vst [vmem:[#allocation186_spill] sm:$0xff] %v17922_v3  ;;  %24379 = vst [vmem:[#allocation94_spill] sm:$0xff] %v17945_v9  ;;  %v2410_v32 = vcombine.low %v17922_v3, %v17918_v0  ;;  %v18261_v6 = vrot.slane %v24450_v33, 2  ;;  %v24458_v33 = vrot.slane %v17918_v0, 7 }
 0x28f   :  { %24371 = vst [vmem:[#allocation184_spill] sm:$0xff] %v17915_v8  ;;  %v14402_v50 = vpop.f32.mrb[161].mxu0  ;;  %v24378_v8 = vld [vmem:[#allocation97_spill] sm:$0xff]  ;;  %v3302_v52 = vrot.slane %v23690_v5, 2  ;;  %24380 = vst [vmem:[#allocation188_spill] sm:$0xff] %v17954_v12  ;;  %v17956_v5 = vrot.slane %v3212_v28, 2  ;;  %v1716_v28 = vcombine.high %v1170_v43, %v1170_v43 }
 0x290   :  { %v3303_v50 = vrot.slane %v17886_v30, 7  ;;  %v24383_v17 = vrot.slane %v24378_v8, 7  ;;  %24387 = vst [vmem:[#allocation193_spill] sm:$0xff] %v17974_v59  ;;  %v17990_v56 = vrot.slane %v2410_v32, %v17011_v58  ;;  %24451 = vst [vmem:[#allocation242_spill] sm:$0xff] %v18261_v6 }
 0x291   :  { %24381 = vst [vmem:[#allocation189_spill] sm:$0xff] %v17956_v5 }
 0x292   :  { %v17947_v48 = vpop.f32.mrb[0].mxu1  ;;  %v17960_v30 = vsel %vm17044_vm9, %v3302_v52, %v3303_v50  ;;  %v17966_v46 = vrot.slane %v24383_v17, 2  ;;  %v2407_v52 = vrot.slane %v2393_v16, %v17011_v58  ;;  %v17978_v50 = vld [vmem:[#allocation4 + $0x1] ss:$0 sm:$0xff]  ;;  %v2409_v17 = vcombine.low %v17878_v35, %v17906_v31  ;;  %24390 = vst [vmem:[#allocation195_spill] sm:$0xff] %v17990_v56 }
 0x293   :  { %v14405_v63 = vpop.f32.mrb[1].mxu1  ;;  %24382 = vst [vmem:[#allocation190_spill] sm:$0xff] %v17960_v30  ;;  %v1044_v21 = vadd.f32 %v17978_v50, %v17829_v34  ;;  %v1049_v34 = vadd.f32 %v17978_v50, %v17870_v19  ;;  %v24411_v31 = vrot.slane %v17551_v23, 7 }
 0x294   :  { %24384 = vst [vmem:[#allocation191_spill] sm:$0xff] %v17966_v46  ;;  %v17970_v63 = vrot.slane %v24385_v11, 2  ;;  %v2408_v12 = vcombine.low %v2400_v39, %v2407_v52  ;;  %v2417_v8 = vrot.slane %v2409_v17, %v17011_v58  ;;  %v2426_v11 = vcombine.low %v17974_v59, %v17909_v45 }
 0x295   :  { %v1171_v5 = vmax.f32 %v1044_v21, 0.0  ;;  %v17999_v46 = vrot.slane %v1170_v43, %v17011_v58  ;;  %v1172_v19 = vmax.f32 %v1049_v34, 0.0 }
 0x296   :  { %24386 = vst [vmem:[#allocation192_spill] sm:$0xff] %v17970_v63  ;;  %v1063_v30 = vpop.f32.mrb[2].mxu1  ;;  %v17987_v63 = vrot.slane %v1699_v44, %v17011_v58  ;;  %v18002_v44 = vrot.slane %v1716_v28, %v17011_v58  ;;  %14495 = vmatprep.mubr.msk.f32.mxu1 %vm684_vm2, %v2408_v12  ;;  %v2425_v39 = vcombine.low %v2417_v8, %v17990_v56  ;;  %v24395_v12 = vrot.slane %v24388_v1, 7 }
 0x297   :  { %v14408_v16 = vpop.f32.mrb[3].mxu1  ;;  %v1733_v32 = vcombine.high %v1171_v5, %v1171_v5  ;;  %v18006_v21 = vrot.slane %v1171_v5, %v17011_v58 }
 0x298   :  { %24389 = vst [vmem:[#allocation194_spill] sm:$0xff] %v17987_v63  ;;  %24391 = vst [vmem:[#allocation196_spill] sm:$0xff] %v18002_v44  ;;  %v2427_v28 = vcombine.low %v17945_v9, %v17987_v63  ;;  %v18018_v22 = vrot.slane %v24395_v12, 2  ;;  %14496 = vmatmul.mubr.msk.f32.gmra.mrb[52].mxu1 %vm684_vm2, %v2425_v39  ;;  %v24399_v16 = vrot.slane %v17513_v51, 7  ;;  %v18038_v12 = vrot.slane %v1172_v19, %v17011_v58 }
 0x299   :  { %24392 = vst [vmem:[#allocation197_spill] sm:$0xff] %v18006_v21  ;;  %v18022_v8 = vrot.slane %v1733_v32, %v17011_v58  ;;  %v18026_v34 = vcombine.high %v18006_v21, %v18006_v21  ;;  %v18046_v43 = vcombine.high %v18002_v44, %v18002_v44  ;;  %v24474_v42 = vrot.slane %v17987_v63, 7 }
 0x29a   :  { %v18009_v52 = vpop.f32.mrb[4].mxu1  ;;  %24396 = vst [vmem:[#allocation198_spill] sm:$0xff] %v18018_v22  ;;  %v18031_v59 = vrot.slane %v24399_v16, 2  ;;  %24402 = vst [vmem:[#allocation203_spill] sm:$0xff] %v18038_v12  ;;  %v18041_v32 = vrot.slane %v2427_v28, %v17011_v58  ;;  %v18053_v16 = vrot.slane %v2426_v11, %v17011_v58  ;;  %v18066_v22 = vcombine.high %v18038_v12, %v18038_v12 }
 0x29b   :  { %v14411_v18 = vpop.f32.mrb[5].mxu1  ;;  %24397 = vst [vmem:[#allocation199_spill] sm:$0xff] %v18022_v8  ;;  %24398 = vst [vmem:[#allocation200_spill] sm:$0xff] %v18026_v34  ;;  %v18050_v39 = vcombine.high %v18022_v8, %v18022_v8  ;;  %v2460_v5 = vcombine.low %v18006_v21, %v18026_v34  ;;  %v1054_v11 = vadd.f32 %v17978_v50, %v17911_v4 }
 0x29c   :  { %24400 = vst [vmem:[#allocation201_spill] sm:$0xff] %v18031_v59  ;;  %v18035_v18 = vcombine.high %v17999_v46, %v17999_v46  ;;  %24403 = vst [vmem:[#allocation204_spill] sm:$0xff] %v18041_v32  ;;  %v24407_v59 = vrot.slane %v17516_v41, 7  ;;  %v1750_v41 = vcombine.high %v1172_v19, %v1172_v19  ;;  %v24413_v19 = vrot.slane %v17556_v24, 7 }
 0x29d   :  { %24404 = vst [vmem:[#allocation205_spill] sm:$0xff] %v18046_v43  ;;  %24405 = vst [vmem:[#allocation206_spill] sm:$0xff] %v18050_v39  ;;  %v2461_v1 = vcombine.low %v18050_v39, %v18038_v12  ;;  %v1173_v4 = vmax.f32 %v1054_v11, 0.0  ;;  %v18124_v11 = vcombine.high %v17737_v26, %v17737_v26 }
 0x29e   :  { %24401 = vst [vmem:[#allocation202_spill] sm:$0xff] %v18035_v18  ;;  %24406 = vst [vmem:[#allocation207_spill] sm:$0xff] %v18053_v16  ;;  %v18055_v56 = vpop.f32.mrb[6].mxu1  ;;  %v18059_v51 = vrot.slane %v24407_v59, 2  ;;  %v2442_v59 = vcombine.low %v18053_v16, %v18041_v32  ;;  %v2443_v28 = vcombine.low %v17999_v46, %v18035_v18  ;;  %v1059_v32 = vadd.f32 %v17978_v50, %v17947_v48 }
 0x29f   :  { %24409 = vst [vmem:[#allocation209_spill] sm:$0xff] %v18066_v22  ;;  %v14414_v14 = vpop.f32.mrb[7].mxu1  ;;  %v2444_v16 = vcombine.low %v18002_v44, %v18046_v43  ;;  %v18104_v43 = vrot.slane %v2461_v1, %v17011_v58  ;;  %24421 = vst [vmem:[#allocation218_spill] sm:$0xff] %v18124_v11 }
 0x2a0   :  { %24408 = vst [vmem:[#allocation208_spill] sm:$0xff] %v18059_v51  ;;  %v18082_v51 = vrot.slane %v24411_v31, 2  ;;  %14498 = vmatprep.mubr.msk.f32.mxu1 %vm684_vm2, %v2442_v59  ;;  %v18095_v14 = vrot.slane %v24413_v19, 2  ;;  %v1064_v59 = vadd.f32 %v17978_v50, %v1063_v30  ;;  %v1174_v23 = vmax.f32 %v1059_v32, 0.0 }
 0x2a1   :  { %v18101_v48 = vrot.slane %v2444_v16, %v17011_v58  ;;  %24416 = vst [vmem:[#allocation213_spill] sm:$0xff] %v18104_v43  ;;  %v18108_v19 = vrot.slane %v1750_v41, %v17011_v58  ;;  %v18111_v31 = vrot.slane %v2443_v28, %v17011_v58  ;;  %v1767_v30 = vcombine.high %v1173_v4, %v1173_v4 }
 0x2a2   :  { %24412 = vst [vmem:[#allocation210_spill] sm:$0xff] %v18082_v51  ;;  %v18091_v17 = vpop.f32.mrb[8].mxu1  ;;  %24414 = vst [vmem:[#allocation211_spill] sm:$0xff] %v18095_v14  ;;  %v18114_v51 = vrot.slane %v2460_v5, %v17011_v58  ;;  %v18118_v32 = vrot.slane %v1173_v4, %v17011_v58  ;;  %v1784_v16 = vcombine.high %v1174_v23, %v1174_v23  ;;  %v1175_v28 = vmax.f32 %v1064_v59, 0.0 }
 0x2a3   :  { %v14417_v27 = vpop.f32.mrb[9].mxu1  ;;  %24415 = vst [vmem:[#allocation212_spill] sm:$0xff] %v18101_v48  ;;  %24417 = vst [vmem:[#allocation214_spill] sm:$0xff] %v18108_v19  ;;  %v18128_v41 = vcombine.low %v18111_v31, %v18101_v48  ;;  %v18136_v57 = vrot.slane %v1767_v30, %v17011_v58  ;;  %v18143_v40 = vrot.slane %v1174_v23, %v17011_v58  ;;  %v24426_v48 = vrot.slane %v17581_v49, 7 }
 0x2a4   :  { %24418 = vst [vmem:[#allocation215_spill] sm:$0xff] %v18111_v31  ;;  %24419 = vst [vmem:[#allocation216_spill] sm:$0xff] %v18114_v51  ;;  %v18132_v5 = vcombine.low %v18114_v51, %v18104_v43  ;;  %v18140_v14 = vcombine.high %v18118_v32, %v18118_v32  ;;  %v18155_v30 = vrot.slane %v1784_v16, %v17011_v58  ;;  %v24430_v4 = vrot.slane %v17657_v47, 7 }
 0x2a5   :  { %24420 = vst [vmem:[#allocation217_spill] sm:$0xff] %v18118_v32  ;;  %24422 = vst [vmem:[#allocation219_spill] sm:$0xff] %v18128_v41  ;;  %v18147_v59 = vrot.slane %v24426_v48, 2  ;;  %14499 = vmatmul.mubr.msk.f32.gmra.mrb[54].mxu1 %vm684_vm2, %v18128_v41  ;;  %v24432_v51 = vrot.slane %v17666_v53, 7  ;;  %v18169_v43 = vcombine.high %v18136_v57, %v18136_v57  ;;  %v1069_v16 = vadd.f32 %v17978_v50, %v18009_v52 }
 0x2a6   :  { %v18120_v1 = vpop.f32.mrb[10].mxu1  ;;  %24423 = vst [vmem:[#allocation220_spill] sm:$0xff] %v18132_v5  ;;  %24424 = vst [vmem:[#allocation221_spill] sm:$0xff] %v18140_v14  ;;  %v18161_v23 = vrot.slane %v24430_v4, 2  ;;  %14501 = vmatprep.mubr.msk.f32.mxu1 %vm684_vm2, %v18132_v5  ;;  %v1801_v53 = vcombine.high %v1175_v28, %v1175_v28  ;;  %v2477_v41 = vcombine.low %v18066_v22, %v18108_v19 }
 0x2a7   :  { %v14420_v27 = vpop.f32.mrb[11].mxu1  ;;  %24425 = vst [vmem:[#allocation222_spill] sm:$0xff] %v18143_v40  ;;  %24427 = vst [vmem:[#allocation223_spill] sm:$0xff] %v18147_v59  ;;  %v18165_v48 = vrot.slane %v24432_v51, 2  ;;  %v18181_v51 = vrot.slane %v1175_v28, %v17011_v58  ;;  %v18197_v28 = vcombine.high %v18155_v30, %v18155_v30  ;;  %v18205_v52 = vcombine.high %v18143_v40, %v18143_v40 }
 0x2a8   :  { %v18152_v27 = vcombine.high %v18108_v19, %v18108_v19  ;;  %24429 = vst [vmem:[#allocation225_spill] sm:$0xff] %v18155_v30  ;;  %24431 = vst [vmem:[#allocation226_spill] sm:$0xff] %v18161_v23  ;;  %v2494_v24 = vcombine.low %v18136_v57, %v18169_v43 }
 0x2a9   :  { %24433 = vst [vmem:[#allocation227_spill] sm:$0xff] %v18165_v48  ;;  %24434 = vst [vmem:[#allocation228_spill] sm:$0xff] %v18169_v43  ;;  %v24436_v48 = vrot.slane %v17737_v26, 7  ;;  %v1176_v26 = vmax.f32 %v1069_v16, 0.0  ;;  %v23751_v5 = vrot.slane %v18197_v28, 7  ;;  %v18222_v11 = vcombine.high %v18181_v51, %v18181_v51 }
 0x2aa   :  { %24428 = vst [vmem:[#allocation224_spill] sm:$0xff] %v18152_v27  ;;  %v18175_v31 = vpop.f32.mrb[12].mxu1  ;;  %24435 = vst [vmem:[#allocation229_spill] sm:$0xff] %v18181_v51  ;;  %v2478_v4 = vcombine.low %v18152_v27, %v18118_v32  ;;  %v12707_v27 = vld [vmem:[%s23506_s4 + $0x50] sm:$0xff]  ;;  %v3379_v47 = vrot.slane %v18181_v51, 7  ;;  %v2495_v51 = vcombine.low %v18143_v40, %v18205_v52 }
 0x2ab   :  { %v14423_v23 = vpop.f32.mrb[13].mxu1  ;;  %v18185_v36 = vrot.slane %v24436_v48, 2  ;;  %24438 = vst [vmem:[#allocation231_spill] sm:$0xff] %v18197_v28  ;;  %24439 = vst [vmem:[#allocation232_spill] sm:$0xff] %v18205_v52  ;;  %v18215_v48 = vrot.slane %v1801_v53, %v17011_v58  ;;  %v18226_v49 = vrot.slane %v1176_v26, %v17011_v58  ;;  %v3378_v53 = vrot.slane %v23751_v5, 2 }
 0x2ac   :  { %v1074_v23 = vadd.f32 %v17978_v50, %v18055_v56  ;;  %24441 = vst [vmem:[#allocation234_spill] sm:$0xff] %v18222_v11  ;;  %v18229_v56 = vrot.slane %v2477_v41, %v17011_v58  ;;  %v18234_v59 = vrot.slane %v2478_v4, %v17011_v58  ;;  %v1818_v37 = vcombine.high %v1176_v26, %v1176_v26 }
 0x2ad   :  { %24437 = vst [vmem:[#allocation230_spill] sm:$0xff] %v18185_v36  ;;  %24440 = vst [vmem:[#allocation233_spill] sm:$0xff] %v18215_v48  ;;  %v18242_v54 = vcombine.high %v18226_v49, %v18226_v49  ;;  %v18249_v4 = vsel %vm17044_vm9, %v3378_v53, %v3379_v47  ;;  %v24448_v26 = vrot.slane %v17866_v13, 7  ;;  %v2512_v47 = vcombine.low %v18222_v11, %v18215_v48 }
 0x2ae   :  { %v1093_v29 = vpop.f32.mrb[14].mxu1  ;;  %24442 = vst [vmem:[#allocation235_spill] sm:$0xff] %v18226_v49  ;;  %24443 = vst [vmem:[#allocation236_spill] sm:$0xff] %v18229_v56  ;;  %v1177_v36 = vmax.f32 %v1074_v23, 0.0  ;;  %v24452_v53 = vrot.slane %v17878_v35, 7  ;;  %v18280_v5 = vrot.slane %v1818_v37, %v17011_v58  ;;  %v18300_v37 = vcombine.high %v17987_v63, %v17987_v63 }
 0x2af   :  { %v14426_v16 = vpop.f32.mrb[15].mxu1  ;;  %24444 = vst [vmem:[#allocation237_spill] sm:$0xff] %v18234_v59  ;;  %24445 = vst [vmem:[#allocation238_spill] sm:$0xff] %v18242_v54  ;;  %v18257_v20 = vrot.slane %v24448_v26, 2  ;;  %v18273_v26 = vcombine.high %v18215_v48, %v18215_v48 }
 0x2b0   :  { %v15588_v16 = vpack.c.bf16 %v12707_v27, %v12706_v61  ;;  %24446 = vst [vmem:[#allocation239_spill] sm:$0xff] %v18249_v4  ;;  %v18253_v61 = vcombine.low %v18229_v56, %v18234_v59  ;;  %v1835_v27 = vcombine.high %v1177_v36, %v1177_v36  ;;  %v18268_v59 = vrot.slane %v24452_v53, 2  ;;  %24455 = vst [vmem:[#allocation245_spill] sm:$0xff] %v18280_v5 }
 0x2b1   :  { %24449 = vst [vmem:[#allocation241_spill] sm:$0xff] %v18257_v20  ;;  %24454 = vst [vmem:[#allocation244_spill] sm:$0xff] %v18273_v26  ;;  %v18286_v53 = vrot.slane %v2494_v24, %v17011_v58  ;;  %v2511_v4 = vcombine.low %v18155_v30, %v18197_v28  ;;  %v1089_v28 = vadd.f32 %v17978_v50, %v18175_v31  ;;  %v12694_v31 = vrot.slane %v17999_v46, 9 }
 0x2b2   :  { %v18244_v41 = vpop.f32.mrb[16].mxu1  ;;  %24447 = vst [vmem:[#allocation240_spill] sm:$0xff] %v18253_v61  ;;  %15589 = vmatprep.subr.bf16.mxu1 %v15588_v16  ;;  %24453 = vst [vmem:[#allocation243_spill] sm:$0xff] %v18268_v59  ;;  %14502 = vmatmul.mubr.msk.f32.gmra.mrb[56].mxu1 %vm684_vm2, %v18253_v61  ;;  %v18296_v59 = vrot.slane %v24458_v33, 2  ;;  %v1079_v61 = vadd.f32 %v17978_v50, %v18091_v17  ;;  %v18314_v33 = vrot.slane %v2512_v47, %v17011_v58 }
 0x2b3   :  { %v14429_v23 = vpop.f32.mrb[17].mxu1  ;;  %15591 = vmatpush3.bf16.msra.mxu1 %v15588_v16  ;;  %v18283_v16 = vrot.slane %v1177_v36, %v17011_v58  ;;  %24456 = vst [vmem:[#allocation246_spill] sm:$0xff] %v18286_v53  ;;  %24460 = vst [vmem:[#allocation249_spill] sm:$0xff] %v18300_v37  ;;  %v18303_v36 = vrot.slane %v1835_v27, %v17011_v58  ;;  %v18394_v20 = vrot.slane %v24474_v42, 2 }
 0x2b4   :  { %v18289_v23 = vrot.slane %v2495_v51, %v17011_v58  ;;  %24459 = vst [vmem:[#allocation248_spill] sm:$0xff] %v18296_v59  ;;  %24463 = vst [vmem:[#allocation252_spill] sm:$0xff] %v18314_v33  ;;  %v24464_v59 = vrot.slane %v17909_v45, 7  ;;  %v1178_v47 = vmax.f32 %v1079_v61, 0.0  ;;  %v1094_v45 = vadd.f32 %v17978_v50, %v1093_v29 }
 0x2b5   :  { %24461 = vst [vmem:[#allocation250_spill] sm:$0xff] %v18303_v36  ;;  %v18327_v17 = vcombine.high %v18283_v16, %v18283_v16  ;;  %24475 = vst [vmem:[#allocation262_spill] sm:$0xff] %v18394_v20  ;;  %v24493_v20 = vrot.slane %v18108_v19, 7 }
 0x2b6   :  { %24457 = vst [vmem:[#allocation247_spill] sm:$0xff] %v18289_v23  ;;  %v18291_v56 = vpop.f32.mrb[18].mxu1  ;;  %v18307_v51 = vcombine.low %v18286_v53, %v18289_v23  ;;  %v18318_v3 = vrot.slane %v24464_v59, 2  ;;  %v1084_v23 = vadd.f32 %v17978_v50, %v18120_v1  ;;  %v18332_v53 = vrot.slane %v2511_v4, %v17011_v58 }
 0x2b7   :  { %v14432_v24 = vpop.f32.mrb[19].mxu1  ;;  %24466 = vst [vmem:[#allocation254_spill] sm:$0xff] %v18327_v17  ;;  %v2529_v59 = vcombine.low %v18242_v54, %v18280_v5  ;;  %v1852_v61 = vcombine.high %v1178_v47, %v1178_v47  ;;  %v18346_v4 = vrot.slane %v1178_v47, %v17011_v58  ;;  %v18494_v8 = vrot.slane %v24493_v20, 2 }
 0x2b8   :  { %24462 = vst [vmem:[#allocation251_spill] sm:$0xff] %v18307_v51  ;;  %24465 = vst [vmem:[#allocation253_spill] sm:$0xff] %v18318_v3  ;;  %v2528_v24 = vcombine.low %v18273_v26, %v18226_v49  ;;  %14504 = vmatprep.mubr.msk.f32.mxu1 %vm684_vm2, %v18307_v51  ;;  %v18340_v26 = vcombine.high %v18303_v36, %v18303_v36  ;;  %v1179_v1 = vmax.f32 %v1084_v23, 0.0 }
 0x2b9   :  { %24467 = vst [vmem:[#allocation255_spill] sm:$0xff] %v18332_v53  ;;  %24469 = vst [vmem:[#allocation257_spill] sm:$0xff] %v18346_v4  ;;  %v18350_v3 = vcombine.low %v18332_v53, %v18314_v33  ;;  %v18353_v0 = vrot.slane %v2529_v59, %v17011_v58  ;;  %v18365_v47 = vrot.slane %v1852_v61, %v17011_v58  ;;  %v1181_v61 = vmax.f32 %v1094_v45, 0.0 }
 0x2ba   :  { %v18336_v27 = vpop.f32.mrb[20].mxu1  ;;  %24468 = vst [vmem:[#allocation256_spill] sm:$0xff] %v18340_v26  ;;  %v1869_v23 = vcombine.high %v1179_v1, %v1179_v1  ;;  %v18357_v6 = vrot.slane %v1179_v1, %v17011_v58  ;;  %v18360_v29 = vrot.slane %v2528_v24, %v17011_v58  ;;  %v18369_v59 = vcombine.high %v18346_v4, %v18346_v4 }
 0x2bb   :  { %v14435_v51 = vpop.f32.mrb[21].mxu1  ;;  %24470 = vst [vmem:[#allocation258_spill] sm:$0xff] %v18350_v3  ;;  %24471 = vst [vmem:[#allocation259_spill] sm:$0xff] %v18353_v0  ;;  %14505 = vmatmul.mubr.msk.f32.gmra.mrb[58].mxu1 %vm684_vm2, %v18350_v3  ;;  %v1180_v1 = vmax.f32 %v1089_v28, 0.0  ;;  %v18388_v3 = vcombine.high %v18365_v47, %v18365_v47  ;;  %v2546_v9 = vcombine.low %v18303_v36, %v18340_v26 }
 0x2bc   :  { %24472 = vst [vmem:[#allocation260_spill] sm:$0xff] %v18360_v29  ;;  %v3326_v51 = vrot.slane %v18035_v18, 7  ;;  %v18377_v24 = vcombine.high %v18357_v6, %v18357_v6  ;;  %v18381_v46 = vcombine.low %v18360_v29, %v18353_v0  ;;  %v2545_v18 = vcombine.low %v18283_v16, %v18327_v17  ;;  %24494 = vst [vmem:[#allocation277_spill] sm:$0xff] %v18494_v8 }
 0x2bd   :  { %v2563_v28 = vcombine.low %v18388_v3, %v18357_v6  ;;  %v1886_v45 = vcombine.high %v1180_v1, %v1180_v1  ;;  %v18418_v26 = vrot.slane %v1180_v1, %v17011_v58  ;;  %v1104_v20 = vadd.f32 %v17978_v50, %v18291_v56 }
 0x2be   :  { %v18373_v35 = vpop.f32.mrb[22].mxu1  ;;  %24473 = vst [vmem:[#allocation261_spill] sm:$0xff] %v18381_v46  ;;  %14507 = vmatprep.mubr.msk.f32.mxu1 %vm684_vm2, %v18381_v46  ;;  %v18406_v53 = vsel %vm17044_vm9, %v12694_v31, %v3326_v51  ;;  %v18408_v0 = vrot.slane %v3326_v51, 2  ;;  %v1903_v46 = vcombine.high %v1181_v61, %v1181_v61  ;;  %v24480_v31 = vrot.slane %v18002_v44, 7 }
 0x2bf   :  { %v14438_v33 = vpop.f32.mrb[23].mxu1  ;;  %24477 = vst [vmem:[#allocation264_spill] sm:$0xff] %v18406_v53  ;;  %24479 = vst [vmem:[#allocation266_spill] sm:$0xff] %v18418_v26  ;;  %v18426_v53 = vrot.slane %v2545_v18, %v17011_v58  ;;  %v18436_v1 = vrot.slane %v1886_v45, %v17011_v58  ;;  %v24487_v18 = vrot.slane %v18006_v21, 7  ;;  %v2562_v21 = vcombine.low %v18346_v4, %v18369_v59 }
 0x2c0   :  { %v18400_v33 = vrot.slane %v1869_v23, %v17011_v58  ;;  %24478 = vst [vmem:[#allocation265_spill] sm:$0xff] %v18408_v0  ;;  %v18422_v51 = vrot.slane %v24480_v31, 2  ;;  %v18429_v0 = vrot.slane %v2546_v9, %v17011_v58  ;;  %v18443_v31 = vrot.slane %v1181_v61, %v17011_v58  ;;  %v12709_v9 = vld [vmem:[%s23506_s4 + $0x60] sm:$0xff] }
 0x2c1   :  { %24482 = vst [vmem:[#allocation268_spill] sm:$0xff] %v18426_v53  ;;  %v18447_v42 = vrot.slane %v24487_v18, 2  ;;  %v18465_v18 = vcombine.high %v18436_v1, %v18436_v1  ;;  %v18506_v22 = vrot.slane %v2562_v21, %v17011_v58  ;;  %v18509_v61 = vrot.slane %v2563_v28, %v17011_v58 }
 0x2c2   :  { %24476 = vst [vmem:[#allocation263_spill] sm:$0xff] %v18400_v33  ;;  %v18413_v29 = vpop.f32.mrb[24].mxu1  ;;  %24481 = vst [vmem:[#allocation267_spill] sm:$0xff] %v18422_v51  ;;  %v18433_v23 = vcombine.high %v18400_v33, %v18400_v33  ;;  %v18451_v51 = vrot.slane %v1903_v46, %v17011_v58  ;;  %v18455_v45 = vcombine.low %v18426_v53, %v18429_v0  ;;  %v12708_v46 = vld [vmem:[%s23506_s4 + $0x58] sm:$0xff] }
 0x2c3   :  { %v14441_v63 = vpop.f32.mrb[25].mxu1  ;;  %24483 = vst [vmem:[#allocation269_spill] sm:$0xff] %v18429_v0  ;;  %24486 = vst [vmem:[#allocation272_spill] sm:$0xff] %v18443_v31  ;;  %v1099_v53 = vadd.f32 %v17978_v50, %v18244_v41  ;;  %v12710_v41 = vld [vmem:[%s23506_s4 + $0x68] sm:$0xff]  ;;  %v2579_v21 = vcombine.low %v18377_v24, %v18400_v33  ;;  %v18527_v56 = vcombine.low %v18506_v22, %v18509_v61 }
 0x2c4   :  { %24484 = vst [vmem:[#allocation270_spill] sm:$0xff] %v18433_v23  ;;  %v18440_v63 = vcombine.high %v18418_v26, %v18418_v26  ;;  %24488 = vst [vmem:[#allocation273_spill] sm:$0xff] %v18447_v42  ;;  %14508 = vmatmul.mubr.msk.f32.gmra.mrb[60].mxu1 %vm684_vm2, %v18455_v45  ;;  %v24491_v42 = vrot.slane %v18038_v12, 7  ;;  %v2580_v37 = vcombine.low %v18433_v23, %v18418_v26 }
 0x2c5   :  { %24489 = vst [vmem:[#allocation274_spill] sm:$0xff] %v18455_v45  ;;  %24490 = vst [vmem:[#allocation275_spill] sm:$0xff] %v18465_v18  ;;  %v15592_v45 = vpack.c.bf16 %v12709_v9, %v12708_v46  ;;  %v24498_v9 = vrot.slane %v18118_v32, 7  ;;  %v1182_v19 = vmax.f32 %v1099_v53, 0.0  ;;  %v1109_v39 = vadd.f32 %v17978_v50, %v18336_v27  ;;  %14510 = vmatprep.mubr.msk.f32.mxu1 %vm684_vm2, %v18527_v56 }
 0x2c6   :  { %24485 = vst [vmem:[#allocation271_spill] sm:$0xff] %v18440_v63  ;;  %v18457_v44 = vpop.f32.mrb[26].mxu1  ;;  %v18482_v34 = vrot.slane %v24491_v42, 2  ;;  %v18500_v42 = vcombine.high %v18451_v51, %v18451_v51  ;;  %24496 = vst [vmem:[#allocation279_spill] sm:$0xff] %v18506_v22  ;;  %v18530_v32 = vrot.slane %v2580_v37, %v17011_v58  ;;  %v18550_v37 = vrot.slane %v2579_v21, %v17011_v58  ;;  %v24571_v63 = vld [vmem:[#allocation125_spill] sm:$0xff] }
 0x2c7   :  { %v14444_v0 = vpop.f32.mrb[27].mxu1  ;;  %24497 = vst [vmem:[#allocation280_spill] sm:$0xff] %v18509_v61  ;;  %v18518_v46 = vrot.slane %v24498_v9, 2  ;;  %15593 = vmatprep.subr.bf16.mxu1 %v15592_v45  ;;  %24500 = vst [vmem:[#allocation282_spill] sm:$0xff] %v18527_v56  ;;  %v1920_v9 = vcombine.high %v1182_v19, %v1182_v19  ;;  %v18533_v53 = vrot.slane %v1182_v19, %v17011_v58  ;;  %v1184_v56 = vmax.f32 %v1109_v39, 0.0 }
 0x2c8   :  { %24492 = vst [vmem:[#allocation276_spill] sm:$0xff] %v18482_v34  ;;  %v18488_v0 = vcombine.high %v18443_v31, %v18443_v31  ;;  %24495 = vst [vmem:[#allocation278_spill] sm:$0xff] %v18500_v42  ;;  %v23811_v34 = vrot.slane %v18500_v42, 7  ;;  %15595 = vmatpush3.bf16.msra.mxu1 %v15592_v45  ;;  %v2596_v45 = vcombine.low %v18436_v1, %v18465_v18  ;;  %v24513_v39 = vrot.slane %v18143_v40, 7 }
 0x2c9   :  { %24499 = vst [vmem:[#allocation281_spill] sm:$0xff] %v18518_v46  ;;  %24501 = vst [vmem:[#allocation283_spill] sm:$0xff] %v18530_v32  ;;  %14534 = vmatprep.subr.mxu1 %v12710_v41  ;;  %v18553_v27 = vrot.slane %v1920_v9, %v17011_v58  ;;  %v3455_v61 = vrot.slane %v18533_v53, 7  ;;  %v18569_v21 = vcombine.low %v18550_v37, %v18530_v32 }
 0x2ca   :  { %v18502_v23 = vpop.f32.mrb[28].mxu1  ;;  %v2597_v28 = vcombine.low %v18443_v31, %v18488_v0  ;;  %24502 = vst [vmem:[#allocation284_spill] sm:$0xff] %v18533_v53  ;;  %v3454_v46 = vrot.slane %v23811_v34, 2  ;;  %24505 = vst [vmem:[#allocation287_spill] sm:$0xff] %v18550_v37  ;;  %v18557_v34 = vcombine.high %v18533_v53, %v18533_v53  ;;  %v18597_v18 = vrot.slane %v24513_v39, 2 }
 0x2cb   :  { %v14447_v8 = vpop.f32.mrb[29].mxu1  ;;  %24507 = vst [vmem:[#allocation289_spill] sm:$0xff] %v18569_v21  ;;  %14511 = vmatmul.mubr.msk.f32.gmra.mrb[62].mxu1 %vm684_vm2, %v18569_v21  ;;  %v24518_v37 = vrot.slane %v18215_v48, 7  ;;  %v1114_v38 = vadd.f32 %v17978_v50, %v18373_v35  ;;  %v2613_v32 = vcombine.low %v18451_v51, %v18500_v42  ;;  %v1119_v35 = vadd.f32 %v17978_v50, %v18413_v29 }
 0x2cc   :  { %v1183_v8 = vmax.f32 %v1104_v20, 0.0  ;;  %v18572_v9 = vrot.slane %v2597_v28, %v17011_v58  ;;  %14535 = vmatpush3.msra.mxu1 %v12710_v41  ;;  %v18578_v22 = vsel %vm17044_vm9, %v3454_v46, %v3455_v61  ;;  %v2614_v28 = vcombine.low %v18557_v34, %v18553_v27  ;;  %24514 = vst [vmem:[#allocation294_spill] sm:$0xff] %v18597_v18 }
 0x2cd   :  { %24509 = vst [vmem:[#allocation291_spill] sm:$0xff] %v18578_v22  ;;  %v18589_v41 = vrot.slane %v2596_v45, %v17011_v58  ;;  %v24512_v61 = vrot.slane %v18169_v43, 7  ;;  %v18613_v39 = vrot.slane %v24518_v37, 2  ;;  %v1954_v22 = vcombine.high %v1184_v56, %v1184_v56 }
 0x2ce   :  { %v18539_v12 = vpop.f32.mrb[30].mxu1  ;;  %v18547_v19 = vrot.slane %v1183_v8, %v17011_v58  ;;  %24508 = vst [vmem:[#allocation290_spill] sm:$0xff] %v18572_v9  ;;  %v18630_v37 = vrot.slane %v2614_v28, %v17011_v58  ;;  %v1185_v42 = vmax.f32 %v1114_v38, 0.0 }
 0x2cf   :  { %24503 = vst [vmem:[#allocation285_spill] sm:$0xff] %v18539_v12  ;;  %v14450_v20 = vpop.f32.mrb[31].mxu1  ;;  %24511 = vst [vmem:[#allocation293_spill] sm:$0xff] %v18589_v41  ;;  %v18593_v46 = vrot.slane %v24512_v61, 2  ;;  %v18609_v61 = vcombine.low %v18589_v41, %v18572_v9  ;;  %v18636_v9 = vcombine.high %v18553_v27, %v18553_v27  ;;  %v18639_v41 = vrot.slane %v1184_v56, %v17011_v58 }
 0x2d0   :  { %24504 = vst [vmem:[#allocation286_spill] sm:$0xff] %v18547_v19  ;;  %v18565_v12 = vcombine.high %v18547_v19, %v18547_v19  ;;  %24519 = vst [vmem:[#allocation297_spill] sm:$0xff] %v18613_v39  ;;  %v1186_v39 = vmax.f32 %v1119_v35, 0.0  ;;  %v18650_v29 = vrot.slane %v1954_v22, %v17011_v58  ;;  %v18653_v11 = vrot.slane %v1185_v42, %v17011_v58 }
 0x2d1   :  { %24517 = vst [vmem:[#allocation296_spill] sm:$0xff] %v18609_v61  ;;  %14513 = vmatprep.mubr.msk.f32.mxu1 %vm684_vm2, %v18609_v61  ;;  %24523 = vst [vmem:[#allocation300_spill] sm:$0xff] %v18630_v37  ;;  %v3402_v56 = vrot.slane %v18327_v17, 7  ;;  %v2630_v22 = vcombine.low %v18636_v9, %v18547_v19  ;;  %v18668_v35 = vcombine.high %v18639_v41, %v18639_v41 }
 0x2d2   :  { %24506 = vst [vmem:[#allocation288_spill] sm:$0xff] %v18565_v12  ;;  %v18580_v53 = vpop.f32.mrb[32].mxu1  ;;  %24524 = vst [vmem:[#allocation301_spill] sm:$0xff] %v18636_v9  ;;  %v18675_v61 = vcombine.high %v18653_v11, %v18653_v11  ;;  %v18693_v9 = vcombine.high %v18650_v29, %v18650_v29  ;;  %v1124_v17 = vadd.f32 %v17978_v50, %v18457_v44 }
 0x2d3   :  { %24510 = vst [vmem:[#allocation292_spill] sm:$0xff] %v18580_v53  ;;  %v14453_v20 = vpop.f32.mrb[33].mxu1  ;;  %v24515_v53 = vrot.slane %v18155_v30, 7  ;;  %24526 = vst [vmem:[#allocation303_spill] sm:$0xff] %v18650_v29  ;;  %v18718_v48 = vrot.slane %v2630_v22, %v17011_v58 }
 0x2d4   :  { %v1937_v20 = vcombine.high %v1183_v8, %v1183_v8  ;;  %v24521_v8 = vrot.slane %v18226_v49, 7  ;;  %24527 = vst [vmem:[#allocation304_spill] sm:$0xff] %v18653_v11  ;;  %v1988_v49 = vcombine.high %v1186_v39, %v1186_v39  ;;  %24529 = vst [vmem:[#allocation306_spill] sm:$0xff] %v18668_v35  ;;  %v2664_v54 = vcombine.low %v18653_v11, %v18675_v61 }
 0x2d5   :  { %v18604_v21 = vrot.slane %v24515_v53, 2  ;;  %v18621_v53 = vcombine.high %v18280_v5, %v18280_v5  ;;  %24532 = vst [vmem:[#allocation308_spill] sm:$0xff] %v18693_v9  ;;  %24536 = vst [vmem:[#allocation312_spill] sm:$0xff] %v18718_v48  ;;  %v1187_v44 = vmax.f32 %v1124_v17, 0.0 }
 0x2d6   :  { %v18625_v45 = vrot.slane %v24521_v8, 2  ;;  %v18642_v8 = vrot.slane %v2613_v32, %v17011_v58  ;;  %v18647_v28 = vrot.slane %v1937_v20, %v17011_v58  ;;  %v12698_v32 = vrot.slane %v18283_v16, 9 }
 0x2d7   :  { %24516 = vst [vmem:[#allocation295_spill] sm:$0xff] %v18604_v21  ;;  %24520 = vst [vmem:[#allocation298_spill] sm:$0xff] %v18621_v53  ;;  %v18662_v20 = vrot.slane %v1186_v39, %v17011_v58  ;;  %v24530_v16 = vrot.slane %v18280_v5, 7  ;;  %v18706_v5 = vrot.slane %v3402_v56, 2  ;;  %v2647_v53 = vcombine.low %v18639_v41, %v18668_v35 }
 0x2d8   :  { %24522 = vst [vmem:[#allocation299_spill] sm:$0xff] %v18625_v45  ;;  %24525 = vst [vmem:[#allocation302_spill] sm:$0xff] %v18642_v8  ;;  %v1971_v45 = vcombine.high %v1185_v42, %v1185_v42  ;;  %v18657_v38 = vcombine.low %v18642_v8, %v18630_v37  ;;  %v18704_v37 = vsel %vm17044_vm9, %v12698_v32, %v3402_v56 }
 0x2d9   :  { %v18681_v39 = vrot.slane %v24530_v16, 2  ;;  %v18686_v8 = vcombine.high %v18662_v20, %v18662_v20  ;;  %v18700_v16 = vrot.slane %v1988_v49, %v17011_v58  ;;  %24534 = vst [vmem:[#allocation310_spill] sm:$0xff] %v18704_v37  ;;  %24535 = vst [vmem:[#allocation311_spill] sm:$0xff] %v18706_v5  ;;  %v24538_v37 = vrot.slane %v18303_v36, 7 }
 0x2da   :  { %24528 = vst [vmem:[#allocation305_spill] sm:$0xff] %v18657_v38  ;;  %v18671_v42 = vrot.slane %v1971_v45, %v17011_v58  ;;  %14514 = vmatmul.mubr.msk.f32.gmra.mrb[64].mxu1 %vm684_vm2, %v18657_v38  ;;  %v2631_v45 = vcombine.low %v18565_v12, %v18647_v28  ;;  %v18756_v21 = vrot.slane %v2664_v54, %v17011_v58 }
 0x2db   :  { %24531 = vst [vmem:[#allocation307_spill] sm:$0xff] %v18681_v39  ;;  %24533 = vst [vmem:[#allocation309_spill] sm:$0xff] %v18700_v16  ;;  %v1129_v39 = vadd.f32 %v17978_v50, %v18502_v23  ;;  %v18731_v5 = vrot.slane %v24538_v37, 2  ;;  %v18736_v22 = vcombine.high %v18700_v16, %v18700_v16  ;;  %v18750_v23 = vrot.slane %v2647_v53, %v17011_v58 }
 0x2dc   :  { %v18697_v38 = vcombine.high %v18671_v42, %v18671_v42  ;;  %v18723_v56 = vrot.slane %v2631_v45, %v17011_v58  ;;  %v2648_v45 = vcombine.low %v18650_v29, %v18693_v9  ;;  %24546 = vst [vmem:[#allocation321_spill] sm:$0xff] %v18756_v21  ;;  %v24547_v9 = vld [vmem:[#allocation18_spill] sm:$0xff]  ;;  %v18767_v53 = vrot.slane %v1187_v44, %v17011_v58 }
 0x2dd   :  { %24539 = vst [vmem:[#allocation314_spill] sm:$0xff] %v18731_v5  ;;  %24540 = vst [vmem:[#allocation315_spill] sm:$0xff] %v18736_v22  ;;  %v18744_v18 = vmax.f32 %v1129_v39, 0.0  ;;  %v3066_v5 = vrot.slane %v24547_v9, 7  ;;  %v2005_v39 = vcombine.high %v1187_v44, %v1187_v44  ;;  %v2681_v54 = vcombine.low %v18686_v8, %v18700_v16 }
 0x2de   :  { %v2665_v49 = vcombine.low %v18697_v38, %v18662_v20  ;;  %24537 = vst [vmem:[#allocation313_spill] sm:$0xff] %v18723_v56  ;;  %v18742_v32 = vcombine.low %v18718_v48, %v18723_v56  ;;  %24544 = vst [vmem:[#allocation319_spill] sm:$0xff] %v18750_v23  ;;  %v18753_v37 = vrot.slane %v2648_v45, %v17011_v58  ;;  %v24548_v56 = vrot.slane %v18346_v4, 7  ;;  %v24564_v4 = vld [vmem:[#allocation120_spill] sm:$0xff] }
 0x2df   :  { %24542 = vst [vmem:[#allocation317_spill] sm:$0xff] %v18744_v18  ;;  %24549 = vst [vmem:[#allocation322_spill] sm:$0xff] %v18767_v53  ;;  %v18780_v17 = vrot.slane %v2005_v39, %v17011_v58  ;;  %v18788_v44 = vrot.slane %v18744_v18, %v17011_v58  ;;  %v2682_v39 = vcombine.low %v18736_v22, %v18767_v53 }
 0x2e0   :  { %24541 = vst [vmem:[#allocation316_spill] sm:$0xff] %v18742_v32  ;;  %v18747_v50 = vrot.slane %v2665_v49, %v17011_v58  ;;  %24545 = vst [vmem:[#allocation320_spill] sm:$0xff] %v18753_v37  ;;  %v18761_v48 = vrot.slane %v24548_v56, 2  ;;  %14516 = vmatprep.mubr.msk.f32.mxu1 %vm684_vm2, %v18742_v32  ;;  %v18773_v45 = vcombine.low %v18750_v23, %v18753_v37  ;;  %v24555_v37 = vrot.slane %v18357_v6, 7  ;;  %v12747_v23 = vld [vmem:[%s23506_s4 + $0x70] sm:$0xff] }
 0x2e1   :  { %24552 = vst [vmem:[#allocation325_spill] sm:$0xff] %v18780_v17  ;;  %v18784_v32 = vcombine.high %v18767_v53, %v18767_v53  ;;  %24554 = vst [vmem:[#allocation327_spill] sm:$0xff] %v18788_v44  ;;  %v18804_v18 = vcombine.high %v18780_v17, %v18780_v17  ;;  %v3067_v49 = vsel %vm17044_vm9, %v24564_v4, %v3066_v5 }
 0x2e2   :  { %24543 = vst [vmem:[#allocation318_spill] sm:$0xff] %v18747_v50  ;;  %24550 = vst [vmem:[#allocation323_spill] sm:$0xff] %v18773_v45  ;;  %v18777_v56 = vcombine.low %v18756_v21, %v18747_v50  ;;  %v18795_v50 = vrot.slane %v24555_v37, 2  ;;  %14517 = vmatmul.mubr.msk.f32.gmra.mrb[66].mxu1 %vm684_vm2, %v18773_v45  ;;  %v3068_v21 = vrot.slane %v3066_v5, 2  ;;  %v24558_v37 = vrot.slane %v17019_v2, 7  ;;  %v12748_v45 = vld [vmem:[%s23506_s4 + $0x78] sm:$0xff] }
 0x2e3   :  { %24553 = vst [vmem:[#allocation326_spill] sm:$0xff] %v18784_v32  ;;  %24557 = vst [vmem:[#allocation329_spill] sm:$0xff] %v18804_v18  ;;  %v24561_v2 = vrot.slane %v18418_v26, 7  ;;  %v18841_v17 = vrot.slane %v2682_v39, %v17011_v58  ;;  %v24568_v26 = vld [vmem:[#allocation113_spill] sm:$0xff] }
 0x2e4   :  { %24551 = vst [vmem:[#allocation324_spill] sm:$0xff] %v18777_v56  ;;  %24556 = vst [vmem:[#allocation328_spill] sm:$0xff] %v18795_v50  ;;  %14519 = vmatprep.mubr.msk.f32.mxu1 %vm684_vm2, %v18777_v56  ;;  %v3064_v9 = vsel %vm17044_vm9, %v17562_v7, %v24558_v37  ;;  %v24559_v56 = vrot.slane %v18400_v33, 7  ;;  %v18835_v50 = vrot.slane %v2681_v54, %v17011_v58  ;;  %v24569_v54 = vrot.slane %v18443_v31, 7  ;;  %v24572_v5 = vld [vmem:[#allocation121_spill] sm:$0xff] }
 0x2e5   :  { %v18829_v32 = vrot.slane %v24561_v2, 2  ;;  %24565 = vst [vmem:[#allocation120_spill] sm:$0xff] %v18841_v17  ;;  %v3522_v7 = vcombine.low %v24568_v26, %v3064_v9  ;;  %v3555_v4 = vcombine.low %v24572_v5, %v24571_v63  ;;  %v24580_v5 = vrot.slane %v17123_v60, 7  ;;  %v24581_v63 = vld [vmem:[#allocation27_spill] sm:$0xff]  ;;  %v24589_v60 = vld [vmem:[#allocation24_spill] sm:$0xff]  ;;  %v24594_v31 = vld [vmem:[#allocation41_spill] sm:$0xff] }
 0x2e6   :  { %v18825_v22 = vrot.slane %v24559_v56, 2  ;;  %24563 = vst [vmem:[#allocation332_spill] sm:$0xff] %v18835_v50  ;;  %v24566_v56 = vld [vmem:[#allocation14_spill] sm:$0xff]  ;;  %v18851_v44 = vrot.slane %v24569_v54, 2  ;;  %v18857_v39 = vcombine.low %v18835_v50, %v18841_v17  ;;  %v24577_v54 = vld [vmem:[#allocation28_spill] sm:$0xff]  ;;  %v24582_v17 = vrot.slane %v24581_v63, 9 }
 0x2e7   :  { %24562 = vst [vmem:[#allocation331_spill] sm:$0xff] %v18829_v32  ;;  %v15596_v32 = vpack.c.bf16 %v12748_v45, %v12747_v23  ;;  %v24578_v37 = vrot.slane %v24577_v54, 7  ;;  %v24583_v50 = vrot.slane %v17117_v55, 7  ;;  %v24590_v54 = vrot.slane %v24589_v60, 7 }
 0x2e8   :  { %24560 = vst [vmem:[#allocation330_spill] sm:$0xff] %v18825_v22  ;;  %v24567_v22 = vrot.slane %v24566_v56, 7  ;;  %24570 = vst [vmem:[#allocation113_spill] sm:$0xff] %v18851_v44  ;;  %v3530_v56 = vrot.slane %v3522_v7, %v17011_v58  ;;  %v3099_v7 = vsel %vm17044_vm9, %v24582_v17, %v24580_v5  ;;  %14520 = vmatmul.mubr.msk.f32.gmra.mrb[68].mxu1 %vm684_vm2, %v18857_v39  ;;  %v24587_v17 = vrot.slane %v17135_v10, 7 }
 0x2e9   :  { %24573 = vst [vmem:[#allocation121_spill] sm:$0xff] %v18857_v39  ;;  %15597 = vmatprep.subr.bf16.mxu1 %v15596_v32  ;;  %v24595_v33 = vrot.slane %v24594_v31, 7  ;;  %v24649_v31 = vld [vmem:[#allocation65_spill] sm:$0xff] }
 0x2ea   :  { %v3070_v2 = vsel %vm17044_vm9, %v3068_v21, %v24567_v22  ;;  %v24574_v21 = vld [vmem:[#allocation23_spill] sm:$0xff]  ;;  %v24576_v22 = vld [vmem:[#allocation25_spill] sm:$0xff]  ;;  %v3105_v5 = vsel %vm17044_vm9, %v17688_v62, %v24587_v17  ;;  %v24588_v39 = vmov %v24587_v17  ;;  %v24596_v62 = vld [vmem:[#allocation42_spill] sm:$0xff] }
 0x2eb   :  { %v3523_v18 = vcombine.low %v3067_v49, %v3070_v2  ;;  %v24575_v26 = vrot.slane %v24574_v21, 7  ;;  %v3088_v23 = vrot.slane %v24576_v22, 7  ;;  %v24579_v49 = vld [vmem:[#allocation127_spill] sm:$0xff]  ;;  %v3106_v55 = vrot.slane %v24588_v39, 2  ;;  %v24598_v39 = vld [vmem:[#allocation45_spill] sm:$0xff] }
 0x2ec   :  { %v3095_v2 = vsel %vm17044_vm9, %v24579_v49, %v24578_v37  ;;  %v24586_v49 = vld [vmem:[#allocation122_spill] sm:$0xff] }
 0x2ed   :  { %v3084_v9 = vrot.slane %v24575_v26, 2  ;;  %v3537_v45 = vrot.slane %v3523_v18, %v17011_v58  ;;  %v3102_v26 = vsel %vm17044_vm9, %v17684_v25, %v24583_v50  ;;  %v24584_v18 = vld [vmem:[#allocation22_spill] sm:$0xff]  ;;  %v3089_v63 = vsel %vm17044_vm9, %v24586_v49, %v3088_v23 }
 0x2ee   :  { %v24585_v21 = vrot.slane %v24584_v18, 7  ;;  %v3090_v22 = vrot.slane %v3088_v23, 2  ;;  %v3573_v18 = vcombine.low %v3099_v7, %v3102_v26  ;;  %v24593_v23 = vld [vmem:[#allocation142_spill] sm:$0xff]  ;;  %v3120_v7 = vrot.slane %v24598_v39, 7 }
 0x2ef   :  { %v3538_v25 = vcombine.low %v3530_v56, %v3537_v45  ;;  %v24597_v56 = vrot.slane %v24596_v62, 9 }
 0x2f0   :  { %v3086_v37 = vsel %vm17044_vm9, %v3084_v9, %v24585_v21  ;;  %v3092_v21 = vsel %vm17044_vm9, %v3090_v22, %v24590_v54  ;;  %v24591_v9 = vld [vmem:[#allocation33_spill] sm:$0xff]  ;;  %v24600_v54 = vld [vmem:[#allocation31_spill] sm:$0xff]  ;;  %v18921_v17 = vrot.slane %v3573_v18, %v17011_v58 }
 0x2f1   :  { %v3556_v50 = vcombine.low %v3086_v37, %v3089_v63  ;;  %v24592_v49 = vrot.slane %v24591_v9, 7  ;;  %v3118_v45 = vsel %vm17044_vm9, %v24597_v56, %v24595_v33  ;;  %14536 = vmatprep.mubr.msk.f32.mxu1 %vm684_vm2, %v3538_v25  ;;  %v3557_v26 = vcombine.low %v3092_v21, %v3095_v2  ;;  %v24603_v33 = vld [vmem:[#allocation148_spill] sm:$0xff]  ;;  %v24606_v56 = vld [vmem:[#allocation43_spill] sm:$0xff] }
 0x2f2   :  { %v24601_v37 = vrot.slane %v24600_v54, 7  ;;  %24602 = vst [vmem:[#allocation27_spill] sm:$0xff] %v18921_v17  ;;  %14537 = vmatmul.mubr.msk.f32.vlgmr.msra.gmra.mrb[34].mxu1 %vm684_vm2, %v3555_v4  ;;  %v24604_v25 = vld [vmem:[#allocation44_spill] sm:$0xff]  ;;  %v3122_v21 = vrot.slane %v3120_v7, 2 }
 0x2f3   :  { %v3111_v44 = vsel %vm17044_vm9, %v24593_v23, %v24592_v49  ;;  %v18914_v22 = vrot.slane %v3556_v50, %v17011_v58  ;;  %v3121_v23 = vsel %vm17044_vm9, %v24603_v33, %v3120_v7  ;;  %15599 = vmatpush3.bf16.msra.mxu1 %v15596_v32  ;;  %v18929_v50 = vrot.slane %v3557_v26, %v17011_v58  ;;  %v24612_v32 = vld [vmem:[#allocation39_spill] sm:$0xff]  ;;  %v24614_v26 = vld [vmem:[#allocation144_spill] sm:$0xff] }
 0x2f4   :  { %v3108_v63 = vsel %vm17044_vm9, %v3106_v55, %v24601_v37  ;;  %v3590_v2 = vcombine.low %v3111_v44, %v24604_v25  ;;  %v3591_v62 = vcombine.low %v3118_v45, %v3121_v23  ;;  %v24607_v55 = vrot.slane %v24606_v56, 7  ;;  %v24608_v37 = vld [vmem:[#allocation145_spill] sm:$0xff] }
 0x2f5   :  { %24599 = vst [vmem:[#allocation127_spill] sm:$0xff] %v18914_v22  ;;  %v3574_v49 = vcombine.low %v3105_v5, %v3108_v63  ;;  %24605 = vst [vmem:[#allocation122_spill] sm:$0xff] %v18929_v50  ;;  %v24613_v7 = vrot.slane %v24612_v32, 7  ;;  %v24615_v33 = vrot.slane %v24614_v26, 7  ;;  %v24616_v23 = vld [vmem:[#allocation153_spill] sm:$0xff] }
 0x2f6   :  { %v3127_v18 = vsel %vm17044_vm9, %v24608_v37, %v24607_v55  ;;  %v24609_v4 = vmov %v24607_v55  ;;  %v18942_v44 = vrot.slane %v3590_v2, %v17011_v58  ;;  %v3572_v55 = vcombine.low %v18914_v22, %v18929_v50  ;;  %v24618_v37 = vld [vmem:[#allocation46_spill] sm:$0xff]  ;;  %v24623_v22 = vld [vmem:[#allocation157_spill] sm:$0xff]  ;;  %v24625_v50 = vld [vmem:[#allocation60_spill] sm:$0xff] }
 0x2f7   :  { %v3128_v5 = vrot.slane %v24609_v4, 2  ;;  %v18939_v63 = vrot.slane %v3574_v49, %v17011_v58  ;;  %v3124_v45 = vsel %vm17044_vm9, %v3122_v21, %v24613_v7  ;;  %v3133_v25 = vsel %vm17044_vm9, %v24616_v23, %v24615_v33  ;;  %v24621_v23 = vld [vmem:[#allocation50_spill] sm:$0xff] }
 0x2f8   :  { %24611 = vst [vmem:[#allocation142_spill] sm:$0xff] %v18942_v44  ;;  %v18958_v2 = vrot.slane %v3591_v62, %v17011_v58  ;;  %v24619_v4 = vrot.slane %v24618_v37, 7  ;;  %v3607_v56 = vcombine.low %v3124_v45, %v3127_v18  ;;  %v24622_v32 = vrot.slane %v24621_v23, 7  ;;  %14539 = vmatprep.mubr.msk.f32.mxu1 %vm684_vm2, %v3572_v55  ;;  %v24629_v18 = vld [vmem:[#allocation158_spill] sm:$0xff]  ;;  %v24641_v23 = vld [vmem:[#allocation167_spill] sm:$0xff] }
 0x2f9   :  { %24610 = vst [vmem:[#allocation24_spill] sm:$0xff] %v18939_v63  ;;  %v18966_v7 = vcombine.low %v18921_v17, %v18939_v63  ;;  %v24627_v17 = vld [vmem:[#allocation55_spill] sm:$0xff] }
 0x2fa   :  { %24617 = vst [vmem:[#allocation42_spill] sm:$0xff] %v18958_v2  ;;  %v3130_v21 = vsel %vm17044_vm9, %v3128_v5, %v24619_v4  ;;  %v3140_v49 = vsel %vm17044_vm9, %v24623_v22, %v24622_v32  ;;  %v18976_v62 = vcombine.low %v18942_v44, %v18958_v2  ;;  %v3142_v5 = vrot.slane %v24625_v50, 7  ;;  %v24626_v4 = vld [vmem:[#allocation154_spill] sm:$0xff]  ;;  %v24646_v37 = vld [vmem:[#allocation51_spill] sm:$0xff] }
 0x2fb   :  { %24620 = vst [vmem:[#allocation31_spill] sm:$0xff] %v18966_v7  ;;  %v3608_v33 = vcombine.low %v3130_v21, %v3133_v25  ;;  %v3624_v9 = vcombine.low %v24626_v4, %v3140_v49  ;;  %v24628_v63 = vrot.slane %v24627_v17, 7  ;;  %14540 = vmatmul.mubr.msk.f32.gmra.mrb[36].mxu1 %vm684_vm2, %v18966_v7  ;;  %v18988_v22 = vrot.slane %v3607_v56, %v17011_v58  ;;  %v24633_v21 = vld [vmem:[#allocation57_spill] sm:$0xff]  ;;  %v24635_v4 = vld [vmem:[#allocation59_spill] sm:$0xff] }
 0x2fc   :  { %24624 = vst [vmem:[#allocation148_spill] sm:$0xff] %v18976_v62  ;;  %v24634_v49 = vrot.slane %v24633_v21, 7  ;;  %v24636_v2 = vrot.slane %v24635_v4, 9  ;;  %14542 = vmatprep.mubr.msk.f32.mxu1 %vm684_vm2, %v18976_v62  ;;  %v24639_v7 = vld [vmem:[#allocation61_spill] sm:$0xff]  ;;  %v24647_v26 = vrot.slane %v24646_v37, 7 }
 0x2fd   :  { %v3149_v45 = vsel %vm17044_vm9, %v24629_v18, %v24628_v63  ;;  %24630 = vst [vmem:[#allocation44_spill] sm:$0xff] %v18988_v22  ;;  %v18991_v32 = vrot.slane %v3608_v33, %v17011_v58  ;;  %v24632_v25 = vmov %v24628_v63  ;;  %v24637_v63 = vld [vmem:[#allocation155_spill] sm:$0xff]  ;;  %v3144_v18 = vrot.slane %v3142_v5, 2 }
 0x2fe   :  { %v3150_v55 = vrot.slane %v24632_v25, 2  ;;  %v3156_v44 = vsel %vm17044_vm9, %v24636_v2, %v24634_v49  ;;  %v3143_v56 = vsel %vm17044_vm9, %v24637_v63, %v3142_v5  ;;  %v19007_v33 = vrot.slane %v3624_v9, %v17011_v58  ;;  %v24643_v49 = vld [vmem:[#allocation54_spill] sm:$0xff] }
 0x2ff   :  { %24631 = vst [vmem:[#allocation145_spill] sm:$0xff] %v18991_v32  ;;  %v24640_v25 = vrot.slane %v24639_v7, 7  ;;  %v19016_v2 = vcombine.low %v18988_v22, %v18991_v32  ;;  %v24644_v62 = vrot.slane %v24643_v49, 7  ;;  %v3146_v21 = vsel %vm17044_vm9, %v3144_v18, %v24647_v26  ;;  %v24651_v22 = vld [vmem:[#allocation171_spill] sm:$0xff]  ;;  %v24655_v26 = vld [vmem:[#allocation66_spill] sm:$0xff]  ;;  %v24657_v18 = vld [vmem:[#allocation64_spill] sm:$0xff] }
 0x300   :  { %24638 = vst [vmem:[#allocation153_spill] sm:$0xff] %v19007_v33  ;;  %v24650_v32 = vrot.slane %v24649_v31, 7 }
 0x301   :  { %v3159_v4 = vsel %vm17044_vm9, %v24641_v23, %v24640_v25  ;;  %24642 = vst [vmem:[#allocation157_spill] sm:$0xff] %v19016_v2  ;;  %v3152_v50 = vsel %vm17044_vm9, %v3150_v55, %v24644_v62  ;;  %v24645_v5 = vmov %v24640_v25  ;;  %v24648_v23 = vld [vmem:[#allocation69_spill] sm:$0xff]  ;;  %14543 = vmatmul.mubr.msk.f32.gmra.mrb[38].mxu1 %vm684_vm2, %v19016_v2  ;;  %v24653_v55 = vld [vmem:[#allocation62_spill] sm:$0xff] }
 0x302   :  { %v3642_v63 = vcombine.low %v3156_v44, %v3159_v4  ;;  %v3160_v9 = vrot.slane %v24645_v5, 2  ;;  %v3641_v17 = vcombine.low %v3149_v45, %v3152_v50  ;;  %v3164_v25 = vrot.slane %v24648_v23, 7 }
 0x303   :  { %v3171_v49 = vsel %vm17044_vm9, %v24651_v22, %v24650_v32  ;;  %v3625_v44 = vcombine.low %v3143_v56, %v3146_v21  ;;  %v24654_v4 = vrot.slane %v24653_v55, 7  ;;  %v24656_v45 = vrot.slane %v24655_v26, 7  ;;  %v24660_v32 = vld [vmem:[#allocation170_spill] sm:$0xff]  ;;  %v24663_v55 = vld [vmem:[#allocation172_spill] sm:$0xff] }
 0x304   :  { %v19037_v62 = vrot.slane %v3642_v63, %v17011_v58  ;;  %v24658_v5 = vrot.slane %v24657_v18, 9  ;;  %v19050_v22 = vrot.slane %v3641_v17, %v17011_v58  ;;  %v3165_v21 = vsel %vm17044_vm9, %v24660_v32, %v3164_v25  ;;  %v24661_v63 = vld [vmem:[#allocation67_spill] sm:$0xff]  ;;  %v24665_v26 = vld [vmem:[#allocation72_spill] sm:$0xff] }
 0x305   :  { %v3162_v50 = vsel %vm17044_vm9, %v3160_v9, %v24654_v4  ;;  %v3166_v56 = vrot.slane %v3164_v25, 2  ;;  %v24662_v2 = vrot.slane %v24661_v63, 7  ;;  %v19061_v4 = vrot.slane %v3625_v44, %v17011_v58  ;;  %v24670_v63 = vld [vmem:[#allocation63_spill] sm:$0xff] }
 0x306   :  { %24652 = vst [vmem:[#allocation154_spill] sm:$0xff] %v19037_v62  ;;  %v3175_v31 = vsel %vm17044_vm9, %v24658_v5, %v24656_v45  ;;  %24659 = vst [vmem:[#allocation158_spill] sm:$0xff] %v19050_v22  ;;  %v3658_v18 = vcombine.low %v3162_v50, %v3165_v21  ;;  %v24666_v45 = vrot.slane %v24665_v26, 7  ;;  %v24667_v5 = vld [vmem:[#allocation173_spill] sm:$0xff]  ;;  %v19072_v25 = vcombine.low %v19050_v22, %v19037_v62  ;;  %v24680_v22 = vld [vmem:[#allocation78_spill] sm:$0xff] }
 0x307   :  { %v3178_v9 = vsel %vm17044_vm9, %v24663_v55, %v24662_v2  ;;  %24664 = vst [vmem:[#allocation59_spill] sm:$0xff] %v19061_v4  ;;  %v24671_v37 = vrot.slane %v24670_v63, 7  ;;  %v24672_v55 = vld [vmem:[#allocation74_spill] sm:$0xff]  ;;  %v24674_v21 = vld [vmem:[#allocation177_spill] sm:$0xff]  ;;  %v24682_v63 = vld [vmem:[#allocation79_spill] sm:$0xff] }
 0x308   :  { %v3181_v17 = vsel %vm17044_vm9, %v24667_v5, %v24666_v45  ;;  %v24668_v23 = vmov %v24666_v45  ;;  %24669 = vst [vmem:[#allocation155_spill] sm:$0xff] %v19072_v25  ;;  %v3675_v44 = vcombine.low %v3175_v31, %v3178_v9  ;;  %v24673_v50 = vrot.slane %v24672_v55, 7  ;;  %v12750_v45 = vld [vmem:[%s23506_s4 + $0x88] sm:$0xff]  ;;  %v25381_v15 = vld [vmem:[#allocation153_spill] sm:$0xff] }
 0x309   :  { %v3182_v32 = vrot.slane %v24668_v23, 2  ;;  %v3168_v2 = vsel %vm17044_vm9, %v3166_v56, %v24671_v37  ;;  %v12749_v23 = vld [vmem:[%s23506_s4 + $0x80] sm:$0xff]  ;;  %v19091_v5 = vcombine.low %v19007_v33, %v19061_v4  ;;  %v19094_v31 = vrot.slane %v3658_v18, %v17011_v58  ;;  %v24677_v56 = vld [vmem:[#allocation71_spill] sm:$0xff]  ;;  %v24689_v33 = vld [vmem:[#allocation184_spill] sm:$0xff] }
 0x30a   :  { %v3187_v7 = vsel %vm17044_vm9, %v24674_v21, %v24673_v50  ;;  %v3659_v37 = vcombine.low %v3168_v2, %v3171_v49  ;;  %v24678_v9 = vrot.slane %v24677_v56, 7  ;;  %v19101_v62 = vrot.slane %v3675_v44, %v17011_v58  ;;  %v24684_v49 = vld [vmem:[#allocation88_spill] sm:$0xff]  ;;  %v24687_v44 = vld [vmem:[#allocation87_spill] sm:$0xff] }
 0x30b   :  { %24675 = vst [vmem:[#allocation167_spill] sm:$0xff] %v19091_v5  ;;  %24676 = vst [vmem:[#allocation171_spill] sm:$0xff] %v19094_v31  ;;  %v24681_v55 = vrot.slane %v24680_v22, 7  ;;  %v24683_v26 = vrot.slane %v24682_v63, 9  ;;  %v3196_v2 = vrot.slane %v24684_v49, 7  ;;  %14545 = vmatprep.mubr.msk.f32.mxu1 %vm684_vm2, %v19091_v5  ;;  %v24728_v56 = vld [vmem:[#allocation95_spill] sm:$0xff] }
 0x30c   :  { %v3184_v50 = vsel %vm17044_vm9, %v3182_v32, %v24678_v9  ;;  %24679 = vst [vmem:[#allocation64_spill] sm:$0xff] %v19101_v62  ;;  %v19113_v18 = vrot.slane %v3659_v37, %v17011_v58  ;;  %v24686_v32 = vld [vmem:[#allocation84_spill] sm:$0xff]  ;;  %v15600_v9 = vpack.c.bf16 %v12750_v45, %v12749_v23  ;;  %14546 = vmatmul.mubr.msk.f32.gmra.mrb[40].mxu1 %vm684_vm2, %v19072_v25  ;;  %v24697_v25 = vld [vmem:[#allocation187_spill] sm:$0xff] }
 0x30d   :  { %v3676_v21 = vcombine.low %v3181_v17, %v3184_v50  ;;  %v3194_v4 = vsel %vm17044_vm9, %v24683_v26, %v24681_v55  ;;  %v3692_v17 = vcombine.low %v3187_v7, %v24686_v32  ;;  %v24688_v50 = vrot.slane %v24687_v44, 7  ;;  %v24691_v55 = vld [vmem:[#allocation179_spill] sm:$0xff] }
 0x30e   :  { %24685 = vst [vmem:[#allocation170_spill] sm:$0xff] %v19113_v18  ;;  %v3197_v37 = vsel %vm17044_vm9, %v24691_v55, %v3196_v2  ;;  %v3198_v5 = vrot.slane %v3196_v2, 2  ;;  %v19133_v45 = vcombine.low %v19094_v31, %v19113_v18  ;;  %15601 = vmatprep.subr.bf16.mxu1 %v15600_v9  ;;  %v24699_v55 = vld [vmem:[#allocation81_spill] sm:$0xff] }
 0x30f   :  { %v3203_v63 = vsel %vm17044_vm9, %v24689_v33, %v24688_v50  ;;  %v19124_v26 = vrot.slane %v3676_v21, %v17011_v58  ;;  %v24692_v7 = vmov %v24688_v50  ;;  %v3693_v32 = vcombine.low %v3194_v4, %v3197_v37  ;;  %v24695_v50 = vld [vmem:[#allocation180_spill] sm:$0xff]  ;;  %15603 = vmatpush3.bf16.msra.mxu1 %v15600_v9  ;;  %v24701_v37 = vld [vmem:[#allocation91_spill] sm:$0xff]  ;;  %v24703_v31 = vld [vmem:[#allocation97_spill] sm:$0xff] }
 0x310   :  { %v3204_v23 = vrot.slane %v24692_v7, 2  ;;  %24693 = vst [vmem:[#allocation173_spill] sm:$0xff] %v19133_v45  ;;  %v19136_v33 = vrot.slane %v3692_v17, %v17011_v58  ;;  %v24696_v21 = vrot.slane %v24695_v50, 7  ;;  %v24700_v7 = vrot.slane %v24699_v55, 7  ;;  %v24705_v50 = vld [vmem:[#allocation189_spill] sm:$0xff]  ;;  %14548 = vmatprep.mubr.msk.f32.mxu1 %vm684_vm2, %v19133_v45 }
 0x311   :  { %24690 = vst [vmem:[#allocation172_spill] sm:$0xff] %v19124_v26  ;;  %v19145_v2 = vcombine.low %v19101_v62, %v19124_v26  ;;  %v24702_v17 = vrot.slane %v24701_v37, 7  ;;  %v24704_v44 = vrot.slane %v24703_v31, 7  ;;  %v19163_v9 = vrot.slane %v3693_v32, %v17011_v58  ;;  %v24709_v62 = vld [vmem:[#allocation101_spill] sm:$0xff]  ;;  %v24711_v31 = vld [vmem:[#allocation192_spill] sm:$0xff]  ;;  %v24713_v32 = vld [vmem:[#allocation103_spill] sm:$0xff] }
 0x312   :  { %24694 = vst [vmem:[#allocation177_spill] sm:$0xff] %v19136_v33  ;;  %v3209_v22 = vsel %vm17044_vm9, %v24697_v25, %v24696_v21  ;;  %v3200_v4 = vsel %vm17044_vm9, %v3198_v5, %v24700_v7  ;;  %v24707_v5 = vld [vmem:[#allocation106_spill] sm:$0xff]  ;;  %v24710_v55 = vrot.slane %v24709_v62, 7  ;;  %v24714_v37 = vrot.slane %v24713_v32, 7  ;;  %v24734_v62 = vld [vmem:[#allocation111_spill] sm:$0xff] }
 0x313   :  { %24698 = vst [vmem:[#allocation79_spill] sm:$0xff] %v19145_v2  ;;  %v3206_v18 = vsel %vm17044_vm9, %v3204_v23, %v24702_v17  ;;  %v3216_v25 = vsel %vm17044_vm9, %v24705_v50, %v24704_v44  ;;  %24706 = vst [vmem:[#allocation84_spill] sm:$0xff] %v19163_v9  ;;  %v3709_v21 = vcombine.low %v3200_v4, %v3203_v63  ;;  %v3218_v7 = vrot.slane %v24707_v5, 7  ;;  %v24708_v23 = vld [vmem:[#allocation188_spill] sm:$0xff]  ;;  %v24715_v63 = vld [vmem:[#allocation105_spill] sm:$0xff] }
 0x314   :  { %v3710_v26 = vcombine.low %v3206_v18, %v3209_v22  ;;  %14549 = vmatmul.mubr.msk.f32.gmra.mrb[42].mxu1 %vm684_vm2, %v19145_v2  ;;  %v3726_v17 = vcombine.low %v24708_v23, %v3216_v25  ;;  %v3225_v44 = vsel %vm17044_vm9, %v24711_v31, %v24710_v55  ;;  %v24712_v50 = vmov %v24710_v55  ;;  %v24720_v55 = vld [vmem:[#allocation191_spill] sm:$0xff]  ;;  %v24721_v2 = vld [vmem:[#allocation100_spill] sm:$0xff] }
 0x315   :  { %v3226_v45 = vrot.slane %v24712_v50, 2  ;;  %v24716_v22 = vrot.slane %v24715_v63, 9  ;;  %v19185_v25 = vcombine.low %v19136_v33, %v19163_v9  ;;  %v19188_v23 = vrot.slane %v3709_v21, %v17011_v58  ;;  %v24725_v9 = vld [vmem:[#allocation198_spill] sm:$0xff] }
 0x316   :  { %v19191_v31 = vrot.slane %v3710_v26, %v17011_v58  ;;  %v3219_v50 = vsel %vm17044_vm9, %v24720_v55, %v3218_v7  ;;  %v3220_v63 = vrot.slane %v3218_v7, 2  ;;  %v24722_v5 = vrot.slane %v24721_v2, 7 }
 0x317   :  { %v3232_v18 = vsel %vm17044_vm9, %v24716_v22, %v24714_v37  ;;  %24717 = vst [vmem:[#allocation184_spill] sm:$0xff] %v19185_v25  ;;  %24718 = vst [vmem:[#allocation179_spill] sm:$0xff] %v19188_v23  ;;  %v24723_v22 = vld [vmem:[#allocation107_spill] sm:$0xff]  ;;  %14551 = vmatprep.mubr.msk.f32.mxu1 %vm684_vm2, %v19185_v25  ;;  %v19218_v32 = vrot.slane %v3726_v17, %v17011_v58  ;;  %v24732_v25 = vld [vmem:[#allocation117_spill] sm:$0xff] }
 0x318   :  { %24719 = vst [vmem:[#allocation187_spill] sm:$0xff] %v19191_v31  ;;  %v3228_v37 = vsel %vm17044_vm9, %v3226_v45, %v24722_v5  ;;  %v24724_v4 = vrot.slane %v24723_v22, 7  ;;  %v19209_v26 = vcombine.low %v19188_v23, %v19191_v31  ;;  %v24729_v45 = vrot.slane %v24728_v56, 7  ;;  %v24741_v23 = vld [vmem:[#allocation208_spill] sm:$0xff] }
 0x319   :  { %v3743_v55 = vcombine.low %v3225_v44, %v3228_v37  ;;  %24730 = vst [vmem:[#allocation188_spill] sm:$0xff] %v19218_v32  ;;  %v24733_v2 = vrot.slane %v24732_v25, 7  ;;  %v24735_v31 = vrot.slane %v24734_v62, 9  ;;  %v24746_v25 = vld [vmem:[#allocation210_spill] sm:$0xff] }
 0x31a   :  { %v3235_v21 = vsel %vm17044_vm9, %v24725_v9, %v24724_v4  ;;  %24726 = vst [vmem:[#allocation189_spill] sm:$0xff] %v19209_v26  ;;  %v24727_v33 = vmov %v24724_v4  ;;  %v3222_v5 = vsel %vm17044_vm9, %v3220_v63, %v24729_v45  ;;  %v24731_v9 = vld [vmem:[#allocation116_spill] sm:$0xff]  ;;  %14552 = vmatmul.mubr.msk.f32.gmra.mrb[44].mxu1 %vm684_vm2, %v19209_v26 }
 0x31b   :  { %v3744_v7 = vcombine.low %v3232_v18, %v3235_v21  ;;  %v3236_v49 = vrot.slane %v24727_v33, 2  ;;  %v3240_v4 = vrot.slane %v24731_v9, 7  ;;  %v3251_v44 = vsel %vm17044_vm9, %v24735_v31, %v24733_v2  ;;  %v24737_v63 = vld [vmem:[#allocation108_spill] sm:$0xff]  ;;  %v24743_v31 = vld [vmem:[#allocation201_spill] sm:$0xff] }
 0x31c   :  { %v3727_v33 = vcombine.low %v3219_v50, %v3222_v5  ;;  %v24738_v37 = vrot.slane %v24737_v63, 7  ;;  %v24739_v21 = vld [vmem:[#allocation112_spill] sm:$0xff]  ;;  %v19242_v2 = vrot.slane %v3743_v55, %v17011_v58  ;;  %v24744_v5 = vld [vmem:[#allocation118_spill] sm:$0xff] }
 0x31d   :  { %v19230_v18 = vrot.slane %v3744_v7, %v17011_v58  ;;  %v24740_v45 = vrot.slane %v24739_v21, 7  ;;  %v3241_v50 = vsel %vm17044_vm9, %v24743_v31, %v3240_v4  ;;  %v3242_v7 = vrot.slane %v3240_v4, 2  ;;  %v24748_v63 = vld [vmem:[#allocation124_spill] sm:$0xff] }
 0x31e   :  { %v3238_v17 = vsel %vm17044_vm9, %v3236_v49, %v24738_v37  ;;  %24742 = vst [vmem:[#allocation105_spill] sm:$0xff] %v19242_v2  ;;  %v24745_v26 = vrot.slane %v24744_v5, 7  ;;  %v19253_v37 = vrot.slane %v3727_v33, %v17011_v58  ;;  %v24753_v5 = vld [vmem:[#allocation109_spill] sm:$0xff]  ;;  %v24755_v33 = vld [vmem:[#allocation128_spill] sm:$0xff] }
 0x31f   :  { %24736 = vst [vmem:[#allocation192_spill] sm:$0xff] %v19230_v18  ;;  %v3247_v62 = vsel %vm17044_vm9, %v24741_v23, %v24740_v45  ;;  %v3760_v21 = vcombine.low %v3238_v17, %v3241_v50  ;;  %v24749_v23 = vrot.slane %v24748_v63, 7  ;;  %v24750_v45 = vld [vmem:[#allocation211_spill] sm:$0xff]  ;;  %v19264_v4 = vcombine.low %v19242_v2, %v19230_v18 }
 0x320   :  { %v3254_v49 = vsel %vm17044_vm9, %v24746_v25, %v24745_v26  ;;  %24747 = vst [vmem:[#allocation191_spill] sm:$0xff] %v19253_v37  ;;  %v24754_v56 = vrot.slane %v24753_v5, 7  ;;  %v24756_v17 = vrot.slane %v24755_v33, 7  ;;  %v24757_v50 = vld [vmem:[#allocation223_spill] sm:$0xff]  ;;  %v24761_v5 = vld [vmem:[#allocation136_spill] sm:$0xff]  ;;  %v24775_v33 = vld [vmem:[#allocation230_spill] sm:$0xff] }
 0x321   :  { %v3257_v55 = vsel %vm17044_vm9, %v24750_v45, %v24749_v23  ;;  %v24751_v9 = vmov %v24749_v23  ;;  %24752 = vst [vmem:[#allocation198_spill] sm:$0xff] %v19264_v4  ;;  %v3777_v26 = vcombine.low %v3251_v44, %v3254_v49  ;;  %v19277_v23 = vcombine.low %v19218_v32, %v19253_v37  ;;  %v24759_v45 = vld [vmem:[#allocation123_spill] sm:$0xff] }
 0x322   :  { %v3258_v31 = vrot.slane %v24751_v9, 2  ;;  %v3244_v25 = vsel %vm17044_vm9, %v3242_v7, %v24754_v56  ;;  %v3263_v22 = vsel %vm17044_vm9, %v24757_v50, %v24756_v17  ;;  %v24760_v18 = vrot.slane %v24759_v45, 7  ;;  %v24763_v56 = vld [vmem:[#allocation137_spill] sm:$0xff]  ;;  %v24766_v50 = vld [vmem:[#allocation146_spill] sm:$0xff]  ;;  %v24767_v32 = vld [vmem:[#allocation139_spill] sm:$0xff] }
 0x323   :  { %24758 = vst [vmem:[#allocation111_spill] sm:$0xff] %v19277_v23  ;;  %v3761_v9 = vcombine.low %v3244_v25, %v3247_v62  ;;  %v24762_v63 = vrot.slane %v24761_v5, 7  ;;  %v24764_v44 = vrot.slane %v24763_v56, 9  ;;  %v19290_v49 = vrot.slane %v3760_v21, %v17011_v58  ;;  %14554 = vmatprep.mubr.msk.f32.mxu1 %vm684_vm2, %v19277_v23  ;;  %v24771_v56 = vld [vmem:[#allocation227_spill] sm:$0xff]  ;;  %v24778_v23 = vld [vmem:[#allocation226_spill] sm:$0xff] }
 0x324   :  { %v3260_v2 = vsel %vm17044_vm9, %v3258_v31, %v24760_v18  ;;  %v3272_v37 = vrot.slane %v24766_v50, 7  ;;  %v3794_v62 = vcombine.low %v3263_v22, %v24767_v32  ;;  %v24769_v31 = vld [vmem:[#allocation143_spill] sm:$0xff]  ;;  %14555 = vmatmul.mubr.msk.f32.gmra.mrb[46].mxu1 %vm684_vm2, %v19264_v4  ;;  %v19314_v22 = vrot.slane %v3777_v26, %v17011_v58 }
 0x325   :  { %v3270_v7 = vsel %vm17044_vm9, %v24764_v44, %v24762_v63  ;;  %24765 = vst [vmem:[#allocation208_spill] sm:$0xff] %v19290_v49  ;;  %v3778_v17 = vcombine.low %v3257_v55, %v3260_v2  ;;  %v19297_v18 = vrot.slane %v3761_v9, %v17011_v58  ;;  %v24770_v25 = vrot.slane %v24769_v31, 7  ;;  %v24773_v2 = vld [vmem:[#allocation218_spill] sm:$0xff] }
 0x326   :  { %v24774_v55 = vrot.slane %v24773_v2, 7  ;;  %24776 = vst [vmem:[#allocation210_spill] sm:$0xff] %v19314_v22  ;;  %v24782_v26 = vrot.slane %v17866_v13, 7  ;;  %v24783_v2 = vld [vmem:[#allocation168_spill] sm:$0xff]  ;;  %v19358_v13 = vrot.slane %v3794_v62, %v17011_v58 }
 0x327   :  { %24768 = vst [vmem:[#allocation201_spill] sm:$0xff] %v19297_v18  ;;  %v3279_v63 = vsel %vm17044_vm9, %v24771_v56, %v24770_v25  ;;  %v24772_v21 = vmov %v24770_v25  ;;  %v19317_v9 = vrot.slane %v3778_v17, %v17011_v58  ;;  %v3273_v25 = vsel %vm17044_vm9, %v24778_v23, %v3272_v37  ;;  %v12752_v23 = vld [vmem:[%s23506_s4 + $0x98] sm:$0xff] }
 0x328   :  { %v3280_v44 = vrot.slane %v24772_v21, 2  ;;  %v3285_v32 = vsel %vm17044_vm9, %v24775_v33, %v24774_v55  ;;  %v3274_v56 = vrot.slane %v3272_v37, 2  ;;  %v19324_v21 = vcombine.low %v19290_v49, %v19297_v18  ;;  %v24780_v33 = vld [vmem:[#allocation149_spill] sm:$0xff]  ;;  %v12751_v37 = vld [vmem:[%s23506_s4 + $0x90] sm:$0xff]  ;;  %24791 = vst [vmem:[#allocation139_spill] sm:$0xff] %v19358_v13 }
 0x329   :  { %24777 = vst [vmem:[#allocation211_spill] sm:$0xff] %v19317_v9  ;;  %v3795_v31 = vcombine.low %v3270_v7, %v3273_v25  ;;  %v24781_v55 = vrot.slane %v24780_v33, 7  ;;  %v24784_v17 = vrot.slane %v24783_v2, 9  ;;  %v19344_v7 = vcombine.low %v19314_v22, %v19317_v9  ;;  %v24788_v18 = vld [vmem:[#allocation175_spill] sm:$0xff] }
 0x32a   :  { %24779 = vst [vmem:[#allocation223_spill] sm:$0xff] %v19324_v21  ;;  %14557 = vmatprep.mubr.msk.f32.mxu1 %vm684_vm2, %v19324_v21 }
 0x32b   :  { %v3282_v4 = vsel %vm17044_vm9, %v3280_v44, %v24781_v55  ;;  %v3289_v5 = vsel %vm17044_vm9, %v24784_v17, %v24782_v26  ;;  %24785 = vst [vmem:[#allocation137_spill] sm:$0xff] %v19344_v7  ;;  %v24786_v44 = vld [vmem:[#allocation138_spill] sm:$0xff]  ;;  %v24789_v26 = vrot.slane %v24788_v18, 7  ;;  %v24790_v17 = vld [vmem:[#allocation241_spill] sm:$0xff]  ;;  %v19361_v9 = vrot.slane %v3795_v31, %v17011_v58  ;;  %14558 = vmatmul.mubr.msk.f32.gmra.mrb[48].mxu1 %vm684_vm2, %v19344_v7  ;;  %v24804_v18 = vld [vmem:[#allocation243_spill] sm:$0xff] }
 0x32c   :  { %v24787_v25 = vrot.slane %v24786_v44, 7  ;;  %v3812_v55 = vcombine.low %v3282_v4, %v3285_v32  ;;  %v24793_v44 = vld [vmem:[#allocation181_spill] sm:$0xff]  ;;  %v24802_v7 = vld [vmem:[#allocation182_spill] sm:$0xff] }
 0x32d   :  { %v3292_v49 = vsel %vm17044_vm9, %v24790_v17, %v24789_v26  ;;  %24792 = vst [vmem:[#allocation227_spill] sm:$0xff] %v19361_v9  ;;  %v24794_v33 = vrot.slane %v24793_v44, 7  ;;  %v15604_v17 = vpack.c.bf16 %v12752_v23, %v12751_v37  ;;  %v19377_v31 = vcombine.low %v19358_v13, %v19361_v9  ;;  %v24805_v37 = vld [vmem:[#allocation185_spill] sm:$0xff]  ;;  %v24807_v23 = vld [vmem:[#allocation186_spill] sm:$0xff] }
 0x32e   :  { %v3276_v2 = vsel %vm17044_vm9, %v3274_v56, %v24787_v25  ;;  %v19368_v4 = vrot.slane %v3812_v55, %v17011_v58  ;;  %v24797_v25 = vld [vmem:[#allocation242_spill] sm:$0xff]  ;;  %v3828_v26 = vcombine.low %v3289_v5, %v3292_v49  ;;  %v24803_v21 = vrot.slane %v24802_v7, 7  ;;  %v12753_v5 = vld [vmem:[%s23506_s4 + $0xa0] sm:$0xff] }
 0x32f   :  { %v3811_v22 = vcombine.low %v3276_v2, %v3279_v63  ;;  %v3296_v56 = vrot.slane %v24794_v33, 2  ;;  %v24796_v32 = vmov %v24794_v33  ;;  %24798 = vst [vmem:[#allocation226_spill] sm:$0xff] %v19377_v31  ;;  %v24800_v33 = vld [vmem:[#allocation176_spill] sm:$0xff]  ;;  %15605 = vmatprep.subr.bf16.mxu1 %v15604_v17  ;;  %v24810_v13 = vld [vmem:[#allocation190_spill] sm:$0xff]  ;;  %14560 = vmatprep.mubr.msk.f32.mxu1 %vm684_vm2, %v19377_v31 }
 0x330   :  { %24795 = vst [vmem:[#allocation230_spill] sm:$0xff] %v19368_v4  ;;  %v3295_v62 = vsel %vm17044_vm9, %v24797_v25, %v24796_v32  ;;  %v24801_v2 = vrot.slane %v24800_v33, 7  ;;  %v3301_v32 = vsel %vm17044_vm9, %v24804_v18, %v24803_v21  ;;  %v24808_v25 = vrot.slane %v24807_v23, 9  ;;  %15607 = vmatpush3.bf16.msra.mxu1 %v15604_v17  ;;  %v24812_v21 = vld [vmem:[#allocation94_spill] sm:$0xff]  ;;  %v24819_v17 = vld [vmem:[#allocation248_spill] sm:$0xff]  ;;  %v24823_v33 = vld [vmem:[#allocation183_spill] sm:$0xff] }
 0x331   :  { %v19380_v63 = vrot.slane %v3811_v22, %v17011_v58  ;;  %v24806_v22 = vrot.slane %v24805_v37, 7  ;;  %v3845_v7 = vcombine.low %v3301_v32, %v24810_v13  ;;  %v24816_v37 = vld [vmem:[#allocation249_spill] sm:$0xff]  ;;  %v24818_v13 = vld [vmem:[#allocation262_spill] sm:$0xff]  ;;  %v3836_v31 = vrot.slane %v3828_v26, %v17011_v58  ;;  %14602 = vmatprep.subr.mxu1 %v12753_v5 }
 0x332   :  { %v3298_v55 = vsel %vm17044_vm9, %v3296_v56, %v24801_v2  ;;  %v24809_v56 = vld [vmem:[#allocation193_spill] sm:$0xff] }
 0x333   :  { %24799 = vst [vmem:[#allocation168_spill] sm:$0xff] %v19380_v63  ;;  %v3829_v49 = vcombine.low %v3295_v62, %v3298_v55  ;;  %v3308_v9 = vsel %vm17044_vm9, %v24808_v25, %v24806_v22  ;;  %v3310_v2 = vrot.slane %v24809_v56, 7  ;;  %v19406_v18 = vcombine.low %v19380_v63, %v19368_v4  ;;  %v24814_v55 = vld [vmem:[#allocation253_spill] sm:$0xff] }
 0x334   :  { %v24813_v62 = vrot.slane %v24812_v21, 7  ;;  %v24817_v56 = vrot.slane %v24816_v37, 7  ;;  %v24821_v37 = vld [vmem:[#allocation194_spill] sm:$0xff]  ;;  %v3853_v50 = vrot.slane %v3845_v7, %v17011_v58  ;;  %14603 = vmatpush3.msra.mxu1 %v12753_v5 }
 0x335   :  { %24811 = vst [vmem:[#allocation241_spill] sm:$0xff] %v19406_v18  ;;  %v3843_v4 = vrot.slane %v3829_v49, %v17011_v58  ;;  %v3311_v63 = vsel %vm17044_vm9, %v24819_v17, %v3310_v2  ;;  %v3312_v44 = vrot.slane %v3310_v2, 2  ;;  %14561 = vmatmul.mubr.msk.f32.gmra.mrb[50].mxu1 %vm684_vm2, %v19406_v18  ;;  %v24824_v17 = vrot.slane %v24823_v33, 7 }
 0x336   :  { %v3317_v23 = vsel %vm17044_vm9, %v24814_v55, %v24813_v62  ;;  %v24815_v22 = vmov %v24813_v62  ;;  %v3323_v32 = vsel %vm17044_vm9, %v24818_v13, %v24817_v56  ;;  %v24820_v62 = vld [vmem:[#allocation275_spill] sm:$0xff]  ;;  %v3846_v21 = vcombine.low %v3308_v9, %v3311_v63 }
 0x337   :  { %v3318_v25 = vrot.slane %v24815_v22, 2  ;;  %v24822_v56 = vrot.slane %v24821_v37, 7  ;;  %v3844_v13 = vcombine.low %v3836_v31, %v3843_v4  ;;  %v3314_v2 = vsel %vm17044_vm9, %v3312_v44, %v24824_v17  ;;  %v24827_v44 = vld [vmem:[#allocation205_spill] sm:$0xff]  ;;  %v24832_v17 = vld [vmem:[#allocation196_spill] sm:$0xff]  ;;  %v24842_v37 = vld [vmem:[#allocation203_spill] sm:$0xff] }
 0x338   :  { %v19441_v9 = vrot.slane %v3846_v21, %v17011_v58  ;;  %v3862_v63 = vcombine.low %v3314_v2, %v3317_v23  ;;  %v3332_v31 = vrot.slane %v24827_v44, 7  ;;  %v24834_v2 = vld [vmem:[#allocation265_spill] sm:$0xff]  ;;  %v24835_v22 = vrot.slane %v24820_v62, 7 }
 0x339   :  { %v3320_v26 = vsel %vm17044_vm9, %v3318_v25, %v24822_v56  ;;  %v19445_v25 = vcombine.high %v18647_v28, %v18647_v28  ;;  %14563 = vmatprep.mubr.msk.f32.mxu1 %vm684_vm2, %v3844_v13  ;;  %v24833_v13 = vrot.slane %v24832_v17, 7  ;;  %v24836_v18 = vrot.slane %v18451_v51, 7 }
 0x33a   :  { %v3863_v55 = vcombine.low %v3320_v26, %v3323_v32  ;;  %24825 = vst [vmem:[#allocation242_spill] sm:$0xff] %v19441_v9  ;;  %v24828_v32 = vld [vmem:[#allocation200_spill] sm:$0xff]  ;;  %v24830_v26 = vld [vmem:[#allocation273_spill] sm:$0xff]  ;;  %v3861_v5 = vcombine.low %v3853_v50, %v19441_v9  ;;  %v19460_v23 = vrot.slane %v3862_v63, %v17011_v58  ;;  %v19469_v49 = vrot.slane %v24835_v22, 2  ;;  %v24844_v9 = vld [vmem:[#allocation206_spill] sm:$0xff] }
 0x33b   :  { %v24829_v56 = vrot.slane %v24828_v32, 7  ;;  %v3334_v50 = vrot.slane %v3332_v31, 2  ;;  %v24837_v63 = vrot.slane %v18547_v19, 7  ;;  %v24841_v44 = vrot.slane %v24828_v32, 7 }
 0x33c   :  { %v19449_v4 = vrot.slane %v3863_v55, %v17011_v58  ;;  %24831 = vst [vmem:[#allocation186_spill] sm:$0xff] %v19460_v23  ;;  %v3330_v55 = vsel %vm17044_vm9, %v24834_v2, %v24833_v13  ;;  %14564 = vmatmul.mubr.msk.f32.gmra.mrb[52].mxu1 %vm684_vm2, %v3861_v5  ;;  %v24838_v13 = vld [vmem:[#allocation197_spill] sm:$0xff]  ;;  %v24843_v45 = vrot.slane %v24842_v37, 7  ;;  %v24845_v39 = vrot.slane %v24844_v9, 9 }
 0x33d   :  { %v3339_v7 = vsel %vm17044_vm9, %v24830_v26, %v24829_v56  ;;  %v19473_v56 = vrot.slane %v24836_v18, 2  ;;  %v19478_v21 = vrot.slane %v24837_v63, 2  ;;  %v24839_v2 = vrot.slane %v24838_v13, 7  ;;  %v24840_v26 = vld [vmem:[#allocation264_spill] sm:$0xff] }
 0x33e   :  { %24826 = vst [vmem:[#allocation243_spill] sm:$0xff] %v19449_v4  ;;  %v3878_v22 = vcombine.low %v19460_v23, %v19449_v4  ;;  %v3879_v17 = vcombine.low %v24840_v26, %v3330_v55  ;;  %v3340_v63 = vrot.slane %v24841_v44, 2  ;;  %v3346_v5 = vsel %vm17044_vm9, %v24845_v39, %v24843_v45  ;;  %v24848_v44 = vld [vmem:[#allocation267_spill] sm:$0xff] }
 0x33f   :  { %v3336_v18 = vsel %vm17044_vm9, %v3334_v50, %v24839_v2  ;;  %v24846_v33 = vrot.slane %v18553_v27, 7  ;;  %v24847_v23 = vrot.slane %v18647_v28, 7  ;;  %v3333_v26 = vsel %vm17044_vm9, %v24848_v44, %v3332_v31  ;;  %v24849_v39 = vld [vmem:[#allocation199_spill] sm:$0xff]  ;;  %v24851_v2 = vld [vmem:[#allocation209_spill] sm:$0xff] }
 0x340   :  { %14566 = vmatprep.mubr.msk.f32.mxu1 %vm684_vm2, %v3878_v22  ;;  %v12702_v9 = vrot.slane %v18639_v41, 9  ;;  %v3880_v50 = vcombine.low %v3333_v26, %v3336_v18  ;;  %v24850_v45 = vrot.slane %v24849_v39, 7  ;;  %v24852_v37 = vrot.slane %v24851_v2, 7 }
 0x341   :  { %v19500_v4 = vrot.slane %v24846_v33, 2  ;;  %v19504_v13 = vrot.slane %v24847_v23, 2  ;;  %v24853_v23 = vld [vmem:[#allocation276_spill] sm:$0xff]  ;;  %v3478_v22 = vrot.slane %v18668_v35, 7  ;;  %v24855_v41 = vrot.slane %v18650_v29, 7 }
 0x342   :  { %v3342_v33 = vsel %vm17044_vm9, %v3340_v63, %v24850_v45  ;;  %v3349_v55 = vsel %vm17044_vm9, %v24853_v23, %v24852_v37  ;;  %v24854_v31 = vmov %v24852_v37  ;;  %v19529_v26 = vrot.slane %v3879_v17, %v17011_v58  ;;  %v24858_v45 = vld [vmem:[#allocation224_spill] sm:$0xff] }
 0x343   :  { %v3896_v32 = vcombine.low %v3339_v7, %v3342_v33  ;;  %v3897_v10 = vcombine.low %v3346_v5, %v3349_v55  ;;  %v3350_v44 = vrot.slane %v24854_v31, 2  ;;  %v19526_v18 = vrot.slane %v24855_v41, 2  ;;  %v24861_v55 = vld [vmem:[#allocation214_spill] sm:$0xff] }
 0x344   :  { %24856 = vst [vmem:[#allocation190_spill] sm:$0xff] %v19529_v26  ;;  %v19532_v63 = vrot.slane %v3880_v50, %v17011_v58  ;;  %v3354_v39 = vrot.slane %v24858_v45, 7  ;;  %v24862_v33 = vrot.slane %v24861_v55, 7  ;;  %v24864_v50 = vld [vmem:[#allocation277_spill] sm:$0xff]  ;;  %v24866_v37 = vrot.slane %v18136_v57, 9  ;;  %v24895_v45 = vld [vmem:[#allocation238_spill] sm:$0xff] }
 0x345   :  { %v19537_v7 = vrot.slane %v3896_v32, %v17011_v58  ;;  %v19540_v5 = vrot.slane %v3897_v10, %v17011_v58  ;;  %v24865_v32 = vrot.slane %v18169_v43, 7  ;;  %v19561_v35 = vsel %vm17044_vm9, %v12702_v9, %v3478_v22  ;;  %v24870_v57 = vld [vmem:[#allocation217_spill] sm:$0xff] }
 0x346   :  { %24857 = vst [vmem:[#allocation253_spill] sm:$0xff] %v19532_v63  ;;  %v3352_v23 = vsel %vm17044_vm9, %v3350_v44, %v24862_v33  ;;  %v19548_v17 = vcombine.low %v19529_v26, %v19532_v63  ;;  %v3355_v31 = vsel %vm17044_vm9, %v24864_v50, %v3354_v39  ;;  %v3356_v41 = vrot.slane %v3354_v39, 2  ;;  %v24869_v39 = vld [vmem:[#allocation281_spill] sm:$0xff] }
 0x347   :  { %24859 = vst [vmem:[#allocation262_spill] sm:$0xff] %v19537_v7  ;;  %24860 = vst [vmem:[#allocation248_spill] sm:$0xff] %v19540_v5  ;;  %v3365_v10 = vsel %vm17044_vm9, %v24866_v37, %v24865_v32  ;;  %v19566_v33 = vcombine.low %v19537_v7, %v19540_v5  ;;  %v24868_v50 = vrot.slane %v18140_v14, 7  ;;  %v24871_v37 = vrot.slane %v24870_v57, 7  ;;  %v24891_v14 = vld [vmem:[#allocation233_spill] sm:$0xff]  ;;  %v24893_v57 = vld [vmem:[#allocation234_spill] sm:$0xff] }
 0x348   :  { %24863 = vst [vmem:[#allocation275_spill] sm:$0xff] %v19548_v17  ;;  %14567 = vmatmul.mubr.msk.f32.gmra.mrb[54].mxu1 %vm684_vm2, %v19548_v17  ;;  %v3913_v32 = vcombine.low %v3352_v23, %v3355_v31  ;;  %v24872_v44 = vrot.slane %v18143_v40, 7  ;;  %v24873_v7 = vrot.slane %v18205_v52, 7  ;;  %v19586_v43 = vrot.slane %v3478_v22, 2 }
 0x349   :  { %24867 = vst [vmem:[#allocation273_spill] sm:$0xff] %v19566_v33  ;;  %v3361_v63 = vsel %vm17044_vm9, %v24869_v39, %v24868_v50  ;;  %v3358_v9 = vsel %vm17044_vm9, %v3356_v41, %v24871_v37  ;;  %v24874_v50 = vrot.slane %v18653_v11, 7  ;;  %14569 = vmatprep.mubr.msk.f32.mxu1 %vm684_vm2, %v19566_v33  ;;  %v24877_v41 = vrot.slane %v18205_v52, 7  ;;  %v24878_v33 = vld [vmem:[#allocation294_spill] sm:$0xff] }
 0x34a   :  { %v3368_v5 = vsel %vm17044_vm9, %v18593_v46, %v24872_v44  ;;  %v3372_v26 = vrot.slane %v24873_v7, 2  ;;  %v3914_v31 = vcombine.low %v3358_v9, %v3361_v63  ;;  %v24875_v46 = vrot.slane %v18155_v30, 7  ;;  %v24886_v9 = vld [vmem:[#allocation295_spill] sm:$0xff]  ;;  %v24899_v52 = vld [vmem:[#allocation298_spill] sm:$0xff] }
 0x34b   :  { %v19590_v39 = vrot.slane %v24874_v50, 2  ;;  %v3930_v7 = vcombine.low %v3365_v10, %v3368_v5  ;;  %v24876_v50 = vrot.slane %v18662_v20, 7  ;;  %v3371_v63 = vsel %vm17044_vm9, %v24878_v33, %v24877_v41  ;;  %v24884_v33 = vld [vmem:[#allocation231_spill] sm:$0xff] }
 0x34c   :  { %v3374_v22 = vsel %vm17044_vm9, %v3372_v26, %v24875_v46  ;;  %v19614_v23 = vrot.slane %v3913_v32, %v17011_v58  ;;  %v19617_v26 = vrot.slane %v3914_v31, %v17011_v58  ;;  %v24881_v10 = vrot.slane %v18700_v16, 7  ;;  %v24901_v30 = vld [vmem:[#allocation307_spill] sm:$0xff] }
 0x34d   :  { %v19605_v17 = vrot.slane %v24876_v50, 2  ;;  %v3931_v5 = vcombine.low %v3371_v63, %v3374_v22  ;;  %v24882_v50 = vrot.slane %v18767_v53, 7  ;;  %v19628_v37 = vrot.slane %v3930_v7, %v17011_v58  ;;  %v24889_v63 = vld [vmem:[#allocation244_spill] sm:$0xff] }
 0x34e   :  { %24879 = vst [vmem:[#allocation265_spill] sm:$0xff] %v19614_v23  ;;  %24880 = vst [vmem:[#allocation264_spill] sm:$0xff] %v19617_v26  ;;  %v19621_v46 = vrot.slane %v24881_v10, 2  ;;  %v24885_v41 = vrot.slane %v24884_v33, 7  ;;  %v19637_v31 = vcombine.low %v19614_v23, %v19617_v26  ;;  %v3386_v10 = vrot.slane %v24889_v63, 7 }
 0x34f   :  { %v19625_v44 = vrot.slane %v24882_v50, 2  ;;  %24883 = vst [vmem:[#allocation206_spill] sm:$0xff] %v19628_v37  ;;  %v19640_v22 = vrot.slane %v3931_v5, %v17011_v58  ;;  %v24890_v50 = vld [vmem:[#allocation239_spill] sm:$0xff]  ;;  %v24892_v7 = vrot.slane %v24891_v14, 7  ;;  %v24894_v55 = vrot.slane %v24893_v57, 9  ;;  %v24903_v57 = vld [vmem:[#allocation297_spill] sm:$0xff] }
 0x350   :  { %v3377_v32 = vsel %vm17044_vm9, %v24886_v9, %v24885_v41  ;;  %24887 = vst [vmem:[#allocation267_spill] sm:$0xff] %v19637_v31  ;;  %v24896_v9 = vrot.slane %v24895_v45, 7  ;;  %v24897_v41 = vld [vmem:[#allocation299_spill] sm:$0xff]  ;;  %v24900_v63 = vrot.slane %v24899_v52, 7  ;;  %14570 = vmatmul.mubr.msk.f32.gmra.mrb[56].mxu1 %vm684_vm2, %v19637_v31 }
 0x351   :  { %24888 = vst [vmem:[#allocation209_spill] sm:$0xff] %v19640_v22  ;;  %v3947_v40 = vcombine.low %v3377_v32, %v24890_v50  ;;  %v3384_v33 = vsel %vm17044_vm9, %v24894_v55, %v24892_v7  ;;  %v19666_v55 = vcombine.low %v19628_v37, %v19640_v22  ;;  %v3387_v50 = vsel %vm17044_vm9, %v24903_v57, %v3386_v10  ;;  %v24909_v37 = vld [vmem:[#allocation256_spill] sm:$0xff] }
 0x352   :  { %v3393_v26 = vsel %vm17044_vm9, %v24897_v41, %v24896_v9  ;;  %v24898_v5 = vmov %v24896_v9  ;;  %v3399_v32 = vsel %vm17044_vm9, %v24901_v30, %v24900_v63  ;;  %v3388_v7 = vrot.slane %v3386_v10, 2  ;;  %v24905_v41 = vld [vmem:[#allocation311_spill] sm:$0xff]  ;;  %v24907_v63 = vld [vmem:[#allocation245_spill] sm:$0xff] }
 0x353   :  { %v3394_v23 = vrot.slane %v24898_v5, 2  ;;  %24902 = vst [vmem:[#allocation276_spill] sm:$0xff] %v19666_v55  ;;  %v24904_v9 = vrot.slane %v18303_v36, 7  ;;  %v3948_v45 = vcombine.low %v3384_v33, %v3387_v50  ;;  %v19677_v30 = vrot.slane %v3947_v40, %v17011_v58  ;;  %14572 = vmatprep.mubr.msk.f32.mxu1 %vm684_vm2, %v19666_v55  ;;  %v24910_v10 = vld [vmem:[#allocation235_spill] sm:$0xff] }
 0x354   :  { %v24908_v31 = vrot.slane %v24907_v63, 7  ;;  %v3408_v52 = vrot.slane %v24909_v37, 7  ;;  %v24911_v57 = vrot.slane %v24910_v10, 7  ;;  %v24912_v33 = vrot.slane %v18369_v59, 7  ;;  %v24915_v37 = vld [vmem:[#allocation310_spill] sm:$0xff] }
 0x355   :  { %v3406_v5 = vsel %vm17044_vm9, %v24905_v41, %v24904_v9  ;;  %24906 = vst [vmem:[#allocation277_spill] sm:$0xff] %v19677_v30 }
 0x356   :  { %v3396_v22 = vsel %vm17044_vm9, %v3394_v23, %v24908_v31  ;;  %v3390_v36 = vsel %vm17044_vm9, %v3388_v7, %v24911_v57  ;;  %v3415_v40 = vsel %vm17044_vm9, %v18761_v48, %v24912_v33  ;;  %v24913_v50 = vmov %v24912_v33 }
 0x357   :  { %v3965_v9 = vcombine.low %v3396_v22, %v3399_v32  ;;  %v3416_v23 = vrot.slane %v24913_v50, 2  ;;  %v19698_v31 = vrot.slane %v3948_v45, %v17011_v58  ;;  %v3964_v41 = vcombine.low %v3390_v36, %v3393_v26  ;;  %v24917_v22 = vld [vmem:[#allocation314_spill] sm:$0xff]  ;;  %v24926_v50 = vld [vmem:[#allocation328_spill] sm:$0xff] }
 0x358   :  { %v3410_v55 = vrot.slane %v3408_v52, 2  ;;  %v3981_v10 = vcombine.low %v24915_v37, %v3406_v5  ;;  %v3409_v32 = vsel %vm17044_vm9, %v24917_v22, %v3408_v52  ;;  %v24918_v7 = vrot.slane %v18365_v47, 7  ;;  %v24923_v52 = vld [vmem:[#allocation257_spill] sm:$0xff] }
 0x359   :  { %24914 = vst [vmem:[#allocation281_spill] sm:$0xff] %v19698_v31  ;;  %v19702_v63 = vrot.slane %v3965_v9, %v17011_v58  ;;  %v24919_v57 = vrot.slane %v18357_v6, 7  ;;  %v24920_v45 = vrot.slane %v18388_v3, 9  ;;  %v19719_v37 = vcombine.low %v19677_v30, %v19698_v31 }
 0x35a   :  { %v3418_v48 = vsel %vm17044_vm9, %v3416_v23, %v24918_v7  ;;  %v19722_v26 = vrot.slane %v3964_v41, %v17011_v58  ;;  %v24924_v5 = vrot.slane %v24923_v52, 7  ;;  %v24925_v33 = vrot.slane %v18377_v24, 7 }
 0x35b   :  { %24916 = vst [vmem:[#allocation294_spill] sm:$0xff] %v19702_v63  ;;  %v3422_v36 = vsel %vm17044_vm9, %v24920_v45, %v24919_v57  ;;  %24921 = vst [vmem:[#allocation295_spill] sm:$0xff] %v19719_v37  ;;  %v3998_v22 = vcombine.low %v3415_v40, %v3418_v48  ;;  %14573 = vmatmul.mubr.msk.f32.gmra.mrb[58].mxu1 %vm684_vm2, %v19719_v37  ;;  %v24932_v40 = vrot.slane %v18436_v1, 9  ;;  %v24939_v37 = vld [vmem:[#allocation331_spill] sm:$0xff] }
 0x35c   :  { %24922 = vst [vmem:[#allocation239_spill] sm:$0xff] %v19722_v26  ;;  %v3412_v9 = vsel %vm17044_vm9, %v3410_v55, %v24924_v5  ;;  %v3425_v3 = vsel %vm17044_vm9, %v24926_v50, %v24925_v33  ;;  %v24927_v57 = vmov %v24925_v33  ;;  %v19739_v41 = vcombine.low %v19722_v26, %v19702_v63  ;;  %v24930_v5 = vld [vmem:[#allocation270_spill] sm:$0xff]  ;;  %v24942_v63 = vld [vmem:[#allocation272_spill] sm:$0xff] }
 0x35d   :  { %v3982_v23 = vcombine.low %v3409_v32, %v3412_v9  ;;  %v3999_v7 = vcombine.low %v3422_v36, %v3425_v3  ;;  %v3426_v45 = vrot.slane %v24927_v57, 2  ;;  %v19742_v55 = vrot.slane %v3981_v10, %v17011_v58  ;;  %v24935_v9 = vld [vmem:[#allocation263_spill] sm:$0xff] }
 0x35e   :  { %24928 = vst [vmem:[#allocation233_spill] sm:$0xff] %v19739_v41  ;;  %v3430_v31 = vrot.slane %v24930_v5, 7  ;;  %v24931_v33 = vrot.slane %v24820_v62, 7  ;;  %v24936_v50 = vrot.slane %v24935_v9, 7  ;;  %v24937_v3 = vld [vmem:[#allocation271_spill] sm:$0xff]  ;;  %14575 = vmatprep.mubr.msk.f32.mxu1 %vm684_vm2, %v19739_v41  ;;  %v24943_v26 = vrot.slane %v24942_v63, 7 }
 0x35f   :  { %24929 = vst [vmem:[#allocation234_spill] sm:$0xff] %v19742_v55  ;;  %v19752_v48 = vrot.slane %v3982_v23, %v17011_v58  ;;  %v19755_v36 = vrot.slane %v3999_v7, %v17011_v58  ;;  %v24938_v57 = vrot.slane %v24937_v3, 7  ;;  %v19769_v23 = vrot.slane %v3998_v22, %v17011_v58  ;;  %v24946_v22 = vld [vmem:[#allocation113_spill] sm:$0xff]  ;;  %v24949_v63 = vld [vmem:[#allocation266_spill] sm:$0xff] }
 0x360   :  { %v3441_v32 = vsel %vm17044_vm9, %v24932_v40, %v24931_v33  ;;  %v3428_v10 = vsel %vm17044_vm9, %v3426_v45, %v24936_v50  ;;  %v24941_v33 = vld [vmem:[#allocation330_spill] sm:$0xff]  ;;  %v3432_v40 = vrot.slane %v3430_v31, 2  ;;  %v3444_v45 = vsel %vm17044_vm9, %v19469_v49, %v24943_v26 }
 0x361   :  { %24933 = vst [vmem:[#allocation299_spill] sm:$0xff] %v19752_v48  ;;  %24934 = vst [vmem:[#allocation307_spill] sm:$0xff] %v19755_v36  ;;  %v3437_v1 = vsel %vm17044_vm9, %v24939_v37, %v24938_v57  ;;  %v3431_v7 = vsel %vm17044_vm9, %v24941_v33, %v3430_v31  ;;  %v19781_v37 = vcombine.low %v19742_v55, %v19752_v48  ;;  %v24945_v57 = vrot.slane %v18488_v0, 7 }
 0x362   :  { %24940 = vst [vmem:[#allocation297_spill] sm:$0xff] %v19769_v23  ;;  %v4015_v50 = vcombine.low %v3428_v10, %v3431_v7  ;;  %v19792_v30 = vcombine.low %v19769_v23, %v19755_v36  ;;  %v24950_v49 = vrot.slane %v24949_v63, 7  ;;  %v4032_v48 = vcombine.low %v3441_v32, %v3444_v45  ;;  %v24951_v10 = vld [vmem:[#allocation278_spill] sm:$0xff]  ;;  %v24956_v45 = vld [vmem:[#allocation301_spill] sm:$0xff] }
 0x363   :  { %24944 = vst [vmem:[#allocation311_spill] sm:$0xff] %v19781_v37  ;;  %v3447_v41 = vsel %vm17044_vm9, %v24946_v22, %v24945_v57  ;;  %v24947_v33 = vmov %v24945_v57  ;;  %v24952_v7 = vrot.slane %v24951_v10, 7  ;;  %14576 = vmatmul.mubr.msk.f32.gmra.mrb[60].mxu1 %vm684_vm2, %v19781_v37  ;;  %v24953_v22 = vrot.slane %v18451_v51, 7  ;;  %v24975_v37 = vld [vmem:[#allocation326_spill] sm:$0xff] }
 0x364   :  { %v3448_v31 = vrot.slane %v24947_v33, 2  ;;  %24948 = vst [vmem:[#allocation310_spill] sm:$0xff] %v19792_v30  ;;  %v3434_v26 = vsel %vm17044_vm9, %v3432_v40, %v24950_v49  ;;  %v24954_v36 = vrot.slane %v18553_v27, 7  ;;  %v24955_v40 = vrot.slane %v18557_v34, 9  ;;  %14578 = vmatprep.mubr.msk.f32.mxu1 %vm684_vm2, %v19792_v30  ;;  %v25064_v23 = vld [vmem:[#allocation78_spill] sm:$0xff] }
 0x365   :  { %v3453_v55 = vsel %vm17044_vm9, %v19473_v56, %v24952_v7  ;;  %v4016_v57 = vcombine.low %v3434_v26, %v3437_v1  ;;  %v3462_v49 = vrot.slane %v24956_v45, 7  ;;  %v19819_v56 = vrot.slane %v4015_v50, %v17011_v58  ;;  %v24958_v26 = vld [vmem:[#allocation291_spill] sm:$0xff] }
 0x366   :  { %v3450_v33 = vsel %vm17044_vm9, %v3448_v31, %v24953_v22  ;;  %v3460_v32 = vsel %vm17044_vm9, %v24955_v40, %v24954_v36  ;;  %v4049_v7 = vcombine.low %v3453_v55, %v24958_v26  ;;  %v24959_v31 = vrot.slane %v18565_v12, 7 }
 0x367   :  { %24957 = vst [vmem:[#allocation314_spill] sm:$0xff] %v19819_v56  ;;  %v4033_v1 = vcombine.low %v3447_v41, %v3450_v33  ;;  %v19828_v22 = vrot.slane %v4016_v57, %v17011_v58  ;;  %v3463_v36 = vsel %vm17044_vm9, %v19500_v4, %v3462_v49  ;;  %v3464_v40 = vrot.slane %v3462_v49, 2 }
 0x368   :  { %v3469_v34 = vsel %vm17044_vm9, %v19478_v21, %v24959_v31  ;;  %v24961_v50 = vmov %v24959_v31  ;;  %v19836_v41 = vrot.slane %v4032_v48, %v17011_v58  ;;  %v4050_v33 = vcombine.low %v3460_v32, %v3463_v36 }
 0x369   :  { %24960 = vst [vmem:[#allocation257_spill] sm:$0xff] %v19828_v22  ;;  %v3470_v30 = vrot.slane %v24961_v50, 2  ;;  %v19839_v55 = vrot.slane %v4033_v1, %v17011_v58  ;;  %v24964_v21 = vrot.slane %v19445_v25, 7  ;;  %v19848_v4 = vcombine.low %v19819_v56, %v19828_v22  ;;  %v25058_v22 = vld [vmem:[#allocation72_spill] sm:$0xff] }
 0x36a   :  { %24962 = vst [vmem:[#allocation328_spill] sm:$0xff] %v19836_v41  ;;  %v24966_v49 = vrot.slane %v18547_v19, 7  ;;  %v24967_v26 = vrot.slane %v18647_v28, 7  ;;  %v24968_v1 = vrot.slane %v18650_v29, 7  ;;  %v19868_v36 = vrot.slane %v4050_v33, %v17011_v58  ;;  %v25063_v56 = vld [vmem:[#allocation88_spill] sm:$0xff] }
 0x36b   :  { %24963 = vst [vmem:[#allocation270_spill] sm:$0xff] %v19839_v55  ;;  %v3475_v57 = vsel %vm17044_vm9, %v19504_v13, %v24964_v21  ;;  %24965 = vst [vmem:[#allocation263_spill] sm:$0xff] %v19848_v4  ;;  %v19865_v31 = vcombine.low %v19836_v41, %v19839_v55  ;;  %14579 = vmatmul.mubr.msk.f32.gmra.mrb[62].mxu1 %vm684_vm2, %v19848_v4  ;;  %v24972_v21 = vld [vmem:[#allocation308_spill] sm:$0xff] }
 0x36c   :  { %v3466_v48 = vsel %vm17044_vm9, %v3464_v40, %v24966_v49  ;;  %v3472_v32 = vsel %vm17044_vm9, %v3470_v30, %v24967_v26  ;;  %v3482_v13 = vsel %vm17044_vm9, %v19586_v43, %v24968_v1  ;;  %24970 = vst [vmem:[#allocation331_spill] sm:$0xff] %v19868_v36  ;;  %v19873_v30 = vrot.slane %v4049_v7, %v17011_v58  ;;  %v25100_v19 = vld [vmem:[#allocation108_spill] sm:$0xff] }
 0x36d   :  { %24969 = vst [vmem:[#allocation271_spill] sm:$0xff] %v19865_v31  ;;  %v4066_v50 = vcombine.low %v3466_v48, %v3469_v34  ;;  %v4067_v40 = vcombine.low %v3472_v32, %v3475_v57  ;;  %v3484_v49 = vrot.slane %v24972_v21, 7  ;;  %v24973_v26 = vrot.slane %v18675_v61, 7  ;;  %14581 = vmatprep.mubr.msk.f32.mxu1 %vm684_vm2, %v19865_v31  ;;  %v25115_v29 = vld [vmem:[#allocation136_spill] sm:$0xff] }
 0x36e   :  { %24971 = vst [vmem:[#allocation330_spill] sm:$0xff] %v19873_v30  ;;  %v3512_v34 = vrot.slane %v24975_v37, 7  ;;  %v24978_v48 = vrot.slane %v18662_v20, 7  ;;  %v24979_v32 = vrot.slane %v18697_v38, 9  ;;  %v4083_v31 = vcombine.low %v19561_v35, %v3482_v13 }
 0x36f   :  { %v3491_v43 = vsel %vm17044_vm9, %v19590_v39, %v24973_v26  ;;  %v24974_v1 = vmov %v24973_v26  ;;  %v19887_v57 = vrot.slane %v4066_v50, %v17011_v58  ;;  %v19890_v7 = vrot.slane %v4067_v40, %v17011_v58 }
 0x370   :  { %v3492_v33 = vrot.slane %v24974_v1, 2  ;;  %v3498_v39 = vsel %vm17044_vm9, %v24979_v32, %v24978_v48  ;;  %v19900_v26 = vcombine.low %v19873_v30, %v19868_v36  ;;  %v3486_v1 = vrot.slane %v3484_v49, 2  ;;  %v25057_v30 = vld [vmem:[#allocation71_spill] sm:$0xff] }
 0x371   :  { %24976 = vst [vmem:[#allocation113_spill] sm:$0xff] %v19887_v57  ;;  %24977 = vst [vmem:[#allocation266_spill] sm:$0xff] %v19890_v7  ;;  %v24981_v50 = vrot.slane %v18671_v42, 7  ;;  %v19909_v4 = vcombine.low %v19887_v57, %v19890_v7  ;;  %v24983_v38 = vrot.slane %v18686_v8, 7  ;;  %v3485_v35 = vsel %vm17044_vm9, %v19526_v18, %v3484_v49  ;;  %v24986_v7 = vld [vmem:[#allocation315_spill] sm:$0xff] }
 0x372   :  { %24980 = vst [vmem:[#allocation301_spill] sm:$0xff] %v19900_v26  ;;  %14582 = vmatmul.mubr.msk.f32.gmra.mrb[64].mxu1 %vm684_vm2, %v19900_v26  ;;  %v24985_v13 = vrot.slane %v18653_v11, 7  ;;  %v3506_v57 = vrot.slane %v24986_v7, 7  ;;  %v24989_v49 = vrot.slane %v18700_v16, 7  ;;  %v4649_v41 = vcombine.low %v25058_v22, %v25057_v30  ;;  %v12796_v22 = vld [vmem:[%s23506_s4 + $0xd8] sm:$0xff] }
 0x373   :  { %v3494_v40 = vsel %vm17044_vm9, %v3492_v33, %v24981_v50  ;;  %24982 = vst [vmem:[#allocation291_spill] sm:$0xff] %v19909_v4  ;;  %v3501_v48 = vsel %vm17044_vm9, %v19605_v17, %v24983_v38  ;;  %v24984_v36 = vmov %v24983_v38  ;;  %v12790_v17 = vld [vmem:[%s23506_s4 + $0xa8] sm:$0xff]  ;;  %14584 = vmatprep.mubr.msk.f32.mxu1 %vm684_vm2, %v19909_v4  ;;  %v24996_v4 = vld [vmem:[#allocation21_spill] sm:$0xff] }
 0x374   :  { %v4100_v32 = vcombine.low %v3491_v43, %v3494_v40  ;;  %v3502_v55 = vrot.slane %v24984_v36, 2  ;;  %v3488_v33 = vsel %vm17044_vm9, %v3486_v1, %v24985_v13  ;;  %v4101_v50 = vcombine.low %v3498_v39, %v3501_v48  ;;  %v12791_v36 = vld [vmem:[%s23506_s4 + $0xb0] sm:$0xff]  ;;  %v24987_v43 = vld [vmem:[#allocation14_spill] sm:$0xff] }
 0x375   :  { %v24988_v40 = vld [vmem:[#allocation18_spill] sm:$0xff]  ;;  %v4084_v18 = vcombine.low %v3485_v35, %v3488_v33  ;;  %v3507_v48 = vsel %vm17044_vm9, %v19621_v46, %v3506_v57  ;;  %v3508_v13 = vrot.slane %v3506_v57, 2  ;;  %v24995_v57 = vld [vmem:[#allocation15_spill] sm:$0xff] }
 0x376   :  { %v4496_v38 = vcombine.low %v24988_v40, %v24987_v43  ;;  %v3504_v39 = vsel %vm17044_vm9, %v3502_v55, %v24989_v49  ;;  %v19943_v1 = vrot.slane %v4101_v50, %v17011_v58  ;;  %v3513_v43 = vsel %vm17044_vm9, %v19625_v44, %v3512_v34 }
 0x377   :  { %v19952_v40 = vrot.slane %v4083_v31, %v17011_v58  ;;  %v19955_v35 = vrot.slane %v4084_v18, %v17011_v58  ;;  %v4117_v33 = vcombine.low %v3504_v39, %v3507_v48  ;;  %v15608_v55 = vpack.c.bf16 %v12791_v36, %v12790_v17  ;;  %v24999_v17 = vld [vmem:[#allocation28_spill] sm:$0xff]  ;;  %v25003_v39 = vld [vmem:[#allocation29_spill] sm:$0xff] }
 0x378   :  { %24990 = vst [vmem:[#allocation14_spill] sm:$0xff] %v19943_v1  ;;  %v19958_v50 = vrot.slane %v4100_v32, %v17011_v58  ;;  %v24994_v49 = vrot.slane %v18767_v53, 7  ;;  %v4495_v26 = vcombine.low %v24996_v4, %v24995_v57  ;;  %v4510_v32 = vrot.slane %v4496_v38, %v17011_v58  ;;  %v25002_v4 = vld [vmem:[#allocation30_spill] sm:$0xff]  ;;  %v25073_v53 = vld [vmem:[#allocation199_spill] sm:$0xff] }
 0x379   :  { %24991 = vst [vmem:[#allocation18_spill] sm:$0xff] %v19952_v40  ;;  %24992 = vst [vmem:[#allocation333_spill] sm:$0xff] %v19955_v35  ;;  %v19968_v44 = vcombine.low %v19952_v40, %v19955_v35  ;;  %15609 = vmatprep.subr.bf16.mxu1 %v15608_v55  ;;  %v25000_v36 = vcombine.low %v24589_v60, %v24999_v17  ;;  %v25004_v48 = vcombine.low %v25002_v4, %v25003_v39  ;;  %v25011_v4 = vld [vmem:[#allocation23_spill] sm:$0xff]  ;;  %v25019_v17 = vld [vmem:[#allocation54_spill] sm:$0xff] }
 0x37a   :  { %24993 = vst [vmem:[#allocation334_spill] sm:$0xff] %v19958_v50  ;;  %v3510_v46 = vsel %vm17044_vm9, %v3508_v13, %v24994_v49  ;;  %v19972_v34 = vcombine.low %v19958_v50, %v19943_v1  ;;  %v4503_v60 = vrot.slane %v4495_v26, %v17011_v58  ;;  %v25008_v49 = vld [vmem:[#allocation25_spill] sm:$0xff] }
 0x37b   :  { %24997 = vst [vmem:[#allocation15_spill] sm:$0xff] %v19968_v44  ;;  %v4118_v31 = vcombine.low %v3510_v46, %v3513_v43  ;;  %v19979_v18 = vrot.slane %v25000_v36, %v17011_v58  ;;  %v19985_v13 = vrot.slane %v25004_v48, %v17011_v58  ;;  %14585 = vmatmul.mubr.msk.f32.gmra.mrb[66].mxu1 %vm684_vm2, %v19968_v44  ;;  %v25009_v46 = vld [vmem:[#allocation22_spill] sm:$0xff]  ;;  %v25010_v36 = vld [vmem:[#allocation20_spill] sm:$0xff]  ;;  %v25016_v44 = vld [vmem:[#allocation45_spill] sm:$0xff] }
 0x37c   :  { %24998 = vst [vmem:[#allocation21_spill] sm:$0xff] %v19972_v34  ;;  %v19990_v43 = vrot.slane %v4117_v33, %v17011_v58  ;;  %14587 = vmatprep.mubr.msk.f32.mxu1 %vm684_vm2, %v19972_v34  ;;  %v4529_v57 = vcombine.low %v25009_v46, %v25008_v49  ;;  %v25012_v39 = vcombine.low %v25010_v36, %v25011_v4  ;;  %v25015_v48 = vld [vmem:[#allocation32_spill] sm:$0xff]  ;;  %v25017_v1 = vld [vmem:[#allocation41_spill] sm:$0xff]  ;;  %v25018_v46 = vld [vmem:[#allocation55_spill] sm:$0xff] }
 0x37d   :  { %25001 = vst [vmem:[#allocation28_spill] sm:$0xff] %v19979_v18  ;;  %25005 = vst [vmem:[#allocation30_spill] sm:$0xff] %v19985_v13  ;;  %v19993_v38 = vrot.slane %v4118_v31, %v17011_v58  ;;  %v4547_v34 = vcombine.low %v25015_v48, %v24600_v54  ;;  %v4511_v26 = vcombine.low %v4503_v60, %v4510_v32  ;;  %v25021_v36 = vld [vmem:[#allocation57_spill] sm:$0xff]  ;;  %v12792_v54 = vld [vmem:[%s23506_s4 + $0xb8] sm:$0xff] }
 0x37e   :  { %25006 = vst [vmem:[#allocation29_spill] sm:$0xff] %v19990_v43  ;;  %v20006_v33 = vrot.slane %v25012_v39, %v17011_v58  ;;  %v4564_v49 = vcombine.low %v25017_v1, %v25016_v44  ;;  %v25020_v35 = vcombine.low %v25018_v46, %v25019_v17  ;;  %v25022_v4 = vld [vmem:[#allocation61_spill] sm:$0xff]  ;;  %v25025_v32 = vld [vmem:[#allocation16_spill] sm:$0xff]  ;;  %v20042_v17 = vrot.slane %v4529_v57, %v17011_v58 }
 0x37f   :  { %25007 = vst [vmem:[#allocation335_spill] sm:$0xff] %v19993_v38  ;;  %v20010_v31 = vcombine.low %v19990_v43, %v19993_v38  ;;  %v25023_v39 = vcombine.low %v25021_v36, %v25022_v4  ;;  %v12793_v1 = vld [vmem:[%s23506_s4 + $0xc0] sm:$0xff]  ;;  %v20050_v36 = vrot.slane %v4547_v34, %v17011_v58  ;;  %v25029_v4 = vld [vmem:[#allocation144_spill] sm:$0xff] }
 0x380   :  { %25013 = vst [vmem:[#allocation25_spill] sm:$0xff] %v20006_v33  ;;  %v20020_v50 = vrot.slane %v25020_v35, %v17011_v58  ;;  %v25024_v44 = vld [vmem:[#allocation17_spill] sm:$0xff]  ;;  %25027 = vst [vmem:[#allocation20_spill] sm:$0xff] %v20042_v17  ;;  %v4545_v57 = vcombine.low %v20042_v17, %v19979_v18 }
 0x381   :  { %25014 = vst [vmem:[#allocation22_spill] sm:$0xff] %v20010_v31  ;;  %v20026_v40 = vrot.slane %v25023_v39, %v17011_v58  ;;  %v25026_v60 = vcombine.low %v25024_v44, %v25025_v32  ;;  %14588 = vmatmul.mubr.msk.f32.gmra.mrb[68].mxu1 %vm684_vm2, %v20010_v31  ;;  %v25030_v39 = vld [vmem:[#allocation46_spill] sm:$0xff]  ;;  %v15612_v32 = vpack.c.bf16 %v12793_v1, %v12792_v54  ;;  %v25032_v31 = vld [vmem:[#allocation60_spill] sm:$0xff]  ;;  %v25033_v34 = vld [vmem:[#allocation33_spill] sm:$0xff] }
 0x382   :  { %14604 = vmatprep.mubr.msk.f32.mxu1 %vm684_vm2, %v4511_v26  ;;  %v4581_v44 = vcombine.low %v25030_v39, %v25029_v4  ;;  %v20059_v26 = vrot.slane %v4564_v49, %v17011_v58  ;;  %v25036_v54 = vld [vmem:[#allocation50_spill] sm:$0xff]  ;;  %v25037_v1 = vld [vmem:[#allocation56_spill] sm:$0xff]  ;;  %v20073_v39 = vcombine.low %v19985_v13, %v20050_v36 }
 0x383   :  { %v4520_v35 = vrot.slane %v25026_v60, %v17011_v58  ;;  %v20046_v48 = vcombine.low %v20020_v50, %v20026_v40  ;;  %v25031_v60 = vld [vmem:[#allocation51_spill] sm:$0xff]  ;;  %v25055_v13 = vld [vmem:[#allocation110_spill] sm:$0xff] }
 0x384   :  { %v4598_v38 = vcombine.low %v25032_v31, %v25031_v60  ;;  %v4597_v31 = vcombine.low %v25037_v1, %v25036_v54  ;;  %25038 = vst [vmem:[#allocation32_spill] sm:$0xff] %v20073_v39  ;;  %v20076_v49 = vrot.slane %v4581_v44, %v17011_v58  ;;  %v25048_v1 = vld [vmem:[#allocation39_spill] sm:$0xff] }
 0x385   :  { %25028 = vst [vmem:[#allocation23_spill] sm:$0xff] %v20046_v48  ;;  %v4528_v46 = vcombine.low %v4520_v35, %v20006_v33  ;;  %v25034_v35 = vld [vmem:[#allocation38_spill] sm:$0xff] }
 0x386   :  { %v25035_v33 = vcombine.low %v25033_v34, %v25034_v35  ;;  %v25044_v34 = vld [vmem:[#allocation107_spill] sm:$0xff]  ;;  %v20095_v44 = vrot.slane %v4598_v38, %v17011_v58 }
 0x387   :  { %14605 = vmatmul.mubr.msk.f32.vlgmr.msra.gmra.mrb[34].mxu1 %vm684_vm2, %v4528_v46  ;;  %v25040_v46 = vld [vmem:[#allocation100_spill] sm:$0xff]  ;;  %v12795_v38 = vld [vmem:[%s23506_s4 + $0xd0] sm:$0xff] }
 0x388   :  { %15611 = vmatpush3.bf16.msra.mxu1 %v15608_v55  ;;  %14607 = vmatprep.mubr.msk.f32.mxu1 %vm684_vm2, %v4545_v57  ;;  %v20067_v4 = vrot.slane %v25035_v33, %v17011_v58  ;;  %v25039_v55 = vld [vmem:[#allocation101_spill] sm:$0xff]  ;;  %v25043_v33 = vld [vmem:[#allocation103_spill] sm:$0xff] }
 0x389   :  { %15613 = vmatprep.subr.bf16.mxu1 %v15612_v32  ;;  %v25041_v60 = vcombine.low %v25039_v55, %v25040_v46  ;;  %v25045_v35 = vcombine.low %v25043_v33, %v25044_v34  ;;  %v25049_v55 = vld [vmem:[#allocation43_spill] sm:$0xff]  ;;  %v12794_v34 = vld [vmem:[%s23506_s4 + $0xc8] sm:$0xff] }
 0x38a   :  { %v20092_v54 = vcombine.low %v20067_v4, %v20059_v26  ;;  %v25050_v46 = vcombine.low %v25048_v1, %v25049_v55  ;;  %v25052_v1 = vld [vmem:[#allocation69_spill] sm:$0xff]  ;;  %v25053_v55 = vld [vmem:[#allocation62_spill] sm:$0xff] }
 0x38b   :  { %v20082_v57 = vrot.slane %v25041_v60, %v17011_v58  ;;  %v20088_v18 = vrot.slane %v25045_v35, %v17011_v58  ;;  %14608 = vmatmul.mubr.msk.f32.gmra.mrb[36].mxu1 %vm684_vm2, %v20073_v39  ;;  %v20118_v35 = vrot.slane %v4597_v31, %v17011_v58  ;;  %v20122_v39 = vld [vmem:[#allocation4 + $0x1] ss:$0 sm:$0xff] }
 0x38c   :  { %25047 = vst [vmem:[#allocation55_spill] sm:$0xff] %v20092_v54  ;;  %v20103_v60 = vrot.slane %v25050_v46, %v17011_v58  ;;  %14610 = vmatprep.mubr.msk.f32.mxu1 %vm684_vm2, %v20092_v54  ;;  %v4631_v46 = vcombine.low %v25053_v55, %v25052_v1  ;;  %15615 = vmatpush3.bf16.msra.mxu1 %v15612_v32  ;;  %25054 = vst [vmem:[#allocation57_spill] sm:$0xff] %v20122_v39  ;;  %v25060_v54 = vld [vmem:[#allocation63_spill] sm:$0xff]  ;;  %v25061_v1 = vld [vmem:[#allocation65_spill] sm:$0xff] }
 0x38d   :  { %25042 = vst [vmem:[#allocation45_spill] sm:$0xff] %v20082_v57  ;;  %25046 = vst [vmem:[#allocation41_spill] sm:$0xff] %v20088_v18  ;;  %v20107_v33 = vcombine.low %v20082_v57, %v20088_v18  ;;  %v1004_v17 = vadd.f32 %v20122_v39, %v25055_v13  ;;  %v20134_v31 = vcombine.low %v20118_v35, %v20095_v44 }
 0x38e   :  { %v20128_v43 = vcombine.low %v20103_v60, %v20076_v49  ;;  %v25062_v32 = vcombine.low %v25060_v54, %v25061_v1  ;;  %v4666_v13 = vcombine.low %v25064_v23, %v25063_v56  ;;  %v15616_v39 = vpack.c.bf16 %v12795_v38, %v12794_v34  ;;  %v25065_v54 = vld [vmem:[#allocation95_spill] sm:$0xff]  ;;  %v25066_v1 = vld [vmem:[#allocation106_spill] sm:$0xff]  ;;  %v25068_v56 = vld [vmem:[#allocation180_spill] sm:$0xff] }
 0x38f   :  { %25051 = vst [vmem:[#allocation54_spill] sm:$0xff] %v20107_v33  ;;  %25059 = vst [vmem:[#allocation17_spill] sm:$0xff] %v20134_v31  ;;  %v20152_v30 = vrot.slane %v4631_v46, %v17011_v58  ;;  %v1163_v37 = vmax.f32 %v1004_v17, 0.0  ;;  %v20157_v23 = vrot.slane %v4649_v41, %v17011_v58  ;;  %v25069_v34 = vld [vmem:[#allocation91_spill] sm:$0xff]  ;;  %v25072_v46 = vld [vmem:[#allocation200_spill] sm:$0xff] }
 0x390   :  { %25056 = vst [vmem:[#allocation61_spill] sm:$0xff] %v20128_v43  ;;  %v20140_v55 = vrot.slane %v25062_v32, %v17011_v58  ;;  %14611 = vmatmul.mubr.msk.f32.gmra.mrb[38].mxu1 %vm684_vm2, %v20128_v43  ;;  %15617 = vmatprep.subr.bf16.mxu1 %v15616_v39  ;;  %v4700_v32 = vcombine.low %v25066_v1, %v25065_v54  ;;  %v25076_v41 = vld [vmem:[#allocation203_spill] sm:$0xff] }
 0x391   :  { %14613 = vmatprep.mubr.msk.f32.mxu1 %vm684_vm2, %v20134_v31  ;;  %25067 = vst [vmem:[#allocation16_spill] sm:$0xff] %v20157_v23  ;;  %v4683_v38 = vcombine.low %v25069_v34, %v25068_v56  ;;  %15619 = vmatpush3.bf16.msra.mxu1 %v15616_v39  ;;  %v20166_v31 = vrot.slane %v4666_v13, %v17011_v58  ;;  %v25079_v39 = vld [vmem:[#allocation66_spill] sm:$0xff]  ;;  %v25080_v13 = vld [vmem:[#allocation67_spill] sm:$0xff] }
 0x392   :  { %v20163_v43 = vcombine.low %v20152_v30, %v20140_v55  ;;  %v25074_v16 = vcombine.low %v25072_v46, %v25073_v53  ;;  %v25077_v17 = vcombine.low %v25076_v41, %v24851_v2  ;;  %14670 = vmatprep.subr.mxu1 %v12796_v22  ;;  %v25081_v56 = vcombine.low %v25079_v39, %v25080_v13  ;;  %v25083_v53 = vld [vmem:[#allocation75_spill] sm:$0xff]  ;;  %v25086_v41 = vld [vmem:[#allocation97_spill] sm:$0xff] }
 0x393   :  { %25071 = vst [vmem:[#allocation46_spill] sm:$0xff] %v20166_v31  ;;  %v20203_v39 = vrot.slane %v1163_v37, %v17011_v58 }
 0x394   :  { %25070 = vst [vmem:[#allocation144_spill] sm:$0xff] %v20163_v43  ;;  %v20172_v54 = vrot.slane %v25074_v16, %v17011_v58  ;;  %v20178_v1 = vrot.slane %v25077_v17, %v17011_v58  ;;  %14614 = vmatmul.mubr.msk.f32.gmra.mrb[40].mxu1 %vm684_vm2, %v20046_v48  ;;  %v20186_v34 = vrot.slane %v25081_v56, %v17011_v58  ;;  %v25082_v16 = vld [vmem:[#allocation74_spill] sm:$0xff] }
 0x395   :  { %14616 = vmatprep.mubr.msk.f32.mxu1 %vm684_vm2, %v20163_v43  ;;  %v25084_v46 = vcombine.low %v25082_v16, %v25083_v53  ;;  %v25087_v17 = vld [vmem:[#allocation102_spill] sm:$0xff]  ;;  %25089 = vst [vmem:[#allocation50_spill] sm:$0xff] %v20203_v39  ;;  %v20210_v56 = vrot.slane %v4683_v38, %v17011_v58  ;;  %14671 = vmatpush3.msra.mxu1 %v12796_v22  ;;  %v25099_v38 = vld [vmem:[#allocation116_spill] sm:$0xff] }
 0x396   :  { %25075 = vst [vmem:[#allocation51_spill] sm:$0xff] %v20172_v54  ;;  %25078 = vst [vmem:[#allocation60_spill] sm:$0xff] %v20178_v1  ;;  %v4699_v7 = vcombine.low %v25087_v17, %v25086_v41  ;;  %v20200_v48 = vcombine.low %v20172_v54, %v20178_v1  ;;  %v20207_v13 = vcombine.low %v20186_v34, %v20157_v23  ;;  %v25094_v41 = vld [vmem:[#allocation81_spill] sm:$0xff]  ;;  %v25095_v17 = vld [vmem:[#allocation87_spill] sm:$0xff] }
 0x397   :  { %v20194_v2 = vrot.slane %v25084_v46, %v17011_v58  ;;  %25091 = vst [vmem:[#allocation101_spill] sm:$0xff] %v20210_v56  ;;  %v20217_v53 = vrot.slane %v4700_v32, %v17011_v58  ;;  %v1597_v46 = vcombine.high %v1163_v37, %v1163_v37  ;;  %v25096_v43 = vcombine.low %v25094_v41, %v25095_v17  ;;  %v25178_v23 = vld [vmem:[#allocation214_spill] sm:$0xff] }
 0x398   :  { %25088 = vst [vmem:[#allocation38_spill] sm:$0xff] %v20200_v48  ;;  %25090 = vst [vmem:[#allocation56_spill] sm:$0xff] %v20207_v13  ;;  %14617 = vmatmul.mubr.msk.f32.gmra.mrb[42].mxu1 %vm684_vm2, %v20207_v13  ;;  %v20230_v22 = vrot.slane %v4699_v7, %v17011_v58  ;;  %v4733_v32 = vcombine.low %v25100_v19, %v25099_v38  ;;  %v25101_v37 = vcombine.low %v18369_v59, %v18365_v47  ;;  %v25107_v19 = vld [vmem:[#allocation123_spill] sm:$0xff]  ;;  %v25108_v38 = vld [vmem:[#allocation124_spill] sm:$0xff] }
 0x399   :  { %25085 = vst [vmem:[#allocation33_spill] sm:$0xff] %v20194_v2  ;;  %v20214_v16 = vcombine.low %v20194_v2, %v20166_v31  ;;  %25093 = vst [vmem:[#allocation103_spill] sm:$0xff] %v20217_v53  ;;  %v20225_v12 = vrot.slane %v25096_v43, %v17011_v58  ;;  %v25103_v43 = vcombine.low %v18357_v6, %v18377_v24  ;;  %v25110_v59 = vld [vmem:[#allocation109_spill] sm:$0xff]  ;;  %v25111_v6 = vld [vmem:[#allocation112_spill] sm:$0xff] }
 0x39a   :  { %25098 = vst [vmem:[#allocation39_spill] sm:$0xff] %v20230_v22  ;;  %v20238_v13 = vrot.slane %v25101_v37, %v17011_v58  ;;  %v20248_v17 = vcombine.high %v20203_v39, %v20203_v39  ;;  %v20258_v47 = vcombine.low %v20230_v22, %v20217_v53  ;;  %v25112_v24 = vcombine.low %v25110_v59, %v25111_v6  ;;  %v25119_v59 = vld [vmem:[#allocation218_spill] sm:$0xff]  ;;  %v25120_v6 = vld [vmem:[#allocation149_spill] sm:$0xff]  ;;  %v25171_v22 = vld [vmem:[#allocation232_spill] sm:$0xff] }
 0x39b   :  { %25092 = vst [vmem:[#allocation100_spill] sm:$0xff] %v20214_v16  ;;  %25097 = vst [vmem:[#allocation107_spill] sm:$0xff] %v20225_v12  ;;  %14619 = vmatprep.mubr.msk.f32.mxu1 %vm684_vm2, %v20214_v16  ;;  %v20244_v41 = vrot.slane %v25103_v43, %v17011_v58  ;;  %v20252_v7 = vcombine.low %v20225_v12, %v20210_v56  ;;  %v4751_v16 = vcombine.low %v25108_v38, %v25107_v19  ;;  %v25114_v43 = vld [vmem:[#allocation146_spill] sm:$0xff]  ;;  %v25177_v12 = vld [vmem:[#allocation224_spill] sm:$0xff] }
 0x39c   :  { %25102 = vst [vmem:[#allocation43_spill] sm:$0xff] %v20238_v13  ;;  %25105 = vst [vmem:[#allocation62_spill] sm:$0xff] %v20248_v17  ;;  %v20264_v37 = vrot.slane %v25112_v24, %v17011_v58  ;;  %v4768_v10 = vcombine.low %v25115_v29, %v25114_v43  ;;  %v20273_v54 = vrot.slane %v1597_v46, %v17011_v58  ;;  %v12835_v29 = vld [vmem:[%s23506_s4 + $0xe0] sm:$0xff]  ;;  %v12836_v38 = vld [vmem:[%s23506_s4 + $0xe8] sm:$0xff] }
 0x39d   :  { %25104 = vst [vmem:[#allocation69_spill] sm:$0xff] %v20244_v41  ;;  %25106 = vst [vmem:[#allocation110_spill] sm:$0xff] %v20252_v7  ;;  %v20270_v1 = vcombine.low %v20238_v13, %v20244_v41  ;;  %14620 = vmatmul.mubr.msk.f32.gmra.mrb[44].mxu1 %vm684_vm2, %v20252_v7  ;;  %v20280_v19 = vrot.slane %v4733_v32, %v17011_v58  ;;  %v20289_v46 = vrot.slane %v4751_v16, %v17011_v58  ;;  %v25128_v13 = vld [vmem:[#allocation181_spill] sm:$0xff] }
 0x39e   :  { %25109 = vst [vmem:[#allocation71_spill] sm:$0xff] %v20258_v47  ;;  %25113 = vst [vmem:[#allocation72_spill] sm:$0xff] %v20264_v37  ;;  %14622 = vmatprep.mubr.msk.f32.mxu1 %vm684_vm2, %v20258_v47  ;;  %v4785_v24 = vcombine.low %v25120_v6, %v25119_v59  ;;  %v25121_v43 = vcombine.low %v18675_v61, %v18671_v42  ;;  %v25123_v47 = vcombine.low %v18662_v20, %v18686_v8  ;;  %v25127_v6 = vld [vmem:[#allocation176_spill] sm:$0xff]  ;;  %v25129_v8 = vld [vmem:[#allocation117_spill] sm:$0xff] }
 0x39f   :  { %25116 = vst [vmem:[#allocation63_spill] sm:$0xff] %v20270_v1  ;;  %25117 = vst [vmem:[#allocation65_spill] sm:$0xff] %v20280_v19  ;;  %v5907_v41 = vrot.slane %v20248_v17, 7  ;;  %v20308_v16 = vcombine.low %v20280_v19, %v20264_v37  ;;  %v20311_v59 = vrot.slane %v4768_v10, %v17011_v58  ;;  %v4802_v61 = vcombine.low %v25128_v13, %v25127_v6  ;;  %v25130_v20 = vld [vmem:[#allocation118_spill] sm:$0xff]  ;;  %v25135_v42 = vld [vmem:[#allocation128_spill] sm:$0xff] }
 0x3a0   :  { %25118 = vst [vmem:[#allocation88_spill] sm:$0xff] %v20289_v46  ;;  %v20297_v32 = vrot.slane %v25121_v43, %v17011_v58  ;;  %v20303_v7 = vrot.slane %v25123_v47, %v17011_v58  ;;  %v25131_v47 = vcombine.low %v25129_v8, %v25130_v20  ;;  %v20328_v10 = vpack.c.bf16 %v12836_v38, %v12835_v29  ;;  %v25136_v8 = vld [vmem:[#allocation126_spill] sm:$0xff] }
 0x3a1   :  { %25125 = vst [vmem:[#allocation106_spill] sm:$0xff] %v20308_v16  ;;  %25126 = vst [vmem:[#allocation180_spill] sm:$0xff] %v20311_v59  ;;  %14623 = vmatmul.mubr.msk.f32.gmra.mrb[46].mxu1 %vm684_vm2, %v20107_v33  ;;  %v20332_v13 = vcombine.high %v20273_v54, %v20273_v54  ;;  %v12833_v6 = vrot.slane %v20203_v39, 9  ;;  %v25137_v20 = vcombine.low %v25135_v42, %v25136_v8  ;;  %v25146_v33 = vld [vmem:[#allocation194_spill] sm:$0xff]  ;;  %v20367_v17 = vrot.slane %v5907_v41, 2 }
 0x3a2   :  { %25122 = vst [vmem:[#allocation78_spill] sm:$0xff] %v20297_v32  ;;  %25124 = vst [vmem:[#allocation95_spill] sm:$0xff] %v20303_v7  ;;  %v20322_v43 = vrot.slane %v25131_v47, %v17011_v58  ;;  %v20326_v1 = vcombine.low %v20297_v32, %v20303_v7  ;;  %14625 = vmatprep.mubr.msk.f32.mxu1 %vm684_vm2, %v20308_v16  ;;  %v20350_v38 = vrot.slane %v4785_v24, %v17011_v58  ;;  %v25141_v7 = vld [vmem:[#allocation193_spill] sm:$0xff]  ;;  %v25143_v16 = vld [vmem:[#allocation147_spill] sm:$0xff] }
 0x3a3   :  { %25134 = vst [vmem:[#allocation199_spill] sm:$0xff] %v20328_v10  ;;  %v20341_v47 = vrot.slane %v25137_v20, %v17011_v58  ;;  %v25142_v32 = vld [vmem:[#allocation185_spill] sm:$0xff]  ;;  %15621 = vmatprep.subr.bf16.mxu1 %v20328_v10  ;;  %v4816_v8 = vrot.slane %v4802_v61, %v17011_v58  ;;  %v20365_v24 = vsel %vm17044_vm9, %v12833_v6, %v5907_v41  ;;  %v25148_v37 = vld [vmem:[#allocation138_spill] sm:$0xff]  ;;  %v25149_v10 = vld [vmem:[#allocation143_spill] sm:$0xff]  ;;  %v25162_v19 = vrot.slane %v25143_v16, 7 }
 0x3a4   :  { %25132 = vst [vmem:[#allocation91_spill] sm:$0xff] %v20322_v43  ;;  %25133 = vst [vmem:[#allocation200_spill] sm:$0xff] %v20326_v1  ;;  %v20347_v29 = vcombine.low %v20322_v43, %v20289_v46  ;;  %v4819_v1 = vcombine.low %v25142_v32, %v25141_v7  ;;  %v25145_v20 = vld [vmem:[#allocation249_spill] sm:$0xff]  ;;  %v25147_v7 = vrot.slane %v20273_v54, 7  ;;  %v25153_v41 = vld [vmem:[#allocation164_spill] sm:$0xff] }
 0x3a5   :  { %25138 = vst [vmem:[#allocation203_spill] sm:$0xff] %v20341_v47  ;;  %25140 = vst [vmem:[#allocation67_spill] sm:$0xff] %v20350_v38  ;;  %v20358_v42 = vcombine.low %v20341_v47, %v20311_v59  ;;  %v4836_v46 = vcombine.low %v25146_v33, %v25145_v20  ;;  %v25150_v59 = vcombine.low %v25148_v37, %v25149_v10  ;;  %v25152_v47 = vld [vmem:[#allocation151_spill] sm:$0xff]  ;;  %v25158_v10 = vld [vmem:[#allocation197_spill] sm:$0xff] }
 0x3a6   :  { %25139 = vst [vmem:[#allocation66_spill] sm:$0xff] %v20347_v29  ;;  %v5912_v32 = vrot.slane %v25147_v7, 2  ;;  %14626 = vmatmul.mubr.msk.f32.gmra.mrb[48].mxu1 %vm684_vm2, %v20347_v29  ;;  %v20385_v20 = vcombine.high %v25153_v41, %v25153_v41  ;;  %v25155_v7 = vld [vmem:[#allocation174_spill] sm:$0xff]  ;;  %v25156_v29 = vld [vmem:[#allocation175_spill] sm:$0xff]  ;;  %v25159_v43 = vld [vmem:[#allocation205_spill] sm:$0xff]  ;;  %v20401_v18 = vrot.slane %v4819_v1, %v17011_v58  ;;  %v5919_v53 = vrot.slane %v25152_v47, 7 }
 0x3a7   :  { %25144 = vst [vmem:[#allocation74_spill] sm:$0xff] %v20358_v42  ;;  %v20377_v61 = vrot.slane %v25150_v59, %v17011_v58  ;;  %14628 = vmatprep.mubr.msk.f32.mxu1 %vm684_vm2, %v20358_v42  ;;  %v25157_v39 = vcombine.low %v25155_v7, %v25156_v29  ;;  %v4853_v33 = vcombine.low %v25159_v43, %v25158_v10  ;;  %v5918_v42 = vrot.slane %v25162_v19, 2  ;;  %v25164_v29 = vld [vmem:[#allocation150_spill] sm:$0xff]  ;;  %v25170_v19 = vld [vmem:[#allocation225_spill] sm:$0xff] }
 0x3a8   :  { %25154 = vst [vmem:[#allocation97_spill] sm:$0xff] %v20385_v20  ;;  %25161 = vst [vmem:[#allocation81_spill] sm:$0xff] %v20401_v18  ;;  %v5922_v7 = vrot.slane %v25164_v29, 7  ;;  %v25165_v43 = vld [vmem:[#allocation182_spill] sm:$0xff]  ;;  %v4904_v47 = vcombine.low %v25171_v22, %v25170_v19  ;;  %v25183_v19 = vld [vmem:[#allocation221_spill] sm:$0xff] }
 0x3a9   :  { %25151 = vst [vmem:[#allocation75_spill] sm:$0xff] %v20377_v61  ;;  %v4809_v37 = vrot.slane %v25157_v39, %v17011_v58  ;;  %v20398_v6 = vcombine.low %v20377_v61, %v20350_v38  ;;  %v20407_v39 = vrot.slane %v4836_v46, %v17011_v58  ;;  %v25166_v10 = vld [vmem:[#allocation178_spill] sm:$0xff]  ;;  %v25168_v38 = vld [vmem:[#allocation196_spill] sm:$0xff]  ;;  %v25173_v46 = vld [vmem:[#allocation183_spill] sm:$0xff] }
 0x3aa   :  { %v25167_v59 = vcombine.low %v25165_v43, %v25166_v10  ;;  %v25169_v61 = vld [vmem:[#allocation202_spill] sm:$0xff]  ;;  %v4886_v43 = vcombine.low %v25178_v23, %v25177_v12 }
 0x3ab   :  { %25160 = vst [vmem:[#allocation102_spill] sm:$0xff] %v20398_v6  ;;  %v4817_v57 = vcombine.low %v4809_v37, %v4816_v8  ;;  %25163 = vst [vmem:[#allocation87_spill] sm:$0xff] %v20407_v39  ;;  %14629 = vmatmul.mubr.msk.f32.gmra.mrb[50].mxu1 %vm684_vm2, %v20398_v6  ;;  %v4852_v56 = vcombine.low %v25169_v61, %v25168_v38  ;;  %v25174_v29 = vld [vmem:[#allocation94_spill] sm:$0xff]  ;;  %v25179_v38 = vrot.slane %v25153_v41, 7 }
 0x3ac   :  { %v4826_v1 = vrot.slane %v25167_v59, %v17011_v58  ;;  %v25175_v31 = vcombine.low %v25173_v46, %v25174_v29  ;;  %v5913_v59 = vrot.slane %v20332_v13, 7  ;;  %v25182_v29 = vld [vmem:[#allocation217_spill] sm:$0xff]  ;;  %v25186_v46 = vld [vmem:[#allocation244_spill] sm:$0xff]  ;;  %v25187_v37 = vld [vmem:[#allocation298_spill] sm:$0xff] }
 0x3ad   :  { %14631 = vmatprep.mubr.msk.f32.mxu1 %vm684_vm2, %v4817_v57  ;;  %v20433_v61 = vrot.slane %v25179_v38, 2  ;;  %v20438_v57 = vrot.slane %v4853_v33, %v17011_v58  ;;  %v25184_v12 = vcombine.low %v25182_v29, %v25183_v19  ;;  %v4921_v38 = vcombine.low %v24891_v14, %v25186_v46  ;;  %v25189_v33 = vld [vmem:[#allocation256_spill] sm:$0xff]  ;;  %v25198_v46 = vld [vmem:[#allocation231_spill] sm:$0xff]  ;;  %v25203_v14 = vld [vmem:[#allocation254_spill] sm:$0xff] }
 0x3ae   :  { %v20426_v6 = vrot.slane %v25175_v31, %v17011_v58  ;;  %v4834_v10 = vcombine.low %v4826_v1, %v20401_v18  ;;  %v4955_v8 = vcombine.low %v25189_v33, %v24923_v52  ;;  %v20461_v29 = vrot.slane %v4904_v47, %v17011_v58  ;;  %v25199_v33 = vld [vmem:[#allocation229_spill] sm:$0xff] }
 0x3af   :  { %25180 = vst [vmem:[#allocation108_spill] sm:$0xff] %v20433_v61  ;;  %25181 = vst [vmem:[#allocation123_spill] sm:$0xff] %v20438_v57  ;;  %v20446_v23 = vrot.slane %v25184_v12, %v17011_v58  ;;  %v25188_v61 = vld [vmem:[#allocation245_spill] sm:$0xff]  ;;  %v5921_v19 = vrot.slane %v5919_v53, 2  ;;  %v25200_v1 = vcombine.low %v25198_v46, %v25199_v33  ;;  %v20492_v20 = vrot.slane %v4921_v38, %v17011_v58 }
 0x3b0   :  { %25176 = vst [vmem:[#allocation116_spill] sm:$0xff] %v20426_v6  ;;  %v4851_v31 = vcombine.low %v20426_v6, %v20407_v39  ;;  %v4938_v22 = vcombine.low %v25188_v61, %v25187_v37  ;;  %14632 = vmatmul.mubr.msk.f32.gmra.mrb[52].mxu1 %vm684_vm2, %v4834_v10  ;;  %v20458_v39 = vrot.slane %v4852_v56, %v17011_v58  ;;  %25191 = vst [vmem:[#allocation112_spill] sm:$0xff] %v20461_v29  ;;  %v25194_v56 = vld [vmem:[#allocation228_spill] sm:$0xff]  ;;  %v25195_v10 = vld [vmem:[#allocation222_spill] sm:$0xff] }
 0x3b1   :  { %25185 = vst [vmem:[#allocation124_spill] sm:$0xff] %v20446_v23  ;;  %v20467_v37 = vrot.slane %v4886_v43, %v17011_v58  ;;  %v5915_v61 = vrot.slane %v5913_v59, 2  ;;  %v25196_v12 = vcombine.low %v25194_v56, %v25195_v10  ;;  %v25202_v43 = vld [vmem:[#allocation250_spill] sm:$0xff]  ;;  %25205 = vst [vmem:[#allocation181_spill] sm:$0xff] %v20492_v20  ;;  %v4988_v10 = vcombine.low %v24935_v9, %v24930_v5  ;;  %v25311_v6 = vld [vmem:[#allocation53_spill] sm:$0xff] }
 0x3b2   :  { %25190 = vst [vmem:[#allocation109_spill] sm:$0xff] %v20458_v39  ;;  %14634 = vmatprep.mubr.msk.f32.mxu1 %vm684_vm2, %v4851_v31  ;;  %v20471_v52 = vcombine.low %v20458_v39, %v20438_v57  ;;  %v20483_v31 = vrot.slane %v25200_v1, %v17011_v58  ;;  %v4954_v11 = vcombine.low %v25203_v14, %v25202_v43  ;;  %v25208_v14 = vld [vmem:[#allocation235_spill] sm:$0xff] }
 0x3b3   :  { %25192 = vst [vmem:[#allocation146_spill] sm:$0xff] %v20467_v37  ;;  %v20477_v47 = vrot.slane %v25196_v12, %v17011_v58  ;;  %v20489_v21 = vcombine.low %v20467_v37, %v20446_v23  ;;  %v20495_v56 = vrot.slane %v4938_v22, %v17011_v58  ;;  %v25209_v12 = vld [vmem:[#allocation238_spill] sm:$0xff]  ;;  %v20512_v38 = vrot.slane %v4955_v8, %v17011_v58  ;;  %v25304_v23 = vld [vmem:[#allocation36_spill] sm:$0xff] }
 0x3b4   :  { %25193 = vst [vmem:[#allocation136_spill] sm:$0xff] %v20471_v52  ;;  %25201 = vst [vmem:[#allocation149_spill] sm:$0xff] %v20483_v31  ;;  %14635 = vmatmul.mubr.msk.f32.gmra.mrb[54].mxu1 %vm684_vm2, %v20471_v52  ;;  %v25210_v46 = vcombine.low %v25208_v14, %v25209_v12  ;;  %v5006_v22 = vcombine.low %v18488_v0, %v18451_v51  ;;  %v25213_v5 = vcombine.low %v24949_v63, %v24937_v3  ;;  %v25240_v52 = vld [vmem:[#allocation62_spill] sm:$0xff] }
 0x3b5   :  { %25197 = vst [vmem:[#allocation218_spill] sm:$0xff] %v20477_v47  ;;  %25204 = vst [vmem:[#allocation176_spill] sm:$0xff] %v20489_v21  ;;  %v20503_v1 = vcombine.low %v20477_v47, %v20461_v29  ;;  %14637 = vmatprep.mubr.msk.f32.mxu1 %vm684_vm2, %v20200_v48  ;;  %v5914_v43 = vsel %vm17044_vm9, %v5912_v32, %v5913_v59  ;;  %v25215_v14 = vrot.slane %v25143_v16, 7  ;;  %v12840_v47 = vld [vmem:[%s23506_s4 + $0x108] sm:$0xff] }
 0x3b6   :  { %25206 = vst [vmem:[#allocation117_spill] sm:$0xff] %v20495_v56  ;;  %v20509_v33 = vrot.slane %v25210_v46, %v17011_v58  ;;  %25212 = vst [vmem:[#allocation126_spill] sm:$0xff] %v20512_v38  ;;  %v20522_v9 = vrot.slane %v25213_v5, %v17011_v58  ;;  %v5920_v51 = vsel %vm17044_vm9, %v5918_v42, %v5919_v53  ;;  %v25226_v46 = vrot.slane %v20273_v54, 7 }
 0x3b7   :  { %25207 = vst [vmem:[#allocation118_spill] sm:$0xff] %v20503_v1  ;;  %v5917_v8 = vsel %vm17044_vm9, %v5915_v61, %v25215_v14  ;;  %v20533_v0 = vrot.slane %v4954_v11, %v17011_v58  ;;  %v5023_v12 = vcombine.low %v18553_v27, %v24956_v45  ;;  %v5923_v63 = vsel %vm17044_vm9, %v5921_v19, %v5922_v7  ;;  %v25221_v45 = vld [vmem:[#allocation272_spill] sm:$0xff] }
 0x3b8   :  { %25211 = vst [vmem:[#allocation128_spill] sm:$0xff] %v20509_v33  ;;  %25214 = vst [vmem:[#allocation193_spill] sm:$0xff] %v20522_v9  ;;  %v5976_v3 = vcombine.low %v5914_v43, %v5917_v8  ;;  %v20541_v32 = vcombine.low %v20483_v31, %v20492_v20  ;;  %v20545_v59 = vcombine.low %v20509_v33, %v20495_v56  ;;  %14638 = vmatmul.mubr.msk.f32.gmra.mrb[56].mxu1 %vm684_vm2, %v20489_v21  ;;  %v25248_v21 = vld [vmem:[#allocation151_spill] sm:$0xff]  ;;  %v25272_v31 = vld [vmem:[#allocation108_spill] sm:$0xff] }
 0x3b9   :  { %25216 = vst [vmem:[#allocation185_spill] sm:$0xff] %v20533_v0  ;;  %v20548_v53 = vrot.slane %v4988_v10, %v17011_v58  ;;  %v5977_v11 = vcombine.low %v5920_v51, %v5923_v63  ;;  %v20554_v27 = vcombine.low %v20533_v0, %v20512_v38  ;;  %v25222_v42 = vcombine.low %v24820_v62, %v25221_v45  ;;  %v25239_v45 = vld [vmem:[#allocation50_spill] sm:$0xff]  ;;  %v25259_v0 = vld [vmem:[#allocation160_spill] sm:$0xff] }
 0x3ba   :  { %25217 = vst [vmem:[#allocation147_spill] sm:$0xff] %v20541_v32  ;;  %25218 = vst [vmem:[#allocation249_spill] sm:$0xff] %v20545_v59  ;;  %v20563_v61 = vrot.slane %v5006_v22, %v17011_v58  ;;  %v5040_v19 = vcombine.low %v18647_v28, %v19445_v25  ;;  %14640 = vmatprep.mubr.msk.f32.mxu1 %vm684_vm2, %v20503_v1  ;;  %v5911_v62 = vsel %vm17044_vm9, %v20367_v17, %v25226_v46  ;;  %v25230_v46 = vld [vmem:[#allocation46_spill] sm:$0xff]  ;;  %v25234_v17 = vld [vmem:[#allocation103_spill] sm:$0xff] }
 0x3bb   :  { %25219 = vst [vmem:[#allocation194_spill] sm:$0xff] %v20548_v53  ;;  %25220 = vst [vmem:[#allocation138_spill] sm:$0xff] %v20554_v27  ;;  %v20560_v7 = vrot.slane %v25222_v42, %v17011_v58  ;;  %v20571_v10 = vcombine.low %v20548_v53, %v20522_v9  ;;  %v20579_v5 = vrot.slane %v5976_v3, %v17011_v58  ;;  %v25235_v1 = vld [vmem:[#allocation65_spill] sm:$0xff]  ;;  %v25263_v42 = vld [vmem:[#allocation284_spill] sm:$0xff]  ;;  %v25268_v38 = vrot.slane %v25153_v41, 7 }
 0x3bc   :  { %25224 = vst [vmem:[#allocation164_spill] sm:$0xff] %v20563_v61  ;;  %v20582_v22 = vrot.slane %v5977_v11, %v17011_v58  ;;  %v20585_v28 = vrot.slane %v5023_v12, %v17011_v58  ;;  %v5493_v25 = vcombine.low %v20273_v54, %v20332_v13  ;;  %14641 = vmatmul.mubr.msk.f32.gmra.mrb[58].mxu1 %vm684_vm2, %v20541_v32  ;;  %v25228_v11 = vld [vmem:[#allocation16_spill] sm:$0xff]  ;;  %v25255_v32 = vld [vmem:[#allocation63_spill] sm:$0xff]  ;;  %v25302_v53 = vld [vmem:[#allocation37_spill] sm:$0xff] }
 0x3bd   :  { %25223 = vst [vmem:[#allocation143_spill] sm:$0xff] %v20560_v7  ;;  %25225 = vst [vmem:[#allocation174_spill] sm:$0xff] %v20571_v10  ;;  %v5967_v63 = vcombine.low %v20365_v24, %v5911_v62  ;;  %14643 = vmatprep.mubr.msk.f32.mxu1 %vm684_vm2, %v20545_v59  ;;  %v25236_v24 = vld [vmem:[#allocation41_spill] sm:$0xff]  ;;  %v25241_v2 = vcombine.low %v25239_v45, %v25240_v52  ;;  %v25243_v12 = vld [vmem:[#allocation88_spill] sm:$0xff]  ;;  %v25246_v62 = vcombine.low %v20332_v13, %v25143_v16 }
 0x3be   :  { %25227 = vst [vmem:[#allocation175_spill] sm:$0xff] %v20585_v28  ;;  %v20627_v59 = vrot.slane %v5493_v25, %v17011_v58  ;;  %v25249_v45 = vld [vmem:[#allocation150_spill] sm:$0xff]  ;;  %v20681_v25 = vrot.slane %v5040_v19, %v17011_v58  ;;  %v25260_v56 = vcombine.low %v25259_v0, %v25153_v41  ;;  %v25301_v9 = vld [vmem:[#allocation47_spill] sm:$0xff] }
 0x3bf   :  { %v20624_v8 = vrot.slane %v25241_v2, %v17011_v58  ;;  %v20637_v48 = vrot.slane %v25246_v62, %v17011_v58  ;;  %v25250_v2 = vcombine.low %v25248_v21, %v25249_v45  ;;  %v20652_v43 = vrot.slane %v5967_v63, %v17011_v58  ;;  %v25262_v19 = vld [vmem:[#allocation278_spill] sm:$0xff]  ;;  %v25307_v13 = vld [vmem:[#allocation199_spill] sm:$0xff] }
 0x3c0   :  { %14644 = vmatmul.mubr.msk.f32.gmra.mrb[60].mxu1 %vm684_vm2, %v20554_v27  ;;  %v20672_v45 = vcombine.low %v20560_v7, %v20563_v61  ;;  %v25258_v62 = vcombine.low %v25143_v16, %v25248_v21  ;;  %v25264_v27 = vcombine.low %v25262_v19, %v25263_v42  ;;  %v25266_v21 = vld [vmem:[#allocation303_spill] sm:$0xff]  ;;  %v25267_v16 = vld [vmem:[#allocation306_spill] sm:$0xff]  ;;  %v25274_v42 = vld [vmem:[#allocation288_spill] sm:$0xff] }
 0x3c1   :  { %25247 = vst [vmem:[#allocation197_spill] sm:$0xff] %v20637_v48  ;;  %v20643_v3 = vrot.slane %v25250_v2, %v17011_v58  ;;  %14646 = vmatprep.mubr.msk.f32.mxu1 %vm684_vm2, %v25255_v32  ;;  %v6412_v2 = vcombine.low %v25240_v52, %v20273_v54  ;;  %v20693_v54 = vrot.slane %v25260_v56, %v17011_v58  ;;  %v25269_v56 = vrot.slane %v25259_v0, 9  ;;  %v25270_v52 = vld [vmem:[#allocation97_spill] sm:$0xff]  ;;  %v25310_v51 = vld [vmem:[#allocation70_spill] sm:$0xff] }
 0x3c2   :  { %25256 = vst [vmem:[#allocation182_spill] sm:$0xff] %v20672_v45  ;;  %v20687_v63 = vrot.slane %v25258_v62, %v17011_v58  ;;  %v20703_v32 = vrot.slane %v25264_v27, %v17011_v58  ;;  %v5056_v62 = vcombine.low %v25267_v16, %v25266_v21  ;;  %v25271_v20 = vrot.slane %v25270_v52, 7  ;;  %v25273_v27 = vld [vmem:[#allocation286_spill] sm:$0xff] }
 0x3c3   :  { %25251 = vst [vmem:[#allocation205_spill] sm:$0xff] %v20643_v3  ;;  %25261 = vst [vmem:[#allocation178_spill] sm:$0xff] %v20693_v54  ;;  %v7191_v33 = vsel %vm17044_vm9, %v25269_v56, %v25268_v38  ;;  %v25275_v19 = vcombine.low %v25273_v27, %v25274_v42  ;;  %v25278_v56 = vld [vmem:[#allocation308_spill] sm:$0xff]  ;;  %v25286_v0 = vcombine.low %v25153_v41, %v25270_v52  ;;  %v25294_v52 = vld [vmem:[#allocation57_spill] sm:$0xff] }
 0x3c4   :  { %14647 = vmatmul.mubr.msk.f32.gmra.mrb[62].mxu1 %vm684_vm2, %v20571_v10  ;;  %25265 = vst [vmem:[#allocation196_spill] sm:$0xff] %v20703_v32  ;;  %v7194_v10 = vsel %vm17044_vm9, %v25272_v31, %v25271_v20  ;;  %v20730_v38 = vcombine.low %v20703_v32, %v20585_v28  ;;  %v25279_v20 = vld [vmem:[#allocation304_spill] sm:$0xff]  ;;  %v5470_v27 = vcombine.low %v25302_v53, %v25301_v9 }
 0x3c5   :  { %14649 = vmatprep.mubr.msk.f32.mxu1 %vm684_vm2, %v20672_v45  ;;  %v20724_v21 = vrot.slane %v25275_v19, %v17011_v58  ;;  %v7235_v16 = vcombine.low %v7191_v33, %v7194_v10  ;;  %v25280_v31 = vcombine.low %v25278_v56, %v25279_v20  ;;  %v20739_v45 = vrot.slane %v6412_v2, %v17011_v58  ;;  %v25284_v56 = vld [vmem:[#allocation315_spill] sm:$0xff]  ;;  %v25285_v20 = vld [vmem:[#allocation309_spill] sm:$0xff] }
 0x3c6   :  { %25277 = vst [vmem:[#allocation225_spill] sm:$0xff] %v20730_v38  ;;  %v20753_v10 = vrot.slane %v5056_v62, %v17011_v58  ;;  %v5090_v2 = vcombine.low %v25285_v20, %v25284_v56  ;;  %v20763_v42 = vrot.slane %v25286_v0, %v17011_v58  ;;  %v25290_v20 = vld [vmem:[#allocation322_spill] sm:$0xff]  ;;  %v25297_v0 = vld [vmem:[#allocation35_spill] sm:$0xff]  ;;  %v5472_v18 = vcombine.low %v25311_v6, %v25310_v51 }
 0x3c7   :  { %25276 = vst [vmem:[#allocation202_spill] sm:$0xff] %v20724_v21  ;;  %v20736_v29 = vrot.slane %v25280_v31, %v17011_v58  ;;  %v20745_v19 = vcombine.low %v20724_v21, %v20681_v25  ;;  %v20748_v33 = vrot.slane %v7235_v16, %v17011_v58  ;;  %v25288_v16 = vld [vmem:[#allocation317_spill] sm:$0xff]  ;;  %v25291_v31 = vld [vmem:[#allocation326_spill] sm:$0xff] }
 0x3c8   :  { %14650 = vmatmul.mubr.msk.f32.gmra.mrb[64].mxu1 %vm684_vm2, %v20730_v38  ;;  %25287 = vst [vmem:[#allocation94_spill] sm:$0xff] %v20763_v42  ;;  %v2022_v54 = vcombine.high %v25288_v16, %v25288_v16  ;;  %v25292_v38 = vcombine.low %v25290_v20, %v25291_v31  ;;  %v20788_v62 = vrot.slane %v5090_v2, %v17011_v58  ;;  %v25300_v42 = vld [vmem:[#allocation327_spill] sm:$0xff] }
 0x3c9   :  { %25282 = vst [vmem:[#allocation232_spill] sm:$0xff] %v20745_v19  ;;  %25283 = vst [vmem:[#allocation183_spill] sm:$0xff] %v20748_v33  ;;  %14652 = vmatprep.mubr.msk.f32.mxu1 %vm684_vm2, %v20745_v19  ;;  %v20773_v56 = vcombine.low %v20753_v10, %v20736_v29  ;;  %v25293_v33 = vld [vmem:[#allocation285_spill] sm:$0xff]  ;;  %v20820_v32 = vcombine.high %v25300_v42, %v25300_v42 }
 0x3ca   :  { %v20779_v41 = vrot.slane %v25292_v38, %v17011_v58  ;;  %v20791_v19 = vrot.slane %v2022_v54, %v17011_v58  ;;  %v1134_v31 = vadd.f32 %v25294_v52, %v25293_v33  ;;  %v25295_v38 = vld [vmem:[#allocation200_spill] sm:$0xff]  ;;  %v25298_v54 = vld [vmem:[#allocation26_spill] sm:$0xff]  ;;  %v12837_v52 = vld [vmem:[%s23506_s4 + $0xf0] sm:$0xff] }
 0x3cb   :  { %25289 = vst [vmem:[#allocation224_spill] sm:$0xff] %v20773_v56  ;;  %v12838_v33 = vld [vmem:[%s23506_s4 + $0xf8] sm:$0xff]  ;;  %v5932_v9 = vrot.slane %v20820_v32, 7 }
 0x3cc   :  { %14653 = vmatmul.mubr.msk.f32.gmra.mrb[66].mxu1 %vm684_vm2, %v20773_v56  ;;  %v20799_v20 = vcombine.low %v20788_v62, %v20779_v41  ;;  %v20805_v2 = vcombine.high %v20791_v19, %v20791_v19  ;;  %v5468_v56 = vcombine.low %v25298_v54, %v25297_v0  ;;  %v20822_v61 = vmax.f32 %v1134_v31, 0.0  ;;  %v25303_v31 = vld [vmem:[#allocation34_spill] sm:$0xff] }
 0x3cd   :  { %14655 = vmatprep.mubr.msk.f32.mxu1 %vm684_vm2, %v25295_v38  ;;  %v25299_v38 = vld [vmem:[#allocation329_spill] sm:$0xff]  ;;  %v5929_v0 = vrot.slane %v25300_v42, 7  ;;  %v15624_v54 = vpack.c.bf16 %v12838_v33, %v12837_v52  ;;  %v25305_v37 = vcombine.low %v25303_v31, %v25304_v23  ;;  %v5935_v23 = vrot.slane %v20791_v19, 7  ;;  %v25309_v31 = vld [vmem:[#allocation48_spill] sm:$0xff] }
 0x3ce   :  { %25296 = vst [vmem:[#allocation214_spill] sm:$0xff] %v20799_v20  ;;  %v5926_v16 = vrot.slane %v25299_v38, 7  ;;  %v5938_v7 = vrot.slane %v20805_v2, 7  ;;  %v25306_v52 = vld [vmem:[#allocation325_spill] sm:$0xff]  ;;  %v20845_v53 = vrot.slane %v20822_v61, %v17011_v58 }
 0x3cf   :  { %v12834_v33 = vrot.slane %v25306_v52, 9  ;;  %v5931_v57 = vrot.slane %v5929_v0, 2 }
 0x3d0   :  { %14656 = vmatmul.mubr.msk.f32.gmra.mrb[68].mxu1 %vm684_vm2, %v20799_v20  ;;  %v12839_v20 = vld [vmem:[%s23506_s4 + $0x100] sm:$0xff]  ;;  %v5928_v14 = vrot.slane %v5926_v16, 2  ;;  %v5940_v21 = vrot.slane %v5938_v7, 2  ;;  %v5941_v28 = vrot.slane %v20845_v53, 7 }
 0x3d1   :  { %14672 = vmatprep.mubr.msk.f32.mxu1 %vm684_vm2, %v5468_v56  ;;  %v15628_v56 = vpack.c.bf16 %v12840_v47, %v12839_v20  ;;  %v5927_v3 = vsel %vm17044_vm9, %v12834_v33, %v5926_v16  ;;  %v5934_v20 = vrot.slane %v5932_v9, 2  ;;  %v25315_v16 = vld [vmem:[#allocation77_spill] sm:$0xff] }
 0x3d2   :  { %v5930_v47 = vsel %vm17044_vm9, %v5928_v14, %v5929_v0  ;;  %v5942_v51 = vsel %vm17044_vm9, %v5940_v21, %v5941_v28  ;;  %v12878_v14 = vld [vmem:[%s23506_s4 + $0x118] sm:$0xff]  ;;  %v12879_v0 = vld [vmem:[%s23506_s4 + $0x120] sm:$0xff] }
 0x3d3   :  { %v6009_v6 = vcombine.low %v5927_v3, %v5930_v47  ;;  %v5933_v3 = vsel %vm17044_vm9, %v5931_v57, %v5932_v9  ;;  %v5936_v28 = vsel %vm17044_vm9, %v5934_v20, %v5935_v23  ;;  %v20890_v57 = vpack.c.bf16 %v12879_v0, %v12878_v14  ;;  %v25320_v20 = vld [vmem:[#allocation86_spill] sm:$0xff] }
 0x3d4   :  { %14673 = vmatmul.mubr.msk.f32.vlgmr.msra.gmra.mrb[34].mxu1 %vm684_vm2, %v25305_v37  ;;  %v25308_v37 = vld [vmem:[#allocation52_spill] sm:$0xff]  ;;  %v6018_v21 = vcombine.low %v5933_v3, %v5936_v28  ;;  %v5535_v3 = vcombine.low %v25300_v42, %v20820_v32  ;;  %v25323_v28 = vld [vmem:[#allocation95_spill] sm:$0xff]  ;;  %v25380_v0 = vld [vmem:[#allocation42_spill] sm:$0xff] }
 0x3d5   :  { %15623 = vmatpush3.bf16.msra.mxu1 %v25307_v13  ;;  %14675 = vmatprep.mubr.msk.f32.mxu1 %vm684_vm2, %v5470_v27  ;;  %v5471_v39 = vcombine.low %v25309_v31, %v25308_v37  ;;  %v5937_v27 = vrot.slane %v5935_v23, 2  ;;  %v25312_v37 = vld [vmem:[#allocation76_spill] sm:$0xff]  ;;  %v25319_v23 = vld [vmem:[#allocation93_spill] sm:$0xff] }
 0x3d6   :  { %15625 = vmatprep.subr.bf16.mxu1 %v15624_v54  ;;  %v25313_v31 = vld [vmem:[#allocation68_spill] sm:$0xff] }
 0x3d7   :  { %v5473_v48 = vcombine.low %v25313_v31, %v25312_v37  ;;  %v5939_v37 = vsel %vm17044_vm9, %v5937_v27, %v5938_v7  ;;  %v25317_v31 = vld [vmem:[#allocation85_spill] sm:$0xff]  ;;  %v5526_v27 = vcombine.low %v25306_v52, %v25299_v38  ;;  %v25327_v52 = vcombine.low %v25299_v38, %v25300_v42  ;;  %v25331_v38 = vld [vmem:[#allocation130_spill] sm:$0xff] }
 0x3d8   :  { %14676 = vmatmul.mubr.msk.f32.gmra.mrb[36].mxu1 %vm684_vm2, %v5471_v39  ;;  %v25314_v39 = vld [vmem:[#allocation82_spill] sm:$0xff]  ;;  %v6019_v9 = vcombine.low %v5939_v37, %v5942_v51  ;;  %v25330_v42 = vld [vmem:[#allocation133_spill] sm:$0xff] }
 0x3d9   :  { %14678 = vmatprep.mubr.msk.f32.mxu1 %vm684_vm2, %v5472_v18  ;;  %15627 = vmatpush3.bf16.msra.mxu1 %v15624_v54  ;;  %v5474_v33 = vcombine.low %v25315_v16, %v25314_v39  ;;  %v12841_v18 = vld [vmem:[%s23506_s4 + $0x110] sm:$0xff]  ;;  %v25316_v54 = vld [vmem:[#allocation78_spill] sm:$0xff] }
 0x3da   :  { %15629 = vmatprep.subr.bf16.mxu1 %v15628_v56  ;;  %v25318_v39 = vld [vmem:[#allocation83_spill] sm:$0xff]  ;;  %v20901_v7 = vrot.slane %v6019_v9, %v17011_v58  ;;  %v25321_v51 = vld [vmem:[#allocation98_spill] sm:$0xff]  ;;  %v6463_v9 = vcombine.low %v20820_v32, %v20791_v19 }
 0x3db   :  { %v5475_v16 = vcombine.low %v25318_v39, %v25317_v31  ;;  %v25324_v37 = vld [vmem:[#allocation114_spill] sm:$0xff]  ;;  %v25325_v31 = vld [vmem:[#allocation99_spill] sm:$0xff] }
 0x3dc   :  { %14679 = vmatmul.mubr.msk.f32.gmra.mrb[38].mxu1 %vm684_vm2, %v5473_v48  ;;  %v5476_v48 = vcombine.low %v25320_v20, %v25319_v23  ;;  %v5478_v39 = vcombine.low %v25325_v31, %v25324_v37  ;;  %v25328_v23 = vld [vmem:[#allocation129_spill] sm:$0xff]  ;;  %v25329_v20 = vld [vmem:[#allocation115_spill] sm:$0xff] }
 0x3dd   :  { %14681 = vmatprep.mubr.msk.f32.mxu1 %vm684_vm2, %v5474_v33  ;;  %15631 = vmatpush3.bf16.msra.mxu1 %v15628_v56  ;;  %v20898_v56 = vrot.slane %v6018_v21, %v17011_v58  ;;  %v25322_v33 = vld [vmem:[#allocation92_spill] sm:$0xff]  ;;  %v25333_v31 = vld [vmem:[#allocation131_spill] sm:$0xff]  ;;  %v25348_v21 = vld [vmem:[#allocation237_spill] sm:$0xff] }
 0x3de   :  { %14738 = vmatprep.subr.mxu1 %v12841_v18  ;;  %v5477_v14 = vcombine.low %v25322_v33, %v25321_v51  ;;  %v20931_v51 = vrot.slane %v5526_v27, %v17011_v58  ;;  %v20936_v33 = vrot.slane %v6463_v9, %v17011_v58  ;;  %v25332_v27 = vld [vmem:[#allocation134_spill] sm:$0xff] }
 0x3e0   :  { %14682 = vmatmul.mubr.msk.f32.gmra.mrb[40].mxu1 %vm684_vm2, %v5475_v16  ;;  %v20923_v16 = vrot.slane %v25327_v52, %v17011_v58  ;;  %v25334_v52 = vld [vmem:[#allocation156_spill] sm:$0xff] }
 0x3e1   :  { %14684 = vmatprep.mubr.msk.f32.mxu1 %vm684_vm2, %v5476_v48  ;;  %14739 = vmatpush3.msra.mxu1 %v12841_v18  ;;  %v20917_v18 = vrot.slane %v5535_v3, %v17011_v58  ;;  %v5479_v48 = vcombine.low %v25329_v20, %v25328_v23  ;;  %v25335_v23 = vld [vmem:[#allocation135_spill] sm:$0xff]  ;;  %v20951_v20 = vrot.slane %v6009_v6, %v17011_v58  ;;  %v25347_v3 = vld [vmem:[#allocation246_spill] sm:$0xff] }
 0x3e2   :  { %15633 = vmatprep.subr.bf16.mxu1 %v20890_v57  ;;  %v5482_v9 = vcombine.low %v25335_v23, %v25334_v52  ;;  %v5509_v6 = vcombine.low %v20627_v59, %v20687_v63  ;;  %v25341_v52 = vld [vmem:[#allocation215_spill] sm:$0xff]  ;;  %v25342_v23 = vld [vmem:[#allocation204_spill] sm:$0xff] }
 0x3e3   :  { %25326 = vst [vmem:[#allocation217_spill] sm:$0xff] %v20917_v18 }
 0x3e4   :  { %14685 = vmatmul.mubr.msk.f32.gmra.mrb[42].mxu1 %vm684_vm2, %v5477_v14  ;;  %v5480_v14 = vcombine.low %v25331_v38, %v25330_v42  ;;  %v25336_v42 = vld [vmem:[#allocation162_spill] sm:$0xff]  ;;  %v25337_v38 = vld [vmem:[#allocation152_spill] sm:$0xff] }
 0x3e5   :  { %14687 = vmatprep.mubr.msk.f32.mxu1 %vm684_vm2, %v5478_v39  ;;  %v5481_v39 = vcombine.low %v25333_v31, %v25332_v27  ;;  %v5483_v37 = vcombine.low %v25337_v38, %v25336_v42  ;;  %v25339_v27 = vld [vmem:[#allocation207_spill] sm:$0xff]  ;;  %v25343_v42 = vld [vmem:[#allocation216_spill] sm:$0xff] }
 0x3e6   :  { %v25340_v31 = vld [vmem:[#allocation195_spill] sm:$0xff]  ;;  %v25344_v38 = vld [vmem:[#allocation212_spill] sm:$0xff] }
 0x3e8   :  { %14688 = vmatmul.mubr.msk.f32.gmra.mrb[44].mxu1 %vm684_vm2, %v5479_v48 }
 0x3e9   :  { %14690 = vmatprep.mubr.msk.f32.mxu1 %vm684_vm2, %v5480_v14  ;;  %v25338_v14 = vld [vmem:[#allocation163_spill] sm:$0xff] }
 0x3ea   :  { %v5492_v32 = vcombine.low %v25338_v14, %v20624_v8  ;;  %v5512_v14 = vcombine.low %v25344_v38, %v25343_v42  ;;  %v25354_v38 = vld [vmem:[#allocation259_spill] sm:$0xff] }
 0x3ec   :  { %14691 = vmatmul.mubr.msk.f32.gmra.mrb[46].mxu1 %vm684_vm2, %v5481_v39  ;;  %v5510_v39 = vcombine.low %v25340_v31, %v25339_v27  ;;  %v5514_v27 = vcombine.low %v25348_v21, %v25347_v3  ;;  %v25350_v31 = vld [vmem:[#allocation247_spill] sm:$0xff] }
 0x3ed   :  { %14693 = vmatprep.mubr.msk.f32.mxu1 %vm684_vm2, %v5482_v9  ;;  %v5511_v9 = vcombine.low %v25342_v23, %v25341_v52  ;;  %v25351_v52 = vld [vmem:[#allocation260_spill] sm:$0xff]  ;;  %v25357_v3 = vld [vmem:[#allocation287_spill] sm:$0xff] }
 0x3ee   :  { %v25352_v23 = vld [vmem:[#allocation252_spill] sm:$0xff] }
 0x3ef   :  { %v5516_v42 = vcombine.low %v25352_v23, %v25351_v52  ;;  %v25362_v23 = vld [vmem:[#allocation290_spill] sm:$0xff] }
 0x3f0   :  { %14694 = vmatmul.mubr.msk.f32.gmra.mrb[48].mxu1 %vm684_vm2, %v5483_v37  ;;  %v25346_v37 = vld [vmem:[#allocation213_spill] sm:$0xff] }
 0x3f1   :  { %14696 = vmatprep.mubr.msk.f32.mxu1 %vm684_vm2, %v5492_v32  ;;  %v25345_v32 = vld [vmem:[#allocation236_spill] sm:$0xff] }
 0x3f2   :  { %v5513_v48 = vcombine.low %v25346_v37, %v25345_v32  ;;  %v25355_v32 = vld [vmem:[#allocation279_spill] sm:$0xff]  ;;  %v25356_v37 = vld [vmem:[#allocation269_spill] sm:$0xff] }
 0x3f3   :  { %v5518_v21 = vcombine.low %v25356_v37, %v25355_v32  ;;  %v25365_v37 = vld [vmem:[#allocation319_spill] sm:$0xff] }
 0x3f4   :  { %14697 = vmatmul.mubr.msk.f32.gmra.mrb[50].mxu1 %vm684_vm2, %v5509_v6  ;;  %v25349_v6 = vld [vmem:[#allocation255_spill] sm:$0xff] }
 0x3f5   :  { %14699 = vmatprep.mubr.msk.f32.mxu1 %vm684_vm2, %v5510_v39  ;;  %v5515_v39 = vcombine.low %v25350_v31, %v25349_v6  ;;  %v25359_v6 = vld [vmem:[#allocation293_spill] sm:$0xff]  ;;  %v25360_v31 = vld [vmem:[#allocation283_spill] sm:$0xff] }
 0x3f6   :  { %v5520_v52 = vcombine.low %v25360_v31, %v25359_v6  ;;  %v25367_v6 = vld [vmem:[#allocation321_spill] sm:$0xff]  ;;  %v25368_v31 = vld [vmem:[#allocation320_spill] sm:$0xff] }
 0x3f8   :  { %14700 = vmatmul.mubr.msk.f32.gmra.mrb[52].mxu1 %vm684_vm2, %v5511_v9  ;;  %v25353_v9 = vld [vmem:[#allocation268_spill] sm:$0xff] }
 0x3f9   :  { %14702 = vmatprep.mubr.msk.f32.mxu1 %vm684_vm2, %v5512_v14  ;;  %v5517_v14 = vcombine.low %v25354_v38, %v25353_v9  ;;  %v2039_v9 = vcombine.high %v20822_v61, %v20822_v61  ;;  %v25363_v38 = vld [vmem:[#allocation312_spill] sm:$0xff] }
 0x3fa   :  { %v25369_v61 = vld [vmem:[#allocation332_spill] sm:$0xff] }
 0x3fc   :  { %14703 = vmatmul.mubr.msk.f32.gmra.mrb[54].mxu1 %vm684_vm2, %v5513_v48  ;;  %v25358_v48 = vld [vmem:[#allocation280_spill] sm:$0xff] }
 0x3fd   :  { %14705 = vmatprep.mubr.msk.f32.mxu1 %vm684_vm2, %v5514_v27  ;;  %v5519_v27 = vcombine.low %v25358_v48, %v25357_v3  ;;  %v5536_v48 = vcombine.low %v20791_v19, %v20805_v2  ;;  %v25371_v19 = vld [vmem:[#allocation120_spill] sm:$0xff] }
 0x400   :  { %14706 = vmatmul.mubr.msk.f32.gmra.mrb[56].mxu1 %vm684_vm2, %v5515_v39  ;;  %v25361_v39 = vld [vmem:[#allocation302_spill] sm:$0xff] }
 0x401   :  { %14708 = vmatprep.mubr.msk.f32.mxu1 %vm684_vm2, %v5516_v42  ;;  %v5521_v42 = vcombine.low %v25362_v23, %v25361_v39  ;;  %v25370_v39 = vld [vmem:[#allocation318_spill] sm:$0xff] }
 0x402   :  { %v5525_v23 = vcombine.low %v25370_v39, %v25369_v61  ;;  %v12881_v61 = vld [vmem:[%s23506_s4 + $0x130] sm:$0xff] }
 0x404   :  { %14709 = vmatmul.mubr.msk.f32.gmra.mrb[58].mxu1 %vm684_vm2, %v5517_v14  ;;  %v25364_v14 = vld [vmem:[#allocation300_spill] sm:$0xff] }
 0x405   :  { %14711 = vmatprep.mubr.msk.f32.mxu1 %vm684_vm2, %v5518_v21  ;;  %v5522_v32 = vcombine.low %v25364_v14, %v25363_v38  ;;  %v25366_v21 = vld [vmem:[#allocation313_spill] sm:$0xff]  ;;  %v5534_v14 = vcombine.low %v25371_v19, %v20931_v51  ;;  %v25374_v19 = vld [vmem:[#allocation142_spill] sm:$0xff] }
 0x406   :  { %v5523_v3 = vcombine.low %v25366_v21, %v25365_v37 }
 0x408   :  { %14712 = vmatmul.mubr.msk.f32.gmra.mrb[60].mxu1 %vm684_vm2, %v5519_v27  ;;  %v21012_v27 = vrot.slane %v2039_v9, %v17011_v58  ;;  %v21029_v9 = vcombine.high %v20845_v53, %v20845_v53 }
 0x409   :  { %14714 = vmatprep.mubr.msk.f32.mxu1 %vm684_vm2, %v5520_v52  ;;  %v5524_v52 = vcombine.low %v25368_v31, %v25367_v6  ;;  %v25373_v6 = vld [vmem:[#allocation125_spill] sm:$0xff] }
 0x40a   :  { %v7209_v38 = vrot.slane %v21012_v27, 7  ;;  %v12965_v21 = vrot.slane %v21029_v9, 9 }
 0x40c   :  { %14715 = vmatmul.mubr.msk.f32.gmra.mrb[62].mxu1 %vm684_vm2, %v5521_v42  ;;  %v21021_v42 = vrot.slane %v5536_v48, %v17011_v58  ;;  %v25372_v48 = vld [vmem:[#allocation127_spill] sm:$0xff]  ;;  %v7210_v13 = vsel %vm17044_vm9, %v12965_v21, %v7209_v38 }
 0x40d   :  { %14717 = vmatprep.mubr.msk.f32.mxu1 %vm684_vm2, %v5522_v32  ;;  %v21033_v32 = vcombine.high %v21012_v27, %v21012_v27  ;;  %v5951_v31 = vcombine.low %v25373_v6, %v25372_v48  ;;  %v12882_v48 = vld [vmem:[%s23506_s4 + $0x138] sm:$0xff]  ;;  %v12883_v6 = vld [vmem:[%s23506_s4 + $0x140] sm:$0xff] }
 0x40e   :  { %v5551_v37 = vcombine.low %v20917_v18, %v21021_v42 }
 0x40f   :  { %v24126_v39 = vrot.slane %v21033_v32, 7 }
 0x410   :  { %14718 = vmatmul.mubr.msk.f32.gmra.mrb[64].mxu1 %vm684_vm2, %v5523_v3  ;;  %v7211_v3 = vrot.slane %v7209_v38, 2  ;;  %v15640_v38 = vpack.c.bf16 %v12883_v6, %v12882_v48  ;;  %v25386_v48 = vld [vmem:[#allocation154_spill] sm:$0xff] }
 0x411   :  { %14720 = vmatprep.mubr.msk.f32.mxu1 %vm684_vm2, %v5524_v52  ;;  %v12880_v52 = vld [vmem:[%s23506_s4 + $0x128] sm:$0xff] }
 0x414   :  { %14721 = vmatmul.mubr.msk.f32.gmra.mrb[66].mxu1 %vm684_vm2, %v5525_v23  ;;  %v15636_v23 = vpack.c.bf16 %v12881_v61, %v12880_v52  ;;  %v25377_v52 = vld [vmem:[#allocation27_spill] sm:$0xff] }
 0x415   :  { %14723 = vmatprep.mubr.msk.f32.mxu1 %vm684_vm2, %v5534_v14  ;;  %v25375_v14 = vld [vmem:[#allocation24_spill] sm:$0xff] }
 0x416   :  { %v5953_v47 = vcombine.low %v25375_v14, %v25374_v19  ;;  %v25379_v14 = vld [vmem:[#allocation44_spill] sm:$0xff] }
 0x417   :  { %v5954_v18 = vcombine.low %v25380_v0, %v25379_v14  ;;  %v25385_v0 = vld [vmem:[#allocation171_spill] sm:$0xff]  ;;  %v25390_v14 = vld [vmem:[#allocation172_spill] sm:$0xff] }
 0x418   :  { %14724 = vmatmul.mubr.msk.f32.gmra.mrb[68].mxu1 %vm684_vm2, %v5551_v37  ;;  %v7213_v37 = vsel %vm17044_vm9, %v7211_v3, %v24126_v39  ;;  %v25382_v3 = vld [vmem:[#allocation145_spill] sm:$0xff]  ;;  %v5957_v6 = vcombine.low %v25386_v48, %v25385_v0  ;;  %v25394_v0 = vld [vmem:[#allocation187_spill] sm:$0xff] }
 0x419   :  { %14740 = vmatprep.mubr.msk.f32.mxu1 %vm684_vm2, %v5951_v31  ;;  %v25376_v31 = vld [vmem:[#allocation122_spill] sm:$0xff]  ;;  %v7262_v19 = vcombine.low %v7210_v13, %v7213_v37  ;;  %v5955_v39 = vcombine.low %v25382_v3, %v25381_v15  ;;  %v12921_v15 = vld [vmem:[%s23506_s4 + $0x150] sm:$0xff] }
 0x41a   :  { %v25378_v61 = vcombine.low %v25376_v31, %v25377_v52  ;;  %v12884_v31 = vld [vmem:[%s23506_s4 + $0x148] sm:$0xff] }
 0x41b   :  { %v21073_v21 = vrot.slane %v7262_v19, %v17011_v58  ;;  %v25389_v19 = vld [vmem:[#allocation177_spill] sm:$0xff] }
 0x41c   :  { %14741 = vmatmul.mubr.msk.f32.vlgmr.msra.gmra.mrb[34].mxu1 %vm684_vm2, %v25378_v61  ;;  %v5959_v3 = vcombine.low %v25390_v14, %v25389_v19  ;;  %v25400_v19 = vld [vmem:[#allocation201_spill] sm:$0xff] }
 0x41d   :  { %15635 = vmatpush3.bf16.msra.mxu1 %v20890_v57  ;;  %14743 = vmatprep.mubr.msk.f32.mxu1 %vm684_vm2, %v5953_v47  ;;  %v7270_v13 = vcombine.low %v20901_v7, %v21073_v21  ;;  %v25383_v47 = vld [vmem:[#allocation158_spill] sm:$0xff]  ;;  %v25384_v57 = vld [vmem:[#allocation59_spill] sm:$0xff]  ;;  %v25600_v21 = vld [vmem:[#allocation56_spill] sm:$0xff] }
 0x41e   :  { %15637 = vmatprep.subr.bf16.mxu1 %v15636_v23  ;;  %v5956_v37 = vcombine.low %v25384_v57, %v25383_v47  ;;  %v25391_v47 = vld [vmem:[#allocation179_spill] sm:$0xff]  ;;  %v25392_v57 = vld [vmem:[#allocation84_spill] sm:$0xff] }
 0x420   :  { %14744 = vmatmul.mubr.msk.f32.gmra.mrb[36].mxu1 %vm684_vm2, %v5954_v18  ;;  %v12922_v18 = vld [vmem:[%s23506_s4 + $0x158] sm:$0xff] }
 0x421   :  { %14746 = vmatprep.mubr.msk.f32.mxu1 %vm684_vm2, %v5955_v39  ;;  %15639 = vmatpush3.bf16.msra.mxu1 %v15636_v23  ;;  %v25387_v39 = vld [vmem:[#allocation64_spill] sm:$0xff]  ;;  %v25388_v23 = vld [vmem:[#allocation170_spill] sm:$0xff]  ;;  %v21098_v61 = vpack.c.bf16 %v12922_v18, %v12921_v15  ;;  %v25396_v15 = vld [vmem:[#allocation191_spill] sm:$0xff] }
 0x422   :  { %15641 = vmatprep.subr.bf16.mxu1 %v15640_v38  ;;  %v5958_v52 = vcombine.low %v25388_v23, %v25387_v39  ;;  %v25397_v39 = vld [vmem:[#allocation208_spill] sm:$0xff] }
 0x423   :  { %v25398_v23 = vld [vmem:[#allocation192_spill] sm:$0xff] }
 0x424   :  { %14747 = vmatmul.mubr.msk.f32.gmra.mrb[38].mxu1 %vm684_vm2, %v5956_v37  ;;  %v5960_v37 = vcombine.low %v25392_v57, %v25391_v47  ;;  %v25402_v47 = vld [vmem:[#allocation211_spill] sm:$0xff] }
 0x425   :  { %14749 = vmatprep.mubr.msk.f32.mxu1 %vm684_vm2, %v5957_v6  ;;  %15643 = vmatpush3.bf16.msra.mxu1 %v15640_v38  ;;  %v25393_v38 = vld [vmem:[#allocation188_spill] sm:$0xff]  ;;  %v25395_v6 = vld [vmem:[#allocation105_spill] sm:$0xff] }
 0x426   :  { %14806 = vmatprep.subr.mxu1 %v12884_v31  ;;  %v5961_v48 = vcombine.low %v25394_v0, %v25393_v38  ;;  %v5962_v18 = vcombine.low %v25396_v15, %v25395_v6  ;;  %v25404_v38 = vld [vmem:[#allocation227_spill] sm:$0xff]  ;;  %v25406_v15 = vld [vmem:[#allocation186_spill] sm:$0xff] }
 0x428   :  { %14750 = vmatmul.mubr.msk.f32.gmra.mrb[40].mxu1 %vm684_vm2, %v5958_v52  ;;  %v5963_v52 = vcombine.low %v25398_v23, %v25397_v39  ;;  %v25408_v23 = vcombine.low %v20579_v5, %v20582_v22 }
 0x429   :  { %14752 = vmatprep.mubr.msk.f32.mxu1 %vm684_vm2, %v5959_v3  ;;  %14807 = vmatpush3.msra.mxu1 %v12884_v31  ;;  %v25399_v31 = vld [vmem:[#allocation210_spill] sm:$0xff]  ;;  %v25401_v3 = vld [vmem:[#allocation139_spill] sm:$0xff] }
 0x42a   :  { %15645 = vmatprep.subr.bf16.mxu1 %v21098_v61  ;;  %v5964_v14 = vcombine.low %v25400_v19, %v25399_v31  ;;  %v5965_v57 = vcombine.low %v25402_v47, %v25401_v3  ;;  %v25410_v31 = vld [vmem:[#allocation243_spill] sm:$0xff]  ;;  %v25412_v3 = vld [vmem:[#allocation253_spill] sm:$0xff] }
 0x42c   :  { %14753 = vmatmul.mubr.msk.f32.gmra.mrb[42].mxu1 %vm684_vm2, %v5960_v37  ;;  %v25403_v37 = vld [vmem:[#allocation168_spill] sm:$0xff] }
 0x42d   :  { %14755 = vmatprep.mubr.msk.f32.mxu1 %vm684_vm2, %v5961_v48  ;;  %v5966_v0 = vcombine.low %v25404_v38, %v25403_v37  ;;  %v25405_v48 = vld [vmem:[#allocation230_spill] sm:$0xff]  ;;  %v25414_v37 = vld [vmem:[#allocation248_spill] sm:$0xff] }
 0x42e   :  { %v5975_v6 = vcombine.low %v25405_v48, %v20652_v43  ;;  %v25416_v48 = vld [vmem:[#allocation264_spill] sm:$0xff] }
 0x430   :  { %14756 = vmatmul.mubr.msk.f32.gmra.mrb[44].mxu1 %vm684_vm2, %v5962_v18  ;;  %v25407_v18 = vld [vmem:[#allocation242_spill] sm:$0xff] }
 0x431   :  { %14758 = vmatprep.mubr.msk.f32.mxu1 %vm684_vm2, %v5963_v52  ;;  %v5993_v39 = vcombine.low %v25407_v18, %v25406_v15  ;;  %v25409_v52 = vld [vmem:[#allocation190_spill] sm:$0xff]  ;;  %v25417_v15 = vld [vmem:[#allocation277_spill] sm:$0xff] }
 0x432   :  { %v5994_v19 = vcombine.low %v25410_v31, %v25409_v52  ;;  %v25418_v18 = vld [vmem:[#allocation209_spill] sm:$0xff] }
 0x433   :  { %v25420_v52 = vld [vmem:[#allocation281_spill] sm:$0xff] }
 0x434   :  { %14759 = vmatmul.mubr.msk.f32.gmra.mrb[46].mxu1 %vm684_vm2, %v5964_v14  ;;  %v25411_v14 = vld [vmem:[#allocation262_spill] sm:$0xff] }
 0x435   :  { %14761 = vmatprep.mubr.msk.f32.mxu1 %vm684_vm2, %v5965_v57  ;;  %v5995_v47 = vcombine.low %v25412_v3, %v25411_v14  ;;  %v25413_v57 = vld [vmem:[#allocation265_spill] sm:$0xff]  ;;  %v25422_v14 = vld [vmem:[#allocation294_spill] sm:$0xff] }
 0x436   :  { %v5996_v38 = vcombine.low %v25414_v37, %v25413_v57  ;;  %v25424_v57 = vld [vmem:[#allocation299_spill] sm:$0xff] }
 0x438   :  { %14762 = vmatmul.mubr.msk.f32.gmra.mrb[48].mxu1 %vm684_vm2, %v5966_v0  ;;  %v25415_v0 = vld [vmem:[#allocation206_spill] sm:$0xff] }
 0x439   :  { %14764 = vmatprep.mubr.msk.f32.mxu1 %vm684_vm2, %v5975_v6  ;;  %v5997_v6 = vcombine.low %v25416_v48, %v25415_v0  ;;  %v25426_v0 = vld [vmem:[#allocation307_spill] sm:$0xff] }
 0x43c   :  { %14765 = vmatmul.mubr.msk.f32.gmra.mrb[50].mxu1 %vm684_vm2, %v25408_v23  ;;  %v25419_v23 = vld [vmem:[#allocation239_spill] sm:$0xff] }
 0x43d   :  { %14767 = vmatprep.mubr.msk.f32.mxu1 %vm684_vm2, %v5993_v39  ;;  %v5998_v39 = vcombine.low %v25418_v18, %v25417_v15  ;;  %v5999_v31 = vcombine.low %v25420_v52, %v25419_v23  ;;  %v25428_v15 = vld [vmem:[#allocation257_spill] sm:$0xff]  ;;  %v25430_v23 = vld [vmem:[#allocation270_spill] sm:$0xff] }
 0x440   :  { %14768 = vmatmul.mubr.msk.f32.gmra.mrb[52].mxu1 %vm684_vm2, %v5994_v19  ;;  %v25421_v19 = vld [vmem:[#allocation234_spill] sm:$0xff] }
 0x441   :  { %14770 = vmatprep.mubr.msk.f32.mxu1 %vm684_vm2, %v5995_v47  ;;  %v6000_v3 = vcombine.low %v25422_v14, %v25421_v19  ;;  %v25423_v47 = vld [vmem:[#allocation297_spill] sm:$0xff]  ;;  %v25432_v19 = vld [vmem:[#allocation331_spill] sm:$0xff] }
 0x442   :  { %v6001_v37 = vcombine.low %v25424_v57, %v25423_v47  ;;  %v25434_v47 = vld [vmem:[#allocation266_spill] sm:$0xff] }
 0x444   :  { %14771 = vmatmul.mubr.msk.f32.gmra.mrb[54].mxu1 %vm684_vm2, %v5996_v38  ;;  %v25425_v38 = vld [vmem:[#allocation314_spill] sm:$0xff] }
 0x445   :  { %14773 = vmatprep.mubr.msk.f32.mxu1 %vm684_vm2, %v5997_v6  ;;  %v6002_v48 = vcombine.low %v25426_v0, %v25425_v38  ;;  %v25427_v6 = vld [vmem:[#allocation328_spill] sm:$0xff]  ;;  %v25436_v38 = vld [vmem:[#allocation333_spill] sm:$0xff] }
 0x446   :  { %v6003_v18 = vcombine.low %v25428_v15, %v25427_v6  ;;  %v25438_v6 = vld [vmem:[#allocation14_spill] sm:$0xff] }
 0x448   :  { %14774 = vmatmul.mubr.msk.f32.gmra.mrb[56].mxu1 %vm684_vm2, %v5998_v39  ;;  %v25429_v39 = vld [vmem:[#allocation330_spill] sm:$0xff] }
 0x449   :  { %14776 = vmatprep.mubr.msk.f32.mxu1 %vm684_vm2, %v5999_v31  ;;  %v6004_v52 = vcombine.low %v25430_v23, %v25429_v39  ;;  %v25431_v31 = vld [vmem:[#allocation113_spill] sm:$0xff]  ;;  %v25440_v23 = vld [vmem:[#allocation20_spill] sm:$0xff] }
 0x44a   :  { %v6005_v14 = vcombine.low %v25432_v19, %v25431_v31  ;;  %v12923_v19 = vld [vmem:[%s23506_s4 + $0x160] sm:$0xff] }
 0x44c   :  { %14777 = vmatmul.mubr.msk.f32.gmra.mrb[58].mxu1 %vm684_vm2, %v6000_v3  ;;  %v25433_v3 = vld [vmem:[#allocation18_spill] sm:$0xff] }
 0x44d   :  { %14779 = vmatprep.mubr.msk.f32.mxu1 %vm684_vm2, %v6001_v37  ;;  %v6006_v57 = vcombine.low %v25434_v47, %v25433_v3  ;;  %v25435_v37 = vld [vmem:[#allocation334_spill] sm:$0xff]  ;;  %v25442_v3 = vcombine.low %v20898_v56, %v20901_v7  ;;  %v25599_v7 = vld [vmem:[#allocation144_spill] sm:$0xff] }
 0x44e   :  { %v6007_v0 = vcombine.low %v25436_v38, %v25435_v37  ;;  %v12926_v37 = vld [vmem:[%s23506_s4 + $0x178] sm:$0xff] }
 0x44f   :  { %v25443_v38 = vld [vmem:[#allocation28_spill] sm:$0xff] }
 0x450   :  { %14780 = vmatmul.mubr.msk.f32.gmra.mrb[60].mxu1 %vm684_vm2, %v6002_v48  ;;  %v25437_v48 = vld [vmem:[#allocation29_spill] sm:$0xff] }
 0x451   :  { %14782 = vmatprep.mubr.msk.f32.mxu1 %vm684_vm2, %v6003_v18  ;;  %v6008_v15 = vcombine.low %v25438_v6, %v25437_v48  ;;  %v25439_v18 = vld [vmem:[#allocation335_spill] sm:$0xff]  ;;  %v25446_v6 = vcombine.low %v20050_v36, %v20067_v4  ;;  %v12927_v36 = vld [vmem:[%s23506_s4 + $0x180] sm:$0xff]  ;;  %v12966_v4 = vld [vmem:[%s23506_s4 + $0x188] sm:$0xff] }
 0x452   :  { %v6017_v39 = vcombine.low %v25439_v18, %v20951_v20  ;;  %v25447_v18 = vcombine.low %v20059_v26, %v20103_v60  ;;  %v12967_v26 = vld [vmem:[%s23506_s4 + $0x190] sm:$0xff]  ;;  %v25449_v60 = vcombine.low %v20095_v44, %v20020_v50  ;;  %v25456_v44 = vld [vmem:[#allocation101_spill] sm:$0xff] }
 0x453   :  { %v25454_v50 = vld [vmem:[#allocation107_spill] sm:$0xff] }
 0x454   :  { %14783 = vmatmul.mubr.msk.f32.gmra.mrb[62].mxu1 %vm684_vm2, %v6004_v52  ;;  %v25441_v52 = vld [vmem:[#allocation25_spill] sm:$0xff] }
 0x455   :  { %14785 = vmatprep.mubr.msk.f32.mxu1 %vm684_vm2, %v6005_v14  ;;  %v6396_v31 = vcombine.low %v25441_v52, %v25440_v23  ;;  %v12924_v14 = vld [vmem:[%s23506_s4 + $0x168] sm:$0xff]  ;;  %v25452_v23 = vld [vmem:[#allocation33_spill] sm:$0xff] }
 0x456   :  { %v15648_v47 = vpack.c.bf16 %v12924_v14, %v12923_v19  ;;  %v25453_v52 = vcombine.low %v25228_v11, %v25452_v23  ;;  %v25461_v11 = vcombine.low %v25236_v24, %v25235_v1  ;;  %v25462_v19 = vld [vmem:[#allocation72_spill] sm:$0xff]  ;;  %v25463_v14 = vld [vmem:[#allocation91_spill] sm:$0xff]  ;;  %v25471_v1 = vld [vmem:[#allocation197_spill] sm:$0xff] }
 0x457   :  { %v25472_v24 = vld [vmem:[#allocation205_spill] sm:$0xff] }
 0x458   :  { %14786 = vmatmul.mubr.msk.f32.gmra.mrb[64].mxu1 %vm684_vm2, %v6006_v57  ;;  %v12925_v57 = vld [vmem:[%s23506_s4 + $0x170] sm:$0xff] }
 0x459   :  { %14788 = vmatprep.mubr.msk.f32.mxu1 %vm684_vm2, %v6007_v0  ;;  %v25444_v0 = vld [vmem:[#allocation30_spill] sm:$0xff] }
 0x45a   :  { %v25445_v48 = vcombine.low %v25443_v38, %v25444_v0  ;;  %v25469_v38 = vld [vmem:[#allocation75_spill] sm:$0xff] }
 0x45c   :  { %14789 = vmatmul.mubr.msk.f32.gmra.mrb[66].mxu1 %vm684_vm2, %v6008_v15  ;;  %v15652_v15 = vpack.c.bf16 %v12926_v37, %v12925_v57  ;;  %v25467_v57 = vld [vmem:[#allocation67_spill] sm:$0xff]  ;;  %v25468_v37 = vld [vmem:[#allocation180_spill] sm:$0xff] }
 0x45d   :  { %14791 = vmatprep.mubr.msk.f32.mxu1 %vm684_vm2, %v6017_v39  ;;  %v25448_v39 = vcombine.low %v20076_v49, %v20118_v35  ;;  %v25450_v49 = vcombine.low %v20026_v40, %v20152_v30  ;;  %v15656_v35 = vpack.c.bf16 %v12967_v26, %v12966_v4  ;;  %v25455_v40 = vcombine.low %v25230_v46, %v25454_v50  ;;  %v25457_v30 = vld [vmem:[#allocation39_spill] sm:$0xff]  ;;  %v25487_v50 = vld [vmem:[#allocation218_spill] sm:$0xff] }
 0x45e   :  { %v25464_v46 = vcombine.low %v25462_v19, %v25463_v14  ;;  %v25470_v0 = vcombine.low %v25468_v37, %v25469_v38  ;;  %v25480_v4 = vld [vmem:[#allocation123_spill] sm:$0xff]  ;;  %v25495_v19 = vld [vmem:[#allocation117_spill] sm:$0xff]  ;;  %v25502_v37 = vld [vmem:[#allocation194_spill] sm:$0xff] }
 0x45f   :  { %v25481_v26 = vld [vmem:[#allocation51_spill] sm:$0xff]  ;;  %v25496_v14 = vld [vmem:[#allocation185_spill] sm:$0xff] }
 0x460   :  { %14792 = vmatmul.mubr.msk.f32.gmra.mrb[68].mxu1 %vm684_vm2, %v25442_v3  ;;  %v25465_v3 = vld [vmem:[#allocation203_spill] sm:$0xff] }
 0x461   :  { %14808 = vmatprep.mubr.msk.f32.mxu1 %vm684_vm2, %v6396_v31  ;;  %v25458_v31 = vcombine.low %v25456_v44, %v25457_v30  ;;  %v25489_v44 = vld [vmem:[#allocation112_spill] sm:$0xff]  ;;  %v25490_v30 = vld [vmem:[#allocation149_spill] sm:$0xff] }
 0x464   :  { %14809 = vmatmul.mubr.msk.f32.vlgmr.msra.gmra.mrb[34].mxu1 %vm684_vm2, %v25445_v48  ;;  %v25473_v48 = vcombine.low %v25471_v1, %v25472_v24 }
 0x465   :  { %15647 = vmatpush3.bf16.msra.mxu1 %v21098_v61  ;;  %14811 = vmatprep.mubr.msk.f32.mxu1 %vm684_vm2, %v25446_v6  ;;  %v25451_v61 = vcombine.low %v20140_v55, %v20186_v34  ;;  %v25459_v55 = vld [vmem:[#allocation45_spill] sm:$0xff] }
 0x466   :  { %15649 = vmatprep.subr.bf16.mxu1 %v15648_v47  ;;  %v25460_v34 = vcombine.low %v25234_v17, %v25459_v55  ;;  %v6420_v17 = vcombine.low %v25467_v57, %v20739_v45  ;;  %v25474_v6 = vld [vmem:[#allocation81_spill] sm:$0xff] }
 0x467   :  { %v25492_v55 = vld [vmem:[#allocation181_spill] sm:$0xff] }
 0x468   :  { %14812 = vmatmul.mubr.msk.f32.gmra.mrb[36].mxu1 %vm684_vm2, %v25447_v18  ;;  %v25477_v18 = vld [vmem:[#allocation87_spill] sm:$0xff] }
 0x469   :  { %14814 = vmatprep.mubr.msk.f32.mxu1 %vm684_vm2, %v25448_v39  ;;  %15651 = vmatpush3.bf16.msra.mxu1 %v15648_v47  ;;  %v25466_v47 = vcombine.low %v25243_v12, %v25465_v3  ;;  %v25478_v39 = vld [vmem:[#allocation109_spill] sm:$0xff]  ;;  %v25498_v3 = vld [vmem:[#allocation126_spill] sm:$0xff] }
 0x46a   :  { %15653 = vmatprep.subr.bf16.mxu1 %v15652_v15 }
 0x46c   :  { %14815 = vmatmul.mubr.msk.f32.gmra.mrb[38].mxu1 %vm684_vm2, %v25449_v60  ;;  %v25482_v60 = vcombine.low %v25480_v4, %v25481_v26  ;;  %v6464_v26 = vcombine.low %v20805_v2, %v20845_v53  ;;  %v25516_v2 = vcombine.low %v20779_v41, %v20923_v16  ;;  %v12970_v41 = vld [vmem:[%s23506_s4 + $0x1a8] sm:$0xff] }
 0x46d   :  { %14817 = vmatprep.mubr.msk.f32.mxu1 %vm684_vm2, %v25450_v49  ;;  %15655 = vmatpush3.bf16.msra.mxu1 %v15652_v15  ;;  %v25475_v15 = vld [vmem:[#allocation116_spill] sm:$0xff] }
 0x46e   :  { %14874 = vmatprep.subr.mxu1 %v12927_v36  ;;  %v25476_v12 = vcombine.low %v25474_v6, %v25475_v15  ;;  %v25483_v49 = vld [vmem:[#allocation60_spill] sm:$0xff] }
 0x46f   :  { %v25507_v15 = vld [vmem:[#allocation164_spill] sm:$0xff] }
 0x470   :  { %14818 = vmatmul.mubr.msk.f32.gmra.mrb[40].mxu1 %vm684_vm2, %v25451_v61  ;;  %v25484_v61 = vld [vmem:[#allocation146_spill] sm:$0xff] }
 0x471   :  { %14820 = vmatprep.mubr.msk.f32.mxu1 %vm684_vm2, %v25453_v52  ;;  %14875 = vmatpush3.msra.mxu1 %v12927_v36  ;;  %v25479_v36 = vcombine.low %v25477_v18, %v25478_v39  ;;  %v25485_v23 = vcombine.low %v25483_v49, %v25484_v61  ;;  %v25486_v52 = vld [vmem:[#allocation124_spill] sm:$0xff]  ;;  %v25510_v39 = vld [vmem:[#allocation175_spill] sm:$0xff]  ;;  %v25514_v49 = vcombine.low %v20736_v29, %v25316_v54 }
 0x472   :  { %15657 = vmatprep.subr.bf16.mxu1 %v15656_v35  ;;  %v21343_v61 = vrot.slane %v6464_v26, %v17011_v58  ;;  %v12968_v29 = vld [vmem:[%s23506_s4 + $0x198] sm:$0xff]  ;;  %v12971_v54 = vld [vmem:[%s23506_s4 + $0x1b0] sm:$0xff] }
 0x474   :  { %14821 = vmatmul.mubr.msk.f32.gmra.mrb[42].mxu1 %vm684_vm2, %v25455_v40  ;;  %v25488_v40 = vcombine.low %v25486_v52, %v25487_v50  ;;  %v25519_v52 = vld [vmem:[#allocation58_spill] sm:$0xff]  ;;  %v15664_v50 = vpack.c.bf16 %v12971_v54, %v12970_v41 }
 0x475   :  { %14823 = vmatprep.mubr.msk.f32.mxu1 %vm684_vm2, %v25458_v31  ;;  %v25491_v31 = vcombine.low %v25489_v44, %v25490_v30  ;;  %v25521_v44 = vld [vmem:[#allocation80_spill] sm:$0xff]  ;;  %v25545_v41 = vld [vmem:[#allocation274_spill] sm:$0xff] }
 0x476   :  { %v12972_v30 = vld [vmem:[%s23506_s4 + $0x1b8] sm:$0xff] }
 0x478   :  { %14824 = vmatmul.mubr.msk.f32.gmra.mrb[44].mxu1 %vm684_vm2, %v25460_v34  ;;  %v25493_v34 = vld [vmem:[#allocation128_spill] sm:$0xff] }
 0x479   :  { %14826 = vmatprep.mubr.msk.f32.mxu1 %vm684_vm2, %v25461_v11  ;;  %v25494_v11 = vcombine.low %v25492_v55, %v25493_v34  ;;  %v25522_v55 = vld [vmem:[#allocation89_spill] sm:$0xff]  ;;  %v25523_v34 = vld [vmem:[#allocation90_spill] sm:$0xff] }
 0x47c   :  { %14827 = vmatmul.mubr.msk.f32.gmra.mrb[46].mxu1 %vm684_vm2, %v25464_v46  ;;  %v25497_v46 = vcombine.low %v25495_v19, %v25496_v14 }
 0x47d   :  { %14829 = vmatprep.mubr.msk.f32.mxu1 %vm684_vm2, %v25466_v47  ;;  %v25499_v47 = vld [vmem:[#allocation43_spill] sm:$0xff] }
 0x47e   :  { %v25500_v57 = vcombine.low %v25498_v3, %v25499_v47  ;;  %v25526_v3 = vld [vmem:[#allocation104_spill] sm:$0xff] }
 0x480   :  { %14830 = vmatmul.mubr.msk.f32.gmra.mrb[48].mxu1 %vm684_vm2, %v25470_v0  ;;  %v25504_v0 = vld [vmem:[#allocation193_spill] sm:$0xff] }
 0x481   :  { %14832 = vmatprep.mubr.msk.f32.mxu1 %vm684_vm2, %v6420_v17  ;;  %v25501_v17 = vld [vmem:[#allocation69_spill] sm:$0xff] }
 0x482   :  { %v25503_v38 = vcombine.low %v25501_v17, %v25502_v37  ;;  %v25528_v17 = vld [vmem:[#allocation132_spill] sm:$0xff] }
 0x484   :  { %14833 = vmatmul.mubr.msk.f32.gmra.mrb[50].mxu1 %vm684_vm2, %v25473_v48  ;;  %v25505_v48 = vld [vmem:[#allocation143_spill] sm:$0xff] }
 0x485   :  { %14835 = vmatprep.mubr.msk.f32.mxu1 %vm684_vm2, %v25476_v12  ;;  %v25506_v6 = vcombine.low %v25504_v0, %v25505_v48  ;;  %v25508_v12 = vld [vmem:[#allocation196_spill] sm:$0xff]  ;;  %v25530_v0 = vld [vmem:[#allocation141_spill] sm:$0xff]  ;;  %v25531_v48 = vld [vmem:[#allocation166_spill] sm:$0xff] }
 0x486   :  { %v25509_v18 = vcombine.low %v25507_v15, %v25508_v12  ;;  %v25532_v15 = vld [vmem:[#allocation159_spill] sm:$0xff]  ;;  %v25533_v12 = vld [vmem:[#allocation97_spill] sm:$0xff] }
 0x488   :  { %14836 = vmatmul.mubr.msk.f32.gmra.mrb[52].mxu1 %vm684_vm2, %v25479_v36  ;;  %v25511_v36 = vld [vmem:[#allocation202_spill] sm:$0xff] }
 0x489   :  { %14838 = vmatprep.mubr.msk.f32.mxu1 %vm684_vm2, %v25482_v60  ;;  %v25512_v4 = vcombine.low %v25510_v39, %v25511_v36  ;;  %v25513_v60 = vcombine.low %v20681_v25, %v20753_v10  ;;  %v6479_v25 = vcombine.low %v20936_v33, %v21343_v61  ;;  %v12969_v10 = vld [vmem:[%s23506_s4 + $0x1a0] sm:$0xff] }
 0x48a   :  { %v15660_v53 = vpack.c.bf16 %v12969_v10, %v12968_v29  ;;  %v25534_v39 = vld [vmem:[#allocation165_spill] sm:$0xff]  ;;  %v25540_v29 = vld [vmem:[#allocation240_spill] sm:$0xff] }
 0x48b   :  { %v25543_v10 = vld [vmem:[#allocation292_spill] sm:$0xff] }
 0x48c   :  { %14839 = vmatmul.mubr.msk.f32.gmra.mrb[54].mxu1 %vm684_vm2, %v25485_v23  ;;  %v25515_v23 = vcombine.low %v25323_v28, %v20788_v62  ;;  %v25517_v62 = vld [vmem:[#allocation40_spill] sm:$0xff]  ;;  %v25518_v28 = vld [vmem:[#allocation49_spill] sm:$0xff] }
 0x48d   :  { %14841 = vmatprep.mubr.msk.f32.mxu1 %vm684_vm2, %v25488_v40  ;;  %v25520_v40 = vld [vmem:[#allocation73_spill] sm:$0xff] }
 0x490   :  { %14842 = vmatmul.mubr.msk.f32.gmra.mrb[56].mxu1 %vm684_vm2, %v25491_v31  ;;  %v13010_v31 = vld [vmem:[%s23506_s4 + $0x1c8] sm:$0xff] }
 0x491   :  { %14844 = vmatprep.mubr.msk.f32.mxu1 %vm684_vm2, %v25494_v11  ;;  %v25524_v11 = vld [vmem:[#allocation161_spill] sm:$0xff] }
 0x492   :  { %v1631_v19 = vcombine.high %v25524_v11, %v25524_v11  ;;  %v25551_v11 = vld [vmem:[#allocation323_spill] sm:$0xff] }
 0x494   :  { %14845 = vmatmul.mubr.msk.f32.gmra.mrb[58].mxu1 %vm684_vm2, %v25497_v46  ;;  %v25525_v46 = vld [vmem:[#allocation96_spill] sm:$0xff]  ;;  %v21398_v47 = vrot.slane %v1631_v19, %v17011_v58 }
 0x495   :  { %14847 = vmatprep.mubr.msk.f32.mxu1 %vm684_vm2, %v25500_v57  ;;  %v25527_v57 = vld [vmem:[#allocation119_spill] sm:$0xff] }
 0x496   :  { %v21406_v37 = vcombine.high %v21398_v47, %v21398_v47 }
 0x498   :  { %14848 = vmatmul.mubr.msk.f32.gmra.mrb[60].mxu1 %vm684_vm2, %v25503_v38  ;;  %v25529_v38 = vld [vmem:[#allocation140_spill] sm:$0xff] }
 0x499   :  { %14850 = vmatprep.mubr.msk.f32.mxu1 %vm684_vm2, %v25506_v6  ;;  %v6852_v6 = vcombine.low %v21406_v37, %v25531_v48 }
 0x49b   :  { %v6866_v36 = vrot.slane %v6852_v6, %v17011_v58  ;;  %v25554_v6 = vld [vmem:[#allocation217_spill] sm:$0xff] }
 0x49c   :  { %14851 = vmatmul.mubr.msk.f32.gmra.mrb[62].mxu1 %vm684_vm2, %v25509_v18  ;;  %v6851_v18 = vcombine.low %v25533_v12, %v21398_v47 }
 0x49d   :  { %14853 = vmatprep.mubr.msk.f32.mxu1 %vm684_vm2, %v25512_v4  ;;  %v25535_v4 = vcombine.low %v20624_v8, %v20627_v59  ;;  %v25541_v59 = vld [vmem:[#allocation251_spill] sm:$0xff]  ;;  %v25542_v8 = vld [vmem:[#allocation258_spill] sm:$0xff] }
 0x49e   :  { %v6859_v26 = vrot.slane %v6851_v18, %v17011_v58 }
 0x4a0   :  { %14854 = vmatmul.mubr.msk.f32.gmra.mrb[64].mxu1 %vm684_vm2, %v25513_v60  ;;  %v25536_v60 = vld [vmem:[#allocation178_spill] sm:$0xff] }
 0x4a1   :  { %14856 = vmatprep.mubr.msk.f32.mxu1 %vm684_vm2, %v25514_v49  ;;  %v25537_v49 = vcombine.low %v20687_v63, %v25536_v60  ;;  %v16331_v63 = vld [vmem:[#allocation4 + $0x1] ss:$0 sm:$0xff]  ;;  %v25557_v60 = vld [vmem:[#allocation148_spill] sm:$0xff] }
 0x4a4   :  { %14857 = vmatmul.mubr.msk.f32.gmra.mrb[66].mxu1 %vm684_vm2, %v25515_v23  ;;  %v6867_v23 = vcombine.low %v6859_v26, %v6866_v36  ;;  %v13012_v36 = vld [vmem:[%s23506_s4 + $0x1d8] sm:$0xff]  ;;  %v13014_v26 = vld [vmem:[%s23506_s4 + $0x1e8] sm:$0xff] }
 0x4a5   :  { %14859 = vmatprep.mubr.msk.f32.mxu1 %vm684_vm2, %v25516_v2  ;;  %v25538_v2 = vld [vmem:[#allocation219_spill] sm:$0xff] }
 0x4a8   :  { %14860 = vmatmul.mubr.msk.f32.gmra.mrb[68].mxu1 %vm684_vm2, %v6479_v25  ;;  %v25539_v25 = vld [vmem:[#allocation220_spill] sm:$0xff] }
 0x4a9   :  { %14876 = vmatprep.mubr.msk.f32.mxu1 %vm684_vm2, %v25517_v62  ;;  %v1139_v62 = vadd.f32 %v16331_v63, %v25543_v10  ;;  %v7199_v63 = vrot.slane %v21406_v37, 7  ;;  %v25563_v10 = vld [vmem:[#allocation184_spill] sm:$0xff] }
 0x4ab   :  { %v1190_v54 = vmax.f32 %v1139_v62, 0.0  ;;  %v7936_v62 = vld [vmem:[%s23507_s5] sm:$0xff] }
 0x4ac   :  { %14877 = vmatmul.mubr.msk.f32.vlgmr.msra.gmra.mrb[34].mxu1 %vm684_vm2, %v25518_v28  ;;  %v25546_v28 = vld [vmem:[#allocation282_spill] sm:$0xff] }
 0x4ad   :  { %15659 = vmatpush3.bf16.msra.mxu1 %v15656_v35  ;;  %14879 = vmatprep.mubr.msk.f32.mxu1 %vm684_vm2, %v25519_v52  ;;  %v13009_v35 = vld [vmem:[%s23506_s4 + $0x1c0] sm:$0xff] }
 0x4ae   :  { %15661 = vmatprep.subr.bf16.mxu1 %v15660_v53  ;;  %v15668_v14 = vpack.c.bf16 %v13010_v31, %v13009_v35  ;;  %v25547_v52 = vld [vmem:[#allocation289_spill] sm:$0xff]  ;;  %v6869_v35 = vcombine.low %v21029_v9, %v21012_v27 }
 0x4b0   :  { %14880 = vmatmul.mubr.msk.f32.gmra.mrb[36].mxu1 %vm684_vm2, %v25520_v40  ;;  %v21451_v40 = vrot.slane %v1190_v54, %v17011_v58  ;;  %v6876_v9 = vrot.slane %v6869_v35, %v17011_v58  ;;  %v7941_v35 = vld [vmem:[%s23507_s5 + $0x28] sm:$0xff] }
 0x4b1   :  { %14882 = vmatprep.mubr.msk.f32.mxu1 %vm684_vm2, %v25521_v44  ;;  %15663 = vmatpush3.bf16.msra.mxu1 %v15660_v53  ;;  %v25544_v53 = vld [vmem:[#allocation261_spill] sm:$0xff]  ;;  %v25548_v44 = vld [vmem:[#allocation296_spill] sm:$0xff] }
 0x4b2   :  { %15665 = vmatprep.subr.bf16.mxu1 %v15664_v50  ;;  %v6878_v19 = vcombine.low %v21033_v32, %v21451_v40 }
 0x4b4   :  { %14883 = vmatmul.mubr.msk.f32.gmra.mrb[38].mxu1 %vm684_vm2, %v25522_v55  ;;  %v21464_v55 = vcombine.high %v21451_v40, %v21451_v40 }
 0x4b5   :  { %14885 = vmatprep.mubr.msk.f32.mxu1 %vm684_vm2, %v25523_v34  ;;  %15667 = vmatpush3.bf16.msra.mxu1 %v15664_v50  ;;  %v2056_v50 = vcombine.high %v1190_v54, %v1190_v54  ;;  %v25550_v34 = vld [vmem:[#allocation316_spill] sm:$0xff]  ;;  %v7196_v54 = vrot.slane %v21398_v47, 7 }
 0x4b6   :  { %14942 = vmatprep.subr.mxu1 %v12972_v30 }
 0x4b7   :  { %v21460_v31 = vrot.slane %v2056_v50, %v17011_v58  ;;  %v7939_v50 = vld [vmem:[%s23507_s5 + $0x18] sm:$0xff] }
 0x4b8   :  { %14886 = vmatmul.mubr.msk.f32.gmra.mrb[40].mxu1 %vm684_vm2, %v25525_v46 }
 0x4b9   :  { %14888 = vmatprep.mubr.msk.f32.mxu1 %vm684_vm2, %v25526_v3  ;;  %14943 = vmatpush3.msra.mxu1 %v12972_v30  ;;  %v25549_v30 = vld [vmem:[#allocation305_spill] sm:$0xff]  ;;  %v6879_v46 = vcombine.low %v21464_v55, %v21460_v31  ;;  %v25552_v3 = vld [vmem:[#allocation324_spill] sm:$0xff] }
 0x4ba   :  { %15669 = vmatprep.subr.bf16.mxu1 %v15668_v14 }
 0x4bc   :  { %14889 = vmatmul.mubr.msk.f32.gmra.mrb[42].mxu1 %vm684_vm2, %v25527_v57  ;;  %v25553_v57 = vld [vmem:[#allocation121_spill] sm:$0xff] }
 0x4bd   :  { %14891 = vmatprep.mubr.msk.f32.mxu1 %vm684_vm2, %v25528_v17  ;;  %v6886_v17 = vrot.slane %v6878_v19, %v17011_v58 }
 0x4c0   :  { %14892 = vmatmul.mubr.msk.f32.gmra.mrb[44].mxu1 %vm684_vm2, %v25529_v38  ;;  %v6893_v38 = vrot.slane %v6879_v46, %v17011_v58  ;;  %v7201_v46 = vrot.slane %v7199_v63, 2 }
 0x4c1   :  { %14894 = vmatprep.mubr.msk.f32.mxu1 %vm684_vm2, %v25530_v0  ;;  %v6877_v0 = vcombine.low %v21021_v42, %v6876_v9  ;;  %v25566_v9 = vld [vmem:[#allocation111_spill] sm:$0xff] }
 0x4c2   :  { %v6894_v18 = vcombine.low %v6886_v17, %v6893_v38  ;;  %v25568_v17 = vrot.slane %v25533_v12, 7  ;;  %v25571_v12 = vld [vmem:[#allocation137_spill] sm:$0xff] }
 0x4c4   :  { %14895 = vmatmul.mubr.msk.f32.gmra.mrb[46].mxu1 %vm684_vm2, %v25532_v15  ;;  %v25555_v15 = vcombine.low %v20931_v51, %v25554_v6  ;;  %v13013_v51 = vld [vmem:[%s23506_s4 + $0x1e0] sm:$0xff]  ;;  %v7195_v38 = vrot.slane %v25568_v17, 2  ;;  %v7942_v6 = vld [vmem:[%s23507_s5 + $0x30] sm:$0xff] }
 0x4c5   :  { %14897 = vmatprep.mubr.msk.f32.mxu1 %vm684_vm2, %v25534_v39  ;;  %v13011_v39 = vld [vmem:[%s23506_s4 + $0x1d0] sm:$0xff] }
 0x4c6   :  { %v15672_v42 = vpack.c.bf16 %v13012_v36, %v13011_v39 }
 0x4c8   :  { %14898 = vmatmul.mubr.msk.f32.gmra.mrb[48].mxu1 %vm684_vm2, %v25535_v4  ;;  %v25556_v4 = vld [vmem:[#allocation31_spill] sm:$0xff] }
 0x4c9   :  { %14900 = vmatprep.mubr.msk.f32.mxu1 %vm684_vm2, %v25537_v49  ;;  %v25558_v49 = vld [vmem:[#allocation157_spill] sm:$0xff] }
 0x4cc   :  { %14901 = vmatmul.mubr.msk.f32.gmra.mrb[50].mxu1 %vm684_vm2, %v6867_v23  ;;  %v15676_v23 = vpack.c.bf16 %v13014_v26, %v13013_v51 }
 0x4cd   :  { %14903 = vmatprep.mubr.msk.f32.mxu1 %vm684_vm2, %v25538_v2  ;;  %v25559_v2 = vld [vmem:[#allocation167_spill] sm:$0xff] }
 0x4d0   :  { %14904 = vmatmul.mubr.msk.f32.gmra.mrb[52].mxu1 %vm684_vm2, %v25539_v25  ;;  %v25560_v25 = vld [vmem:[#allocation155_spill] sm:$0xff] }
 0x4d1   :  { %14906 = vmatprep.mubr.msk.f32.mxu1 %vm684_vm2, %v25540_v29  ;;  %v13015_v29 = vld [vmem:[%s23506_s4 + $0x1f0] sm:$0xff] }
 0x4d4   :  { %14907 = vmatmul.mubr.msk.f32.gmra.mrb[54].mxu1 %vm684_vm2, %v25541_v59  ;;  %v25561_v59 = vld [vmem:[#allocation173_spill] sm:$0xff] }
 0x4d5   :  { %14909 = vmatprep.mubr.msk.f32.mxu1 %vm684_vm2, %v25542_v8  ;;  %v7202_v8 = vrot.slane %v25531_v48, 7 }
 0x4d7   :  { %v7203_v39 = vsel %vm17044_vm9, %v7201_v46, %v7202_v8  ;;  %v7221_v46 = vrot.slane %v21460_v31, 7 }
 0x4d8   :  { %14910 = vmatmul.mubr.msk.f32.gmra.mrb[56].mxu1 %vm684_vm2, %v25544_v53  ;;  %v7937_v53 = vld [vmem:[%s23507_s5 + $0x8] sm:$0xff] }
 0x4d9   :  { %14912 = vmatprep.mubr.msk.f32.mxu1 %vm684_vm2, %v25545_v41  ;;  %v7938_v41 = vld [vmem:[%s23507_s5 + $0x10] sm:$0xff]  ;;  %v7223_v17 = vrot.slane %v7221_v46, 2 }
 0x4dc   :  { %14913 = vmatmul.mubr.msk.f32.gmra.mrb[58].mxu1 %vm684_vm2, %v25546_v28  ;;  %v25564_v28 = vld [vmem:[#allocation189_spill] sm:$0xff] }
 0x4dd   :  { %14915 = vmatprep.mubr.msk.f32.mxu1 %vm684_vm2, %v25547_v52  ;;  %v15680_v52 = vpack.c.bf16 %v7937_v53, %v7936_v62  ;;  %v25575_v53 = vld [vmem:[#allocation183_spill] sm:$0xff] }
 0x4df   :  { %15681 = vmatprep.subr.bf16.mxu0 %v15680_v52 }
 0x4e0   :  { %14916 = vmatmul.mubr.msk.f32.gmra.mrb[60].mxu1 %vm684_vm2, %v25548_v44  ;;  %v15684_v44 = vpack.c.bf16 %v7939_v50, %v7938_v41  ;;  %15683 = vmatpush3.bf16.msra.mxu0 %v15680_v52  ;;  %v25576_v41 = vcombine.low %v20582_v22, %v25575_v53  ;;  %v25577_v52 = vld [vmem:[#allocation275_spill] sm:$0xff]  ;;  %v25580_v22 = vld [vmem:[#allocation276_spill] sm:$0xff] }
 0x4e1   :  { %14918 = vmatprep.mubr.msk.f32.mxu1 %vm684_vm2, %v25549_v30  ;;  %v7940_v30 = vld [vmem:[%s23507_s5 + $0x20] sm:$0xff]  ;;  %v25581_v50 = vld [vmem:[#allocation295_spill] sm:$0xff] }
 0x4e2   :  { %15685 = vmatprep.subr.bf16.mxu0 %v15684_v44  ;;  %v25603_v53 = vld [vmem:[#allocation71_spill] sm:$0xff] }
 0x4e4   :  { %14919 = vmatmul.mubr.msk.f32.gmra.mrb[62].mxu1 %vm684_vm2, %v25550_v34  ;;  %v7204_v34 = vrot.slane %v7202_v8, 2  ;;  %15687 = vmatpush3.bf16.msra.mxu0 %v15684_v44  ;;  %v7946_v8 = vld [vmem:[%s23507_s5 + $0x50] sm:$0xff]  ;;  %v25582_v44 = vld [vmem:[#allocation233_spill] sm:$0xff] }
 0x4e5   :  { %14921 = vmatprep.mubr.msk.f32.mxu1 %vm684_vm2, %v25551_v11  ;;  %v25565_v11 = vld [vmem:[#allocation169_spill] sm:$0xff] }
 0x4e6   :  { %v7205_v19 = vrot.slane %v25565_v11, 7 }
 0x4e8   :  { %14922 = vmatmul.mubr.msk.f32.gmra.mrb[64].mxu1 %vm684_vm2, %v25552_v3  ;;  %v7198_v3 = vrot.slane %v7196_v54, 2  ;;  %v7206_v36 = vsel %vm17044_vm9, %v7204_v34, %v7205_v19  ;;  %v21611_v34 = vcombine.high %v21460_v31, %v21460_v31  ;;  %v7218_v19 = vrot.slane %v21464_v55, 7 }
 0x4e9   :  { %14924 = vmatprep.mubr.msk.f32.mxu1 %vm684_vm2, %v25553_v57  ;;  %v25567_v57 = vld [vmem:[#allocation198_spill] sm:$0xff] }
 0x4ea   :  { %v7200_v51 = vsel %vm17044_vm9, %v7198_v3, %v7199_v63  ;;  %v7947_v63 = vld [vmem:[%s23507_s5 + $0x58] sm:$0xff]  ;;  %v25585_v3 = vld [vmem:[#allocation263_spill] sm:$0xff] }
 0x4ec   :  { %14925 = vmatmul.mubr.msk.f32.gmra.mrb[66].mxu1 %vm684_vm2, %v25555_v15  ;;  %v7943_v15 = vld [vmem:[%s23507_s5 + $0x38] sm:$0xff] }
 0x4ed   :  { %14927 = vmatprep.mubr.msk.f32.mxu1 %vm684_vm2, %v6877_v0  ;;  %v15688_v0 = vpack.c.bf16 %v7941_v35, %v7940_v30  ;;  %v15692_v26 = vpack.c.bf16 %v7943_v15, %v7942_v6  ;;  %v25583_v30 = vld [vmem:[#allocation311_spill] sm:$0xff]  ;;  %v7215_v35 = vrot.slane %v21451_v40, 7  ;;  %v7220_v15 = vrot.slane %v7218_v19, 2 }
 0x4ef   :  { %15689 = vmatprep.subr.bf16.mxu0 %v15688_v0 }
 0x4f0   :  { %14928 = vmatmul.mubr.msk.f32.gmra.mrb[68].mxu1 %vm684_vm2, %v6894_v18  ;;  %15691 = vmatpush3.bf16.msra.mxu0 %v15688_v0  ;;  %v25586_v0 = vrot.slane %v21033_v32, 7  ;;  %v25593_v18 = vcombine.low %v20951_v20, %v20898_v56  ;;  %v25597_v56 = vld [vmem:[#allocation17_spill] sm:$0xff]  ;;  %v25598_v20 = vld [vmem:[#allocation23_spill] sm:$0xff] }
 0x4f1   :  { %14944 = vmatprep.mubr.msk.f32.mxu1 %vm684_vm2, %v25556_v4  ;;  %v25570_v4 = vld [vmem:[#allocation223_spill] sm:$0xff]  ;;  %15693 = vmatprep.subr.bf16.mxu0 %v15692_v26 }
 0x4f2   :  { %v7214_v6 = vrot.slane %v25586_v0, 2  ;;  %v25624_v0 = vld [vmem:[#allocation232_spill] sm:$0xff] }
 0x4f4   :  { %14945 = vmatmul.mubr.msk.f32.vlgmr.msra.gmra.mrb[34].mxu1 %vm684_vm2, %v25557_v60  ;;  %v7245_v60 = vcombine.low %v7203_v39, %v7206_v36  ;;  %15695 = vmatpush3.bf16.msra.mxu0 %v15692_v26  ;;  %v25587_v39 = vld [vmem:[#allocation271_spill] sm:$0xff]  ;;  %v25588_v36 = vld [vmem:[#allocation301_spill] sm:$0xff] }
 0x4f5   :  { %15671 = vmatpush3.bf16.msra.mxu1 %v15668_v14  ;;  %14947 = vmatprep.mubr.msk.f32.mxu1 %vm684_vm2, %v25558_v49  ;;  %v25562_v14 = vld [vmem:[#allocation79_spill] sm:$0xff]  ;;  %v7944_v49 = vld [vmem:[%s23507_s5 + $0x40] sm:$0xff] }
 0x4f6   :  { %15673 = vmatprep.subr.bf16.mxu1 %v15672_v42  ;;  %v25589_v26 = vld [vmem:[#allocation291_spill] sm:$0xff] }
 0x4f8   :  { %14948 = vmatmul.mubr.msk.f32.gmra.mrb[36].mxu1 %vm684_vm2, %v25559_v2  ;;  %v25572_v2 = vld [vmem:[#allocation226_spill] sm:$0xff] }
 0x4f9   :  { %14950 = vmatprep.mubr.msk.f32.mxu1 %vm684_vm2, %v25560_v25  ;;  %15675 = vmatpush3.bf16.msra.mxu1 %v15672_v42  ;;  %v7197_v42 = vsel %vm17044_vm9, %v7195_v38, %v7196_v54  ;;  %v15700_v54 = vpack.c.bf16 %v7947_v63, %v7946_v8  ;;  %v7224_v38 = vrot.slane %v21611_v34, 7  ;;  %v25594_v8 = vld [vmem:[#allocation32_spill] sm:$0xff]  ;;  %v25595_v63 = vld [vmem:[#allocation55_spill] sm:$0xff] }
 0x4fa   :  { %15677 = vmatprep.subr.bf16.mxu1 %v15676_v23  ;;  %v7244_v25 = vcombine.low %v7197_v42, %v7200_v51  ;;  %v7222_v42 = vsel %vm17044_vm9, %v7220_v15, %v7221_v46  ;;  %v25619_v46 = vld [vmem:[#allocation138_spill] sm:$0xff]  ;;  %v7626_v15 = vcombine.low %v21451_v40, %v21464_v55  ;;  %v25628_v40 = vcombine.low %v20923_v16, %v20936_v33  ;;  %v8302_v55 = vld [vmem:[%s23508_s6] sm:$0xff]  ;;  %v8304_v33 = vld [vmem:[%s23508_s6 + $0x10] sm:$0xff] }
 0x4fb   :  { %v7225_v51 = vsel %vm17044_vm9, %v7223_v17, %v7224_v38  ;;  %v25623_v17 = vld [vmem:[#allocation225_spill] sm:$0xff]  ;;  %v7617_v38 = vcombine.low %v21012_v27, %v21033_v32 }
 0x4fc   :  { %14951 = vmatmul.mubr.msk.f32.gmra.mrb[38].mxu1 %vm684_vm2, %v25561_v59  ;;  %v7252_v62 = vrot.slane %v7244_v25, %v17011_v58  ;;  %v25592_v25 = vld [vmem:[#allocation22_spill] sm:$0xff]  ;;  %v7634_v27 = vrot.slane %v7626_v15, %v17011_v58 }
 0x4fd   :  { %14953 = vmatprep.mubr.msk.f32.mxu1 %vm684_vm2, %v25562_v14  ;;  %15679 = vmatpush3.bf16.msra.mxu1 %v15676_v23  ;;  %v7945_v23 = vld [vmem:[%s23507_s5 + $0x48] sm:$0xff]  ;;  %v7259_v14 = vrot.slane %v7245_v60, %v17011_v58  ;;  %v25590_v60 = vld [vmem:[#allocation15_spill] sm:$0xff] }
 0x4fe   :  { %15010 = vmatprep.subr.mxu1 %v13015_v29  ;;  %v15696_v59 = vpack.c.bf16 %v7945_v23, %v7944_v49  ;;  %v7272_v23 = vcombine.low %v7222_v42, %v7225_v51 }
 0x500   :  { %14954 = vmatmul.mubr.msk.f32.gmra.mrb[40].mxu1 %vm684_vm2, %v25563_v10  ;;  %v25574_v10 = vcombine.low %v20652_v43, %v20579_v5  ;;  %15697 = vmatprep.subr.bf16.mxu0 %v15696_v59  ;;  %v25578_v5 = vld [vmem:[#allocation273_spill] sm:$0xff]  ;;  %v25579_v43 = vld [vmem:[#allocation267_spill] sm:$0xff] }
 0x501   :  { %14956 = vmatprep.mubr.msk.f32.mxu1 %vm684_vm2, %v25564_v28  ;;  %15011 = vmatpush3.msra.mxu1 %v13015_v29  ;;  %v25573_v29 = vld [vmem:[#allocation241_spill] sm:$0xff]  ;;  %v7260_v28 = vcombine.low %v7252_v62, %v7259_v14  ;;  %v25602_v62 = vld [vmem:[#allocation110_spill] sm:$0xff] }
 0x502   :  { %15699 = vmatpush3.bf16.msra.mxu0 %v15696_v59  ;;  %v7286_v59 = vrot.slane %v7272_v23, %v17011_v58 }
 0x503   :  { %15701 = vmatprep.subr.bf16.mxu0 %v15700_v54 }
 0x504   :  { %14957 = vmatmul.mubr.msk.f32.gmra.mrb[42].mxu1 %vm684_vm2, %v25566_v9  ;;  %v25584_v9 = vld [vmem:[#allocation310_spill] sm:$0xff] }
 0x505   :  { %14959 = vmatprep.mubr.msk.f32.mxu1 %vm684_vm2, %v25567_v57  ;;  %v7217_v57 = vrot.slane %v7215_v35, 2 }
 0x506   :  { %15703 = vmatpush3.bf16.msra.mxu0 %v15700_v54  ;;  %v25605_v54 = vld [vmem:[#allocation106_spill] sm:$0xff] }
 0x508   :  { %14960 = vmatmul.mubr.msk.f32.gmra.mrb[44].mxu1 %vm684_vm2, %v25570_v4  ;;  %v7216_v4 = vsel %vm17044_vm9, %v7214_v6, %v7215_v35  ;;  %v25611_v35 = vld [vmem:[#allocation94_spill] sm:$0xff]  ;;  %v25625_v6 = vld [vmem:[#allocation224_spill] sm:$0xff] }
 0x509   :  { %14962 = vmatprep.mubr.msk.f32.mxu1 %vm684_vm2, %v25571_v12  ;;  %v7219_v12 = vsel %vm17044_vm9, %v7217_v57, %v7218_v19  ;;  %v25612_v19 = vcombine.low %v25472_v24, %v25611_v35  ;;  %v25618_v24 = vld [vmem:[#allocation249_spill] sm:$0xff]  ;;  %v25622_v57 = vld [vmem:[#allocation182_spill] sm:$0xff] }
 0x50a   :  { %v7271_v49 = vcombine.low %v7216_v4, %v7219_v12  ;;  %v25626_v4 = vld [vmem:[#allocation200_spill] sm:$0xff]  ;;  %v25627_v12 = vld [vmem:[#allocation214_spill] sm:$0xff] }
 0x50c   :  { %14963 = vmatmul.mubr.msk.f32.gmra.mrb[46].mxu1 %vm684_vm2, %v25572_v2  ;;  %v25591_v2 = vld [vmem:[#allocation21_spill] sm:$0xff] }
 0x50d   :  { %14965 = vmatprep.mubr.msk.f32.mxu1 %vm684_vm2, %v25573_v29  ;;  %v7279_v29 = vrot.slane %v7271_v49, %v17011_v58 }
 0x50f   :  { %v7287_v14 = vcombine.low %v7279_v29, %v7286_v59  ;;  %v8306_v29 = vld [vmem:[%s23508_s6 + $0x20] sm:$0xff]  ;;  %v8307_v59 = vld [vmem:[%s23508_s6 + $0x28] sm:$0xff] }
 0x510   :  { %14966 = vmatmul.mubr.msk.f32.gmra.mrb[48].mxu1 %vm684_vm2, %v25574_v10  ;;  %v25596_v10 = vld [vmem:[#allocation61_spill] sm:$0xff] }
 0x511   :  { %14968 = vmatprep.mubr.msk.f32.mxu1 %vm684_vm2, %v25576_v41  ;;  %v25604_v41 = vld [vmem:[#allocation54_spill] sm:$0xff] }
 0x514   :  { %14969 = vmatmul.mubr.msk.f32.gmra.mrb[50].mxu1 %vm684_vm2, %v7260_v28  ;;  %v25606_v28 = vld [vmem:[#allocation66_spill] sm:$0xff] }
 0x515   :  { %14971 = vmatprep.mubr.msk.f32.mxu1 %vm684_vm2, %v25577_v52  ;;  %v25607_v52 = vld [vmem:[#allocation74_spill] sm:$0xff] }
 0x518   :  { %14972 = vmatmul.mubr.msk.f32.gmra.mrb[52].mxu1 %vm684_vm2, %v25578_v5  ;;  %v7599_v5 = vcombine.low %v21398_v47, %v21406_v37  ;;  %v25613_v37 = vld [vmem:[#allocation136_spill] sm:$0xff] }
 0x519   :  { %14974 = vmatprep.mubr.msk.f32.mxu1 %vm684_vm2, %v25579_v43  ;;  %v25608_v43 = vld [vmem:[#allocation102_spill] sm:$0xff] }
 0x51c   :  { %14975 = vmatmul.mubr.msk.f32.gmra.mrb[54].mxu1 %vm684_vm2, %v25580_v22  ;;  %v25609_v22 = vcombine.low %v25531_v48, %v25565_v11  ;;  %v25614_v48 = vld [vmem:[#allocation38_spill] sm:$0xff]  ;;  %v25615_v11 = vld [vmem:[#allocation176_spill] sm:$0xff] }
 0x51d   :  { %14977 = vmatprep.mubr.msk.f32.mxu1 %vm684_vm2, %v25581_v50 }
 0x51e   :  { %v7614_v50 = vrot.slane %v25609_v22, %v17011_v58 }
 0x520   :  { %14978 = vmatmul.mubr.msk.f32.gmra.mrb[56].mxu1 %vm684_vm2, %v25582_v44  ;;  %v25610_v44 = vcombine.low %v20739_v45, %v25471_v1  ;;  %v25616_v45 = vld [vmem:[#allocation118_spill] sm:$0xff]  ;;  %v25617_v1 = vld [vmem:[#allocation147_spill] sm:$0xff] }
 0x521   :  { %14980 = vmatprep.mubr.msk.f32.mxu1 %vm684_vm2, %v25583_v30  ;;  %v7607_v30 = vrot.slane %v7599_v5, %v17011_v58 }
 0x523   :  { %v7615_v47 = vcombine.low %v7607_v30, %v7614_v50  ;;  %v8312_v50 = vld [vmem:[%s23508_s6 + $0x50] sm:$0xff] }
 0x524   :  { %14981 = vmatmul.mubr.msk.f32.gmra.mrb[58].mxu1 %vm684_vm2, %v25584_v9  ;;  %v25620_v9 = vld [vmem:[#allocation63_spill] sm:$0xff] }
 0x525   :  { %14983 = vmatprep.mubr.msk.f32.mxu1 %vm684_vm2, %v25585_v3  ;;  %v25621_v3 = vld [vmem:[#allocation174_spill] sm:$0xff] }
 0x528   :  { %14984 = vmatmul.mubr.msk.f32.gmra.mrb[60].mxu1 %vm684_vm2, %v25587_v39  ;;  %v7627_v39 = vcombine.low %v21460_v31, %v21611_v34  ;;  %v8303_v34 = vld [vmem:[%s23508_s6 + $0x8] sm:$0xff] }
 0x529   :  { %14986 = vmatprep.mubr.msk.f32.mxu1 %vm684_vm2, %v25588_v36  ;;  %v7624_v36 = vrot.slane %v7617_v38, %v17011_v58  ;;  %v15704_v51 = vpack.c.bf16 %v8303_v34, %v8302_v55 }
 0x52a   :  { %v7641_v32 = vrot.slane %v7627_v39, %v17011_v58 }
 0x52b   :  { %v7625_v42 = vcombine.low %v21343_v61, %v7624_v36  ;;  %15705 = vmatprep.subr.bf16.mxu0 %v15704_v51  ;;  %v21751_v61 = vld [vmem:[#allocation4 + $0x2] ss:$0 sm:$0xff] }
 0x52c   :  { %14987 = vmatmul.mubr.msk.f32.gmra.mrb[62].mxu1 %vm684_vm2, %v25589_v26  ;;  %v7642_v31 = vcombine.low %v7634_v27, %v7641_v32  ;;  %v8305_v26 = vld [vmem:[%s23508_s6 + $0x18] sm:$0xff] }
 0x52d   :  { %14989 = vmatprep.mubr.msk.f32.mxu1 %vm684_vm2, %v25590_v60 }
 0x530   :  { %14990 = vmatmul.mubr.msk.f32.gmra.mrb[64].mxu1 %vm684_vm2, %v25591_v2  ;;  %v15708_v2 = vpack.c.bf16 %v8305_v26, %v8304_v33 }
 0x531   :  { %14992 = vmatprep.mubr.msk.f32.mxu1 %vm684_vm2, %v25592_v25 }
 0x534   :  { %14993 = vmatmul.mubr.msk.f32.gmra.mrb[66].mxu1 %vm684_vm2, %v25593_v18 }
 0x535   :  { %14995 = vmatprep.mubr.msk.f32.mxu1 %vm684_vm2, %v7270_v13  ;;  %v25601_v13 = vld [vmem:[#allocation100_spill] sm:$0xff] }
 0x538   :  { %14996 = vmatmul.mubr.msk.f32.gmra.mrb[68].mxu1 %vm684_vm2, %v7287_v14 }
 0x539   :  { %15012 = vmatprep.mubr.msk.f32.mxu1 %vm684_vm2, %v25594_v8 }
 0x53c   :  { %15013 = vmatmul.mubr.msk.f32.vlgmr.msra.gmra.mrb[34].mxu1 %vm684_vm2, %v25595_v63  ;;  %v15712_v63 = vpack.c.bf16 %v8307_v59, %v8306_v29 }
 0x53d   :  { %15015 = vmatprep.mubr.msk.f32.mxu1 %vm684_vm2, %v25596_v10 }
 0x540   :  { %15016 = vmatmul.mubr.msk.f32.gmra.mrb[36].mxu1 %vm684_vm2, %v25597_v56  ;;  %v8308_v56 = vld [vmem:[%s23508_s6 + $0x30] sm:$0xff] }
 0x541   :  { %15018 = vmatprep.mubr.msk.f32.mxu1 %vm684_vm2, %v25598_v20  ;;  %v8309_v20 = vld [vmem:[%s23508_s6 + $0x38] sm:$0xff] }
 0x544   :  { %15019 = vmatmul.mubr.msk.f32.gmra.mrb[38].mxu1 %vm684_vm2, %v25599_v7 }
 0x545   :  { %15021 = vmatprep.mubr.msk.f32.mxu1 %vm684_vm2, %v25600_v21 }
 0x548   :  { %15022 = vmatmul.mubr.msk.f32.gmra.mrb[40].mxu1 %vm684_vm2, %v25601_v13 }
 0x549   :  { %15024 = vmatprep.mubr.msk.f32.mxu1 %vm684_vm2, %v25602_v62  ;;  %v15716_v62 = vpack.c.bf16 %v8309_v20, %v8308_v56 }
 0x54c   :  { %15025 = vmatmul.mubr.msk.f32.gmra.mrb[42].mxu1 %vm684_vm2, %v25603_v53 }
 0x54d   :  { %15027 = vmatprep.mubr.msk.f32.mxu1 %vm684_vm2, %v25604_v41  ;;  %v8310_v41 = vld [vmem:[%s23508_s6 + $0x40] sm:$0xff] }
 0x550   :  { %15028 = vmatmul.mubr.msk.f32.gmra.mrb[44].mxu1 %vm684_vm2, %v25605_v54  ;;  %v8311_v54 = vld [vmem:[%s23508_s6 + $0x48] sm:$0xff] }
 0x551   :  { %15030 = vmatprep.mubr.msk.f32.mxu1 %vm684_vm2, %v25606_v28 }
 0x554   :  { %15031 = vmatmul.mubr.msk.f32.gmra.mrb[46].mxu1 %vm684_vm2, %v25607_v52 }
 0x555   :  { %15033 = vmatprep.mubr.msk.f32.mxu1 %vm684_vm2, %v25608_v43  ;;  %v15720_v43 = vpack.c.bf16 %v8311_v54, %v8310_v41 }
 0x558   :  { %15034 = vmatmul.mubr.msk.f32.gmra.mrb[48].mxu1 %vm684_vm2, %v25610_v44  ;;  %v8313_v44 = vld [vmem:[%s23508_s6 + $0x58] sm:$0xff] }
 0x559   :  { %15036 = vmatprep.mubr.msk.f32.mxu1 %vm684_vm2, %v25612_v19 }
 0x55c   :  { %15037 = vmatmul.mubr.msk.f32.gmra.mrb[50].mxu1 %vm684_vm2, %v7615_v47  ;;  %v15724_v47 = vpack.c.bf16 %v8313_v44, %v8312_v50 }
 0x55d   :  { %15039 = vmatprep.mubr.msk.f32.mxu1 %vm684_vm2, %v25613_v37 }
 0x560   :  { %15040 = vmatmul.mubr.msk.f32.gmra.mrb[52].mxu1 %vm684_vm2, %v25614_v48 }
 0x561   :  { %15042 = vmatprep.mubr.msk.f32.mxu1 %vm684_vm2, %v25615_v11 }
 0x564   :  { %15043 = vmatmul.mubr.msk.f32.gmra.mrb[54].mxu1 %vm684_vm2, %v25616_v45 }
 0x565   :  { %15045 = vmatprep.mubr.msk.f32.mxu1 %vm684_vm2, %v25617_v1 }
 0x568   :  { %15046 = vmatmul.mubr.msk.f32.gmra.mrb[56].mxu1 %vm684_vm2, %v25618_v24 }
 0x569   :  { %15048 = vmatprep.mubr.msk.f32.mxu1 %vm684_vm2, %v25619_v46 }
 0x56c   :  { %15049 = vmatmul.mubr.msk.f32.gmra.mrb[58].mxu1 %vm684_vm2, %v25620_v9 }
 0x56d   :  { %15051 = vmatprep.mubr.msk.f32.mxu1 %vm684_vm2, %v25621_v3 }
 0x570   :  { %15052 = vmatmul.mubr.msk.f32.gmra.mrb[60].mxu1 %vm684_vm2, %v25622_v57 }
 0x571   :  { %15054 = vmatprep.mubr.msk.f32.mxu1 %vm684_vm2, %v25623_v17 }
 0x574   :  { %15055 = vmatmul.mubr.msk.f32.gmra.mrb[62].mxu1 %vm684_vm2, %v25624_v0 }
 0x575   :  { %15057 = vmatprep.mubr.msk.f32.mxu1 %vm684_vm2, %v25625_v6 }
 0x578   :  { %15058 = vmatmul.mubr.msk.f32.gmra.mrb[64].mxu1 %vm684_vm2, %v25626_v4 }
 0x579   :  { %15060 = vmatprep.mubr.msk.f32.mxu1 %vm684_vm2, %v25627_v12 }
 0x57c   :  { %15061 = vmatmul.mubr.msk.f32.gmra.mrb[66].mxu1 %vm684_vm2, %v25628_v40 }
 0x57d   :  { %15063 = vmatprep.mubr.msk.f32.mxu1 %vm684_vm2, %v7625_v42 }
 0x580   :  { %15064 = vmatmul.mubr.msk.f32.gmra.mrb[68].mxu1 %vm684_vm2, %v7642_v31  ;;  %vm12005_vm2 = vcmask 261120  }
 0x60f   :  { %v15014_v16 = vpop.f32.mrb[34].mxu1 }
 0x610   :  { %v7721_v60 = vpop.f32.mrb[35].mxu1  ;;  %v21763_v23 = vadd.f32 %v15014_v16, %v21751_v61 }
 0x611   :  { %v21760_v49 = vadd.f32 %v21751_v61, %v7721_v60 }
 0x613   :  { %v15017_v25 = vpop.f32.mrb[36].mxu1  ;;  %15090 = vmatprep.mubr.msk.f32.mxu0 %vm7948_vm10, %v21760_v49 }
 0x614   :  { %v7731_v18 = vpop.f32.mrb[37].mxu1  ;;  %15091 = vmatmul.mubr.msk.f32.vlgmr.msra.gmra.mrb[162].mxu0 %vm7948_vm10, %v21763_v23  ;;  %v21779_v8 = vadd.f32 %v15017_v25, %v21751_v61 }
 0x615   :  { %v21776_v14 = vadd.f32 %v21751_v61, %v7731_v18  ;;  %15707 = vmatpush3.bf16.msra.mxu0 %v15704_v51 }
 0x616   :  { %15709 = vmatprep.subr.bf16.mxu0 %v15708_v2 }
 0x617   :  { %v15020_v10 = vpop.f32.mrb[38].mxu1  ;;  %15093 = vmatprep.mubr.msk.f32.mxu0 %vm7948_vm10, %v21776_v14 }
 0x618   :  { %v7741_v7 = vpop.f32.mrb[39].mxu1  ;;  %15094 = vmatmul.mubr.msk.f32.gmra.mrb[164].mxu0 %vm7948_vm10, %v21779_v8  ;;  %v21795_v13 = vadd.f32 %v15020_v10, %v21751_v61 }
 0x619   :  { %v21792_v21 = vadd.f32 %v21751_v61, %v7741_v7  ;;  %15711 = vmatpush3.bf16.msra.mxu0 %v15708_v2 }
 0x61a   :  { %15713 = vmatprep.subr.bf16.mxu0 %v15712_v63 }
 0x61b   :  { %v15023_v53 = vpop.f32.mrb[40].mxu1  ;;  %15096 = vmatprep.mubr.msk.f32.mxu0 %vm7948_vm10, %v21792_v21 }
 0x61c   :  { %v7751_v28 = vpop.f32.mrb[41].mxu1  ;;  %15097 = vmatmul.mubr.msk.f32.gmra.mrb[166].mxu0 %vm7948_vm10, %v21795_v13  ;;  %v21811_v5 = vadd.f32 %v15023_v53, %v21751_v61 }
 0x61d   :  { %v21808_v52 = vadd.f32 %v21751_v61, %v7751_v28  ;;  %15715 = vmatpush3.bf16.msra.mxu0 %v15712_v63 }
 0x61e   :  { %15717 = vmatprep.subr.bf16.mxu0 %v15716_v62 }
 0x61f   :  { %v15026_v22 = vpop.f32.mrb[42].mxu1  ;;  %15099 = vmatprep.mubr.msk.f32.mxu0 %vm7948_vm10, %v21808_v52 }
 0x620   :  { %v7761_v30 = vpop.f32.mrb[43].mxu1  ;;  %15100 = vmatmul.mubr.msk.f32.gmra.mrb[168].mxu0 %vm7948_vm10, %v21811_v5  ;;  %v21827_v19 = vadd.f32 %v15026_v22, %v21751_v61 }
 0x621   :  { %v21824_v35 = vadd.f32 %v21751_v61, %v7761_v30  ;;  %15719 = vmatpush3.bf16.msra.mxu0 %v15716_v62 }
 0x622   :  { %15721 = vmatprep.subr.bf16.mxu0 %v15720_v43 }
 0x623   :  { %v15029_v37 = vpop.f32.mrb[44].mxu1  ;;  %15102 = vmatprep.mubr.msk.f32.mxu0 %vm7948_vm10, %v21824_v35 }
 0x624   :  { %v7771_v48 = vpop.f32.mrb[45].mxu1  ;;  %15103 = vmatmul.mubr.msk.f32.gmra.mrb[170].mxu0 %vm7948_vm10, %v21827_v19  ;;  %v21837_v45 = vadd.f32 %v15029_v37, %v21751_v61 }
 0x625   :  { %v21834_v11 = vadd.f32 %v21751_v61, %v7771_v48  ;;  %15723 = vmatpush3.bf16.msra.mxu0 %v15720_v43 }
 0x626   :  { %15725 = vmatprep.subr.bf16.mxu0 %v15724_v47 }
 0x627   :  { %v15032_v1 = vpop.f32.mrb[46].mxu1  ;;  %15105 = vmatprep.mubr.msk.f32.mxu0 %vm7948_vm10, %v21834_v11 }
 0x628   :  { %v7781_v24 = vpop.f32.mrb[47].mxu1  ;;  %15106 = vmatmul.mubr.msk.f32.gmra.mrb[172].mxu0 %vm7948_vm10, %v21837_v45  ;;  %v21847_v9 = vadd.f32 %v15032_v1, %v21751_v61 }
 0x629   :  { %v21844_v46 = vadd.f32 %v21751_v61, %v7781_v24  ;;  %15727 = vmatpush3.bf16.msra.mxu0 %v15724_v47 }
 0x62b   :  { %v15035_v3 = vpop.f32.mrb[48].mxu1  ;;  %15108 = vmatprep.mubr.msk.f32.mxu0 %vm7948_vm10, %v21844_v46 }
 0x62c   :  { %v7791_v57 = vpop.f32.mrb[49].mxu1  ;;  %15109 = vmatmul.mubr.msk.f32.gmra.mrb[174].mxu0 %vm7948_vm10, %v21847_v9  ;;  %v21857_v38 = vadd.f32 %v15035_v3, %v21751_v61 }
 0x62d   :  { %v21854_v17 = vadd.f32 %v21751_v61, %v7791_v57 }
 0x62f   :  { %v15038_v0 = vpop.f32.mrb[50].mxu1  ;;  %15111 = vmatprep.mubr.msk.f32.mxu0 %vm7948_vm10, %v21854_v17 }
 0x630   :  { %v7801_v6 = vpop.f32.mrb[51].mxu1  ;;  %15112 = vmatmul.mubr.msk.f32.gmra.mrb[176].mxu0 %vm7948_vm10, %v21857_v38  ;;  %v21867_v39 = vadd.f32 %v15038_v0, %v21751_v61 }
 0x631   :  { %v21864_v15 = vadd.f32 %v21751_v61, %v7801_v6 }
 0x633   :  { %v15041_v36 = vpop.f32.mrb[52].mxu1  ;;  %15114 = vmatprep.mubr.msk.f32.mxu0 %vm7948_vm10, %v21864_v15 }
 0x634   :  { %v7811_v4 = vpop.f32.mrb[53].mxu1  ;;  %15115 = vmatmul.mubr.msk.f32.gmra.mrb[178].mxu0 %vm7948_vm10, %v21867_v39  ;;  %v21877_v27 = vadd.f32 %v15041_v36, %v21751_v61 }
 0x635   :  { %v21874_v12 = vadd.f32 %v21751_v61, %v7811_v4 }
 0x637   :  { %v15044_v32 = vpop.f32.mrb[54].mxu1  ;;  %15117 = vmatprep.mubr.msk.f32.mxu0 %vm7948_vm10, %v21874_v12 }
 0x638   :  { %v7821_v42 = vpop.f32.mrb[55].mxu1  ;;  %15118 = vmatmul.mubr.msk.f32.gmra.mrb[180].mxu0 %vm7948_vm10, %v21877_v27  ;;  %v21887_v31 = vadd.f32 %v15044_v32, %v21751_v61 }
 0x639   :  { %v21884_v40 = vadd.f32 %v21751_v61, %v7821_v42 }
 0x63b   :  { %v15047_v55 = vpop.f32.mrb[56].mxu1  ;;  %15120 = vmatprep.mubr.msk.f32.mxu0 %vm7948_vm10, %v21884_v40 }
 0x63c   :  { %v7831_v34 = vpop.f32.mrb[57].mxu1  ;;  %15121 = vmatmul.mubr.msk.f32.gmra.mrb[182].mxu0 %vm7948_vm10, %v21887_v31  ;;  %v15970_v16 = vadd.f32 %v15047_v55, %v21751_v61  ;;  %v10117_v55 = vld [vmem:[#allocation7 + $0x20] sm:$0xff] }
 0x63d   :  { %v15971_v51 = vadd.f32 %v21751_v61, %v7831_v34  ;;  %v10118_v34 = vld [vmem:[#allocation7 + $0x28] sm:$0xff] }
 0x63f   :  { %v15050_v33 = vpop.f32.mrb[58].mxu1  ;;  %15123 = vmatprep.mubr.msk.f32.mxu0 %vm7948_vm10, %v15971_v51 }
 0x640   :  { %v7841_v26 = vpop.f32.mrb[59].mxu1  ;;  %15124 = vmatmul.mubr.msk.f32.gmra.mrb[184].mxu0 %vm7948_vm10, %v15970_v16  ;;  %v15972_v2 = vadd.f32 %v15050_v33, %v21751_v61 }
 0x641   :  { %v15973_v60 = vadd.f32 %v21751_v61, %v7841_v26 }
 0x643   :  { %v15053_v25 = vpop.f32.mrb[60].mxu1  ;;  %15126 = vmatprep.mubr.msk.f32.mxu0 %vm7948_vm10, %v15973_v60 }
 0x644   :  { %v7851_v29 = vpop.f32.mrb[61].mxu1  ;;  %15127 = vmatmul.mubr.msk.f32.gmra.mrb[186].mxu0 %vm7948_vm10, %v15972_v2  ;;  %v15974_v18 = vadd.f32 %v15053_v25, %v21751_v61 }
 0x645   :  { %v15975_v59 = vadd.f32 %v21751_v61, %v7851_v29 }
 0x647   :  { %v15056_v63 = vpop.f32.mrb[62].mxu1  ;;  %15129 = vmatprep.mubr.msk.f32.mxu0 %vm7948_vm10, %v15975_v59 }
 0x648   :  { %v7861_v10 = vpop.f32.mrb[63].mxu1  ;;  %15130 = vmatmul.mubr.msk.f32.gmra.mrb[188].mxu0 %vm7948_vm10, %v15974_v18  ;;  %v15976_v20 = vadd.f32 %v15056_v63, %v21751_v61 }
 0x649   :  { %v15977_v56 = vadd.f32 %v21751_v61, %v7861_v10 }
 0x64b   :  { %v15059_v7 = vpop.f32.mrb[64].mxu1  ;;  %15132 = vmatprep.mubr.msk.f32.mxu0 %vm7948_vm10, %v15977_v56 }
 0x64c   :  { %v7871_v62 = vpop.f32.mrb[65].mxu1  ;;  %15133 = vmatmul.mubr.msk.f32.gmra.mrb[190].mxu0 %vm7948_vm10, %v15976_v20  ;;  %v15978_v41 = vadd.f32 %v15059_v7, %v21751_v61 }
 0x64d   :  { %v15979_v53 = vadd.f32 %v21751_v61, %v7871_v62 }
 0x64f   :  { %v15062_v54 = vpop.f32.mrb[66].mxu1  ;;  %15135 = vmatprep.mubr.msk.f32.mxu0 %vm7948_vm10, %v15979_v53 }
 0x650   :  { %v7881_v28 = vpop.f32.mrb[67].mxu1  ;;  %15136 = vmatmul.mubr.msk.f32.gmra.mrb[192].mxu0 %vm7948_vm10, %v15978_v41  ;;  %v15980_v22 = vadd.f32 %v15062_v54, %v21751_v61 }
 0x651   :  { %v15981_v43 = vadd.f32 %v21751_v61, %v7881_v28 }
 0x653   :  { %v15065_v50 = vpop.f32.mrb[68].mxu1  ;;  %15138 = vmatprep.mubr.msk.f32.mxu0 %vm7948_vm10, %v15981_v43 }
 0x654   :  { %v7891_v44 = vpop.f32.mrb[69].mxu1  ;;  %15139 = vmatmul.mubr.msk.f32.gmra.mrb[194].mxu0 %vm7948_vm10, %v15980_v22  ;;  %v15982_v47 = vadd.f32 %v15065_v50, %v21751_v61 }
 0x655   :  { %v15983_v30 = vadd.f32 %v21751_v61, %v7891_v44  ;;  %v10113_v61 = vld [vmem:[#allocation7] sm:$0xff] }
 0x657   :  { %15141 = vmatprep.mubr.msk.f32.mxu0 %vm7948_vm10, %v15983_v30 }
 0x658   :  { %15142 = vmatmul.mubr.msk.f32.gmra.mrb[196].mxu0 %vm7948_vm10, %v15982_v47 }
 0x659   :  { %15168 = vmatprep.mubr.msk.f32.mxu0 %vm7948_vm10, %v21760_v49  ;;  %v10114_v49 = vld [vmem:[#allocation7 + $0x8] sm:$0xff] }
 0x65c   :  { %15169 = vmatmul.mubr.msk.f32.vlgmr.msra.gmra.mrb[198].mxu0 %vm7948_vm10, %v21763_v23  ;;  %v15728_v23 = vpack.c.bf16 %v10114_v49, %v10113_v61 }
 0x65d   :  { %15171 = vmatprep.mubr.msk.f32.mxu0 %vm7948_vm10, %v21776_v14 }
 0x65e   :  { %15729 = vmatprep.subr.bf16.mxu0 %v15728_v23 }
 0x65f   :  { %15731 = vmatpush3.bf16.msra.mxu0 %v15728_v23 }
 0x660   :  { %15172 = vmatmul.mubr.msk.f32.gmra.mrb[200].mxu0 %vm7948_vm10, %v21779_v8 }
 0x661   :  { %15174 = vmatprep.mubr.msk.f32.mxu0 %vm7948_vm10, %v21792_v21 }
 0x664   :  { %15175 = vmatmul.mubr.msk.f32.gmra.mrb[202].mxu0 %vm7948_vm10, %v21795_v13 }
 0x665   :  { %15177 = vmatprep.mubr.msk.f32.mxu0 %vm7948_vm10, %v21808_v52 }
 0x668   :  { %15178 = vmatmul.mubr.msk.f32.gmra.mrb[204].mxu0 %vm7948_vm10, %v21811_v5 }
 0x669   :  { %15180 = vmatprep.mubr.msk.f32.mxu0 %vm7948_vm10, %v21824_v35  ;;  %v10115_v35 = vld [vmem:[#allocation7 + $0x10] sm:$0xff] }
 0x66c   :  { %15181 = vmatmul.mubr.msk.f32.gmra.mrb[206].mxu0 %vm7948_vm10, %v21827_v19  ;;  %v10116_v19 = vld [vmem:[#allocation7 + $0x18] sm:$0xff] }
 0x66d   :  { %15183 = vmatprep.mubr.msk.f32.mxu0 %vm7948_vm10, %v21834_v11  ;;  %v15732_v48 = vpack.c.bf16 %v10116_v19, %v10115_v35 }
 0x66f   :  { %15733 = vmatprep.subr.bf16.mxu0 %v15732_v48 }
 0x670   :  { %15184 = vmatmul.mubr.msk.f32.gmra.mrb[208].mxu0 %vm7948_vm10, %v21837_v45 }
 0x671   :  { %15186 = vmatprep.mubr.msk.f32.mxu0 %vm7948_vm10, %v21844_v46  ;;  %15735 = vmatpush3.bf16.msra.mxu0 %v15732_v48 }
 0x674   :  { %15187 = vmatmul.mubr.msk.f32.gmra.mrb[210].mxu0 %vm7948_vm10, %v21847_v9 }
 0x675   :  { %15189 = vmatprep.mubr.msk.f32.mxu0 %vm7948_vm10, %v21854_v17 }
 0x678   :  { %15190 = vmatmul.mubr.msk.f32.gmra.mrb[212].mxu0 %vm7948_vm10, %v21857_v38 }
 0x679   :  { %15192 = vmatprep.mubr.msk.f32.mxu0 %vm7948_vm10, %v21864_v15 }
 0x67c   :  { %15193 = vmatmul.mubr.msk.f32.gmra.mrb[214].mxu0 %vm7948_vm10, %v21867_v39 }
 0x67d   :  { %15195 = vmatprep.mubr.msk.f32.mxu0 %vm7948_vm10, %v21874_v12 }
 0x680   :  { %15196 = vmatmul.mubr.msk.f32.gmra.mrb[216].mxu0 %vm7948_vm10, %v21877_v27 }
 0x681   :  { %15198 = vmatprep.mubr.msk.f32.mxu0 %vm7948_vm10, %v21884_v40 }
 0x684   :  { %15199 = vmatmul.mubr.msk.f32.gmra.mrb[218].mxu0 %vm7948_vm10, %v21887_v31 }
 0x685   :  { %15201 = vmatprep.mubr.msk.f32.mxu0 %vm7948_vm10, %v15971_v51 }
 0x688   :  { %15202 = vmatmul.mubr.msk.f32.gmra.mrb[220].mxu0 %vm7948_vm10, %v15970_v16  ;;  %v15736_v16 = vpack.c.bf16 %v10118_v34, %v10117_v55 }
 0x689   :  { %15204 = vmatprep.mubr.msk.f32.mxu0 %vm7948_vm10, %v15973_v60 }
 0x68a   :  { %15737 = vmatprep.subr.bf16.mxu0 %v15736_v16 }
 0x68b   :  { %15739 = vmatpush3.bf16.msra.mxu0 %v15736_v16 }
 0x68c   :  { %15205 = vmatmul.mubr.msk.f32.gmra.mrb[222].mxu0 %vm7948_vm10, %v15972_v2 }
 0x68d   :  { %15207 = vmatprep.mubr.msk.f32.mxu0 %vm7948_vm10, %v15975_v59 }
 0x690   :  { %15208 = vmatmul.mubr.msk.f32.gmra.mrb[224].mxu0 %vm7948_vm10, %v15974_v18 }
 0x691   :  { %15210 = vmatprep.mubr.msk.f32.mxu0 %vm7948_vm10, %v15977_v56 }
 0x694   :  { %15211 = vmatmul.mubr.msk.f32.gmra.mrb[226].mxu0 %vm7948_vm10, %v15976_v20 }
 0x695   :  { %15213 = vmatprep.mubr.msk.f32.mxu0 %vm7948_vm10, %v15979_v53 }
 0x698   :  { %15214 = vmatmul.mubr.msk.f32.gmra.mrb[228].mxu0 %vm7948_vm10, %v15978_v41 }
 0x699   :  { %15216 = vmatprep.mubr.msk.f32.mxu0 %vm7948_vm10, %v15981_v43 }
 0x69c   :  { %15217 = vmatmul.mubr.msk.f32.gmra.mrb[230].mxu0 %vm7948_vm10, %v15980_v22 }
 0x69d   :  { %15219 = vmatprep.mubr.msk.f32.mxu0 %vm7948_vm10, %v15983_v30 }
 0x6a0   :  { %15220 = vmatmul.mubr.msk.f32.gmra.mrb[232].mxu0 %vm7948_vm10, %v15982_v47 }
 0x6e7   :  { %v15092_v14 = vpop.f32.mrb[162].mxu0 }
 0x6e8   :  { %v8123_v8 = vpop.f32.mrb[163].mxu0 }
 0x6eb   :  { %v15095_v21 = vpop.f32.mrb[164].mxu0 }
 0x6ec   :  { %v8133_v13 = vpop.f32.mrb[165].mxu0 }
 0x6ef   :  { %v21979_v52 = vpop.f32.mrb[166].mxu0 }
 0x6f0   :  { %v21981_v5 = vpop.f32.mrb[167].mxu0 }
 0x6f3   :  { %v21983_v37 = vpop.f32.mrb[168].mxu0 }
 0x6f4   :  { %v21985_v11 = vpop.f32.mrb[169].mxu0 }
 0x6f7   :  { %v21987_v45 = vpop.f32.mrb[170].mxu0 }
 0x6f8   :  { %v21989_v1 = vpop.f32.mrb[171].mxu0 }
 0x6fb   :  { %v21991_v24 = vpop.f32.mrb[172].mxu0 }
 0x6fc   :  { %v21993_v46 = vpop.f32.mrb[173].mxu0 }
 0x6ff   :  { %v21995_v9 = vpop.f32.mrb[174].mxu0 }
 0x700   :  { %v21997_v3 = vpop.f32.mrb[175].mxu0 }
 0x703   :  { %v21999_v57 = vpop.f32.mrb[176].mxu0 }
 0x704   :  { %v22001_v17 = vpop.f32.mrb[177].mxu0 }
 0x707   :  { %v22003_v38 = vpop.f32.mrb[178].mxu0 }
 0x708   :  { %v22005_v0 = vpop.f32.mrb[179].mxu0 }
 0x70b   :  { %v22007_v6 = vpop.f32.mrb[180].mxu0 }
 0x70c   :  { %v22009_v15 = vpop.f32.mrb[181].mxu0 }
 0x70d   :  { %25629 = vst [vmem:[#allocation221_spill] sm:$0xff] %v22009_v15 }
 0x70f   :  { %v22011_v39 = vpop.f32.mrb[182].mxu0 }
 0x710   :  { %25630 = vst [vmem:[#allocation244_spill] sm:$0xff] %v22011_v39  ;;  %v22013_v36 = vpop.f32.mrb[183].mxu0 }
 0x711   :  { %25631 = vst [vmem:[#allocation298_spill] sm:$0xff] %v22013_v36 }
 0x713   :  { %v22015_v4 = vpop.f32.mrb[184].mxu0 }
 0x714   :  { %25632 = vst [vmem:[#allocation245_spill] sm:$0xff] %v22015_v4  ;;  %v22017_v12 = vpop.f32.mrb[185].mxu0 }
 0x715   :  { %25633 = vst [vmem:[#allocation256_spill] sm:$0xff] %v22017_v12 }
 0x717   :  { %v22019_v27 = vpop.f32.mrb[186].mxu0 }
 0x718   :  { %25634 = vst [vmem:[#allocation228_spill] sm:$0xff] %v22019_v27  ;;  %v22021_v32 = vpop.f32.mrb[187].mxu0 }
 0x719   :  { %25635 = vst [vmem:[#allocation222_spill] sm:$0xff] %v22021_v32 }
 0x71b   :  { %v22023_v42 = vpop.f32.mrb[188].mxu0 }
 0x71c   :  { %25636 = vst [vmem:[#allocation231_spill] sm:$0xff] %v22023_v42  ;;  %v22025_v40 = vpop.f32.mrb[189].mxu0 }
 0x71d   :  { %25637 = vst [vmem:[#allocation229_spill] sm:$0xff] %v22025_v40 }
 0x71f   :  { %v22027_v31 = vpop.f32.mrb[190].mxu0 }
 0x720   :  { %25638 = vst [vmem:[#allocation250_spill] sm:$0xff] %v22027_v31  ;;  %v22029_v51 = vpop.f32.mrb[191].mxu0 }
 0x721   :  { %25639 = vst [vmem:[#allocation254_spill] sm:$0xff] %v22029_v51 }
 0x723   :  { %v22031_v33 = vpop.f32.mrb[192].mxu0 }
 0x724   :  { %25640 = vst [vmem:[#allocation235_spill] sm:$0xff] %v22031_v33  ;;  %v22033_v26 = vpop.f32.mrb[193].mxu0 }
 0x725   :  { %25641 = vst [vmem:[#allocation238_spill] sm:$0xff] %v22033_v26 }
 0x727   :  { %v22035_v60 = vpop.f32.mrb[194].mxu0 }
 0x728   :  { %25642 = vst [vmem:[#allocation272_spill] sm:$0xff] %v22035_v60  ;;  %v22037_v2 = vpop.f32.mrb[195].mxu0 }
 0x729   :  { %25643 = vst [vmem:[#allocation16_spill] sm:$0xff] %v22037_v2 }
 0x72b   :  { %v22039_v25 = vpop.f32.mrb[196].mxu0 }
 0x72c   :  { %25644 = vst [vmem:[#allocation46_spill] sm:$0xff] %v22039_v25  ;;  %v22041_v29 = vpop.f32.mrb[197].mxu0 }
 0x72d   :  { %25645 = vst [vmem:[#allocation103_spill] sm:$0xff] %v22041_v29 }
 0x72f   :  { %v15170_v59 = vpop.f32.mrb[198].mxu0 }
 0x730   :  { %v8560_v18 = vmax.f32 %v15092_v14, %v15170_v59  ;;  %v8380_v63 = vpop.f32.mrb[199].mxu0 }
 0x731   :  { %v8559_v10 = vmax.f32 %v8123_v8, %v8380_v63 }
 0x732   :  { %v8648_v56 = vcombine.high %v8560_v18, %v8560_v18  ;;  %v8655_v20 = vrot.slane %v8560_v18, %v17011_v58 }
 0x733   :  { %v8631_v7 = vcombine.high %v8559_v10, %v8559_v10  ;;  %v8638_v62 = vrot.slane %v8559_v10, %v17011_v58  ;;  %v15173_v53 = vpop.f32.mrb[200].mxu0 }
 0x734   :  { %v8662_v41 = vrot.slane %v8648_v56, %v17011_v58  ;;  %v8663_v54 = vcombine.high %v8655_v20, %v8655_v20  ;;  %v8562_v28 = vmax.f32 %v15095_v21, %v15173_v53  ;;  %v8390_v43 = vpop.f32.mrb[201].mxu0  ;;  %v13128_v35 = vrot.slane %v8655_v20, 9 }
 0x735   :  { %v8645_v22 = vrot.slane %v8631_v7, %v17011_v58  ;;  %v8646_v50 = vcombine.high %v8638_v62, %v8638_v62  ;;  %v13124_v44 = vrot.slane %v8638_v62, 9  ;;  %v8561_v30 = vmax.f32 %v8133_v13, %v8390_v43  ;;  %v25646_v7 = vld [vmem:[#allocation12_spill] sm:$0xff] }
 0x736   :  { %v8664_v47 = vcombine.high %v8662_v41, %v8662_v41  ;;  %v13130_v61 = vrot.slane %v8662_v41, 9  ;;  %v8682_v55 = vcombine.high %v8562_v28, %v8562_v28  ;;  %v13129_v16 = vrot.slane %v8663_v54, 9 }
 0x737   :  { %v8647_v49 = vcombine.high %v8645_v22, %v8645_v22  ;;  %v13125_v23 = vrot.slane %v8646_v50, 9  ;;  %v9819_v14 = vmax.f32 %v8638_v62, %v13124_v44  ;;  %v15176_v8 = vpop.f32.mrb[202].mxu0  ;;  %v13126_v59 = vrot.slane %v8645_v22, 9 }
 0x738   :  { %v13131_v19 = vrot.slane %v8664_v47, 9  ;;  %v9825_v48 = vmax.f32 %v8662_v41, %v13130_v61  ;;  %v8400_v34 = vpop.f32.mrb[203].mxu0  ;;  %v8696_v56 = vrot.slane %v8682_v55, %v17011_v58  ;;  %v8665_v13 = vcombine.high %v8561_v30, %v8561_v30 }
 0x739   :  { %v13127_v21 = vrot.slane %v8647_v49, 9  ;;  %v9820_v18 = vmax.f32 %v8646_v50, %v13125_v23  ;;  %v22049_v53 = vsub.s32 0, %v25646_v7  ;;  %v8672_v62 = vrot.slane %v8561_v30, %v17011_v58 }
 0x73a   :  { %v9826_v63 = vmax.f32 %v8664_v47, %v13131_v19  ;;  %v9963_v10 = vmax.f32 %v9819_v14, %v9825_v48  ;;  %v22054_v44 = vmax.f32 %v8655_v20, %v13128_v35  ;;  %v22056_v25 = vmax.f32 %v8663_v54, %v13129_v16 }
 0x73b   :  { %v22052_v43 = vpop.f32.mrb[204].mxu0  ;;  %v9821_v50 = vmax.f32 %v8645_v22, %v13126_v59  ;;  %v8679_v47 = vrot.slane %v8665_v13, %v17011_v58  ;;  %v8680_v23 = vcombine.high %v8672_v62, %v8672_v62  ;;  %v9822_v14 = vmax.f32 %v8647_v49, %v13127_v21 }
 0x73c   :  { %v9964_v41 = vmax.f32 %v9820_v18, %v9826_v63  ;;  %v10035_v61 = vmax.f32 %v9963_v10, 0.0  ;;  %v8410_v29 = vpop.f32.mrb[205].mxu0  ;;  %v8689_v48 = vrot.slane %v8562_v28, %v17011_v58  ;;  %v8698_v55 = vcombine.high %v8696_v56, %v8696_v56 }
 0x73d   :  { %v13138_v30 = vrot.slane %v8696_v56, 9  ;;  %v8681_v7 = vcombine.high %v8679_v47, %v8679_v47  ;;  %v13132_v2 = vrot.slane %v8672_v62, 9  ;;  %v13133_v20 = vrot.slane %v8680_v23, 9 }
 0x73e   :  { %v10036_v19 = vmax.f32 %v9964_v41, 0.0  ;;  %v10154_v18 = vrot.slane %v10035_v61, %v22049_v53  ;;  %v13134_v16 = vrot.slane %v8679_v47, 9  ;;  %v8564_v22 = vmax.f32 %v21979_v52, %v15176_v8 }
 0x73f   :  { %v22060_v35 = vpop.f32.mrb[206].mxu0  ;;  %v13135_v49 = vrot.slane %v8681_v7, 9  ;;  %v9827_v21 = vmax.f32 %v8672_v62, %v13132_v2  ;;  %v9828_v63 = vmax.f32 %v8680_v23, %v13133_v20  ;;  %v8563_v28 = vmax.f32 %v21981_v5, %v8400_v34 }
 0x740   :  { %v10158_v54 = vrot.slane %v10036_v19, %v22049_v53  ;;  %v22065_v59 = vpop.f32.mrb[207].mxu0  ;;  %v9829_v13 = vmax.f32 %v8679_v47, %v13134_v16  ;;  %v8716_v41 = vcombine.high %v8564_v22, %v8564_v22  ;;  %v8723_v60 = vrot.slane %v8564_v22, %v17011_v58 }
 0x741   :  { %v13139_v61 = vrot.slane %v8698_v55, 9  ;;  %v9830_v26 = vmax.f32 %v8681_v7, %v13135_v49  ;;  %v9965_v19 = vmax.f32 %v9821_v50, %v9827_v21  ;;  %v9966_v33 = vmax.f32 %v9822_v14, %v9828_v63 }
 0x742   :  { %v22069_v10 = vsel %vm10279_vm11, %v10158_v54, %v10154_v18  ;;  %v9967_v52 = vmax.f32 %v22054_v44, %v9829_v13  ;;  %v8730_v2 = vrot.slane %v8716_v41, %v17011_v58  ;;  %v8731_v8 = vcombine.high %v8723_v60, %v8723_v60 }
 0x743   :  { %v22072_v51 = vpop.f32.mrb[208].mxu0  ;;  %v13144_v62 = vrot.slane %v8723_v60, 9  ;;  %v8697_v34 = vcombine.high %v8689_v48, %v8689_v48  ;;  %v9968_v47 = vmax.f32 %v22056_v25, %v9830_v26  ;;  %v10037_v23 = vmax.f32 %v9965_v19, 0.0 }
 0x744   :  { %v22076_v5 = vpop.f32.mrb[209].mxu0  ;;  %v9833_v20 = vmax.f32 %v8696_v56, %v13138_v30  ;;  %v13145_v18 = vrot.slane %v8731_v8, 9  ;;  %v8699_v16 = vcombine.high %v8563_v28, %v8563_v28  ;;  %v13146_v14 = vrot.slane %v8730_v2, 9 }
 0x745   :  { %v22080_v50 = vrot.slane %v10037_v23, %v22049_v53  ;;  %v9839_v7 = vmax.f32 %v8723_v60, %v13144_v62  ;;  %v8706_v44 = vrot.slane %v8563_v28, %v17011_v58  ;;  %v13136_v49 = vrot.slane %v8689_v48, 9 }
 0x746   :  { %v9834_v21 = vmax.f32 %v8698_v55, %v13139_v61  ;;  %v9840_v63 = vmax.f32 %v8731_v8, %v13145_v18  ;;  %v13137_v41 = vrot.slane %v8697_v34, 9  ;;  %v10038_v56 = vmax.f32 %v9966_v33, 0.0 }
 0x747   :  { %v22083_v22 = vpop.f32.mrb[210].mxu0  ;;  %v22089_v26 = vsel %vm10279_vm11, %v22080_v50, %v10158_v54  ;;  %v9971_v25 = vmax.f32 %v9833_v20, %v9839_v7  ;;  %v8732_v30 = vcombine.high %v8730_v2, %v8730_v2  ;;  %v8713_v60 = vrot.slane %v8699_v16, %v17011_v58 }
 0x748   :  { %v22085_v13 = vpop.f32.mrb[211].mxu0  ;;  %25647 = vst [vmem:[#allocation65_spill] sm:$0xff] %v22089_v26  ;;  %v9972_v19 = vmax.f32 %v9834_v21, %v9840_v63  ;;  %v22092_v62 = vmax.f32 %v8730_v2, %v13146_v14  ;;  %v13140_v28 = vrot.slane %v8706_v44, 9  ;;  %v8566_v55 = vmax.f32 %v21983_v37, %v22052_v43 }
 0x749   :  { %v8565_v61 = vmax.f32 %v21985_v11, %v8410_v29  ;;  %v9831_v23 = vmax.f32 %v8689_v48, %v13136_v49  ;;  %v8715_v18 = vcombine.high %v8713_v60, %v8713_v60  ;;  %v13142_v54 = vrot.slane %v8713_v60, 9 }
 0x74a   :  { %v10039_v33 = vmax.f32 %v9967_v52, 0.0  ;;  %v22101_v20 = vmax.f32 %v9968_v47, 0.0  ;;  %v22103_v7 = vmax.f32 %v8706_v44, %v13140_v28  ;;  %v8750_v2 = vcombine.high %v8566_v55, %v8566_v55 }
 0x74b   :  { %v22097_v8 = vpop.f32.mrb[212].mxu0  ;;  %v22106_v16 = vrot.slane %v10038_v56, %v22049_v53  ;;  %v13143_v14 = vrot.slane %v8715_v18, 9  ;;  %v9837_v37 = vmax.f32 %v8713_v60, %v13142_v54  ;;  %v8757_v11 = vrot.slane %v8566_v55, %v17011_v58 }
 0x74c   :  { %v22099_v26 = vpop.f32.mrb[213].mxu0  ;;  %25648 = vst [vmem:[#allocation41_spill] sm:$0xff] %v22101_v20  ;;  %v9832_v29 = vmax.f32 %v8697_v34, %v13137_v41  ;;  %v13147_v43 = vrot.slane %v8732_v30, 9  ;;  %v8764_v49 = vrot.slane %v8750_v2, %v17011_v58  ;;  %v8733_v63 = vcombine.high %v8565_v61, %v8565_v61 }
 0x74d   :  { %v9838_v47 = vmax.f32 %v8715_v18, %v13143_v14  ;;  %v9969_v21 = vmax.f32 %v9831_v23, %v9837_v37  ;;  %v8740_v28 = vrot.slane %v8565_v61, %v17011_v58  ;;  %v22118_v60 = vrot.slane %v10039_v33, %v22049_v53 }
 0x74e   :  { %v8766_v41 = vcombine.high %v8764_v49, %v8764_v49  ;;  %v13154_v55 = vrot.slane %v8764_v49, 9  ;;  %v22125_v54 = vsel %vm10279_vm11, %v22106_v16, %v22080_v50  ;;  %v8765_v23 = vcombine.high %v8757_v11, %v8757_v11 }
 0x74f   :  { %v22112_v52 = vpop.f32.mrb[214].mxu0  ;;  %25649 = vst [vmem:[#allocation50_spill] sm:$0xff] %v22118_v60  ;;  %25650 = vst [vmem:[#allocation62_spill] sm:$0xff] %v22125_v54  ;;  %v9970_v18 = vmax.f32 %v9832_v29, %v9838_v47  ;;  %v8747_v2 = vrot.slane %v8733_v63, %v17011_v58  ;;  %v22128_v61 = vmax.f32 %v8732_v30, %v13147_v43  ;;  %v10043_v34 = vmax.f32 %v9971_v25, 0.0 }
 0x750   :  { %v22115_v56 = vpop.f32.mrb[215].mxu0  ;;  %v22130_v14 = vcombine.high %v8706_v44, %v8706_v44  ;;  %v13155_v33 = vrot.slane %v8766_v41, 9  ;;  %v8748_v37 = vcombine.high %v8740_v28, %v8740_v28  ;;  %v9849_v20 = vmax.f32 %v8764_v49, %v13154_v55 }
 0x751   :  { %25651 = vst [vmem:[#allocation88_spill] sm:$0xff] %v22128_v61  ;;  %v8749_v60 = vcombine.high %v8747_v2, %v8747_v2  ;;  %v13148_v31 = vrot.slane %v8740_v28, 9  ;;  %v22136_v42 = vmax.f32 %v9972_v19, 0.0  ;;  %v8568_v30 = vmax.f32 %v21987_v45, %v22060_v35 }
 0x752   :  { %v9850_v29 = vmax.f32 %v8766_v41, %v13155_v33  ;;  %v13149_v47 = vrot.slane %v8748_v37, 9  ;;  %v13152_v43 = vrot.slane %v8757_v11, 9  ;;  %v13153_v44 = vrot.slane %v8765_v23, 9 }
 0x753   :  { %v22132_v48 = vpop.f32.mrb[216].mxu0  ;;  %v9843_v63 = vmax.f32 %v8740_v28, %v13148_v31  ;;  %v8567_v54 = vmax.f32 %v21989_v1, %v22065_v59  ;;  %v13150_v61 = vrot.slane %v8747_v2, 9  ;;  %v8784_v49 = vcombine.high %v8568_v30, %v8568_v30 }
 0x754   :  { %v22134_v40 = vpop.f32.mrb[217].mxu0  ;;  %v9844_v25 = vmax.f32 %v8748_v37, %v13149_v47  ;;  %v8791_v55 = vrot.slane %v8568_v30, %v17011_v58  ;;  %v13151_v19 = vrot.slane %v8749_v60, 9  ;;  %v22149_v45 = vrot.slane %v10043_v34, %v22049_v53 }
 0x755   :  { %25652 = vst [vmem:[#allocation151_spill] sm:$0xff] %v22134_v40  ;;  %v9975_v27 = vmax.f32 %v9843_v63, %v9849_v20  ;;  %v8767_v41 = vcombine.high %v8567_v54, %v8567_v54  ;;  %v8774_v33 = vrot.slane %v8567_v54, %v17011_v58  ;;  %v8798_v35 = vrot.slane %v8784_v49, %v17011_v58 }
 0x756   :  { %v9976_v1 = vmax.f32 %v9844_v25, %v9850_v29  ;;  %v22153_v59 = vmax.f32 %v9969_v21, 0.0  ;;  %v22156_v20 = vmax.f32 %v9970_v18, 0.0  ;;  %v22158_v30 = vmax.f32 %v8757_v11, %v13152_v43 }
 0x757   :  { %v22143_v32 = vpop.f32.mrb[218].mxu0  ;;  %v8781_v28 = vrot.slane %v8767_v41, %v17011_v58  ;;  %v8782_v37 = vcombine.high %v8774_v33, %v8774_v33  ;;  %v13156_v47 = vrot.slane %v8774_v33, 9  ;;  %v22160_v54 = vmax.f32 %v8765_v23, %v13153_v44 }
 0x758   :  { %25653 = vst [vmem:[#allocation150_spill] sm:$0xff] %v22143_v32  ;;  %v22146_v12 = vpop.f32.mrb[219].mxu0  ;;  %v8799_v63 = vcombine.high %v8791_v55, %v8791_v55  ;;  %v9845_v4 = vmax.f32 %v8747_v2, %v13150_v61  ;;  %v9846_v31 = vmax.f32 %v8749_v60, %v13151_v19  ;;  %v10047_v21 = vmax.f32 %v9975_v27, 0.0 }
 0x759   :  { %25654 = vst [vmem:[#allocation160_spill] sm:$0xff] %v22146_v12  ;;  %v8783_v29 = vcombine.high %v8781_v28, %v8781_v28  ;;  %v13157_v25 = vrot.slane %v8782_v37, 9  ;;  %v10048_v36 = vmax.f32 %v9976_v1, 0.0  ;;  %v8800_v41 = vcombine.high %v8798_v35, %v8798_v35 }
 0x75a   :  { %v13160_v12 = vrot.slane %v8791_v55, 9  ;;  %v13158_v39 = vrot.slane %v8781_v28, 9  ;;  %v9851_v32 = vmax.f32 %v8774_v33, %v13156_v47  ;;  %v13161_v43 = vrot.slane %v8799_v63, 9 }
 0x75b   :  { %v22162_v34 = vpop.f32.mrb[220].mxu0  ;;  %v13159_v18 = vrot.slane %v8783_v29, 9  ;;  %v9852_v11 = vmax.f32 %v8782_v37, %v13157_v25  ;;  %v13162_v23 = vrot.slane %v8798_v35, 9  ;;  %v8570_v44 = vmax.f32 %v21991_v24, %v22072_v51 }
 0x75c   :  { %25655 = vst [vmem:[#allocation278_spill] sm:$0xff] %v22162_v34  ;;  %v22164_v49 = vpop.f32.mrb[221].mxu0  ;;  %v8569_v60 = vmax.f32 %v21993_v46, %v22076_v5  ;;  %v9853_v61 = vmax.f32 %v8781_v28, %v13158_v39  ;;  %v9977_v27 = vmax.f32 %v9845_v4, %v9851_v32  ;;  %v22177_v33 = vrot.slane %v10047_v21, %v22049_v53 }
 0x75d   :  { %25656 = vst [vmem:[#allocation284_spill] sm:$0xff] %v22164_v49  ;;  %v22172_v19 = vmax.f32 %v8783_v29, %v13159_v18  ;;  %v9978_v1 = vmax.f32 %v9846_v31, %v9852_v11  ;;  %v8818_v37 = vcombine.high %v8570_v44, %v8570_v44  ;;  %v8825_v47 = vrot.slane %v8570_v44, %v17011_v58 }
 0x75e   :  { %25659 = vst [vmem:[#allocation108_spill] sm:$0xff] %v22177_v33  ;;  %v8801_v25 = vcombine.high %v8569_v60, %v8569_v60  ;;  %v13163_v24 = vrot.slane %v8800_v41, 9  ;;  %v9979_v51 = vmax.f32 %v22158_v30, %v9853_v61  ;;  %v8808_v39 = vrot.slane %v8569_v60, %v17011_v58 }
 0x75f   :  { %v22170_v2 = vpop.f32.mrb[222].mxu0  ;;  %v9980_v46 = vmax.f32 %v22160_v54, %v22172_v19  ;;  %v8832_v4 = vrot.slane %v8818_v37, %v17011_v58  ;;  %v8833_v32 = vcombine.high %v8825_v47, %v8825_v47  ;;  %v13168_v5 = vrot.slane %v8825_v47, 9 }
 0x760   :  { %25657 = vst [vmem:[#allocation303_spill] sm:$0xff] %v22170_v2  ;;  %v22174_v49 = vpop.f32.mrb[223].mxu0  ;;  %v8815_v31 = vrot.slane %v8801_v25, %v17011_v58  ;;  %v22189_v29 = vrot.slane %v10048_v36, %v22049_v53  ;;  %v9855_v21 = vmax.f32 %v8791_v55, %v13160_v12  ;;  %v9856_v18 = vmax.f32 %v8799_v63, %v13161_v43 }
 0x761   :  { %25658 = vst [vmem:[#allocation306_spill] sm:$0xff] %v22174_v49  ;;  %v9857_v11 = vmax.f32 %v8798_v35, %v13162_v23  ;;  %v8834_v44 = vcombine.high %v8832_v4, %v8832_v4  ;;  %v13169_v54 = vrot.slane %v8833_v32, 9  ;;  %v13170_v61 = vrot.slane %v8832_v4, 9 }
 0x762   :  { %25661 = vst [vmem:[#allocation288_spill] sm:$0xff] %v22189_v29  ;;  %v9863_v60 = vmax.f32 %v8825_v47, %v13168_v5  ;;  %v9858_v19 = vmax.f32 %v8800_v41, %v13163_v24  ;;  %v10049_v37 = vmax.f32 %v9977_v27, 0.0  ;;  %v8816_v49 = vcombine.high %v8808_v39, %v8808_v39 }
 0x763   :  { %v22186_v28 = vpop.f32.mrb[224].mxu0  ;;  %v8817_v2 = vcombine.high %v8815_v31, %v8815_v31  ;;  %v13171_v34 = vrot.slane %v8834_v44, 9  ;;  %v9864_v25 = vmax.f32 %v8833_v32, %v13169_v54  ;;  %v9865_v15 = vmax.f32 %v8832_v4, %v13170_v61 }
 0x764   :  { %25660 = vst [vmem:[#allocation286_spill] sm:$0xff] %v22186_v28  ;;  %v22191_v30 = vpop.f32.mrb[225].mxu0  ;;  %v9983_v28 = vmax.f32 %v9857_v11, %v9863_v60  ;;  %v13164_v36 = vrot.slane %v8808_v39, 9  ;;  %v13165_v12 = vrot.slane %v8816_v49, 9  ;;  %v13166_v55 = vrot.slane %v8815_v31, 9 }
 0x765   :  { %v13167_v35 = vrot.slane %v8817_v2, 9  ;;  %v10050_v43 = vmax.f32 %v9978_v1, 0.0  ;;  %v22197_v23 = vmax.f32 %v8834_v44, %v13171_v34  ;;  %v9984_v47 = vmax.f32 %v9858_v19, %v9864_v25 }
 0x766   :  { %v8572_v41 = vmax.f32 %v21995_v9, %v22083_v22  ;;  %v9859_v27 = vmax.f32 %v8808_v39, %v13164_v36  ;;  %v22201_v24 = vmax.f32 %v8816_v49, %v13165_v12  ;;  %v9861_v4 = vmax.f32 %v8815_v31, %v13166_v55 }
 0x767   :  { %v22193_v40 = vpop.f32.mrb[226].mxu0  ;;  %v9862_v32 = vmax.f32 %v8817_v2, %v13167_v35  ;;  %v10051_v5 = vmax.f32 %v9979_v51, 0.0  ;;  %v10055_v11 = vmax.f32 %v9983_v28, 0.0  ;;  %v22212_v9 = vrot.slane %v22136_v42, %v22049_v53 }
 0x768   :  { %v22195_v63 = vpop.f32.mrb[227].mxu0  ;;  %v8852_v54 = vcombine.high %v8572_v41, %v8572_v41  ;;  %v8859_v61 = vrot.slane %v8572_v41, %v17011_v58  ;;  %v9985_v34 = vmax.f32 %v9859_v27, %v9865_v15  ;;  %v25663_v22 = vrot.slane %v22130_v14, 9 }
 0x769   :  { %25662 = vst [vmem:[#allocation308_spill] sm:$0xff] %v22195_v63  ;;  %v9981_v63 = vmax.f32 %v9855_v21, %v9861_v4  ;;  %v9982_v1 = vmax.f32 %v9856_v18, %v9862_v32  ;;  %v10056_v2 = vmax.f32 %v9984_v47, 0.0  ;;  %v25665_v15 = vmax.f32 %v22103_v7, %v22092_v62 }
 0x76a   :  { %v22217_v49 = vmax.f32 %v22130_v14, %v25663_v22  ;;  %v8866_v51 = vrot.slane %v8852_v54, %v17011_v58  ;;  %v22227_v31 = vrot.slane %v22153_v59, %v22049_v53  ;;  %v22231_v42 = vrot.slane %v22156_v20, %v22049_v53 }
 0x76b   :  { %v22204_v60 = vpop.f32.mrb[228].mxu0  ;;  %v22223_v39 = vmax.f32 %v25665_v15, 0.0  ;;  %v22236_v14 = vsel %vm10279_vm11, %v22189_v29, %v22177_v33  ;;  %v22238_v28 = vmax.f32 %v9980_v46, 0.0  ;;  %v22241_v21 = vrot.slane %v10049_v37, %v22049_v53 }
 0x76c   :  { %v22208_v19 = vpop.f32.mrb[229].mxu0  ;;  %25664 = vst [vmem:[#allocation304_spill] sm:$0xff] %v22217_v49  ;;  %25667 = vst [vmem:[#allocation309_spill] sm:$0xff] %v22227_v31  ;;  %v22244_v62 = vrot.slane %v10050_v43, %v22049_v53  ;;  %v8868_v7 = vcombine.high %v8866_v51, %v8866_v51  ;;  %v22249_v18 = vrot.slane %v10051_v5, %v22049_v53  ;;  %v13178_v36 = vrot.slane %v8866_v51, 9 }
 0x76d   :  { %25666 = vst [vmem:[#allocation315_spill] sm:$0xff] %v22223_v39  ;;  %v22252_v20 = vrot.slane %v10055_v11, %v22049_v53  ;;  %v8867_v25 = vcombine.high %v8859_v61, %v8859_v61  ;;  %v22257_v46 = vrot.slane %v10056_v2, %v22049_v53  ;;  %v22259_v37 = vmax.f32 %v9981_v63, 0.0 }
 0x76e   :  { %25668 = vst [vmem:[#allocation317_spill] sm:$0xff] %v22249_v18  ;;  %v13176_v55 = vrot.slane %v8859_v61, 9  ;;  %v8571_v35 = vmax.f32 %v21997_v3, %v22085_v13  ;;  %v22263_v43 = vmax.f32 %v9982_v1, 0.0  ;;  %v13179_v47 = vrot.slane %v8868_v7, 9 }
 0x76f   :  { %v22246_v59 = vpop.f32.mrb[230].mxu0  ;;  %25669 = vst [vmem:[#allocation322_spill] sm:$0xff] %v22257_v46  ;;  %v8574_v41 = vmax.f32 %v21999_v57, %v22097_v8  ;;  %v8573_v27 = vmax.f32 %v22001_v17, %v22099_v26  ;;  %v22269_v4 = vmax.f32 %v9985_v34, 0.0  ;;  %v10281_v63 = vsel %vm3052_vm4, %v22080_v50, %v22069_v10 }
 0x770   :  { %v22254_v12 = vpop.f32.mrb[231].mxu0  ;;  %v8835_v32 = vcombine.high %v8571_v35, %v8571_v35  ;;  %v8842_v5 = vrot.slane %v8571_v35, %v17011_v58  ;;  %v13177_v3 = vrot.slane %v8867_v25, 9  ;;  %v9873_v13 = vmax.f32 %v8866_v51, %v13178_v36 }
 0x771   :  { %v8886_v54 = vcombine.high %v8574_v41, %v8574_v41  ;;  %v8869_v1 = vcombine.high %v8573_v27, %v8573_v27  ;;  %v8893_v8 = vrot.slane %v8574_v41, %v17011_v58  ;;  %v9874_v34 = vmax.f32 %v8868_v7, %v13179_v47 }
 0x772   :  { %v8849_v57 = vrot.slane %v8835_v32, %v17011_v58  ;;  %v8850_v17 = vcombine.high %v8842_v5, %v8842_v5  ;;  %v13172_v26 = vrot.slane %v8842_v5, 9  ;;  %v8876_v10 = vrot.slane %v8573_v27, %v17011_v58 }
 0x773   :  { %v22275_v11 = vpop.f32.mrb[232].mxu0  ;;  %v8900_v2 = vrot.slane %v8886_v54, %v17011_v58  ;;  %v8883_v50 = vrot.slane %v8869_v1, %v17011_v58  ;;  %v22284_v44 = vmax.f32 %v8859_v61, %v13176_v55  ;;  %v22286_v32 = vmax.f32 %v8867_v25, %v13177_v3 }
 0x774   :  { %25670 = vst [vmem:[#allocation326_spill] sm:$0xff] %v22275_v11  ;;  %v22277_v22 = vpop.f32.mrb[233].mxu0  ;;  %v8851_v51 = vcombine.high %v8849_v57, %v8849_v57  ;;  %v13173_v15 = vrot.slane %v8850_v17, 9  ;;  %v13174_v36 = vrot.slane %v8849_v57, 9  ;;  %v9867_v35 = vmax.f32 %v8842_v5, %v13172_v26 }
 0x775   :  { %25671 = vst [vmem:[#allocation285_spill] sm:$0xff] %v22277_v22  ;;  %v8902_v33 = vcombine.high %v8900_v2, %v8900_v2  ;;  %v10283_v7 = vsel %vm10282_vm12, %v22106_v16, %v10281_v63  ;;  %v8901_v27 = vcombine.high %v8893_v8, %v8893_v8  ;;  %v13184_v1 = vrot.slane %v8893_v8, 9 }
 0x776   :  { %v13175_v47 = vrot.slane %v8851_v51, 9  ;;  %v9868_v41 = vmax.f32 %v8850_v17, %v13173_v15  ;;  %v9987_v54 = vmax.f32 %v9867_v35, %v9873_v13  ;;  %v22290_v49 = vmax.f32 %v8849_v57, %v13174_v36 }
 0x777   :  { %v13186_v18 = vrot.slane %v8900_v2, 9  ;;  %v8884_v29 = vcombine.high %v8876_v10, %v8876_v10  ;;  %v13187_v26 = vrot.slane %v8902_v33, 9  ;;  %v8885_v61 = vcombine.high %v8883_v50, %v8883_v50 }
 0x778   :  { %v9988_v39 = vmax.f32 %v9868_v41, %v9874_v34  ;;  %v10059_v5 = vmax.f32 %v9987_v54, 0.0  ;;  %v9870_v55 = vmax.f32 %v8851_v51, %v13175_v47  ;;  %v13180_v25 = vrot.slane %v8876_v10, 9 }
 0x779   :  { %v13181_v3 = vrot.slane %v8884_v29, 9  ;;  %v13182_v22 = vrot.slane %v8883_v50, 9  ;;  %v13183_v17 = vrot.slane %v8885_v61, 9  ;;  %v10284_v13 = vsel %vm3054_vm6, %v22227_v31, %v10283_v7 }
 0x77a   :  { %v10060_v11 = vmax.f32 %v9988_v39, 0.0  ;;  %v22293_v63 = vrot.slane %v10059_v5, %v22049_v53  ;;  %v9875_v57 = vmax.f32 %v8876_v10, %v13180_v25  ;;  %v10286_v34 = vsel %vm10285_vm13, %v22231_v42, %v10284_v13 }
 0x77b   :  { %v9876_v15 = vmax.f32 %v8884_v29, %v13181_v3  ;;  %v9877_v36 = vmax.f32 %v8883_v50, %v13182_v22  ;;  %v22302_v51 = vmax.f32 %v8885_v61, %v13183_v17  ;;  %v10287_v39 = vsel %vm3056_vm8, %v22149_v45, %v10286_v34 }
 0x77c   :  { %25672 = vst [vmem:[#allocation57_spill] sm:$0xff] %v22293_v63  ;;  %v22300_v35 = vrot.slane %v10060_v11, %v22049_v53  ;;  %v8576_v47 = vmax.f32 %v22003_v38, %v22112_v52  ;;  %v9989_v41 = vmax.f32 %v22290_v49, %v9875_v57  ;;  %v10289_v22 = vsel %vm10288_vm15, %v22212_v9, %v10287_v39 }
 0x77d   :  { %v9990_v7 = vmax.f32 %v9870_v55, %v9876_v15  ;;  %v9991_v29 = vmax.f32 %v22284_v44, %v9877_v36  ;;  %v9992_v10 = vmax.f32 %v22286_v32, %v22302_v51  ;;  %15234 = vmatprep.mubr.msk.f32.mxu0 %vm10311_vm14, %v10289_v22  ;;  %v22323_v52 = vrot.slane %v22263_v43, %v22049_v53  ;;  %v25677_v51 = vld [vmem:[#allocation221_spill] sm:$0xff] }
 0x77e   :  { %25673 = vst [vmem:[#allocation35_spill] sm:$0xff] %v22300_v35  ;;  %v22315_v11 = vsel %vm10279_vm11, %v22300_v35, %v22293_v63  ;;  %v8920_v50 = vcombine.high %v8576_v47, %v8576_v47  ;;  %v8927_v38 = vrot.slane %v8576_v47, %v17011_v58  ;;  %v22327_v44 = vrot.slane %v22269_v4, %v22049_v53 }
 0x77f   :  { %25674 = vst [vmem:[#allocation26_spill] sm:$0xff] %v22315_v11  ;;  %v11091_v49 = vsel %vm10279_vm11, %v22257_v46, %v22252_v20  ;;  %v8575_v32 = vmax.f32 %v22005_v0, %v22115_v56  ;;  %v13185_v54 = vrot.slane %v8901_v27, 9  ;;  %v22335_v25 = vmax.f32 %v8893_v8, %v13184_v1  ;;  %v25676_v56 = vld [vmem:[#allocation151_spill] sm:$0xff] }
 0x780   :  { %25675 = vst [vmem:[#allocation329_spill] sm:$0xff] %v22327_v44  ;;  %v8934_v5 = vrot.slane %v8920_v50, %v17011_v58  ;;  %v8935_v61 = vcombine.high %v8927_v38, %v8927_v38  ;;  %v13192_v55 = vrot.slane %v8927_v38, 9  ;;  %v9881_v43 = vmax.f32 %v8900_v2, %v13186_v18 }
 0x781   :  { %v22337_v3 = vmax.f32 %v8902_v33, %v13187_v26  ;;  %v8903_v17 = vcombine.high %v8575_v32, %v8575_v32  ;;  %v8910_v36 = vrot.slane %v8575_v32, %v17011_v58  ;;  %v8578_v0 = vmax.f32 %v22007_v6, %v22132_v48 }
 0x782   :  { %v8936_v4 = vcombine.high %v8934_v5, %v8934_v5  ;;  %v13193_v13 = vrot.slane %v8935_v61, 9  ;;  %v13194_v57 = vrot.slane %v8934_v5, 9  ;;  %v9887_v15 = vmax.f32 %v8927_v38, %v13192_v55 }
 0x783   :  { %v8917_v34 = vrot.slane %v8903_v17, %v17011_v58  ;;  %v8577_v39 = vmax.f32 %v25677_v51, %v25676_v56  ;;  %v8918_v2 = vcombine.high %v8910_v36, %v8910_v36  ;;  %v13188_v47 = vrot.slane %v8910_v36, 9 }
 0x784   :  { %v13195_v8 = vrot.slane %v8936_v4, 9  ;;  %v22345_v1 = vmax.f32 %v8935_v61, %v13193_v13  ;;  %v9889_v33 = vmax.f32 %v8934_v5, %v13194_v57  ;;  %v9995_v18 = vmax.f32 %v9881_v43, %v9887_v15 }
 0x785   :  { %v8919_v26 = vcombine.high %v8917_v34, %v8917_v34  ;;  %v13190_v22 = vrot.slane %v8917_v34, 9  ;;  %v9880_v50 = vmax.f32 %v8901_v27, %v13185_v54  ;;  %v8954_v55 = vcombine.high %v8578_v0, %v8578_v0 }
 0x786   :  { %v22347_v38 = vmax.f32 %v8936_v4, %v13195_v8  ;;  %v13189_v6 = vrot.slane %v8918_v2, 9  ;;  %v9883_v17 = vmax.f32 %v8910_v36, %v13188_v47  ;;  %v10061_v51 = vmax.f32 %v9989_v41, 0.0 }
 0x787   :  { %v13191_v48 = vrot.slane %v8919_v26, 9  ;;  %v9885_v56 = vmax.f32 %v8917_v34, %v13190_v22  ;;  %v10062_v61 = vmax.f32 %v9990_v7, 0.0  ;;  %v8961_v5 = vrot.slane %v8578_v0, %v17011_v58 }
 0x788   :  { %25678 = vst [vmem:[#allocation327_spill] sm:$0xff] %v22347_v38  ;;  %v8968_v43 = vrot.slane %v8954_v55, %v17011_v58  ;;  %v22353_v13 = vmax.f32 %v8918_v2, %v13189_v6  ;;  %v9997_v54 = vmax.f32 %v9883_v17, %v9889_v33  ;;  %v22358_v4 = vrot.slane %v22259_v37, %v22049_v53  ;;  %v25691_v6 = vld [vmem:[#allocation244_spill] sm:$0xff] }
 0x789   :  { %v9886_v57 = vmax.f32 %v8919_v26, %v13191_v48  ;;  %v9993_v27 = vmax.f32 %v22335_v25, %v9885_v56  ;;  %v10063_v15 = vmax.f32 %v9991_v29, 0.0  ;;  %v10067_v8 = vmax.f32 %v9995_v18, 0.0  ;;  %v25692_v17 = vld [vmem:[#allocation160_spill] sm:$0xff]  ;;  %v25693_v56 = vld [vmem:[#allocation298_spill] sm:$0xff] }
 0x78a   :  { %25679 = vst [vmem:[#allocation47_spill] sm:$0xff] %v22353_v13  ;;  %v8970_v36 = vcombine.high %v8968_v43, %v8968_v43  ;;  %v22362_v41 = vrot.slane %v22238_v28, %v22049_v53  ;;  %v8969_v0 = vcombine.high %v8961_v5, %v8961_v5  ;;  %v25681_v25 = vmax.f32 %v22201_v24, %v22197_v23 }
 0x78b   :  { %v9994_v7 = vmax.f32 %v9880_v50, %v9886_v57  ;;  %v22374_v37 = vsel %vm10279_vm11, %v22323_v52, %v22358_v4  ;;  %v22378_v29 = vsel %vm3052_vm4, %v22327_v44, %v11091_v49  ;;  %v13202_v28 = vrot.slane %v8968_v43, 9 }
 0x78c   :  { %25680 = vst [vmem:[#allocation37_spill] sm:$0xff] %v22362_v41  ;;  %v22369_v33 = vmax.f32 %v25681_v25, 0.0  ;;  %25683 = vst [vmem:[#allocation36_spill] sm:$0xff] %v22374_v37  ;;  %v22380_v18 = vmax.f32 %v9992_v10, 0.0  ;;  %v22383_v2 = vrot.slane %v10061_v51, %v22049_v53  ;;  %v22386_v26 = vrot.slane %v10062_v61, %v22049_v53  ;;  %v25690_v10 = vld [vmem:[#allocation150_spill] sm:$0xff] }
 0x78d   :  { %25684 = vst [vmem:[#allocation325_spill] sm:$0xff] %v22378_v29  ;;  %v13203_v23 = vrot.slane %v8970_v36, 9  ;;  %v22389_v24 = vrot.slane %v10063_v15, %v22049_v53  ;;  %v22392_v47 = vrot.slane %v10067_v8, %v22049_v53  ;;  %v8937_v22 = vcombine.high %v8577_v39, %v8577_v39 }
 0x78e   :  { %25682 = vst [vmem:[#allocation34_spill] sm:$0xff] %v22369_v33  ;;  %25685 = vst [vmem:[#allocation199_spill] sm:$0xff] %v22380_v18  ;;  %v8944_v49 = vrot.slane %v8577_v39, %v17011_v58  ;;  %v13200_v50 = vrot.slane %v8961_v5, 9  ;;  %v13201_v55 = vrot.slane %v8969_v0, 9  ;;  %v8580_v48 = vmax.f32 %v25691_v6, %v25690_v10 }
 0x78f   :  { %25686 = vst [vmem:[#allocation52_spill] sm:$0xff] %v22383_v2  ;;  %25687 = vst [vmem:[#allocation48_spill] sm:$0xff] %v22386_v26  ;;  %v8579_v51 = vmax.f32 %v25693_v56, %v25692_v17  ;;  %v9897_v61 = vmax.f32 %v8968_v43, %v13202_v28  ;;  %v8951_v57 = vrot.slane %v8937_v22, %v17011_v58  ;;  %v22404_v6 = vmax.f32 %v9993_v27, 0.0 }
 0x790   :  { %25688 = vst [vmem:[#allocation70_spill] sm:$0xff] %v22389_v24  ;;  %25689 = vst [vmem:[#allocation53_spill] sm:$0xff] %v22392_v47  ;;  %v8952_v25 = vcombine.high %v8944_v49, %v8944_v49  ;;  %v13196_v15 = vrot.slane %v8944_v49, 9  ;;  %v9898_v34 = vmax.f32 %v8970_v36, %v13203_v23  ;;  %v8988_v32 = vcombine.high %v8580_v48, %v8580_v48 }
 0x791   :  { %v8971_v8 = vcombine.high %v8579_v51, %v8579_v51  ;;  %v10291_v39 = vsel %vm3052_vm4, %v22241_v21, %v22236_v14  ;;  %v8953_v47 = vcombine.high %v8951_v57, %v8951_v57  ;;  %v8978_v10 = vrot.slane %v8579_v51, %v17011_v58  ;;  %25694 = vst [vmem:[#allocation76_spill] sm:$0xff] %v22404_v6 }
 0x792   :  { %v13197_v11 = vrot.slane %v8952_v25, 9  ;;  %v9891_v29 = vmax.f32 %v8944_v49, %v13196_v15  ;;  %v13198_v17 = vrot.slane %v8951_v57, 9  ;;  %v9002_v43 = vrot.slane %v8988_v32, %v17011_v58 }
 0x793   :  { %v8985_v28 = vrot.slane %v8971_v8, %v17011_v58  ;;  %v22408_v22 = vmax.f32 %v9997_v54, 0.0  ;;  %v13199_v36 = vrot.slane %v8953_v47, 9  ;;  %v22410_v18 = vmax.f32 %v9994_v7, 0.0 }
 0x794   :  { %v9892_v23 = vmax.f32 %v8952_v25, %v13197_v11  ;;  %v9999_v56 = vmax.f32 %v9891_v29, %v9897_v61  ;;  %v22412_v14 = vmax.f32 %v8961_v5, %v13200_v50  ;;  %v22414_v24 = vmax.f32 %v8969_v0, %v13201_v55 }
 0x795   :  { %v10292_v27 = vsel %vm10282_vm12, %v22244_v62, %v10291_v39  ;;  %v22419_v32 = vrot.slane %v8580_v48, %v17011_v58  ;;  %v8986_v15 = vcombine.high %v8978_v10, %v8978_v10  ;;  %v9893_v54 = vmax.f32 %v8951_v57, %v13198_v17 }
 0x796   :  { %v10000_v49 = vmax.f32 %v9892_v23, %v9898_v34  ;;  %v10071_v51 = vmax.f32 %v9999_v56, 0.0  ;;  %v9004_v8 = vcombine.high %v9002_v43, %v9002_v43  ;;  %v13210_v26 = vrot.slane %v9002_v43, 9  ;;  %v25696_v56 = vld [vmem:[#allocation245_spill] sm:$0xff] }
 0x797   :  { %v8987_v11 = vcombine.high %v8985_v28, %v8985_v28  ;;  %v9894_v29 = vmax.f32 %v8953_v47, %v13199_v36  ;;  %v13204_v61 = vrot.slane %v8978_v10, 9  ;;  %v13205_v5 = vrot.slane %v8986_v15, 9  ;;  %v25695_v36 = vld [vmem:[#allocation278_spill] sm:$0xff] }
 0x798   :  { %v10072_v7 = vmax.f32 %v10000_v49, 0.0  ;;  %v10218_v0 = vrot.slane %v10071_v51, %v22049_v53  ;;  %v13206_v50 = vrot.slane %v8985_v28, 9  ;;  %v10293_v34 = vsel %vm3054_vm6, %v22358_v4, %v10292_v27 }
 0x799   :  { %v13207_v55 = vrot.slane %v8987_v11, 9  ;;  %v9899_v48 = vmax.f32 %v8978_v10, %v13204_v61  ;;  %v9900_v39 = vmax.f32 %v8986_v15, %v13205_v5  ;;  %v10294_v57 = vsel %vm10285_vm13, %v22323_v52, %v10293_v34  ;;  %v25698_v5 = vld [vmem:[#allocation284_spill] sm:$0xff] }
 0x79a   :  { %v10222_v25 = vrot.slane %v10072_v7, %v22049_v53  ;;  %v9901_v17 = vmax.f32 %v8985_v28, %v13206_v50  ;;  %v10295_v47 = vsel %vm3056_vm8, %v22252_v20, %v10294_v57  ;;  %v8582_v49 = vmax.f32 %v25696_v56, %v25695_v36  ;;  %v25701_v50 = vld [vmem:[#allocation228_spill] sm:$0xff] }
 0x79b   :  { %v9902_v23 = vmax.f32 %v8987_v11, %v13207_v55  ;;  %v10001_v2 = vmax.f32 %v9893_v54, %v9899_v48  ;;  %v10002_v4 = vmax.f32 %v9894_v29, %v9900_v39  ;;  %v22436_v10 = vsel %vm10288_vm15, %v22257_v46, %v10295_v47  ;;  %v25700_v29 = vld [vmem:[#allocation303_spill] sm:$0xff] }
 0x79c   :  { %v22432_v51 = vsel %vm10279_vm11, %v10222_v25, %v10218_v0  ;;  %25697 = vst [vmem:[#allocation68_spill] sm:$0xff] %v22436_v10  ;;  %v10003_v27 = vmax.f32 %v22412_v14, %v9901_v17  ;;  %15235 = vmatmul.mubr.msk.f32.vlgmr.msra.gmra.mrb[234].mxu0 %vm10311_vm14, %v22436_v10  ;;  %v9022_v15 = vcombine.high %v8582_v49, %v8582_v49  ;;  %v25699_v0 = vld [vmem:[#allocation256_spill] sm:$0xff]  ;;  %v13211_v14 = vrot.slane %v9004_v8, 9 }
 0x79d   :  { %v10004_v28 = vmax.f32 %v22414_v24, %v9902_v23  ;;  %v9029_v11 = vrot.slane %v8582_v49, %v17011_v58  ;;  %v10073_v7 = vmax.f32 %v10001_v2, 0.0  ;;  %v10074_v61 = vmax.f32 %v10002_v4, 0.0 }
 0x79e   :  { %v8581_v54 = vmax.f32 %v25699_v0, %v25698_v5  ;;  %v8584_v55 = vmax.f32 %v25701_v50, %v25700_v29  ;;  %v9003_v34 = vcombine.high %v22419_v32, %v22419_v32  ;;  %v9036_v24 = vrot.slane %v9022_v15, %v17011_v58 }
 0x79f   :  { %v9037_v48 = vcombine.high %v9029_v11, %v9029_v11  ;;  %v22451_v39 = vrot.slane %v10073_v7, %v22049_v53  ;;  %v22454_v57 = vrot.slane %v10074_v61, %v22049_v53  ;;  %v13216_v2 = vrot.slane %v9029_v11, 9 }
 0x7a0   :  { %v9005_v17 = vcombine.high %v8581_v54, %v8581_v54  ;;  %v13208_v47 = vrot.slane %v22419_v32, 9  ;;  %v9905_v36 = vmax.f32 %v9002_v43, %v13210_v26  ;;  %v13218_v15 = vrot.slane %v9036_v24, 9 }
 0x7a1   :  { %v13217_v56 = vrot.slane %v9037_v48, 9  ;;  %v22461_v49 = vsel %vm10279_vm11, %v22451_v39, %v10222_v25  ;;  %v22466_v4 = vsel %vm10279_vm11, %v22454_v57, %v22451_v39  ;;  %v9911_v7 = vmax.f32 %v9029_v11, %v13216_v2 }
 0x7a2   :  { %25702 = vst [vmem:[#allocation82_spill] sm:$0xff] %v22466_v4  ;;  %v9906_v61 = vmax.f32 %v9004_v8, %v13211_v14  ;;  %v9012_v0 = vrot.slane %v8581_v54, %v17011_v58  ;;  %v9019_v29 = vrot.slane %v9005_v17, %v17011_v58  ;;  %v13209_v50 = vrot.slane %v9003_v34, 9 }
 0x7a3   :  { %v9912_v5 = vmax.f32 %v9037_v48, %v13217_v56  ;;  %v9038_v26 = vcombine.high %v9036_v24, %v9036_v24  ;;  %v10007_v43 = vmax.f32 %v9905_v36, %v9911_v7  ;;  %v9056_v23 = vcombine.high %v8584_v55, %v8584_v55  ;;  %v25706_v7 = vld [vmem:[#allocation306_spill] sm:$0xff] }
 0x7a4   :  { %v10075_v10 = vmax.f32 %v10003_v27, 0.0  ;;  %v22470_v25 = vmax.f32 %v9036_v24, %v13218_v15  ;;  %v9021_v35 = vcombine.high %v9019_v29, %v9019_v29  ;;  %v13212_v38 = vrot.slane %v9012_v0, 9 }
 0x7a5   :  { %v10008_v6 = vmax.f32 %v9906_v61, %v9912_v5  ;;  %v13214_v13 = vrot.slane %v9019_v29, 9  ;;  %v9063_v63 = vrot.slane %v8584_v55, %v17011_v58  ;;  %v9070_v8 = vrot.slane %v9056_v23, %v17011_v58 }
 0x7a6   :  { %v22476_v11 = vrot.slane %v22408_v22, %v22049_v53  ;;  %v9903_v54 = vmax.f32 %v22419_v32, %v13208_v47  ;;  %v22479_v14 = vmax.f32 %v10004_v28, 0.0  ;;  %v13215_v48 = vrot.slane %v9021_v35, 9 }
 0x7a7   :  { %v13219_v27 = vrot.slane %v9038_v26, 9  ;;  %v22481_v24 = vmax.f32 %v9012_v0, %v13212_v38  ;;  %v9909_v2 = vmax.f32 %v9019_v29, %v13214_v13  ;;  %v9072_v17 = vcombine.high %v9070_v8, %v9070_v8  ;;  %v25710_v38 = vld [vmem:[#allocation231_spill] sm:$0xff] }
 0x7a8   :  { %25703 = vst [vmem:[#allocation77_spill] sm:$0xff] %v22476_v11  ;;  %25704 = vst [vmem:[#allocation78_spill] sm:$0xff] %v22479_v14  ;;  %v22485_v36 = vrot.slane %v22410_v18, %v22049_v53  ;;  %v9904_v55 = vmax.f32 %v9003_v34, %v13209_v50  ;;  %v22487_v23 = vcombine.high %v9012_v0, %v9012_v0  ;;  %v13226_v15 = vrot.slane %v9070_v8, 9  ;;  %v25707_v18 = vld [vmem:[#allocation222_spill] sm:$0xff] }
 0x7a9   :  { %v9910_v56 = vmax.f32 %v9021_v35, %v13215_v48  ;;  %v22490_v22 = vrot.slane %v10075_v10, %v22049_v53  ;;  %v10005_v32 = vmax.f32 %v9903_v54, %v9909_v2  ;;  %v9071_v47 = vcombine.high %v9063_v63, %v9063_v63  ;;  %v25709_v2 = vld [vmem:[#allocation286_spill] sm:$0xff] }
 0x7aa   :  { %25705 = vst [vmem:[#allocation85_spill] sm:$0xff] %v22485_v36  ;;  %v8583_v61 = vmax.f32 %v25707_v18, %v25706_v7  ;;  %v22498_v34 = vmax.f32 %v9038_v26, %v13219_v27  ;;  %v10079_v5 = vmax.f32 %v10007_v43, 0.0  ;;  %v22500_v35 = vmax.f32 %v10008_v6, 0.0  ;;  %v25712_v26 = vld [vmem:[#allocation250_spill] sm:$0xff] }
 0x7ab   :  { %v10006_v13 = vmax.f32 %v9904_v55, %v9910_v56  ;;  %v13227_v10 = vrot.slane %v9072_v17, 9  ;;  %v13224_v29 = vrot.slane %v9063_v63, 9  ;;  %v13225_v48 = vrot.slane %v9071_v47, 9  ;;  %v25711_v56 = vld [vmem:[#allocation229_spill] sm:$0xff] }
 0x7ac   :  { %25708 = vst [vmem:[#allocation83_spill] sm:$0xff] %v22498_v34  ;;  %v9039_v50 = vcombine.high %v8583_v61, %v8583_v61  ;;  %v9046_v54 = vrot.slane %v8583_v61, %v17011_v58  ;;  %v8586_v55 = vmax.f32 %v25710_v38, %v25709_v2  ;;  %v8585_v28 = vmax.f32 %v25711_v56, %v22191_v30 }
 0x7ad   :  { %v8588_v27 = vmax.f32 %v25712_v26, %v22193_v40  ;;  %v9921_v43 = vmax.f32 %v9070_v8, %v13226_v15  ;;  %v9922_v0 = vmax.f32 %v9072_v17, %v13227_v10  ;;  %v22514_v30 = vrot.slane %v10079_v5, %v22049_v53 }
 0x7ae   :  { %v9053_v6 = vrot.slane %v9039_v50, %v17011_v58  ;;  %v9054_v7 = vcombine.high %v9046_v54, %v9046_v54  ;;  %v13220_v18 = vrot.slane %v9046_v54, 9  ;;  %v9090_v11 = vcombine.high %v8586_v55, %v8586_v55 }
 0x7af   :  { %v9097_v36 = vrot.slane %v8586_v55, %v17011_v58  ;;  %v9073_v61 = vcombine.high %v8585_v28, %v8585_v28  ;;  %v9080_v38 = vrot.slane %v8585_v28, %v17011_v58  ;;  %v22518_v15 = vmax.f32 %v9063_v63, %v13224_v29 }
 0x7b0   :  { %v9055_v37 = vcombine.high %v9053_v6, %v9053_v6  ;;  %v13221_v31 = vrot.slane %v9054_v7, 9  ;;  %v9915_v14 = vmax.f32 %v9046_v54, %v13220_v18  ;;  %v13222_v2 = vrot.slane %v9053_v6, 9 }
 0x7b1   :  { %v9104_v40 = vrot.slane %v9090_v11, %v17011_v58  ;;  %v9087_v8 = vrot.slane %v9073_v61, %v17011_v58  ;;  %v10077_v55 = vmax.f32 %v10005_v32, 0.0  ;;  %v10078_v56 = vmax.f32 %v10006_v13, 0.0 }
 0x7b2   :  { %v13223_v17 = vrot.slane %v9055_v37, 9  ;;  %v9916_v10 = vmax.f32 %v9054_v7, %v13221_v31  ;;  %v10011_v50 = vmax.f32 %v9915_v14, %v9921_v43  ;;  %v9920_v26 = vmax.f32 %v9071_v47, %v13225_v48 }
 0x7b3   :  { %v9105_v4 = vcombine.high %v9097_v36, %v9097_v36  ;;  %v13232_v28 = vrot.slane %v9097_v36, 9  ;;  %v9088_v41 = vcombine.high %v9080_v38, %v9080_v38  ;;  %v9917_v5 = vmax.f32 %v9053_v6, %v13222_v2  ;;  %v25715_v2 = vld [vmem:[#allocation254_spill] sm:$0xff] }
 0x7b4   :  { %v10012_v54 = vmax.f32 %v9916_v10, %v9922_v0  ;;  %v10083_v18 = vmax.f32 %v10011_v50, 0.0  ;;  %v9106_v34 = vcombine.high %v9104_v40, %v9104_v40  ;;  %v13234_v33 = vrot.slane %v9104_v40, 9 }
 0x7b5   :  { %v9089_v44 = vcombine.high %v9087_v8, %v9087_v8  ;;  %v9918_v11 = vmax.f32 %v9055_v37, %v13223_v17  ;;  %v13228_v61 = vrot.slane %v9080_v38, 9  ;;  %v13229_v63 = vrot.slane %v9088_v41, 9  ;;  %v25714_v37 = vld [vmem:[#allocation308_spill] sm:$0xff] }
 0x7b6   :  { %v10084_v46 = vmax.f32 %v10012_v54, 0.0  ;;  %v22521_v29 = vrot.slane %v10083_v18, %v22049_v53  ;;  %v13230_v31 = vrot.slane %v9087_v8, 9  ;;  %v9124_v32 = vcombine.high %v8588_v27, %v8588_v27 }
 0x7b7   :  { %v13231_v14 = vrot.slane %v9089_v44, 9  ;;  %v9923_v13 = vmax.f32 %v9080_v38, %v13228_v61  ;;  %v9924_v0 = vmax.f32 %v9088_v41, %v13229_v63  ;;  %v9131_v48 = vrot.slane %v8588_v27, %v17011_v58 }
 0x7b8   :  { %25713 = vst [vmem:[#allocation93_spill] sm:$0xff] %v22521_v29  ;;  %v22524_v47 = vrot.slane %v10084_v46, %v22049_v53  ;;  %v13235_v43 = vrot.slane %v9106_v34, 9  ;;  %v9925_v6 = vmax.f32 %v9087_v8, %v13230_v31  ;;  %v8587_v17 = vmax.f32 %v25715_v2, %v25714_v37 }
 0x7b9   :  { %v9926_v7 = vmax.f32 %v9089_v44, %v13231_v14  ;;  %v10013_v50 = vmax.f32 %v9917_v5, %v9923_v13  ;;  %v10014_v54 = vmax.f32 %v9918_v11, %v9924_v0  ;;  %v9139_v18 = vcombine.high %v9131_v48, %v9131_v48 }
 0x7ba   :  { %v22532_v10 = vsel %vm10279_vm11, %v22524_v47, %v22521_v29  ;;  %v10015_v46 = vmax.f32 %v22518_v15, %v9925_v6  ;;  %v9138_v41 = vrot.slane %v9124_v32, %v17011_v58  ;;  %v13240_v27 = vrot.slane %v9131_v48, 9 }
 0x7bb   :  { %v10016_v38 = vmax.f32 %v9920_v26, %v9926_v7  ;;  %v22538_v44 = vrot.slane %v22500_v35, %v22049_v53  ;;  %v25716_v8 = vrot.slane %v22487_v23, 9  ;;  %v25717_v5 = vmax.f32 %v22481_v24, %v22470_v25 }
 0x7bc   :  { %v13241_v63 = vrot.slane %v9139_v18, 9  ;;  %v22551_v15 = vrot.slane %v10077_v55, %v22049_v53  ;;  %v13233_v26 = vrot.slane %v9105_v4, 9  ;;  %v9929_v31 = vmax.f32 %v9104_v40, %v13234_v33  ;;  %v25719_v55 = vld [vmem:[#allocation235_spill] sm:$0xff]  ;;  %v25720_v40 = vld [vmem:[#allocation238_spill] sm:$0xff] }
 0x7bd   :  { %v22543_v61 = vmax.f32 %v22487_v23, %v25716_v8  ;;  %v22548_v11 = vmax.f32 %v25717_v5, 0.0  ;;  %v9935_v14 = vmax.f32 %v9131_v48, %v13240_v27  ;;  %v22554_v35 = vrot.slane %v10078_v56, %v22049_v53 }
 0x7be   :  { %25718 = vst [vmem:[#allocation86_spill] sm:$0xff] %v22551_v15  ;;  %v22556_v32 = vmax.f32 %v9097_v36, %v13232_v28  ;;  %v9930_v13 = vmax.f32 %v9106_v34, %v13235_v43  ;;  %v9936_v23 = vmax.f32 %v9139_v18, %v13241_v63  ;;  %v10085_v0 = vmax.f32 %v10013_v50, 0.0  ;;  %v25721_v36 = vld [vmem:[#allocation272_spill] sm:$0xff] }
 0x7bf   :  { %v9140_v6 = vcombine.high %v9138_v41, %v9138_v41  ;;  %v13242_v7 = vrot.slane %v9138_v41, 9  ;;  %v10019_v25 = vmax.f32 %v9929_v31, %v9935_v14  ;;  %v9107_v37 = vcombine.high %v8587_v17, %v8587_v17  ;;  %v25722_v28 = vld [vmem:[#allocation16_spill] sm:$0xff] }
 0x7c0   :  { %v10020_v24 = vmax.f32 %v9930_v13, %v9936_v23  ;;  %v9114_v2 = vrot.slane %v8587_v17, %v17011_v58  ;;  %v8590_v8 = vmax.f32 %v25719_v55, %v22204_v60  ;;  %v22561_v33 = vmax.f32 %v9105_v4, %v13233_v26 }
 0x7c1   :  { %v8589_v56 = vmax.f32 %v25720_v40, %v22208_v19  ;;  %v8592_v34 = vmax.f32 %v25721_v36, %v22246_v59  ;;  %v8591_v48 = vmax.f32 %v25722_v28, %v22254_v12  ;;  %v10086_v43 = vmax.f32 %v10014_v54, 0.0 }
 0x7c2   :  { %v10087_v50 = vmax.f32 %v10015_v46, 0.0  ;;  %v9121_v18 = vrot.slane %v9107_v37, %v17011_v58  ;;  %v13236_v27 = vrot.slane %v9114_v2, 9  ;;  %v10088_v17 = vmax.f32 %v10016_v38, 0.0 }
 0x7c3   :  { %v13243_v5 = vrot.slane %v9140_v6, 9  ;;  %v9937_v63 = vmax.f32 %v9138_v41, %v13242_v7  ;;  %v9158_v60 = vcombine.high %v8590_v8, %v8590_v8  ;;  %v22571_v4 = vrot.slane %v10085_v0, %v22049_v53 }
 0x7c4   :  { %v9123_v26 = vcombine.high %v9121_v18, %v9121_v18  ;;  %v13238_v19 = vrot.slane %v9121_v18, 9  ;;  %v9141_v31 = vcombine.high %v8589_v56, %v8589_v56  ;;  %v9122_v14 = vcombine.high %v9114_v2, %v9114_v2 }
 0x7c5   :  { %v9931_v59 = vmax.f32 %v9114_v2, %v13236_v27  ;;  %v9165_v13 = vrot.slane %v8590_v8, %v17011_v58  ;;  %v9172_v12 = vrot.slane %v9158_v60, %v17011_v58  ;;  %v22576_v54 = vrot.slane %v10086_v43, %v22049_v53 }
 0x7c6   :  { %v13239_v46 = vrot.slane %v9123_v26, 9  ;;  %v9933_v38 = vmax.f32 %v9121_v18, %v13238_v19  ;;  %v9148_v41 = vrot.slane %v8589_v56, %v17011_v58  ;;  %v22580_v23 = vrot.slane %v10087_v50, %v22049_v53 }
 0x7c7   :  { %v10021_v0 = vmax.f32 %v9931_v59, %v9937_v63  ;;  %v9174_v7 = vcombine.high %v9172_v12, %v9172_v12  ;;  %v13250_v37 = vrot.slane %v9172_v12, 9  ;;  %v10091_v55 = vmax.f32 %v10019_v25, 0.0 }
 0x7c8   :  { %v9934_v40 = vmax.f32 %v9123_v26, %v13239_v46  ;;  %v10017_v2 = vmax.f32 %v22556_v32, %v9933_v38  ;;  %v9155_v8 = vrot.slane %v9141_v31, %v17011_v58  ;;  %v10092_v36 = vmax.f32 %v10020_v24, 0.0 }
 0x7c9   :  { %v13237_v28 = vrot.slane %v9122_v14, 9  ;;  %v9173_v43 = vcombine.high %v9165_v13, %v9165_v13  ;;  %v13251_v27 = vrot.slane %v9174_v7, 9  ;;  %v22585_v18 = vrot.slane %v10088_v17, %v22049_v53 }
 0x7ca   :  { %v10018_v56 = vmax.f32 %v22561_v33, %v9934_v40  ;;  %v9156_v50 = vcombine.high %v9148_v41, %v9148_v41  ;;  %v9157_v60 = vcombine.high %v9155_v8, %v9155_v8  ;;  %v13248_v63 = vrot.slane %v9165_v13, 9 }
 0x7cb   :  { %25723 = vst [vmem:[#allocation98_spill] sm:$0xff] %v22585_v18  ;;  %v9945_v19 = vmax.f32 %v9172_v12, %v13250_v37  ;;  %v13244_v59 = vrot.slane %v9148_v41, 9  ;;  %v9192_v25 = vcombine.high %v8592_v34, %v8592_v34  ;;  %v22588_v26 = vmax.f32 %v9140_v6, %v13243_v5 }
 0x7cc   :  { %v22591_v32 = vrot.slane %v10091_v55, %v22049_v53  ;;  %v9946_v24 = vmax.f32 %v9174_v7, %v13251_v27  ;;  %v13245_v31 = vrot.slane %v9156_v50, 9  ;;  %v22594_v46 = vrot.slane %v10092_v36, %v22049_v53 }
 0x7cd   :  { %v22596_v17 = vmax.f32 %v9122_v14, %v13237_v28  ;;  %v13249_v38 = vrot.slane %v9173_v43, 9  ;;  %v9939_v33 = vmax.f32 %v9148_v41, %v13244_v59  ;;  %v13246_v40 = vrot.slane %v9155_v8, 9 }
 0x7ce   :  { %v13247_v29 = vrot.slane %v9157_v60, 9  ;;  %v9940_v18 = vmax.f32 %v9156_v50, %v13245_v31  ;;  %v9175_v12 = vcombine.high %v8591_v48, %v8591_v48  ;;  %v22598_v37 = vmax.f32 %v9165_v13, %v13248_v63 }
 0x7cf   :  { %25724 = vst [vmem:[#allocation92_spill] sm:$0xff] %v22596_v17  ;;  %v10023_v6 = vmax.f32 %v9939_v33, %v9945_v19  ;;  %v9199_v5 = vrot.slane %v8592_v34, %v17011_v58  ;;  %v9206_v55 = vrot.slane %v9192_v25, %v17011_v58  ;;  %v22602_v7 = vmax.f32 %v10021_v0, 0.0 }
 0x7d0   :  { %25725 = vst [vmem:[#allocation95_spill] sm:$0xff] %v22598_v37  ;;  %v10024_v27 = vmax.f32 %v9940_v18, %v9946_v24  ;;  %v9182_v36 = vrot.slane %v8591_v48, %v17011_v58  ;;  %v9189_v14 = vrot.slane %v9175_v12, %v17011_v58  ;;  %v10089_v28 = vmax.f32 %v10017_v2, 0.0 }
 0x7d1   :  { %v10090_v41 = vmax.f32 %v10018_v56, 0.0  ;;  %v22606_v59 = vmax.f32 %v9173_v43, %v13249_v38  ;;  %v10095_v50 = vmax.f32 %v10023_v6, 0.0  ;;  %v9941_v31 = vmax.f32 %v9155_v8, %v13246_v40  ;;  %v25729_v8 = vld [vmem:[#allocation326_spill] sm:$0xff]  ;;  %v25731_v38 = vld [vmem:[#allocation285_spill] sm:$0xff]  ;;  %v25732_v40 = vld [vmem:[#allocation103_spill] sm:$0xff] }
 0x7d2   :  { %v22608_v13 = vmax.f32 %v9157_v60, %v13247_v29  ;;  %v10096_v63 = vmax.f32 %v10024_v27, 0.0  ;;  %v9190_v19 = vcombine.high %v9182_v36, %v9182_v36  ;;  %v9207_v34 = vcombine.high %v9199_v5, %v9199_v5  ;;  %v25730_v60 = vld [vmem:[#allocation46_spill] sm:$0xff] }
 0x7d3   :  { %25726 = vst [vmem:[#allocation114_spill] sm:$0xff] %v22606_v59  ;;  %v9208_v33 = vcombine.high %v9206_v55, %v9206_v55  ;;  %v13258_v25 = vrot.slane %v9206_v55, 9  ;;  %v13252_v0 = vrot.slane %v9182_v36, 9  ;;  %v22611_v18 = vrot.slane %v10095_v50, %v22049_v53 }
 0x7d4   :  { %v22614_v48 = vrot.slane %v10096_v63, %v22049_v53  ;;  %v13253_v2 = vrot.slane %v9190_v19, 9  ;;  %v13254_v56 = vrot.slane %v9189_v14, 9  ;;  %v10298_v29 = vsel %vm3052_vm4, %v22451_v39, %v22432_v51 }
 0x7d5   :  { %25727 = vst [vmem:[#allocation99_spill] sm:$0xff] %v22611_v18  ;;  %v9947_v43 = vmax.f32 %v9182_v36, %v13252_v0  ;;  %v8594_v24 = vmax.f32 %v25730_v60, %v25729_v8  ;;  %v8593_v12 = vmax.f32 %v25732_v40, %v25731_v38  ;;  %v9191_v27 = vcombine.high %v9189_v14, %v9189_v14 }
 0x7d6   :  { %25728 = vst [vmem:[#allocation129_spill] sm:$0xff] %v22614_v48  ;;  %v22626_v6 = vsel %vm10279_vm11, %v22614_v48, %v22611_v18  ;;  %v9948_v50 = vmax.f32 %v9190_v19, %v13253_v2  ;;  %v22628_v63 = vmax.f32 %v9189_v14, %v13254_v56  ;;  %v10299_v0 = vsel %vm10282_vm12, %v22454_v57, %v10298_v29  ;;  %v10410_v29 = vld [vmem:[#allocation7 + $0x30] sm:$0xff]  ;;  %v10413_v48 = vld [vmem:[#allocation7 + $0x48] sm:$0xff] }
 0x7d7   :  { %25733 = vst [vmem:[#allocation115_spill] sm:$0xff] %v22626_v6  ;;  %v10025_v36 = vmax.f32 %v9941_v31, %v9947_v43  ;;  %v9226_v51 = vcombine.high %v8594_v24, %v8594_v24  ;;  %v9233_v39 = vrot.slane %v8594_v24, %v17011_v58  ;;  %v13256_v8 = vrot.slane %v9199_v5, 9  ;;  %v10411_v24 = vld [vmem:[#allocation7 + $0x38] sm:$0xff] }
 0x7d8   :  { %25734 = vst [vmem:[#allocation133_spill] sm:$0xff] %v22628_v63  ;;  %v10026_v60 = vmax.f32 %v22608_v13, %v9948_v50  ;;  %v10300_v40 = vsel %vm3054_vm6, %v22551_v15, %v10299_v0  ;;  %v13257_v6 = vrot.slane %v9207_v34, 9  ;;  %v9209_v19 = vcombine.high %v8593_v12, %v8593_v12 }
 0x7d9   :  { %v10301_v14 = vsel %vm10285_vm13, %v22554_v35, %v10300_v40  ;;  %v9240_v31 = vrot.slane %v9226_v51, %v17011_v58  ;;  %v22642_v2 = vrot.slane %v10089_v28, %v22049_v53  ;;  %v22645_v56 = vrot.slane %v10090_v41, %v22049_v53 }
 0x7da   :  { %v10302_v13 = vsel %vm3056_vm8, %v22514_v30, %v10301_v14  ;;  %v13264_v43 = vrot.slane %v9233_v39, 9  ;;  %v13259_v50 = vrot.slane %v9208_v33, 9  ;;  %v22649_v0 = vmax.f32 %v9206_v55, %v13258_v25  ;;  %v10412_v14 = vld [vmem:[#allocation7 + $0x40] sm:$0xff] }
 0x7db   :  { %v13255_v38 = vrot.slane %v9191_v27, 9  ;;  %v10303_v51 = vsel %vm10288_vm15, %v22538_v44, %v10302_v13  ;;  %v10097_v40 = vmax.f32 %v10025_v36, 0.0  ;;  %v13266_v28 = vrot.slane %v9240_v31, 9  ;;  %v25751_v36 = vld [vmem:[#allocation329_spill] sm:$0xff] }
 0x7dc   :  { %15237 = vmatprep.mubr.msk.f32.mxu0 %vm10311_vm14, %v10303_v51  ;;  %v22654_v59 = vmax.f32 %v9233_v39, %v13264_v43  ;;  %v22657_v41 = vrot.slane %v8593_v12, %v17011_v58  ;;  %v22659_v63 = vmax.f32 %v9199_v5, %v13256_v8  ;;  %v22661_v37 = vmax.f32 %v9207_v34, %v13257_v6  ;;  %v10414_v51 = vld [vmem:[#allocation7 + $0x50] sm:$0xff]  ;;  %v10415_v12 = vld [vmem:[#allocation7 + $0x58] sm:$0xff] }
 0x7dd   :  { %v9223_v55 = vrot.slane %v9209_v19, %v17011_v58  ;;  %v15740_v25 = vpack.c.bf16 %v10411_v24, %v10410_v29  ;;  %v9241_v18 = vcombine.high %v9233_v39, %v9233_v39  ;;  %v22664_v13 = vmax.f32 %v9240_v31, %v13266_v28  ;;  %v10582_v28 = vld [vmem:[#allocation7 + $0x60] sm:$0xff] }
 0x7de   :  { %v13260_v43 = vrot.slane %v22657_v41, 9  ;;  %v22669_v15 = vmax.f32 %v9208_v33, %v13259_v50  ;;  %v15744_v34 = vpack.c.bf16 %v10413_v48, %v10412_v14  ;;  %v22671_v6 = vmax.f32 %v9191_v27, %v13255_v38  ;;  %v25738_v38 = vld [vmem:[#allocation65_spill] sm:$0xff]  ;;  %v10583_v14 = vld [vmem:[#allocation7 + $0x68] sm:$0xff]  ;;  %v25742_v27 = vld [vmem:[#allocation288_spill] sm:$0xff] }
 0x7df   :  { %25735 = vst [vmem:[#allocation130_spill] sm:$0xff] %v22664_v13  ;;  %v9225_v17 = vcombine.high %v9223_v55, %v9223_v55  ;;  %v13262_v5 = vrot.slane %v9223_v55, 9  ;;  %15741 = vmatprep.subr.bf16.mxu0 %v15740_v25  ;;  %v10098_v8 = vmax.f32 %v10026_v60, 0.0  ;;  %v22674_v39 = vrot.slane %v10097_v40, %v22049_v53  ;;  %v25766_v13 = vld [vmem:[#allocation36_spill] sm:$0xff] }
 0x7e0   :  { %25736 = vst [vmem:[#allocation134_spill] sm:$0xff] %v22669_v15  ;;  %v22677_v19 = vmax.f32 %v22657_v41, %v13260_v43  ;;  %15743 = vmatpush3.bf16.msra.mxu0 %v15740_v25  ;;  %v15748_v33 = vpack.c.bf16 %v10415_v12, %v10414_v51  ;;  %v10305_v50 = vsel %vm3052_vm4, %v22571_v4, %v22532_v10  ;;  %v13265_v48 = vrot.slane %v9241_v18, 9  ;;  %v25739_v43 = vld [vmem:[#allocation50_spill] sm:$0xff]  ;;  %v10928_v15 = vld [vmem:[#allocation7 + $0xd0] sm:$0xff] }
 0x7e1   :  { %v13263_v29 = vrot.slane %v9225_v17, 9  ;;  %v22679_v24 = vmax.f32 %v9223_v55, %v13262_v5  ;;  %15745 = vmatprep.subr.bf16.mxu0 %v15744_v34  ;;  %v10306_v60 = vsel %vm10282_vm12, %v22576_v54, %v10305_v50  ;;  %v10457_v40 = vsel %vm3052_vm4, %v22106_v16, %v25738_v38  ;;  %v25740_v16 = vld [vmem:[#allocation315_spill] sm:$0xff]  ;;  %v10584_v38 = vld [vmem:[#allocation7 + $0x70] sm:$0xff]  ;;  %v25750_v25 = vld [vmem:[#allocation62_spill] sm:$0xff] }
 0x7e2   :  { %25737 = vst [vmem:[#allocation131_spill] sm:$0xff] %v22677_v19  ;;  %v10307_v10 = vsel %vm3054_vm6, %v22642_v2, %v10306_v60  ;;  %v10458_v51 = vsel %vm10282_vm12, %v25739_v43, %v10457_v40  ;;  %v22699_v12 = vcombine.high %v9240_v31, %v9240_v31  ;;  %v22705_v50 = vrot.slane %v25740_v16, %v22049_v53  ;;  %v10585_v40 = vld [vmem:[#allocation7 + $0x78] sm:$0xff] }
 0x7e3   :  { %v22691_v55 = vmax.f32 %v9225_v17, %v13263_v29  ;;  %v10308_v5 = vsel %vm10285_vm13, %v22645_v56, %v10307_v10  ;;  %v10459_v17 = vsel %vm3054_vm6, %v22231_v42, %v10458_v51  ;;  %v22716_v10 = vrot.slane %v10098_v8, %v22049_v53 }
 0x7e4   :  { %15747 = vmatpush3.bf16.msra.mxu0 %v15744_v34  ;;  %v10309_v60 = vsel %vm3056_vm8, %v22591_v32, %v10308_v5  ;;  %v10460_v31 = vsel %vm10285_vm13, %v22149_v45, %v10459_v17  ;;  %v15752_v34 = vpack.c.bf16 %v10583_v14, %v10582_v28  ;;  %v10463_v5 = vsel %vm10279_vm11, %v22241_v21, %v25742_v27 }
 0x7e5   :  { %15749 = vmatprep.subr.bf16.mxu0 %v15748_v33  ;;  %v22720_v16 = vsel %vm10288_vm15, %v22594_v46, %v10309_v60  ;;  %v10461_v51 = vsel %vm3056_vm8, %v22212_v9, %v10460_v31  ;;  %v22727_v29 = vmax.f32 %v9241_v18, %v13265_v48  ;;  %v10464_v28 = vsel %vm3052_vm4, %v22244_v62, %v10463_v5  ;;  %v25746_v18 = vld [vmem:[#allocation317_spill] sm:$0xff] }
 0x7e6   :  { %25741 = vst [vmem:[#allocation156_spill] sm:$0xff] %v22720_v16  ;;  %15238 = vmatmul.mubr.msk.f32.gmra.mrb[236].mxu0 %vm10311_vm14, %v22720_v16  ;;  %v10462_v8 = vsel %vm10288_vm15, %v22705_v50, %v10461_v51  ;;  %v22737_v14 = vrot.slane %v22548_v11, %v22049_v53  ;;  %v25744_v17 = vmax.f32 %v22337_v3, %v22345_v1  ;;  %v10755_v16 = vld [vmem:[#allocation7 + $0x98] sm:$0xff] }
 0x7e7   :  { %25743 = vst [vmem:[#allocation135_spill] sm:$0xff] %v22727_v29  ;;  %15252 = vmatprep.mubr.msk.f32.mxu0 %vm10311_vm14, %v10462_v8  ;;  %v10465_v48 = vsel %vm10282_vm12, %v25746_v18, %v10464_v28  ;;  %v10471_v31 = vsel %vm3052_vm4, %v22454_v57, %v22461_v49  ;;  %v15756_v51 = vpack.c.bf16 %v10585_v40, %v10584_v38  ;;  %v25747_v38 = vld [vmem:[#allocation88_spill] sm:$0xff]  ;;  %v10586_v28 = vld [vmem:[#allocation7 + $0x80] sm:$0xff]  ;;  %v10929_v29 = vld [vmem:[#allocation7 + $0xd8] sm:$0xff] }
 0x7e8   :  { %v22742_v60 = vmax.f32 %v25744_v17, 0.0  ;;  %15751 = vmatpush3.bf16.msra.mxu0 %v15748_v33  ;;  %v10466_v11 = vsel %vm3054_vm6, %v22323_v52, %v10465_v48  ;;  %v10472_v3 = vsel %vm10282_vm12, %v22490_v22, %v10471_v31  ;;  %v22756_v1 = vrot.slane %v22602_v7, %v22049_v53  ;;  %v25748_v40 = vld [vmem:[#allocation304_spill] sm:$0xff]  ;;  %v10587_v17 = vld [vmem:[#allocation7 + $0x88] sm:$0xff]  ;;  %v25749_v7 = vld [vmem:[#allocation322_spill] sm:$0xff] }
 0x7e9   :  { %15753 = vmatprep.subr.bf16.mxu0 %v15752_v34  ;;  %v10477_v33 = vsel %vm10279_vm11, %v22571_v4, %v22524_v47  ;;  %v10467_v5 = vsel %vm10285_vm13, %v22252_v20, %v10466_v11  ;;  %v10473_v57 = vsel %vm3054_vm6, %v22554_v35, %v10472_v3  ;;  %v9974_v8 = vmax.f32 %v25748_v40, %v25747_v38 }
 0x7ea   :  { %25745 = vst [vmem:[#allocation162_spill] sm:$0xff] %v22742_v60  ;;  %v10478_v49 = vsel %vm3052_vm4, %v22576_v54, %v10477_v33  ;;  %v10468_v48 = vsel %vm3056_vm8, %v25749_v7, %v10467_v5  ;;  %v10474_v31 = vsel %vm10285_vm13, %v22514_v30, %v10473_v57  ;;  %v10629_v3 = vsel %vm3052_vm4, %v25739_v43, %v25750_v25  ;;  %v25753_v43 = vld [vmem:[#allocation41_spill] sm:$0xff] }
 0x7eb   :  { %v10479_v11 = vsel %vm10282_vm12, %v22580_v23, %v10478_v49  ;;  %v22780_v33 = vsel %vm10288_vm15, %v25751_v36, %v10468_v48  ;;  %v10475_v38 = vsel %vm3056_vm8, %v22538_v44, %v10474_v31  ;;  %v10046_v40 = vmax.f32 %v9974_v8, 0.0  ;;  %v10754_v31 = vld [vmem:[#allocation7 + $0x90] sm:$0xff] }
 0x7ec   :  { %25752 = vst [vmem:[#allocation152_spill] sm:$0xff] %v22780_v33  ;;  %v10480_v5 = vsel %vm3054_vm6, %v22645_v56, %v10479_v11  ;;  %15253 = vmatmul.mubr.msk.f32.vlgmr.msra.gmra.mrb[234].mxu0 %vm10311_vm14, %v22780_v33  ;;  %v10476_v57 = vsel %vm10288_vm15, %v22737_v14, %v10475_v38  ;;  %v25754_v49 = vrot.slane %v25753_v43, %v22049_v53  ;;  %v25759_v11 = vld [vmem:[#allocation82_spill] sm:$0xff]  ;;  %v25760_v33 = vld [vmem:[#allocation92_spill] sm:$0xff] }
 0x7ed   :  { %v10481_v25 = vsel %vm10285_vm13, %v22591_v32, %v10480_v5  ;;  %v15760_v58 = vpack.c.bf16 %v10587_v17, %v10586_v28  ;;  %15755 = vmatpush3.bf16.msra.mxu0 %v15752_v34  ;;  %15255 = vmatprep.mubr.msk.f32.mxu0 %vm10311_vm14, %v10476_v57  ;;  %v22801_v38 = vrot.slane %v10046_v40, %v22049_v53  ;;  %v25756_v34 = vld [vmem:[#allocation34_spill] sm:$0xff] }
 0x7ee   :  { %v10630_v48 = vsel %vm10282_vm12, %v25754_v49, %v10629_v3  ;;  %v10482_v8 = vsel %vm3056_vm8, %v22594_v46, %v10481_v25  ;;  %15757 = vmatprep.subr.bf16.mxu0 %v15756_v51  ;;  %v22813_v3 = vrot.slane %v25756_v34, %v22049_v53  ;;  %v10635_v40 = vsel %vm10279_vm11, %v22244_v62, %v22241_v21  ;;  %v25757_v49 = vld [vmem:[#allocation83_spill] sm:$0xff] }
 0x7ef   :  { %v10631_v5 = vsel %vm3054_vm6, %v22149_v45, %v10630_v48  ;;  %v22807_v28 = vsel %vm10288_vm15, %v22756_v1, %v10482_v8  ;;  %v10636_v25 = vsel %vm3052_vm4, %v25746_v18, %v10635_v40  ;;  %v15764_v43 = vpack.c.bf16 %v10755_v16, %v10754_v31  ;;  %v25761_v31 = vld [vmem:[#allocation78_spill] sm:$0xff] }
 0x7f0   :  { %25755 = vst [vmem:[#allocation163_spill] sm:$0xff] %v22807_v28  ;;  %v10632_v17 = vsel %vm10285_vm13, %v22212_v9, %v10631_v5  ;;  %v10010_v48 = vmax.f32 %v22543_v61, %v25757_v49  ;;  %15256 = vmatmul.mubr.msk.f32.gmra.mrb[236].mxu0 %vm10311_vm14, %v22807_v28  ;;  %v25758_v5 = vld [vmem:[#allocation37_spill] sm:$0xff]  ;;  %v10022_v40 = vmax.f32 %v25760_v33, %v22588_v26 }
 0x7f1   :  { %v10633_v57 = vsel %vm3056_vm8, %v22705_v50, %v10632_v17  ;;  %v10637_v34 = vsel %vm10282_vm12, %v25758_v5, %v10636_v25  ;;  %v10643_v17 = vsel %vm3052_vm4, %v22490_v22, %v25759_v11  ;;  %15759 = vmatpush3.bf16.msra.mxu0 %v15756_v51  ;;  %v10649_v25 = vsel %vm10279_vm11, %v22576_v54, %v22571_v4 }
 0x7f2   :  { %v10634_v8 = vsel %vm10288_vm15, %v22801_v38, %v10633_v57  ;;  %v10638_v61 = vsel %vm3054_vm6, %v22252_v20, %v10637_v34  ;;  %v10082_v16 = vmax.f32 %v10010_v48, 0.0  ;;  %v25762_v57 = vrot.slane %v25761_v31, %v22049_v53  ;;  %15761 = vmatprep.subr.bf16.mxu0 %v15760_v58  ;;  %v25763_v34 = vld [vmem:[#allocation98_spill] sm:$0xff]  ;;  %v10757_v31 = vld [vmem:[#allocation7 + $0xa8] sm:$0xff] }
 0x7f3   :  { %15270 = vmatprep.mubr.msk.f32.mxu0 %vm10311_vm14, %v10634_v8  ;;  %v10639_v22 = vsel %vm10285_vm13, %v25749_v7, %v10638_v61  ;;  %v10094_v51 = vmax.f32 %v10022_v40, 0.0  ;;  %v10650_v33 = vsel %vm3052_vm4, %v22580_v23, %v10649_v25  ;;  %v10756_v61 = vld [vmem:[#allocation7 + $0xa0] sm:$0xff]  ;;  %v10758_v25 = vld [vmem:[#allocation7 + $0xb0] sm:$0xff] }
 0x7f4   :  { %v10644_v49 = vsel %vm10282_vm12, %v25762_v57, %v10643_v17  ;;  %v10640_v11 = vsel %vm3056_vm8, %v25751_v36, %v10639_v22  ;;  %v22854_v48 = vrot.slane %v10082_v16, %v22049_v53  ;;  %v10651_v17 = vsel %vm10282_vm12, %v25763_v34, %v10650_v33  ;;  %v10759_v22 = vld [vmem:[#allocation7 + $0xb8] sm:$0xff] }
 0x7f5   :  { %v10645_v26 = vsel %vm3054_vm6, %v22514_v30, %v10644_v49  ;;  %v22862_v40 = vsel %vm10288_vm15, %v22813_v3, %v10640_v11  ;;  %v22867_v49 = vrot.slane %v10094_v51, %v22049_v53  ;;  %v10652_v16 = vsel %vm3054_vm6, %v22591_v32, %v10651_v17  ;;  %15763 = vmatpush3.bf16.msra.mxu0 %v15760_v58 }
 0x7f6   :  { %v10646_v8 = vsel %vm10285_vm13, %v22538_v44, %v10645_v26  ;;  %25764 = vst [vmem:[#allocation207_spill] sm:$0xff] %v22862_v40  ;;  %v22873_v26 = vcombine.high %v22657_v41, %v22657_v41  ;;  %v10653_v11 = vsel %vm10285_vm13, %v22594_v46, %v10652_v16  ;;  %15765 = vmatprep.subr.bf16.mxu0 %v15764_v43 }
 0x7f7   :  { %v10647_v57 = vsel %vm3056_vm8, %v22737_v14, %v10646_v8  ;;  %v25765_v8 = vld [vmem:[#allocation309_spill] sm:$0xff]  ;;  %v10654_v17 = vsel %vm3056_vm8, %v22756_v1, %v10653_v11  ;;  %v15768_v28 = vpack.c.bf16 %v10757_v31, %v10756_v61  ;;  %v10808_v58 = vsel %vm3052_vm4, %v22252_v20, %v25766_v13  ;;  %v25768_v61 = vld [vmem:[#allocation108_spill] sm:$0xff] }
 0x7f8   :  { %v10648_v33 = vsel %vm10288_vm15, %v22854_v48, %v10647_v57  ;;  %v10800_v51 = vsel %vm10279_vm11, %v22231_v42, %v25765_v8  ;;  %v22891_v57 = vsel %vm10288_vm15, %v22867_v49, %v10654_v17  ;;  %v15772_v8 = vpack.c.bf16 %v10759_v22, %v10758_v25  ;;  %15271 = vmatmul.mubr.msk.f32.vlgmr.msra.gmra.mrb[234].mxu0 %vm10311_vm14, %v22862_v40  ;;  %v25769_v11 = vld [vmem:[#allocation57_spill] sm:$0xff]  ;;  %v25771_v22 = vld [vmem:[#allocation47_spill] sm:$0xff] }
 0x7f9   :  { %v10801_v41 = vsel %vm3052_vm4, %v22149_v45, %v10800_v51  ;;  %25767 = vst [vmem:[#allocation195_spill] sm:$0xff] %v22891_v57  ;;  %v10809_v19 = vsel %vm10282_vm12, %v25749_v7, %v10808_v58  ;;  %v25770_v51 = vld [vmem:[#allocation86_spill] sm:$0xff]  ;;  %v10821_v25 = vsel %vm10279_vm11, %v22645_v56, %v22642_v2  ;;  %15273 = vmatprep.mubr.msk.f32.mxu0 %vm10311_vm14, %v10648_v33  ;;  %v10927_v40 = vld [vmem:[#allocation7 + $0xc8] sm:$0xff] }
 0x7fa   :  { %v10802_v16 = vsel %vm10282_vm12, %v22212_v9, %v10801_v41  ;;  %v10810_v13 = vsel %vm3054_vm6, %v25769_v11, %v10809_v19  ;;  %v10814_v17 = vsel %vm10279_vm11, %v22554_v35, %v25770_v51  ;;  %v25772_v41 = vld [vmem:[#allocation327_spill] sm:$0xff]  ;;  %15767 = vmatpush3.bf16.msra.mxu0 %v15764_v43  ;;  %v25776_v51 = vld [vmem:[#allocation52_spill] sm:$0xff]  ;;  %v10822_v43 = vsel %vm3052_vm4, %v22591_v32, %v10821_v25 }
 0x7fb   :  { %v10803_v31 = vsel %vm3054_vm6, %v25768_v61, %v10802_v16  ;;  %v25773_v58 = vmax.f32 %v25771_v22, %v25772_v41  ;;  %v25775_v19 = vld [vmem:[#allocation35_spill] sm:$0xff]  ;;  %v10815_v11 = vsel %vm3052_vm4, %v22514_v30, %v10814_v17  ;;  %15769 = vmatprep.subr.bf16.mxu0 %v15768_v28  ;;  %v25779_v41 = vld [vmem:[#allocation48_spill] sm:$0xff] }
 0x7fc   :  { %v10804_v16 = vsel %vm10285_vm13, %v25742_v27, %v10803_v31  ;;  %v10811_v61 = vsel %vm10285_vm13, %v25775_v19, %v10810_v13  ;;  %v10816_v33 = vsel %vm10282_vm12, %v22538_v44, %v10815_v11  ;;  %v25777_v31 = vrot.slane %v22699_v12, 9  ;;  %15274 = vmatmul.mubr.msk.f32.gmra.mrb[236].mxu0 %vm10311_vm14, %v22891_v57  ;;  %v25781_v11 = vld [vmem:[#allocation99_spill] sm:$0xff]  ;;  %v25785_v57 = vld [vmem:[#allocation129_spill] sm:$0xff] }
 0x7fd   :  { %v22912_v60 = vmax.f32 %v25773_v58, 0.0  ;;  %v10805_v2 = vsel %vm3056_vm8, %v22241_v21, %v10804_v16  ;;  %v10812_v22 = vsel %vm3056_vm8, %v25776_v51, %v10811_v61  ;;  %v10926_v58 = vld [vmem:[#allocation7 + $0xc0] sm:$0xff]  ;;  %v25780_v16 = vld [vmem:[#allocation93_spill] sm:$0xff]  ;;  %v10823_v61 = vsel %vm10282_vm12, %v22594_v46, %v10822_v43 }
 0x7fe   :  { %v22932_v13 = vmax.f32 %v22699_v12, %v25777_v31  ;;  %v10813_v17 = vsel %vm10288_vm15, %v25779_v41, %v10812_v22  ;;  %v10806_v25 = vsel %vm10288_vm15, %v22244_v62, %v10805_v2  ;;  %v10824_v22 = vsel %vm3054_vm6, %v25781_v11, %v10823_v61  ;;  %15771 = vmatpush3.bf16.msra.mxu0 %v15768_v28 }
 0x7ff   :  { %25774 = vst [vmem:[#allocation215_spill] sm:$0xff] %v22912_v60  ;;  %v10817_v60 = vsel %vm3054_vm6, %v25780_v16, %v10816_v33  ;;  %v10942_v31 = vsel %vm10279_vm11, %v22149_v45, %v22231_v42  ;;  %v25782_v33 = vld [vmem:[#allocation95_spill] sm:$0xff]  ;;  %v25783_v16 = vld [vmem:[#allocation133_spill] sm:$0xff]  ;;  %15288 = vmatprep.mubr.msk.f32.mxu0 %vm10311_vm14, %v10806_v25  ;;  %15773 = vmatprep.subr.bf16.mxu0 %v15772_v8 }
 0x800   :  { %25778 = vst [vmem:[#allocation204_spill] sm:$0xff] %v22932_v13  ;;  %v10818_v12 = vsel %vm10285_vm13, %v22524_v47, %v10817_v60  ;;  %v25784_v13 = vmax.f32 %v25782_v33, %v25783_v16  ;;  %v10825_v60 = vsel %vm10285_vm13, %v25785_v57, %v10824_v22  ;;  %v10943_v61 = vsel %vm3052_vm4, %v22212_v9, %v10942_v31 }
 0x801   :  { %v10819_v2 = vsel %vm3056_vm8, %v22571_v4, %v10818_v12  ;;  %v15776_v42 = vpack.c.bf16 %v10927_v40, %v10926_v58  ;;  %v10826_v28 = vsel %vm3056_vm8, %v22674_v39, %v10825_v60  ;;  %v25786_v25 = vmax.f32 %v22649_v0, %v22654_v59 }
 0x802   :  { %v10099_v43 = vmax.f32 %v25784_v13, 0.0  ;;  %v10820_v11 = vsel %vm10288_vm15, %v22576_v54, %v10819_v2  ;;  %v10944_v13 = vsel %vm10282_vm12, %v22705_v50, %v10943_v61  ;;  %v10827_v22 = vsel %vm10288_vm15, %v22716_v10, %v10826_v28  ;;  %15775 = vmatpush3.bf16.msra.mxu0 %v15772_v8  ;;  %v10931_v8 = vld [vmem:[#allocation7 + $0xe8] sm:$0xff] }
 0x803   :  { %v22970_v12 = vmax.f32 %v25786_v25, 0.0  ;;  %v10945_v40 = vsel %vm3054_vm6, %v25742_v27, %v10944_v13  ;;  %v10949_v58 = vsel %vm10279_vm11, %v22252_v20, %v22323_v52  ;;  %v15780_v31 = vpack.c.bf16 %v10929_v29, %v10928_v15  ;;  %15777 = vmatprep.subr.bf16.mxu0 %v15776_v42 }
 0x804   :  { %v10946_v33 = vsel %vm10285_vm13, %v22241_v21, %v10945_v40  ;;  %v10950_v16 = vsel %vm3052_vm4, %v25749_v7, %v10949_v58  ;;  %v10956_v59 = vsel %vm10279_vm11, %v22514_v30, %v22554_v35  ;;  %v10963_v52 = vsel %vm10279_vm11, %v22591_v32, %v22645_v56  ;;  %v10930_v7 = vld [vmem:[#allocation7 + $0xe0] sm:$0xff]  ;;  %v11068_v58 = vld [vmem:[#allocation7 + $0xf0] sm:$0xff] }
 0x805   :  { %v10947_v0 = vsel %vm3056_vm8, %v22244_v62, %v10946_v33  ;;  %v10951_v27 = vsel %vm10282_vm12, %v25751_v36, %v10950_v16  ;;  %v10957_v20 = vsel %vm3052_vm4, %v22538_v44, %v10956_v59  ;;  %v10964_v36 = vsel %vm3052_vm4, %v22594_v46, %v10963_v52  ;;  %15289 = vmatmul.mubr.msk.f32.vlgmr.msra.gmra.mrb[234].mxu0 %vm10311_vm14, %v10813_v17  ;;  %v25787_v40 = vld [vmem:[#allocation70_spill] sm:$0xff]  ;;  %v11069_v33 = vld [vmem:[#allocation7 + $0xf8] sm:$0xff] }
 0x806   :  { %v10948_v15 = vsel %vm10288_vm15, %v25746_v18, %v10947_v0  ;;  %v10952_v35 = vsel %vm3054_vm6, %v25775_v19, %v10951_v27  ;;  %v10958_v29 = vsel %vm10282_vm12, %v22737_v14, %v10957_v20  ;;  %v23008_v60 = vrot.slane %v10099_v43, %v22049_v53  ;;  %15291 = vmatprep.mubr.msk.f32.mxu0 %vm10311_vm14, %v10820_v11  ;;  %v25788_v20 = vld [vmem:[#allocation199_spill] sm:$0xff] }
 0x807   :  { %v10953_v2 = vsel %vm10285_vm13, %v25776_v51, %v10952_v35  ;;  %v10959_v56 = vsel %vm3054_vm6, %v22524_v47, %v10958_v29  ;;  %v10965_v61 = vsel %vm10282_vm12, %v22756_v1, %v10964_v36  ;;  %v11084_v47 = vsel %vm10279_vm11, %v22212_v9, %v22149_v45  ;;  %15779 = vmatpush3.bf16.msra.mxu0 %v15776_v42  ;;  %v25789_v35 = vld [vmem:[#allocation325_spill] sm:$0xff] }
 0x808   :  { %v10954_v28 = vsel %vm3056_vm8, %v25779_v41, %v10953_v2  ;;  %v10960_v13 = vsel %vm10285_vm13, %v22571_v4, %v10959_v56  ;;  %v10966_v25 = vsel %vm3054_vm6, %v25785_v57, %v10965_v61  ;;  %v13261_v43 = vrot.slane %v22873_v26, 9  ;;  %15781 = vmatprep.subr.bf16.mxu0 %v15780_v31  ;;  %v11070_v56 = vld [vmem:[#allocation7 + $0x100] sm:$0xff]  ;;  %v11071_v61 = vld [vmem:[#allocation7 + $0x108] sm:$0xff] }
 0x809   :  { %v10955_v17 = vsel %vm10288_vm15, %v25787_v40, %v10954_v28  ;;  %v10961_v16 = vsel %vm3056_vm8, %v22576_v54, %v10960_v13  ;;  %v10967_v59 = vsel %vm10285_vm13, %v22674_v39, %v10966_v25  ;;  %v15784_v0 = vpack.c.bf16 %v10931_v8, %v10930_v7  ;;  %15292 = vmatmul.mubr.msk.f32.gmra.mrb[236].mxu0 %vm10311_vm14, %v10827_v22 }
 0x80a   :  { %v10962_v45 = vsel %vm10288_vm15, %v22580_v23, %v10961_v16  ;;  %v10968_v9 = vsel %vm3056_vm8, %v22716_v10, %v10967_v59  ;;  %v11085_v42 = vsel %vm3052_vm4, %v22705_v50, %v11084_v47  ;;  %v23044_v52 = vrot.slane %v25788_v20, %v22049_v53  ;;  %15306 = vmatprep.mubr.msk.f32.mxu0 %vm10311_vm14, %v10948_v15 }
 0x80b   :  { %v23038_v11 = vsel %vm10288_vm15, %v23008_v60, %v10968_v9  ;;  %v11086_v27 = vsel %vm10282_vm12, %v22801_v38, %v11085_v42  ;;  %v11093_v29 = vsel %vm10282_vm12, %v22813_v3, %v25789_v35  ;;  %v15788_v36 = vpack.c.bf16 %v11069_v33, %v11068_v58  ;;  %15783 = vmatpush3.bf16.msra.mxu0 %v15780_v31  ;;  %v25794_v58 = vld [vmem:[#allocation135_spill] sm:$0xff]  ;;  %v25795_v33 = vld [vmem:[#allocation134_spill] sm:$0xff]  ;;  %v25797_v42 = vld [vmem:[#allocation76_spill] sm:$0xff] }
 0x80c   :  { %v11087_v50 = vsel %vm3054_vm6, %v22241_v21, %v11086_v27  ;;  %v11094_v7 = vsel %vm3054_vm6, %v25776_v51, %v11093_v29  ;;  %v11098_v38 = vsel %vm10279_vm11, %v22538_v44, %v22514_v30  ;;  %v25790_v8 = vmax.f32 %v22659_v63, %v22679_v24  ;;  %15785 = vmatprep.subr.bf16.mxu0 %v15784_v0  ;;  %v11210_v29 = vld [vmem:[#allocation7 + $0x120] sm:$0xff] }
 0x80d   :  { %v11088_v3 = vsel %vm10285_vm13, %v22244_v62, %v11087_v50  ;;  %v11095_v21 = vsel %vm10285_vm13, %v25779_v41, %v11094_v7  ;;  %v11099_v22 = vsel %vm3052_vm4, %v22737_v14, %v11098_v38  ;;  %v25791_v62 = vld [vmem:[#allocation114_spill] sm:$0xff]  ;;  %v23094_v25 = vmax.f32 %v22873_v26, %v13261_v43  ;;  %v11072_v26 = vld [vmem:[#allocation7 + $0x110] sm:$0xff]  ;;  %v11073_v43 = vld [vmem:[#allocation7 + $0x118] sm:$0xff] }
 0x80e   :  { %v10101_v2 = vmax.f32 %v25790_v8, 0.0  ;;  %v11089_v30 = vsel %vm3056_vm8, %v25746_v18, %v11088_v3  ;;  %v11096_v44 = vsel %vm3056_vm8, %v25787_v40, %v11095_v21  ;;  %v11100_v63 = vsel %vm10282_vm12, %v22854_v48, %v11099_v22  ;;  %v11211_v50 = vld [vmem:[#allocation7 + $0x128] sm:$0xff]  ;;  %v25799_v7 = vld [vmem:[#allocation85_spill] sm:$0xff]  ;;  %v25802_v22 = vld [vmem:[#allocation130_spill] sm:$0xff] }
 0x80f   :  { %v10028_v24 = vmax.f32 %v25791_v62, %v22671_v6  ;;  %v11090_v31 = vsel %vm10288_vm15, %v25758_v5, %v11089_v30  ;;  %v23079_v14 = vsel %vm10288_vm15, %v23044_v52, %v11096_v44  ;;  %v11101_v15 = vsel %vm3054_vm6, %v22571_v4, %v11100_v63  ;;  %15787 = vmatpush3.bf16.msra.mxu0 %v15784_v0  ;;  %v25796_v0 = vld [vmem:[#allocation162_spill] sm:$0xff]  ;;  %v25801_v21 = vld [vmem:[#allocation131_spill] sm:$0xff]  ;;  %v11212_v63 = vld [vmem:[#allocation7 + $0x130] sm:$0xff] }
 0x810   :  { %v11105_v18 = vsel %vm10279_vm11, %v22594_v46, %v22591_v32  ;;  %v25792_v48 = vmax.f32 %v22661_v37, %v22691_v55  ;;  %v11102_v6 = vsel %vm10285_vm13, %v22576_v54, %v11101_v15  ;;  %v15792_v4 = vpack.c.bf16 %v11071_v61, %v11070_v56  ;;  %15789 = vmatprep.subr.bf16.mxu0 %v15788_v36  ;;  %v25793_v55 = vld [vmem:[#allocation26_spill] sm:$0xff]  ;;  %v11213_v62 = vld [vmem:[#allocation7 + $0x138] sm:$0xff] }
 0x811   :  { %v10100_v13 = vmax.f32 %v10028_v24, 0.0  ;;  %v11106_v5 = vsel %vm3052_vm4, %v22756_v1, %v11105_v18  ;;  %v11103_v47 = vsel %vm3056_vm8, %v22580_v23, %v11102_v6  ;;  %v11257_v1 = vsel %vm3052_vm4, %v25776_v51, %v25793_v55 }
 0x812   :  { %v10102_v28 = vmax.f32 %v25792_v48, 0.0  ;;  %v11107_v32 = vsel %vm10282_vm12, %v22867_v49, %v11106_v5  ;;  %v23102_v46 = vsel %vm10288_vm15, %v25763_v34, %v11103_v47  ;;  %v11243_v23 = vrot.slane %v10101_v2, %v22049_v53  ;;  %15307 = vmatmul.mubr.msk.f32.vlgmr.msra.gmra.mrb[234].mxu0 %vm10311_vm14, %v10955_v17  ;;  %v25800_v2 = vld [vmem:[#allocation115_spill] sm:$0xff] }
 0x813   :  { %v23105_v54 = vrot.slane %v10100_v13, %v22049_v53  ;;  %v11108_v37 = vsel %vm3054_vm6, %v22674_v39, %v11107_v32  ;;  %v11258_v34 = vsel %vm10282_vm12, %v25779_v41, %v11257_v1  ;;  %v10032_v16 = vmax.f32 %v25795_v33, %v25794_v58  ;;  %15309 = vmatprep.mubr.msk.f32.mxu0 %vm10311_vm14, %v10962_v45  ;;  %v25807_v33 = vld [vmem:[#allocation77_spill] sm:$0xff] }
 0x814   :  { %v11109_v49 = vsel %vm10285_vm13, %v22716_v10, %v11108_v37  ;;  %v11239_v9 = vrot.slane %v25796_v0, %v22049_v53  ;;  %v25798_v27 = vrot.slane %v25797_v42, %v22049_v53  ;;  %v11247_v35 = vrot.slane %v10102_v28, %v22049_v53  ;;  %15791 = vmatpush3.bf16.msra.mxu0 %v15788_v36  ;;  %v25804_v36 = vld [vmem:[#allocation53_spill] sm:$0xff] }
 0x815   :  { %v11110_v59 = vsel %vm3056_vm8, %v23008_v60, %v11109_v49  ;;  %v10104_v8 = vmax.f32 %v10032_v16, 0.0  ;;  %v11264_v3 = vsel %vm3052_vm4, %v22674_v39, %v25800_v2  ;;  %v25803_v56 = vmax.f32 %v25801_v21, %v25802_v22  ;;  %15793 = vmatprep.subr.bf16.mxu0 %v15792_v4  ;;  %v11366_v21 = vld [vmem:[#allocation7 + $0x160] sm:$0xff]  ;;  %v11367_v22 = vld [vmem:[#allocation7 + $0x168] sm:$0xff] }
 0x816   :  { %v11259_v20 = vsel %vm3054_vm6, %v25798_v27, %v11258_v34  ;;  %v23132_v17 = vsel %vm10288_vm15, %v23105_v54, %v11110_v59  ;;  %v15796_v45 = vpack.c.bf16 %v11073_v43, %v11072_v26  ;;  %v11265_v44 = vsel %vm10282_vm12, %v22716_v10, %v11264_v3  ;;  %15310 = vmatmul.mubr.msk.f32.gmra.mrb[236].mxu0 %vm10311_vm14, %v23038_v11  ;;  %v25806_v34 = vld [vmem:[#allocation204_spill] sm:$0xff] }
 0x817   :  { %v11260_v38 = vsel %vm10285_vm13, %v25799_v7, %v11259_v20  ;;  %v10105_v61 = vmax.f32 %v25803_v56, 0.0  ;;  %v11251_v15 = vrot.slane %v22970_v12, %v22049_v53  ;;  %v11266_v18 = vsel %vm3054_vm6, %v11243_v23, %v11265_v44  ;;  %15324 = vmatprep.mubr.msk.f32.mxu0 %vm10311_vm14, %v11090_v31  ;;  %v11214_v20 = vld [vmem:[#allocation7 + $0x140] sm:$0xff]  ;;  %v11489_v44 = vld [vmem:[#allocation7 + $0x188] sm:$0xff] }
 0x818   :  { %v11261_v30 = vsel %vm3056_vm8, %v25804_v36, %v11260_v38  ;;  %v11380_v48 = vsel %vm10279_vm11, %v25776_v51, %v25775_v19  ;;  %v15800_v28 = vpack.c.bf16 %v11211_v50, %v11210_v29  ;;  %v11255_v6 = vrot.slane %v10104_v8, %v22049_v53  ;;  %15795 = vmatpush3.bf16.msra.mxu0 %v15792_v4  ;;  %v11365_v8 = vld [vmem:[#allocation7 + $0x158] sm:$0xff] }
 0x819   :  { %v23147_v24 = vsel %vm10288_vm15, %v11239_v9, %v11261_v30  ;;  %v11267_v13 = vsel %vm10285_vm13, %v11247_v35, %v11266_v18  ;;  %v11381_v5 = vsel %vm3052_vm4, %v25779_v41, %v11380_v48  ;;  %v11387_v19 = vsel %vm10279_vm11, %v22674_v39, %v25785_v57  ;;  %15797 = vmatprep.subr.bf16.mxu0 %v15796_v45  ;;  %v25805_v57 = vld [vmem:[#allocation215_spill] sm:$0xff]  ;;  %v11488_v30 = vld [vmem:[#allocation7 + $0x180] sm:$0xff]  ;;  %v11491_v18 = vld [vmem:[#allocation7 + $0x198] sm:$0xff] }
 0x81a   :  { %v11268_v12 = vsel %vm3056_vm8, %v11251_v15, %v11267_v13  ;;  %v11382_v47 = vsel %vm10282_vm12, %v25787_v40, %v11381_v5  ;;  %v15804_v11 = vpack.c.bf16 %v11213_v62, %v11212_v63  ;;  %v11388_v4 = vsel %vm3052_vm4, %v22716_v10, %v11387_v19  ;;  %v25810_v63 = vld [vmem:[#allocation152_spill] sm:$0xff]  ;;  %v11492_v48 = vld [vmem:[#allocation7 + $0x1a0] sm:$0xff]  ;;  %v11611_v5 = vld [vmem:[%s23510_s8] sm:$0xff] }
 0x81b   :  { %v11269_v32 = vsel %vm10288_vm15, %v11255_v6, %v11268_v12  ;;  %v11383_v37 = vsel %vm3054_vm6, %v25799_v7, %v11382_v47  ;;  %v11379_v55 = vrot.slane %v10105_v61, %v22049_v53  ;;  %v11389_v1 = vsel %vm10282_vm12, %v23008_v60, %v11388_v4  ;;  %v11368_v61 = vld [vmem:[#allocation7 + $0x170] sm:$0xff]  ;;  %v11612_v12 = vld [vmem:[%s23510_s8 + $0x8] sm:$0xff]  ;;  %v25812_v47 = vld [vmem:[#allocation207_spill] sm:$0xff] }
 0x81c   :  { %v11384_v31 = vsel %vm10285_vm13, %v25804_v36, %v11383_v37  ;;  %v11499_v23 = vrot.slane %v25805_v57, %v22049_v53  ;;  %v11390_v43 = vsel %vm3054_vm6, %v11247_v35, %v11389_v1  ;;  %v11504_v49 = vsel %vm10279_vm11, %v25779_v41, %v25776_v51  ;;  %15799 = vmatpush3.bf16.msra.mxu0 %v15796_v45  ;;  %v11215_v35 = vld [vmem:[#allocation7 + $0x148] sm:$0xff]  ;;  %v11369_v45 = vld [vmem:[#allocation7 + $0x178] sm:$0xff] }
 0x81d   :  { %v11385_v26 = vsel %vm3056_vm8, %v11239_v9, %v11384_v31  ;;  %v10034_v58 = vmax.f32 %v23094_v25, %v25806_v34  ;;  %v11391_v59 = vsel %vm10285_vm13, %v11251_v15, %v11390_v43  ;;  %v11505_v0 = vsel %vm3052_vm4, %v25787_v40, %v11504_v49  ;;  %15801 = vmatprep.subr.bf16.mxu0 %v15800_v28  ;;  %v11615_v4 = vld [vmem:[%s23510_s8 + $0x20] sm:$0xff]  ;;  %v11616_v31 = vld [vmem:[%s23510_s8 + $0x28] sm:$0xff]  ;;  %v11617_v57 = vld [vmem:[%s23510_s8 + $0x30] sm:$0xff] }
 0x81e   :  { %v11386_v16 = vsel %vm10288_vm15, %v25807_v33, %v11385_v26  ;;  %v11511_v42 = vsel %vm10279_vm11, %v22716_v10, %v22674_v39  ;;  %v11392_v27 = vsel %vm3056_vm8, %v11255_v6, %v11391_v59  ;;  %v11506_v51 = vsel %vm10282_vm12, %v23044_v52, %v11505_v0  ;;  %v11717_v43 = vld [vmem:[%s23511_s9] sm:$0xff]  ;;  %v11718_v49 = vld [vmem:[%s23511_s9 + $0x8] sm:$0xff]  ;;  %v11720_v59 = vld [vmem:[%s23511_s9 + $0x18] sm:$0xff] }
 0x81f   :  { %v10106_v41 = vmax.f32 %v10034_v58, 0.0  ;;  %v11512_v25 = vsel %vm3052_vm4, %v23008_v60, %v11511_v42  ;;  %v11393_v29 = vsel %vm10288_vm15, %v11379_v55, %v11392_v27  ;;  %v11507_v40 = vsel %vm3054_vm6, %v25804_v36, %v11506_v51  ;;  %15325 = vmatmul.mubr.msk.f32.vlgmr.msra.gmra.mrb[234].mxu0 %vm10311_vm14, %v23079_v14  ;;  %v25809_v36 = vld [vmem:[#allocation156_spill] sm:$0xff]  ;;  %v13268_v58 = vld [vmem:[#allocation4 + $0x3] ss:$0 sm:$0xff] }
 0x820   :  { %v11513_v39 = vsel %vm10282_vm12, %v23105_v54, %v11512_v25  ;;  %v11508_v10 = vsel %vm10285_vm13, %v11239_v9, %v11507_v40  ;;  %15327 = vmatprep.mubr.msk.f32.mxu0 %vm10311_vm14, %v23102_v46  ;;  %15803 = vmatpush3.bf16.msra.mxu0 %v15800_v28  ;;  %v15808_v54 = vpack.c.bf16 %v11215_v35, %v11214_v20  ;;  %v11364_v9 = vld [vmem:[#allocation7 + $0x150] sm:$0xff]  ;;  %v11493_v28 = vld [vmem:[#allocation7 + $0x1a8] sm:$0xff]  ;;  %v11721_v25 = vld [vmem:[%s23511_s9 + $0x20] sm:$0xff] }
 0x821   :  { %v11503_v52 = vrot.slane %v10106_v41, %v22049_v53  ;;  %v11514_v50 = vsel %vm3054_vm6, %v11251_v15, %v11513_v39  ;;  %v11509_v60 = vsel %vm3056_vm8, %v25807_v33, %v11508_v10  ;;  %15805 = vmatprep.subr.bf16.mxu0 %v15804_v11  ;;  %v25808_v46 = vld [vmem:[#allocation68_spill] sm:$0xff]  ;;  %v15812_v3 = vpack.c.bf16 %v11365_v8, %v11364_v9  ;;  %v11722_v20 = vld [vmem:[%s23511_s9 + $0x28] sm:$0xff]  ;;  %v11723_v10 = vld [vmem:[%s23511_s9 + $0x30] sm:$0xff] }
 0x822   :  { %v11515_v7 = vsel %vm10285_vm13, %v11255_v6, %v11514_v50  ;;  %v11510_v38 = vsel %vm10288_vm15, %v11499_v23, %v11509_v60  ;;  %v15816_v56 = vpack.c.bf16 %v11367_v22, %v11366_v21  ;;  %v15824_v62 = vpack.c.bf16 %v11489_v44, %v11488_v30  ;;  %v11490_v15 = vld [vmem:[#allocation7 + $0x190] sm:$0xff]  ;;  %v25811_v6 = vld [vmem:[#allocation163_spill] sm:$0xff]  ;;  %v25816_v30 = vld [vmem:[#allocation13_spill] sm:$0xff] }
 0x823   :  { %v11516_v14 = vsel %vm3056_vm8, %v11379_v55, %v11515_v7  ;;  %15328 = vmatmul.mubr.msk.f32.gmra.mrb[236].mxu0 %vm10311_vm14, %v23132_v17  ;;  %v15820_v17 = vpack.c.bf16 %v11369_v45, %v11368_v61  ;;  %v15832_v13 = vpack.c.bf16 %v11493_v28, %v11492_v48  ;;  %v15836_v19 = vpack.c.bf16 %v11612_v12, %v11611_v5  ;;  %v25813_v55 = vld [vmem:[#allocation195_spill] sm:$0xff]  ;;  %v11618_v23 = vld [vmem:[%s23510_s8 + $0x38] sm:$0xff] }
 0x824   :  { %v11517_v2 = vsel %vm10288_vm15, %v11503_v52, %v11516_v14  ;;  %15807 = vmatpush3.bf16.msra.mxu0 %v15804_v11  ;;  %15342 = vmatprep.mubr.msk.f32.mxu0 %vm10311_vm14, %v25808_v46  ;;  %v11613_v11 = vld [vmem:[%s23510_s8 + $0x10] sm:$0xff]  ;;  %v15844_v1 = vpack.c.bf16 %v11616_v31, %v11615_v4  ;;  %v15848_v26 = vpack.c.bf16 %v11618_v23, %v11617_v57  ;;  %v11724_v52 = vld [vmem:[%s23511_s9 + $0x38] sm:$0xff]  ;;  %v25814_v60 = vmov 0.0|0.0  }
 0x825   :  { %15809 = vmatprep.subr.bf16.mxu0 %v15808_v54  ;;  %v15852_v34 = vpack.c.bf16 %v11718_v49, %v11717_v43  ;;  %v15860_v39 = vpack.c.bf16 %v11722_v20, %v11721_v25  ;;  %v15864_v50 = vpack.c.bf16 %v11724_v52, %v11723_v10  ;;  %v25815_v7 = vmov 0.0   ;;  %v11992_v14 = vld [vmem:[%s23512_s10 + $0x10] sm:$0xff]  ;;  %v11993_v8 = vld [vmem:[%s23512_s10 + $0x18] sm:$0xff] }
 0x828   :  { %15811 = vmatpush3.bf16.msra.mxu0 %v15808_v54  ;;  %v11990_v54 = vld [vmem:[%s23512_s10] sm:$0xff] }
 0x829   :  { %15813 = vmatprep.subr.bf16.mxu0 %v15812_v3 }
 0x82b   :  { %15343 = vmatmul.mubr.msk.f32.vlgmr.msra.gmra.mrb[234].mxu0 %vm10311_vm14, %v23147_v24  ;;  %v15828_v24 = vpack.c.bf16 %v11491_v18, %v11490_v15 }
 0x82c   :  { %15345 = vmatprep.mubr.msk.f32.mxu0 %vm10311_vm14, %v25809_v36  ;;  %15815 = vmatpush3.bf16.msra.mxu0 %v15812_v3 }
 0x82d   :  { %15817 = vmatprep.subr.bf16.mxu0 %v15816_v56 }
 0x82f   :  { %15346 = vmatmul.mubr.msk.f32.gmra.mrb[236].mxu0 %vm10311_vm14, %v11269_v32  ;;  %v11614_v32 = vld [vmem:[%s23510_s8 + $0x18] sm:$0xff] }
 0x830   :  { %15819 = vmatpush3.bf16.msra.mxu0 %v15816_v56  ;;  %15360 = vmatprep.mubr.msk.f32.mxu0 %vm10311_vm14, %v25810_v63  ;;  %v15840_v37 = vpack.c.bf16 %v11614_v32, %v11613_v11 }
 0x831   :  { %15821 = vmatprep.subr.bf16.mxu0 %v15820_v17 }
 0x834   :  { %15823 = vmatpush3.bf16.msra.mxu0 %v15820_v17 }
 0x835   :  { %15825 = vmatprep.subr.bf16.mxu0 %v15824_v62 }
 0x837   :  { %15361 = vmatmul.mubr.msk.f32.vlgmr.msra.gmra.mrb[234].mxu0 %vm10311_vm14, %v11386_v16  ;;  %v11719_v16 = vld [vmem:[%s23511_s9 + $0x10] sm:$0xff] }
 0x838   :  { %15363 = vmatprep.mubr.msk.f32.mxu0 %vm10311_vm14, %v25811_v6  ;;  %15827 = vmatpush3.bf16.msra.mxu0 %v15824_v62  ;;  %v15856_v51 = vpack.c.bf16 %v11720_v59, %v11719_v16 }
 0x839   :  { %15829 = vmatprep.subr.bf16.mxu0 %v15828_v24 }
 0x83b   :  { %15364 = vmatmul.mubr.msk.f32.gmra.mrb[236].mxu0 %vm10311_vm14, %v11393_v29 }
 0x83c   :  { %15831 = vmatpush3.bf16.msra.mxu0 %v15828_v24  ;;  %15378 = vmatprep.mubr.msk.f32.mxu0 %vm10311_vm14, %v25812_v47 }
 0x83d   :  { %15833 = vmatprep.subr.bf16.mxu0 %v15832_v13 }
 0x840   :  { %15835 = vmatpush3.bf16.msra.mxu0 %v15832_v13 }
 0x841   :  { %15837 = vmatprep.subr.bf16.mxu0 %v15836_v19 }
 0x843   :  { %15379 = vmatmul.mubr.msk.f32.vlgmr.msra.gmra.mrb[234].mxu0 %vm10311_vm14, %v11510_v38  ;;  %v11991_v38 = vld [vmem:[%s23512_s10 + $0x8] sm:$0xff] }
 0x844   :  { %15381 = vmatprep.mubr.msk.f32.mxu0 %vm10311_vm14, %v25813_v55  ;;  %15839 = vmatpush3.bf16.msra.mxu0 %v15836_v19  ;;  %v15869_v9 = vpack.c.bf16 %v11991_v38, %v11990_v54 }
 0x845   :  { %15841 = vmatprep.subr.bf16.mxu0 %v15840_v37 }
 0x847   :  { %15382 = vmatmul.mubr.msk.f32.gmra.mrb[236].mxu0 %vm10311_vm14, %v11517_v2  ;;  %v15872_v2 = vpack.c.bf16 %v11993_v8, %v11992_v14 }
 0x848   :  { %15843 = vmatpush3.bf16.msra.mxu0 %v15840_v37 }
 0x849   :  { %15845 = vmatprep.subr.bf16.mxu0 %v15844_v1 }
 0x84c   :  { %15847 = vmatpush3.bf16.msra.mxu0 %v15844_v1 }
 0x84d   :  { %15849 = vmatprep.subr.bf16.mxu0 %v15848_v26 }
 0x850   :  { %15851 = vmatpush3.bf16.msra.mxu0 %v15848_v26 }
 0x851   :  { %15853 = vmatprep.subr.bf16.mxu0 %v15852_v34 }
 0x916   :  { %v15380_v33 = vpop.f32.mrb[234].mxu0 }
 0x917   :  { %v11588_v0 = vpop.f32.mrb[235].mxu0  ;;  %v15984_v27 = vadd.f32 %v15380_v33, %v13268_v58 }
 0x918   :  { %v15985_v42 = vadd.f32 %v13268_v58, %v11588_v0 }
 0x91a   :  { %v15383_v41 = vpop.f32.mrb[236].mxu0  ;;  %15400 = vmatprep.mubr.msk.f32.mxu0 %vm11619_vm1, %v15985_v42 }
 0x91b   :  { %v11598_v35 = vpop.f32.mrb[237].mxu0  ;;  %15401 = vmatmul.mubr.msk.f32.vlgmr.msra.gmra.mrb[238].mxu0 %vm11619_vm1, %v15984_v27  ;;  %v15986_v40 = vadd.f32 %v15383_v41, %v13268_v58 }
 0x91c   :  { %v15987_v29 = vadd.f32 %v13268_v58, %v11598_v35  ;;  %15855 = vmatpush3.bf16.msra.mxu0 %v15852_v34 }
 0x91d   :  { %15857 = vmatprep.subr.bf16.mxu0 %v15856_v51 }
 0x91e   :  { %15403 = vmatprep.mubr.msk.f32.mxu0 %vm11619_vm1, %v15987_v29 }
 0x91f   :  { %15404 = vmatmul.mubr.msk.f32.gmra.mrb[240].mxu0 %vm11619_vm1, %v15986_v40 }
 0x920   :  { %15859 = vmatpush3.bf16.msra.mxu0 %v15856_v51  ;;  %15422 = vmatprep.mubr.msk.f32.mxu0 %vm11619_vm1, %v15985_v42 }
 0x921   :  { %15861 = vmatprep.subr.bf16.mxu0 %v15860_v39 }
 0x924   :  { %15863 = vmatpush3.bf16.msra.mxu0 %v15860_v39 }
 0x925   :  { %15865 = vmatprep.subr.bf16.mxu0 %v15864_v50 }
 0x928   :  { %15867 = vmatpush3.bf16.msra.mxu0 %v15864_v50 }
 0x929   :  { %15868 = vmatprep.subr.bf16.mxu0 %v25814_v60 }
 0x92b   :  { %15423 = vmatmul.mubr.msk.f32.vlgmr.msra.gmra.mrb[242].mxu0 %vm11619_vm1, %v15984_v27 }
 0x92c   :  { %15425 = vmatprep.mubr.msk.f32.mxu0 %vm11619_vm1, %v15987_v29  ;;  %15870 = vmatpush3.bf16.msra.mxu0 %v15869_v9 }
 0x92d   :  { %15871 = vmatprep.subr.bf16.mxu0 %v25814_v60 }
 0x92f   :  { %15426 = vmatmul.mubr.msk.f32.gmra.mrb[244].mxu0 %vm11619_vm1, %v15986_v40 }
 0x930   :  { %15436 = vmatprep.mubr.msk.f32.mxu0 %vm16433_vm0, %v25815_v7  ;;  %15873 = vmatpush3.bf16.msra.mxu0 %v15872_v2 }
 0x931   :  { %15874 = vmatprep.subr.bf16.mxu0 %v25814_v60 }
 0x9ee   :  { %v15402_v46 = vpop.f32.mrb[238].mxu0 }
 0x9ef   :  { %v11698_v3 = vpop.f32.mrb[239].mxu0 }
 0x9f2   :  { %v15405_v21 = vpop.f32.mrb[240].mxu0 }
 0x9f3   :  { %v11708_v22 = vpop.f32.mrb[241].mxu0 }
 0x9fe   :  { %v15424_v56 = vpop.f32.mrb[242].mxu0 }
 0x9ff   :  { %v11811_v61 = vmax.f32 %v15402_v46, %v15424_v56  ;;  %v11791_v45 = vpop.f32.mrb[243].mxu0 }
 0xa00   :  { %v11810_v36 = vmax.f32 %v11698_v3, %v11791_v45 }
 0xa01   :  { %v11835_v17 = vcombine.high %v11811_v61, %v11811_v61  ;;  %v11842_v44 = vrot.slane %v11811_v61, %v25816_v30 }
 0xa02   :  { %v11818_v63 = vcombine.high %v11810_v36, %v11810_v36  ;;  %v15427_v62 = vpop.f32.mrb[244].mxu0  ;;  %v11825_v24 = vrot.slane %v11810_v36, %v25816_v30 }
 0xa03   :  { %v11849_v15 = vrot.slane %v11835_v17, %v25816_v30  ;;  %v11850_v18 = vcombine.high %v11842_v44, %v11842_v44  ;;  %v11813_v48 = vmax.f32 %v15405_v21, %v15427_v62  ;;  %v11801_v28 = vpop.f32.mrb[245].mxu0  ;;  %v13317_v6 = vrot.slane %v11842_v44, 9 }
 0xa04   :  { %v11832_v13 = vrot.slane %v11818_v63, %v25816_v30  ;;  %v11812_v5 = vmax.f32 %v11708_v22, %v11801_v28  ;;  %v11833_v4 = vcombine.high %v11825_v24, %v11825_v24  ;;  %v13313_v1 = vrot.slane %v11825_v24, 9 }
 0xa05   :  { %v11851_v12 = vcombine.high %v11849_v15, %v11849_v15  ;;  %v13318_v47 = vrot.slane %v11850_v18, 9  ;;  %v13319_v19 = vrot.slane %v11849_v15, 9  ;;  %v11869_v31 = vcombine.high %v11813_v48, %v11813_v48 }
 0xa06   :  { %v11834_v11 = vcombine.high %v11832_v13, %v11832_v13  ;;  %v11954_v55 = vmax.f32 %v11842_v44, %v13317_v6  ;;  %v13315_v57 = vrot.slane %v11832_v13, 9  ;;  %v11876_v23 = vrot.slane %v11813_v48, %v25816_v30  ;;  %v13331_v6 = vld [vmem:[%s23512_s10 + $0x20] sm:$0xff] }
 0xa07   :  { %v13320_v32 = vrot.slane %v11851_v12, 9  ;;  %v11956_v37 = vmax.f32 %v11849_v15, %v13319_v19  ;;  %v11955_v26 = vmax.f32 %v11850_v18, %v13318_v47  ;;  %v11883_v34 = vrot.slane %v11869_v31, %v25816_v30 }
 0xa08   :  { %v13316_v49 = vrot.slane %v11834_v11, 9  ;;  %v11884_v33 = vcombine.high %v11876_v23, %v11876_v23  ;;  %v13325_v16 = vrot.slane %v11876_v23, 9  ;;  %v11852_v59 = vcombine.high %v11812_v5, %v11812_v5 }
 0xa09   :  { %v11957_v43 = vmax.f32 %v11851_v12, %v13320_v32  ;;  %v11968_v58 = vmax.f32 %v11954_v55, %v11956_v37  ;;  %v13314_v0 = vrot.slane %v11833_v4, 9  ;;  %v11885_v42 = vcombine.high %v11883_v34, %v11883_v34 }
 0xa0a   :  { %v13327_v27 = vrot.slane %v11883_v34, 9  ;;  %v11950_v41 = vmax.f32 %v11825_v24, %v13313_v1  ;;  %v11952_v25 = vmax.f32 %v11832_v13, %v13315_v57  ;;  %v13326_v20 = vrot.slane %v11884_v33, 9  ;;  %v13332_v13 = vld [vmem:[%s23512_s10 + $0x28] sm:$0xff]  ;;  %v13333_v57 = vld [vmem:[%s23512_s10 + $0x30] sm:$0xff] }
 0xa0b   :  { %v11969_v51 = vmax.f32 %v11955_v26, %v11957_v43  ;;  %v13328_v35 = vrot.slane %v11885_v42, 9  ;;  %v11962_v29 = vmax.f32 %v11876_v23, %v13325_v16  ;;  %v11859_v39 = vrot.slane %v11812_v5, %v25816_v30  ;;  %v13334_v23 = vld [vmem:[%s23512_s10 + $0x38] sm:$0xff]  ;;  %v13337_v16 = vld [vmem:[%s23512_s10 + $0x48] sm:$0xff] }
 0xa0c   :  { %v11964_v40 = vmax.f32 %v11883_v34, %v13327_v27  ;;  %v11976_v10 = vmax.f32 %v11968_v58, 0.0  ;;  %v11953_v52 = vmax.f32 %v11834_v11, %v13316_v49  ;;  %v11963_v50 = vmax.f32 %v11884_v33, %v13326_v20  ;;  %v13336_v33 = vld [vmem:[%s23512_s10 + $0x40] sm:$0xff]  ;;  %v13344_v20 = vld [vmem:[%s23512_s10 + $0x78] sm:$0xff] }
 0xa0d   :  { %v11866_v54 = vrot.slane %v11852_v59, %v25816_v30  ;;  %v11965_v38 = vmax.f32 %v11885_v42, %v13328_v35  ;;  %v11867_v9 = vcombine.high %v11859_v39, %v11859_v39  ;;  %v13321_v8 = vrot.slane %v11859_v39, 9  ;;  %v13338_v59 = vld [vmem:[%s23512_s10 + $0x50] sm:$0xff]  ;;  %v13341_v27 = vld [vmem:[%s23512_s10 + $0x60] sm:$0xff] }
 0xa0e   :  { %v11972_v14 = vmax.f32 %v11962_v29, %v11964_v40  ;;  %v11951_v2 = vmax.f32 %v11833_v4, %v13314_v0  ;;  %v11966_v46 = vmax.f32 %v11950_v41, %v11952_v25  ;;  %v11977_v22 = vmax.f32 %v11969_v51, 0.0  ;;  %v13339_v0 = vld [vmem:[%s23512_s10 + $0x58] sm:$0xff]  ;;  %v13342_v51 = vld [vmem:[%s23512_s10 + $0x68] sm:$0xff]  ;;  %v13343_v25 = vld [vmem:[%s23512_s10 + $0x70] sm:$0xff] }
 0xa0f   :  { %v11868_v3 = vcombine.high %v11866_v54, %v11866_v54  ;;  %v13323_v21 = vrot.slane %v11866_v54, 9  ;;  %v11973_v56 = vmax.f32 %v11963_v50, %v11965_v38  ;;  %v13322_v45 = vrot.slane %v11867_v9, 9  ;;  %v12347_v29 = vld [vmem:[%s23513_s11] sm:$0xff]  ;;  %v12348_v40 = vld [vmem:[%s23513_s11 + $0x8] sm:$0xff] }
 0xa10   :  { %v11980_v61 = vmax.f32 %v11972_v14, 0.0  ;;  %v11967_v36 = vmax.f32 %v11951_v2, %v11953_v52  ;;  %v11958_v44 = vmax.f32 %v11859_v39, %v13321_v8  ;;  %v12178_v15 = vrot.slane %v11976_v10, %v22049_v53  ;;  %v12349_v10 = vld [vmem:[%s23513_s11 + $0x10] sm:$0xff]  ;;  %v12350_v52 = vld [vmem:[%s23513_s11 + $0x18] sm:$0xff]  ;;  %v12352_v38 = vld [vmem:[%s23513_s11 + $0x28] sm:$0xff] }
 0xa11   :  { %v13324_v17 = vrot.slane %v11868_v3, 9  ;;  %v11960_v63 = vmax.f32 %v11866_v54, %v13323_v21  ;;  %v11981_v62 = vmax.f32 %v11973_v56, 0.0  ;;  %v11974_v18 = vmax.f32 %v11966_v46, 0.0  ;;  %v12351_v54 = vld [vmem:[%s23513_s11 + $0x20] sm:$0xff]  ;;  %v12354_v8 = vld [vmem:[%s23513_s11 + $0x38] sm:$0xff] }
 0xa12   :  { %v12182_v30 = vrot.slane %v11980_v61, %v22049_v53  ;;  %v11959_v24 = vmax.f32 %v11867_v9, %v13322_v45  ;;  %v12267_v12 = vrot.slane %v11977_v22, %v22049_v53  ;;  %v11975_v19 = vmax.f32 %v11967_v36, 0.0  ;;  %v12353_v9 = vld [vmem:[%s23513_s11 + $0x30] sm:$0xff]  ;;  %v12355_v46 = vld [vmem:[%s23513_s11 + $0x40] sm:$0xff]  ;;  %v12358_v56 = vld [vmem:[%s23513_s11 + $0x58] sm:$0xff] }
 0xa13   :  { %v11961_v48 = vmax.f32 %v11868_v3, %v13324_v17  ;;  %v11970_v28 = vmax.f32 %v11958_v44, %v11960_v63  ;;  %v12271_v47 = vrot.slane %v11981_v62, %v22049_v53  ;;  %v11999_v4 = vrot.slane %v11974_v18, %v22049_v53  ;;  %v12356_v3 = vld [vmem:[%s23513_s11 + $0x48] sm:$0xff]  ;;  %v12357_v22 = vld [vmem:[%s23513_s11 + $0x50] sm:$0xff]  ;;  %v12359_v45 = vld [vmem:[%s23513_s11 + $0x60] sm:$0xff] }
 0xa14   :  { %v12183_v5 = vsel %vm10279_vm11, %v12182_v30, %v12178_v15  ;;  %v15875_v1 = vpack.c.bf16 %v13332_v13, %v13331_v6  ;;  %v12089_v43 = vrot.slane %v11975_v19, %v22049_v53  ;;  %v15878_v34 = vpack.c.bf16 %v13334_v23, %v13333_v57  ;;  %v12360_v36 = vld [vmem:[%s23513_s11 + $0x68] sm:$0xff]  ;;  %v12361_v44 = vld [vmem:[%s23513_s11 + $0x70] sm:$0xff]  ;;  %v12362_v63 = vld [vmem:[%s23513_s11 + $0x78] sm:$0xff] }
 0xa15   :  { %v11971_v11 = vmax.f32 %v11959_v24, %v11961_v48  ;;  %v11978_v32 = vmax.f32 %v11970_v28, 0.0  ;;  %v12272_v37 = vsel %vm10279_vm11, %v12271_v47, %v12267_v12  ;;  %v15884_v42 = vpack.c.bf16 %v13339_v0, %v13338_v59  ;;  %v13329_v15 = vld [vmem:[#allocation4 + $0x4] ss:$0 sm:$0xff]  ;;  %v12438_v30 = vld [vmem:[%s23514_s12] sm:$0xff]  ;;  %v12441_v12 = vld [vmem:[%s23514_s12 + $0x18] sm:$0xff] }
 0xa16   :  { %v15887_v41 = vpack.c.bf16 %v13342_v51, %v13341_v27  ;;  %v15890_v35 = vpack.c.bf16 %v13344_v20, %v13343_v25  ;;  %v15893_v39 = vpack.c.bf16 %v12348_v40, %v12347_v29  ;;  %v15896_v50 = vpack.c.bf16 %v12350_v52, %v12349_v10  ;;  %v12439_v18 = vld [vmem:[%s23514_s12 + $0x8] sm:$0xff]  ;;  %v12442_v19 = vld [vmem:[%s23514_s12 + $0x20] sm:$0xff]  ;;  %v12448_v57 = vld [vmem:[%s23514_s12 + $0x50] sm:$0xff] }
 0xa17   :  { %v11979_v31 = vmax.f32 %v11971_v11, 0.0  ;;  %v12003_v55 = vrot.slane %v11978_v32, %v22049_v53  ;;  %v15899_v14 = vpack.c.bf16 %v12352_v38, %v12351_v54  ;;  %v15902_v2 = vpack.c.bf16 %v12354_v8, %v12353_v9  ;;  %v12443_v11 = vld [vmem:[%s23514_s12 + $0x28] sm:$0xff]  ;;  %v12449_v23 = vld [vmem:[%s23514_s12 + $0x58] sm:$0xff] }
 0xa18   :  { %v15905_v21 = vpack.c.bf16 %v12356_v3, %v12355_v46  ;;  %v15908_v61 = vpack.c.bf16 %v12358_v56, %v12357_v22  ;;  %v15911_v17 = vpack.c.bf16 %v12360_v36, %v12359_v45  ;;  %v15914_v62 = vpack.c.bf16 %v12362_v63, %v12361_v44  ;;  %v13347_v51 = vld [vmem:[#allocation4 + $0x6] ss:$0 sm:$0xff] }
 0xa19   :  { %v12004_v26 = vsel %vm10279_vm11, %v12003_v55, %v11999_v4  ;;  %v12093_v49 = vrot.slane %v11979_v31, %v22049_v53  ;;  %v15881_v53 = vpack.c.bf16 %v13337_v16, %v13336_v33  ;;  %v15917_v6 = vpack.c.bf16 %v12439_v18, %v12438_v30  ;;  %v12446_v31 = vld [vmem:[%s23514_s12 + $0x40] sm:$0xff]  ;;  %v12447_v55 = vld [vmem:[%s23514_s12 + $0x48] sm:$0xff]  ;;  %v12453_v33 = vld [vmem:[%s23514_s12 + $0x78] sm:$0xff] }
 0xa1a   :  { %15437 = vmatmul.mubr.msk.f32.vlgmr.msra.gmra.mrb[246].mxu0 %vm12005_vm2, %v12004_v26  ;;  %v15923_v32 = vpack.c.bf16 %v12443_v11, %v12442_v19  ;;  %v15932_v26 = vpack.c.bf16 %v12449_v23, %v12448_v57 }
 0xa1b   :  { %15876 = vmatpush3.bf16.msra.mxu0 %v15875_v1  ;;  %15447 = vmatprep.mubr.msk.f32.mxu0 %vm16433_vm0, %v25815_v7  ;;  %v12094_v58 = vsel %vm10279_vm11, %v12093_v49, %v12089_v43  ;;  %v15929_v1 = vpack.c.bf16 %v12447_v55, %v12446_v31  ;;  %v12450_v43 = vld [vmem:[%s23514_s12 + $0x60] sm:$0xff]  ;;  %v12451_v49 = vld [vmem:[%s23514_s12 + $0x68] sm:$0xff] }
 0xa1c   :  { %15877 = vmatprep.subr.bf16.mxu0 %v25814_v60 }
 0xa1f   :  { %15879 = vmatpush3.bf16.msra.mxu0 %v15878_v34  ;;  %v15935_v34 = vpack.c.bf16 %v12451_v49, %v12450_v43 }
 0xa20   :  { %15880 = vmatprep.subr.bf16.mxu0 %v25814_v60 }
 0xa22   :  { %15448 = vmatmul.mubr.msk.f32.vlgmr.msra.gmra.mrb[246].mxu0 %vm12005_vm2, %v12094_v58  ;;  %v12452_v58 = vld [vmem:[%s23514_s12 + $0x70] sm:$0xff] }
 0xa23   :  { %15882 = vmatpush3.bf16.msra.mxu0 %v15881_v53  ;;  %15458 = vmatprep.mubr.msk.f32.mxu0 %vm16433_vm0, %v25815_v7  ;;  %v15938_v16 = vpack.c.bf16 %v12453_v33, %v12452_v58  ;;  %v13346_v53 = vld [vmem:[#allocation4 + $0x5] ss:$0 sm:$0xff] }
 0xa24   :  { %15883 = vmatprep.subr.bf16.mxu0 %v25814_v60 }
 0xa27   :  { %15885 = vmatpush3.bf16.msra.mxu0 %v15884_v42 }
 0xa28   :  { %15886 = vmatprep.subr.bf16.mxu0 %v25814_v60 }
 0xa2a   :  { %15459 = vmatmul.mubr.msk.f32.vlgmr.msra.gmra.mrb[246].mxu0 %vm12005_vm2, %v12183_v5  ;;  %v12440_v5 = vld [vmem:[%s23514_s12 + $0x10] sm:$0xff] }
 0xa2b   :  { %15888 = vmatpush3.bf16.msra.mxu0 %v15887_v41  ;;  %15469 = vmatprep.mubr.msk.f32.mxu0 %vm16433_vm0, %v25815_v7  ;;  %v15920_v47 = vpack.c.bf16 %v12441_v12, %v12440_v5 }
 0xa2c   :  { %15889 = vmatprep.subr.bf16.mxu0 %v25814_v60 }
 0xa2f   :  { %15891 = vmatpush3.bf16.msra.mxu0 %v15890_v35 }
 0xa30   :  { %15892 = vmatprep.subr.bf16.mxu0 %v25814_v60 }
 0xa32   :  { %15470 = vmatmul.mubr.msk.f32.vlgmr.msra.gmra.mrb[246].mxu0 %vm12005_vm2, %v12272_v37  ;;  %v12444_v37 = vld [vmem:[%s23514_s12 + $0x30] sm:$0xff] }
 0xa33   :  { %15894 = vmatpush3.bf16.msra.mxu0 %v15893_v39  ;;  %15504 = vmatprep.mubr.msk.f32.mxu0 %vm16433_vm0, %v25815_v7 }
 0xa34   :  { %15895 = vmatprep.subr.bf16.mxu0 %v25814_v60 }
 0xa37   :  { %15897 = vmatpush3.bf16.msra.mxu0 %v15896_v50 }
 0xa38   :  { %15898 = vmatprep.subr.bf16.mxu0 %v25814_v60 }
 0xa3b   :  { %15900 = vmatpush3.bf16.msra.mxu0 %v15899_v14 }
 0xa3c   :  { %15901 = vmatprep.subr.bf16.mxu0 %v25814_v60 }
 0xa3f   :  { %15903 = vmatpush3.bf16.msra.mxu0 %v15902_v2 }
 0xa40   :  { %15904 = vmatprep.subr.bf16.mxu0 %v25814_v60 }
 0xa43   :  { %15906 = vmatpush3.bf16.msra.mxu0 %v15905_v21 }
 0xa44   :  { %15907 = vmatprep.subr.bf16.mxu0 %v25814_v60 }
 0xa47   :  { %15909 = vmatpush3.bf16.msra.mxu0 %v15908_v61 }
 0xa48   :  { %15910 = vmatprep.subr.bf16.mxu0 %v25814_v60 }
 0xa4b   :  { %15912 = vmatpush3.bf16.msra.mxu0 %v15911_v17 }
 0xa4c   :  { %15913 = vmatprep.subr.bf16.mxu0 %v25814_v60 }
 0xa4f   :  { %15915 = vmatpush3.bf16.msra.mxu0 %v15914_v62 }
 0xa50   :  { %15916 = vmatprep.subr.bf16.mxu0 %v25814_v60 }
 0xb05   :  { %v12341_v24 = vpop.f32.mrb[246].mxu0 }
 0xb06   :  { %v15988_v48 = vadd.f32 %v13329_v15, %v12341_v24  ;;  %v15471_v28 = vpop.f32.mrb[247].mxu0 }
 0xb08   :  { %v12346_v13 = vmax.f32 %v15988_v48, 0.0 }
 0xb0a   :  { %15505 = vmatmul.mubr.f32.vlgmr.msra.gmra.mrb[248].mxu0 %v12346_v13 }
 0xb0b   :  { %15918 = vmatpush3.bf16.msra.mxu0 %v15917_v6  ;;  %15539 = vmatprep.mubr.msk.f32.mxu0 %vm16433_vm0, %v25815_v7  ;;  %v12445_v7 = vld [vmem:[%s23514_s12 + $0x38] sm:$0xff]  ;;  %vm12534_vm0 = vcmask 1024  }
 0xb0c   :  { %15919 = vmatprep.subr.bf16.mxu0 %v25814_v60  ;;  %v15926_v4 = vpack.c.bf16 %v12445_v7, %v12444_v37 }
 0xb0f   :  { %15921 = vmatpush3.bf16.msra.mxu0 %v15920_v47 }
 0xb10   :  { %15922 = vmatprep.subr.bf16.mxu0 %v25814_v60 }
 0xb13   :  { %15924 = vmatpush3.bf16.msra.mxu0 %v15923_v32 }
 0xb14   :  { %15925 = vmatprep.subr.bf16.mxu0 %v25814_v60 }
 0xb17   :  { %15927 = vmatpush3.bf16.msra.mxu0 %v15926_v4 }
 0xb18   :  { %15928 = vmatprep.subr.bf16.mxu0 %v25814_v60 }
 0xb1b   :  { %15930 = vmatpush3.bf16.msra.mxu0 %v15929_v1 }
 0xb1c   :  { %15931 = vmatprep.subr.bf16.mxu0 %v25814_v60 }
 0xb1f   :  { %15933 = vmatpush3.bf16.msra.mxu0 %v15932_v26 }
 0xb20   :  { %15934 = vmatprep.subr.bf16.mxu0 %v25814_v60 }
 0xb23   :  { %15936 = vmatpush3.bf16.msra.mxu0 %v15935_v34 }
 0xb24   :  { %15937 = vmatprep.subr.bf16.mxu0 %v25814_v60 }
 0xb27   :  { %15939 = vmatpush3.bf16.msra.mxu0 %v15938_v16 }
 0xbdd   :  { %v12433_v59 = vpop.f32.mrb[248].mxu0 }
 0xbde   :  { %v12434_v0 = vadd.f32 %v13346_v53, %v12433_v59  ;;  %v15506_v42 = vpop.f32.mrb[249].mxu0 }
 0xbe0   :  { %v12437_v27 = vmax.f32 %v12434_v0, 0.0 }
 0xbe2   :  { %15540 = vmatmul.mubr.f32.vlgmr.msra.gmra.mrb[250].mxu0 %v12437_v27 }
 0xcb5   :  { %v12524_v41 = vpop.f32.mrb[250].mxu0 }
 0xcb6   :  { %v12525_v25 = vadd.f32 %v13347_v51, %v12524_v41  ;;  %v15541_v60 = vpop.f32.mrb[251].mxu0 }
 0xcb8   :  { %v12528_v20 = vsub.f32 0.0, %v12525_v25 }
 0xcba   :  { %v12529_v35 = vmul.f32 1.442695, %v12528_v20 }
 0xcbc   :  { %16325 = vpow2.f32 %v12529_v35 }
 0xcc6   :  { %v16326_v29 = vpop.eup %16325 }
 0xcc7   :  { %v12531_v40 = vadd.f32 1.0, %v16326_v29 }
 0xcc9   :  { %16327 = vrcp.f32 %v12531_v40 }
 0xcd3   :  { %v16328_v39 = vpop.eup %16327 }
 0xcd4   :  { %12535 = vst.msk [vmem:[%s23515_s13] sm:$0x3] %vm12534_vm0, %v16328_v39 }
 0xcd5   :  { %12540 = vsyncpa [#allocation3], 1 }
 0xcd6   :  { %12541 = vsyncpa [#allocation5], 1 }
 0xcd7   :  { %12542 = vsyncpa [#allocation8], 1 }

</bundles_post_ra>
